<compile_context>
chip_gen: v5e
topology: v5e:2x2
jax: 0.10.0
libtpu: 0.0.40
codegen_flags: <defaults>
</compile_context>

<pallas_src>
import jax
import jax.numpy as jnp
from jax.experimental import pallas as pl
from jax.experimental.pallas import tpu as pltpu  # noqa: F401  (TPU backend)


# Operand dtype fed to the MXU.  float32 keeps numerical parity with the PyTorch
# reference; switch to jnp.bfloat16 on v6e/v7x for full-rate MXU + half the
# VMEM/HBM footprint (accumulation stays f32 via preferred_element_type).
_OPERAND_DTYPE = jnp.float32


def _full_spec(shape):
    # Whole-array block, resident in VMEM (no grid -> single kernel invocation).
    return pl.BlockSpec(shape, lambda: (0,) * len(shape))


# ------------------- fused Conv2d + ReLU + MaxPool2x2 kernel ------------------- #

def _conv_relu_pool_kernel(p00_ref, p01_ref, p10_ref, p11_ref, w_ref, b_ref, o_ref):
    """o[oc, m] = relu(max over 4 pool sub-grids of (w @ p_s)[oc, m] + b[oc]).

    Output is lane-dense: [OC, B*PH*PW] with the big dim on lanes.
    relu(max4(conv + b)) == max4(relu(conv + b)), so bias/ReLU commute with the max.
    """
    w = w_ref[...]
    z00 = jnp.dot(w, p00_ref[...], preferred_element_type=jnp.float32)
    z01 = jnp.dot(w, p01_ref[...], preferred_element_type=jnp.float32)
    z10 = jnp.dot(w, p10_ref[...], preferred_element_type=jnp.float32)
    z11 = jnp.dot(w, p11_ref[...], preferred_element_type=jnp.float32)
    z = jnp.maximum(jnp.maximum(z00, z01), jnp.maximum(z10, z11))
    o_ref[...] = jnp.maximum(z + b_ref[...], 0.0)


def conv_relu_pool(x_cf, weight, bias):
    """Fused conv(valid, stride 1) + ReLU + 2x2/stride-2 max-pool.

    x_cf:   [C, B, H, W] channel-first activations (W on the lane axis).
    weight: [OC, C, KH, KW] (PyTorch layout); bias: [OC].
    returns [OC, B, PH, PW] with PH = (H-KH+1)//2, PW = (W-KW+1)//2.
    """
    OC, C, KH, KW = weight.shape
    Cin, B, H, W = x_cf.shape
    assert Cin == C, (Cin, C)
    OH, OW = H - KH + 1, W - KW + 1
    PH, PW = OH // 2, OW // 2
    K = C * KH * KW
    M = B * PH * PW

    # TODO(synk): patch extraction is pure data movement and stays in XLA (one
    # conv_general_dilated_patches per pool sub-grid) rather than in-kernel strided
    # VMEM gathers.  Its feature order is (c, kh, kw), matching torch's
    # weight.reshape(OC, C*KH*KW); HIGHEST precision keeps the identity-kernel
    # gather exact in f32.  K (49/100/72) is left unpadded: it only occupies
    # sublanes/lanes that Mosaic pads internally, so an explicit HBM-side zero-pad
    # would just add glue.
    dn = ("CNHW", "OIHW", "CNHW")
    subgrids = []
    for di in (0, 1):
        for dj in (0, 1):
            p = jax.lax.conv_general_dilated_patches(
                x_cf[:, :, di:, dj:], (KH, KW), (2, 2), "VALID",
                dimension_numbers=dn, precision=jax.lax.Precision.HIGHEST,
            )                                              # [K, B, PH, PW]
            subgrids.append(p.reshape(K, M).astype(_OPERAND_DTYPE))

    w2d = weight.reshape(OC, K).astype(_OPERAND_DTYPE)     # free reshape, no transpose
    b2d = bias.reshape(OC, 1).astype(jnp.float32)

    # At B=2 everything fits one VMEM-resident block.  For much larger batches,
    # tile M with a grid (BlockSpec((K, TM), ...), dimension_semantics=("parallel",)).
    y = pl.pallas_call(
        _conv_relu_pool_kernel,
        out_shape=jax.ShapeDtypeStruct((OC, M), jnp.float32),
        in_specs=[_full_spec((K, M))] * 4 + [_full_spec((OC, K)), _full_spec((OC, 1))],
        out_specs=_full_spec((OC, M)),
    )(*subgrids, w2d, b2d)
    return y.reshape(OC, B, PH, PW)


# --------------------------- fused 3-layer MLP head ---------------------------- #

def _mlp_kernel(x_ref, w1_ref, b1_ref, w2_ref, b2_ref, w3_ref, b3_ref, o_ref):
    h = jnp.dot(x_ref[...], w1_ref[...], preferred_element_type=jnp.float32) + b1_ref[...]
    h = jnp.maximum(h, 0.0).astype(w2_ref.dtype)
    h = jnp.dot(h, w2_ref[...], preferred_element_type=jnp.float32) + b2_ref[...]
    h = jnp.maximum(h, 0.0).astype(w3_ref.dtype)
    o_ref[...] = jnp.dot(h, w3_ref[...], preferred_element_type=jnp.float32) + b3_ref[...]


def mlp_head(x, w1, b1, w2, b2, w3, b3):
    """relu(x@w1+b1) -> relu(.@w2+b2) -> .@w3+b3 in one kernel; weights are [in, out]."""
    B, F = x.shape
    F1, H1 = w1.shape
    H1b, H2 = w2.shape
    H2b, NC = w3.shape
    assert F == F1 and H1 == H1b and H2 == H2b, (x.shape, w1.shape, w2.shape, w3.shape)
    args = (
        x.astype(_OPERAND_DTYPE),
        w1.astype(_OPERAND_DTYPE), b1.reshape(1, H1).astype(jnp.float32),
        w2.astype(_OPERAND_DTYPE), b2.reshape(1, H2).astype(jnp.float32),
        w3.astype(_OPERAND_DTYPE), b3.reshape(1, NC).astype(jnp.float32),
    )
    return pl.pallas_call(
        _mlp_kernel,
        out_shape=jax.ShapeDtypeStruct((B, NC), jnp.float32),
        in_specs=[_full_spec(a.shape) for a in args],
        out_specs=_full_spec((B, NC)),
    )(*args)


# ------------------------------- params & forward ------------------------------ #

def init_params(key, num_classes):
    """PyTorch-style uniform(+-1/sqrt(fan_in)) init.

    Conv weights keep torch layout [OC, C, KH, KW] (reshape to [OC, K] is free).
    FC weights are stored pre-transposed ([in, out] == torch fc.weight.T) so the
    forward pass never materializes a weight transpose in HBM.
    """
    ks = jax.random.split(key, 12)

    def u(k, shape, fan_in):
        bound = 1.0 / (fan_in ** 0.5)
        return jax.random.uniform(k, shape, jnp.float32, -bound, bound)

    return {
        "conv1_w": u(ks[0], (4, 1, 7, 7), 1 * 7 * 7),
        "conv1_b": u(ks[1], (4,), 1 * 7 * 7),
        "conv2_w": u(ks[2], (8, 4, 5, 5), 4 * 5 * 5),
        "conv2_b": u(ks[3], (8,), 4 * 5 * 5),
        "conv3_w": u(ks[4], (16, 8, 3, 3), 8 * 3 * 3),
        "conv3_b": u(ks[5], (16,), 8 * 3 * 3),
        "fc1_w": u(ks[6], (16 * 9 * 9, 600), 16 * 9 * 9),   # == torch fc1.weight.T
        "fc1_b": u(ks[7], (600,), 16 * 9 * 9),
        "fc2_w": u(ks[8], (600, 200), 600),                  # == torch fc2.weight.T
        "fc2_b": u(ks[9], (200,), 600),
        "fc3_w": u(ks[10], (200, num_classes), 200),         # == torch fc3.weight.T
        "fc3_b": u(ks[11], (num_classes,), 200),
    }


@jax.jit
def baseline_token_cnn_forward(params, x):
    """x: [B, 1, 94, 94] NCHW -> logits [B, num_classes] (same semantics as torch)."""
    x = x.astype(jnp.float32)                              # x.float()
    x_cf = jnp.transpose(x, (1, 0, 2, 3))                  # [1, B, H, W]; free for C == 1
    x_cf = conv_relu_pool(x_cf, params["conv1_w"], params["conv1_b"])   # [4,  B, 44, 44]
    x_cf = conv_relu_pool(x_cf, params["conv2_w"], params["conv2_b"])   # [8,  B, 20, 20]
    x_cf = conv_relu_pool(x_cf, params["conv3_w"], params["conv3_b"])   # [16, B,  9,  9]
    B = x.shape[0]
    # Single tiny (~10 KiB) reorder so the flatten matches torch .view(-1, 16*9*9)
    # (channel-major per batch element).
    feats = jnp.transpose(x_cf, (1, 0, 2, 3)).reshape(B, 16 * 9 * 9)
    return mlp_head(feats,
                    params["fc1_w"], params["fc1_b"],
                    params["fc2_w"], params["fc2_b"],
                    params["fc3_w"], params["fc3_b"])


if __name__ == "__main__":
    num_classes = 10
    key = jax.random.PRNGKey(0)
    pkey, xkey = jax.random.split(key)
    params = init_params(pkey, num_classes)
    # NCHW input: batch=2, 1 channel, 94x94 (required so the flatten is 16*9*9).
    x = jax.random.normal(xkey, (2, 1, 94, 94), dtype=jnp.float32)

    logits = baseline_token_cnn_forward(params, x)
    jax.block_until_ready(logits)
    assert logits.shape == (2, num_classes), logits.shape
    assert bool(jnp.all(jnp.isfinite(logits)))
    print("KERNEL_OK")
</pallas_src>

<mosaic_0001>
module attributes {stable_mosaic.version = 11 : i64} {
  func.func @_conv_relu_pool_kernel(%arg0: memref<49x3872xf32, #tpu.memory_space<vmem>>, %arg1: memref<49x3872xf32, #tpu.memory_space<vmem>>, %arg2: memref<49x3872xf32, #tpu.memory_space<vmem>>, %arg3: memref<49x3872xf32, #tpu.memory_space<vmem>>, %arg4: memref<4x49xf32, #tpu.memory_space<vmem>>, %arg5: memref<4x1xf32, #tpu.memory_space<vmem>>, %arg6: memref<4x3872xf32, #tpu.memory_space<vmem>>) attributes {dimension_semantics = [], scalar_prefetch = 0 : i64, scratch_operands = 0 : i64, tpu.core_type = #tpu.core_type<tc>} {
    %c0 = arith.constant 0 : index
    %c0_0 = arith.constant 0 : index
    %0 = vector.load %arg4[%c0, %c0_0] : memref<4x49xf32, #tpu.memory_space<vmem>>, vector<4x49xf32>
    %c0_1 = arith.constant 0 : index
    %c0_2 = arith.constant 0 : index
    %1 = vector.load %arg0[%c0_1, %c0_2] : memref<49x3872xf32, #tpu.memory_space<vmem>>, vector<49x3872xf32>
    %cst = arith.constant dense<0.000000e+00> : vector<4x3872xf32>
    %2 = tpu.matmul %0, %1, %cst {dimension_numbers = #tpu.dot_dimension_numbers<[1], [0], [0], [1], [0, 0, 1, 1], [], []>} : vector<4x49xf32>, vector<49x3872xf32>, vector<4x3872xf32> -> vector<4x3872xf32>
    %c0_3 = arith.constant 0 : index
    %c0_4 = arith.constant 0 : index
    %3 = vector.load %arg1[%c0_3, %c0_4] : memref<49x3872xf32, #tpu.memory_space<vmem>>, vector<49x3872xf32>
    %cst_5 = arith.constant dense<0.000000e+00> : vector<4x3872xf32>
    %4 = tpu.matmul %0, %3, %cst_5 {dimension_numbers = #tpu.dot_dimension_numbers<[1], [0], [0], [1], [0, 0, 1, 1], [], []>} : vector<4x49xf32>, vector<49x3872xf32>, vector<4x3872xf32> -> vector<4x3872xf32>
    %c0_6 = arith.constant 0 : index
    %c0_7 = arith.constant 0 : index
    %5 = vector.load %arg2[%c0_6, %c0_7] : memref<49x3872xf32, #tpu.memory_space<vmem>>, vector<49x3872xf32>
    %cst_8 = arith.constant dense<0.000000e+00> : vector<4x3872xf32>
    %6 = tpu.matmul %0, %5, %cst_8 {dimension_numbers = #tpu.dot_dimension_numbers<[1], [0], [0], [1], [0, 0, 1, 1], [], []>} : vector<4x49xf32>, vector<49x3872xf32>, vector<4x3872xf32> -> vector<4x3872xf32>
    %c0_9 = arith.constant 0 : index
    %c0_10 = arith.constant 0 : index
    %7 = vector.load %arg3[%c0_9, %c0_10] : memref<49x3872xf32, #tpu.memory_space<vmem>>, vector<49x3872xf32>
    %cst_11 = arith.constant dense<0.000000e+00> : vector<4x3872xf32>
    %8 = tpu.matmul %0, %7, %cst_11 {dimension_numbers = #tpu.dot_dimension_numbers<[1], [0], [0], [1], [0, 0, 1, 1], [], []>} : vector<4x49xf32>, vector<49x3872xf32>, vector<4x3872xf32> -> vector<4x3872xf32>
    %9 = arith.maximumf %2, %4 : vector<4x3872xf32>
    %10 = arith.maximumf %6, %8 : vector<4x3872xf32>
    %11 = arith.maximumf %9, %10 : vector<4x3872xf32>
    %c0_12 = arith.constant 0 : index
    %c0_13 = arith.constant 0 : index
    %12 = vector.load %arg5[%c0_12, %c0_13] : memref<4x1xf32, #tpu.memory_space<vmem>>, vector<4x1xf32>
    %13 = vector.broadcast %12 : vector<4x1xf32> to vector<4x3872xf32>
    %14 = arith.addf %11, %13 : vector<4x3872xf32>
    %cst_14 = arith.constant 0.000000e+00 : f32
    %15 = vector.broadcast %cst_14 : f32 to vector<4x3872xf32>
    %16 = arith.maximumf %14, %15 : vector<4x3872xf32>
    %c0_15 = arith.constant 0 : index
    %c0_16 = arith.constant 0 : index
    %17 = vector.load %arg6[%c0_15, %c0_16] : memref<4x3872xf32, #tpu.memory_space<vmem>>, vector<4x3872xf32>
    tpu.vector_store %arg6[%c0_15, %c0_16], %16 {strides = array<i32>} : memref<4x3872xf32, #tpu.memory_space<vmem>>, vector<4x3872xf32>,
    return
  }
}

module attributes {stable_mosaic.version = 11 : i64} {
  func.func @_conv_relu_pool_kernel(%arg0: memref<100x800xf32, #tpu.memory_space<vmem>>, %arg1: memref<100x800xf32, #tpu.memory_space<vmem>>, %arg2: memref<100x800xf32, #tpu.memory_space<vmem>>, %arg3: memref<100x800xf32, #tpu.memory_space<vmem>>, %arg4: memref<8x100xf32, #tpu.memory_space<vmem>>, %arg5: memref<8x1xf32, #tpu.memory_space<vmem>>, %arg6: memref<8x800xf32, #tpu.memory_space<vmem>>) attributes {dimension_semantics = [], scalar_prefetch = 0 : i64, scratch_operands = 0 : i64, tpu.core_type = #tpu.core_type<tc>} {
    %c0 = arith.constant 0 : index
    %c0_0 = arith.constant 0 : index
    %0 = vector.load %arg4[%c0, %c0_0] : memref<8x100xf32, #tpu.memory_space<vmem>>, vector<8x100xf32>
    %c0_1 = arith.constant 0 : index
    %c0_2 = arith.constant 0 : index
    %1 = vector.load %arg0[%c0_1, %c0_2] : memref<100x800xf32, #tpu.memory_space<vmem>>, vector<100x800xf32>
    %cst = arith.constant dense<0.000000e+00> : vector<8x800xf32>
    %2 = tpu.matmul %0, %1, %cst {dimension_numbers = #tpu.dot_dimension_numbers<[1], [0], [0], [1], [0, 0, 1, 1], [], []>} : vector<8x100xf32>, vector<100x800xf32>, vector<8x800xf32> -> vector<8x800xf32>
    %c0_3 = arith.constant 0 : index
    %c0_4 = arith.constant 0 : index
    %3 = vector.load %arg1[%c0_3, %c0_4] : memref<100x800xf32, #tpu.memory_space<vmem>>, vector<100x800xf32>
    %cst_5 = arith.constant dense<0.000000e+00> : vector<8x800xf32>
    %4 = tpu.matmul %0, %3, %cst_5 {dimension_numbers = #tpu.dot_dimension_numbers<[1], [0], [0], [1], [0, 0, 1, 1], [], []>} : vector<8x100xf32>, vector<100x800xf32>, vector<8x800xf32> -> vector<8x800xf32>
    %c0_6 = arith.constant 0 : index
    %c0_7 = arith.constant 0 : index
    %5 = vector.load %arg2[%c0_6, %c0_7] : memref<100x800xf32, #tpu.memory_space<vmem>>, vector<100x800xf32>
    %cst_8 = arith.constant dense<0.000000e+00> : vector<8x800xf32>
    %6 = tpu.matmul %0, %5, %cst_8 {dimension_numbers = #tpu.dot_dimension_numbers<[1], [0], [0], [1], [0, 0, 1, 1], [], []>} : vector<8x100xf32>, vector<100x800xf32>, vector<8x800xf32> -> vector<8x800xf32>
    %c0_9 = arith.constant 0 : index
    %c0_10 = arith.constant 0 : index
    %7 = vector.load %arg3[%c0_9, %c0_10] : memref<100x800xf32, #tpu.memory_space<vmem>>, vector<100x800xf32>
    %cst_11 = arith.constant dense<0.000000e+00> : vector<8x800xf32>
    %8 = tpu.matmul %0, %7, %cst_11 {dimension_numbers = #tpu.dot_dimension_numbers<[1], [0], [0], [1], [0, 0, 1, 1], [], []>} : vector<8x100xf32>, vector<100x800xf32>, vector<8x800xf32> -> vector<8x800xf32>
    %9 = arith.maximumf %2, %4 : vector<8x800xf32>
    %10 = arith.maximumf %6, %8 : vector<8x800xf32>
    %11 = arith.maximumf %9, %10 : vector<8x800xf32>
    %c0_12 = arith.constant 0 : index
    %c0_13 = arith.constant 0 : index
    %12 = vector.load %arg5[%c0_12, %c0_13] : memref<8x1xf32, #tpu.memory_space<vmem>>, vector<8x1xf32>
    %13 = vector.broadcast %12 : vector<8x1xf32> to vector<8x800xf32>
    %14 = arith.addf %11, %13 : vector<8x800xf32>
    %cst_14 = arith.constant 0.000000e+00 : f32
    %15 = vector.broadcast %cst_14 : f32 to vector<8x800xf32>
    %16 = arith.maximumf %14, %15 : vector<8x800xf32>
    %c0_15 = arith.constant 0 : index
    %c0_16 = arith.constant 0 : index
    %17 = vector.load %arg6[%c0_15, %c0_16] : memref<8x800xf32, #tpu.memory_space<vmem>>, vector<8x800xf32>
    tpu.vector_store %arg6[%c0_15, %c0_16], %16 {strides = array<i32>} : memref<8x800xf32, #tpu.memory_space<vmem>>, vector<8x800xf32>,
    return
  }
}

module attributes {stable_mosaic.version = 11 : i64} {
  func.func @_conv_relu_pool_kernel(%arg0: memref<72x162xf32, #tpu.memory_space<vmem>>, %arg1: memref<72x162xf32, #tpu.memory_space<vmem>>, %arg2: memref<72x162xf32, #tpu.memory_space<vmem>>, %arg3: memref<72x162xf32, #tpu.memory_space<vmem>>, %arg4: memref<16x72xf32, #tpu.memory_space<vmem>>, %arg5: memref<16x1xf32, #tpu.memory_space<vmem>>, %arg6: memref<16x162xf32, #tpu.memory_space<vmem>>) attributes {dimension_semantics = [], scalar_prefetch = 0 : i64, scratch_operands = 0 : i64, tpu.core_type = #tpu.core_type<tc>} {
    %c0 = arith.constant 0 : index
    %c0_0 = arith.constant 0 : index
    %0 = vector.load %arg4[%c0, %c0_0] : memref<16x72xf32, #tpu.memory_space<vmem>>, vector<16x72xf32>
    %c0_1 = arith.constant 0 : index
    %c0_2 = arith.constant 0 : index
    %1 = vector.load %arg0[%c0_1, %c0_2] : memref<72x162xf32, #tpu.memory_space<vmem>>, vector<72x162xf32>
    %cst = arith.constant dense<0.000000e+00> : vector<16x162xf32>
    %2 = tpu.matmul %0, %1, %cst {dimension_numbers = #tpu.dot_dimension_numbers<[1], [0], [0], [1], [0, 0, 1, 1], [], []>} : vector<16x72xf32>, vector<72x162xf32>, vector<16x162xf32> -> vector<16x162xf32>
    %c0_3 = arith.constant 0 : index
    %c0_4 = arith.constant 0 : index
    %3 = vector.load %arg1[%c0_3, %c0_4] : memref<72x162xf32, #tpu.memory_space<vmem>>, vector<72x162xf32>
    %cst_5 = arith.constant dense<0.000000e+00> : vector<16x162xf32>
    %4 = tpu.matmul %0, %3, %cst_5 {dimension_numbers = #tpu.dot_dimension_numbers<[1], [0], [0], [1], [0, 0, 1, 1], [], []>} : vector<16x72xf32>, vector<72x162xf32>, vector<16x162xf32> -> vector<16x162xf32>
    %c0_6 = arith.constant 0 : index
    %c0_7 = arith.constant 0 : index
    %5 = vector.load %arg2[%c0_6, %c0_7] : memref<72x162xf32, #tpu.memory_space<vmem>>, vector<72x162xf32>
    %cst_8 = arith.constant dense<0.000000e+00> : vector<16x162xf32>
    %6 = tpu.matmul %0, %5, %cst_8 {dimension_numbers = #tpu.dot_dimension_numbers<[1], [0], [0], [1], [0, 0, 1, 1], [], []>} : vector<16x72xf32>, vector<72x162xf32>, vector<16x162xf32> -> vector<16x162xf32>
    %c0_9 = arith.constant 0 : index
    %c0_10 = arith.constant 0 : index
    %7 = vector.load %arg3[%c0_9, %c0_10] : memref<72x162xf32, #tpu.memory_space<vmem>>, vector<72x162xf32>
    %cst_11 = arith.constant dense<0.000000e+00> : vector<16x162xf32>
    %8 = tpu.matmul %0, %7, %cst_11 {dimension_numbers = #tpu.dot_dimension_numbers<[1], [0], [0], [1], [0, 0, 1, 1], [], []>} : vector<16x72xf32>, vector<72x162xf32>, vector<16x162xf32> -> vector<16x162xf32>
    %9 = arith.maximumf %2, %4 : vector<16x162xf32>
    %10 = arith.maximumf %6, %8 : vector<16x162xf32>
    %11 = arith.maximumf %9, %10 : vector<16x162xf32>
    %c0_12 = arith.constant 0 : index
    %c0_13 = arith.constant 0 : index
    %12 = vector.load %arg5[%c0_12, %c0_13] : memref<16x1xf32, #tpu.memory_space<vmem>>, vector<16x1xf32>
    %13 = vector.broadcast %12 : vector<16x1xf32> to vector<16x162xf32>
    %14 = arith.addf %11, %13 : vector<16x162xf32>
    %cst_14 = arith.constant 0.000000e+00 : f32
    %15 = vector.broadcast %cst_14 : f32 to vector<16x162xf32>
    %16 = arith.maximumf %14, %15 : vector<16x162xf32>
    %c0_15 = arith.constant 0 : index
    %c0_16 = arith.constant 0 : index
    %17 = vector.load %arg6[%c0_15, %c0_16] : memref<16x162xf32, #tpu.memory_space<vmem>>, vector<16x162xf32>
    tpu.vector_store %arg6[%c0_15, %c0_16], %16 {strides = array<i32>} : memref<16x162xf32, #tpu.memory_space<vmem>>, vector<16x162xf32>,
    return
  }
}

module attributes {stable_mosaic.version = 11 : i64} {
  func.func @_mlp_kernel(%arg0: memref<2x1296xf32, #tpu.memory_space<vmem>>, %arg1: memref<1296x600xf32, #tpu.memory_space<vmem>>, %arg2: memref<1x600xf32, #tpu.memory_space<vmem>>, %arg3: memref<600x200xf32, #tpu.memory_space<vmem>>, %arg4: memref<1x200xf32, #tpu.memory_space<vmem>>, %arg5: memref<200x10xf32, #tpu.memory_space<vmem>>, %arg6: memref<1x10xf32, #tpu.memory_space<vmem>>, %arg7: memref<2x10xf32, #tpu.memory_space<vmem>>) attributes {dimension_semantics = [], scalar_prefetch = 0 : i64, scratch_operands = 0 : i64, tpu.core_type = #tpu.core_type<tc>} {
    %c0 = arith.constant 0 : index
    %c0_0 = arith.constant 0 : index
    %0 = vector.load %arg0[%c0, %c0_0] : memref<2x1296xf32, #tpu.memory_space<vmem>>, vector<2x1296xf32>
    %c0_1 = arith.constant 0 : index
    %c0_2 = arith.constant 0 : index
    %1 = vector.load %arg1[%c0_1, %c0_2] : memref<1296x600xf32, #tpu.memory_space<vmem>>, vector<1296x600xf32>
    %cst = arith.constant dense<0.000000e+00> : vector<2x600xf32>
    %2 = tpu.matmul %0, %1, %cst {dimension_numbers = #tpu.dot_dimension_numbers<[1], [0], [0], [1], [0, 0, 1, 1], [], []>} : vector<2x1296xf32>, vector<1296x600xf32>, vector<2x600xf32> -> vector<2x600xf32>
    %c0_3 = arith.constant 0 : index
    %c0_4 = arith.constant 0 : index
    %3 = vector.load %arg2[%c0_3, %c0_4] : memref<1x600xf32, #tpu.memory_space<vmem>>, vector<1x600xf32>
    %4 = vector.broadcast %3 : vector<1x600xf32> to vector<2x600xf32>
    %5 = arith.addf %2, %4 : vector<2x600xf32>
    %cst_5 = arith.constant 0.000000e+00 : f32
    %6 = vector.broadcast %cst_5 : f32 to vector<2x600xf32>
    %7 = arith.maximumf %5, %6 : vector<2x600xf32>
    %c0_6 = arith.constant 0 : index
    %c0_7 = arith.constant 0 : index
    %8 = vector.load %arg3[%c0_6, %c0_7] : memref<600x200xf32, #tpu.memory_space<vmem>>, vector<600x200xf32>
    %cst_8 = arith.constant dense<0.000000e+00> : vector<2x200xf32>
    %9 = tpu.matmul %7, %8, %cst_8 {dimension_numbers = #tpu.dot_dimension_numbers<[1], [0], [0], [1], [0, 0, 1, 1], [], []>} : vector<2x600xf32>, vector<600x200xf32>, vector<2x200xf32> -> vector<2x200xf32>
    %c0_9 = arith.constant 0 : index
    %c0_10 = arith.constant 0 : index
    %10 = vector.load %arg4[%c0_9, %c0_10] : memref<1x200xf32, #tpu.memory_space<vmem>>, vector<1x200xf32>
    %11 = vector.broadcast %10 : vector<1x200xf32> to vector<2x200xf32>
    %12 = arith.addf %9, %11 : vector<2x200xf32>
    %cst_11 = arith.constant 0.000000e+00 : f32
    %13 = vector.broadcast %cst_11 : f32 to vector<2x200xf32>
    %14 = arith.maximumf %12, %13 : vector<2x200xf32>
    %c0_12 = arith.constant 0 : index
    %c0_13 = arith.constant 0 : index
    %15 = vector.load %arg5[%c0_12, %c0_13] : memref<200x10xf32, #tpu.memory_space<vmem>>, vector<200x10xf32>
    %cst_14 = arith.constant dense<0.000000e+00> : vector<2x10xf32>
    %16 = tpu.matmul %14, %15, %cst_14 {dimension_numbers = #tpu.dot_dimension_numbers<[1], [0], [0], [1], [0, 0, 1, 1], [], []>} : vector<2x200xf32>, vector<200x10xf32>, vector<2x10xf32> -> vector<2x10xf32>
    %c0_15 = arith.constant 0 : index
    %c0_16 = arith.constant 0 : index
    %17 = vector.load %arg6[%c0_15, %c0_16] : memref<1x10xf32, #tpu.memory_space<vmem>>, vector<1x10xf32>
    %18 = vector.broadcast %17 : vector<1x10xf32> to vector<2x10xf32>
    %19 = arith.addf %16, %18 : vector<2x10xf32>
    %c0_17 = arith.constant 0 : index
    %c0_18 = arith.constant 0 : index
    %20 = vector.load %arg7[%c0_17, %c0_18] : memref<2x10xf32, #tpu.memory_space<vmem>>, vector<2x10xf32>
    tpu.vector_store %arg7[%c0_17, %c0_18], %19 {strides = array<i32>} : memref<2x10xf32, #tpu.memory_space<vmem>>, vector<2x10xf32>,
    return
  }
}

</mosaic_0001>

<bundles_post_ra>
// kernel: baseline_token_cnn_forward.4
= control target key start
LH: loop header
LB: loop body
LE: loop exit
PB: predicated region body
PF: predicated region fallthrough
CT: control target
= control target key end

     0   :  { %vm245_vm0 = vcmask 1040384   ;;  %vm241_vm1 = vcmask 400384   ;;  %vm3955_vm2 = vcmask 1043456   ;;  %vm4001_vm3 = vcmask 257024   ;;  %s7670_s0 = inlined_call_operand.vmem [shape: f32[49,3872], index: 0, kind: input, shape index: {}]   ;;  %s7671_s4 = inlined_call_operand.vmem [shape: f32[4,49], index: 4, kind: input, shape index: {}]   ;;  %s7672_s1 = inlined_call_operand.vmem [shape: f32[49,3872], index: 1, kind: input, shape index: {}]   ;;  %s7673_s2 = inlined_call_operand.vmem [shape: f32[49,3872], index: 2, kind: input, shape index: {}]   ;;  %s7674_s3 = inlined_call_operand.vmem [shape: f32[49,3872], index: 3, kind: input, shape index: {}]   ;;  %s7675_s5 = inlined_call_operand.vmem [shape: f32[4,1], index: 5, kind: input, shape index: {}]   ;;  %s7676_s6 = inlined_call_operand.vmem [shape: f32[4,3872], index: 6, kind: output, shape index: {}]  }
   0x1   :  { %v210_v0 = vld [vmem:[%s7670_s0 + $0x5d0] sm:$0x1]  ;;  %v211_v1 = vld [vmem:[%s7670_s0 + $0x5d8] sm:$0x1]  ;;  %v212_v2 = vld [vmem:[%s7670_s0 + $0x5e0] sm:$0x1] }
   0x2   :  { %4007 = vmatpush.msk.msra.mxu0 %vm245_vm0, %v210_v0  ;;  %4009 = vmatpush.msk.msra.mxu1 %vm245_vm0, %v211_v1  ;;  %v213_v3 = vld [vmem:[%s7670_s0 + $0x5e8] sm:$0x1]  ;;  %v179_v4 = vld [vmem:[%s7670_s0 + $0x4d8] sm:$0xff]  ;;  %v180_v5 = vld [vmem:[%s7670_s0 + $0x4e0] sm:$0xff] }
   0x3   :  { %4011 = vmatpush.msk.msra.mxu2 %vm245_vm0, %v212_v2  ;;  %4013 = vmatpush.msk.msra.mxu3 %vm245_vm0, %v213_v3  ;;  %v181_v6 = vld [vmem:[%s7670_s0 + $0x4e8] sm:$0xff]  ;;  %v182_v7 = vld [vmem:[%s7670_s0 + $0x4f0] sm:$0xff]  ;;  %v148_v8 = vld [vmem:[%s7670_s0 + $0x3e0] sm:$0xff] }
   0x4   :  { %349 = vmatpush.msra.mxu0 %v179_v4  ;;  %369 = vmatpush.msra.mxu1 %v180_v5  ;;  %v149_v9 = vld [vmem:[%s7670_s0 + $0x3e8] sm:$0xff]  ;;  %v150_v10 = vld [vmem:[%s7670_s0 + $0x3f0] sm:$0xff]  ;;  %v151_v11 = vld [vmem:[%s7670_s0 + $0x3f8] sm:$0xff] }
   0x5   :  { %389 = vmatpush.msra.mxu2 %v181_v6  ;;  %409 = vmatpush.msra.mxu3 %v182_v7  ;;  %v117_v12 = vld [vmem:[%s7670_s0 + $0x2e8] sm:$0xff]  ;;  %v118_v13 = vld [vmem:[%s7670_s0 + $0x2f0] sm:$0xff]  ;;  %v119_v14 = vld [vmem:[%s7670_s0 + $0x2f8] sm:$0xff] }
   0x6   :  { %350 = vmatpush.msra.mxu0 %v148_v8  ;;  %370 = vmatpush.msra.mxu1 %v149_v9  ;;  %v120_v15 = vld [vmem:[%s7670_s0 + $0x300] sm:$0xff]  ;;  %v86_v16 = vld [vmem:[%s7670_s0 + $0x1f0] sm:$0xff]  ;;  %v87_v17 = vld [vmem:[%s7670_s0 + $0x1f8] sm:$0xff] }
   0x7   :  { %390 = vmatpush.msra.mxu2 %v150_v10  ;;  %410 = vmatpush.msra.mxu3 %v151_v11  ;;  %v88_v18 = vld [vmem:[%s7670_s0 + $0x200] sm:$0xff]  ;;  %v89_v19 = vld [vmem:[%s7670_s0 + $0x208] sm:$0xff]  ;;  %v55_v20 = vld [vmem:[%s7670_s0 + $0xf8] sm:$0xff] }
   0x8   :  { %351 = vmatpush.msra.mxu0 %v117_v12  ;;  %371 = vmatpush.msra.mxu1 %v118_v13  ;;  %v56_v21 = vld [vmem:[%s7670_s0 + $0x100] sm:$0xff]  ;;  %v57_v22 = vld [vmem:[%s7670_s0 + $0x108] sm:$0xff]  ;;  %v58_v23 = vld [vmem:[%s7670_s0 + $0x110] sm:$0xff] }
   0x9   :  { %391 = vmatpush.msra.mxu2 %v119_v14  ;;  %411 = vmatpush.msra.mxu3 %v120_v15  ;;  %v24_v24 = vld [vmem:[%s7670_s0] sm:$0xff]  ;;  %v25_v25 = vld [vmem:[%s7670_s0 + $0x8] sm:$0xff]  ;;  %v26_v26 = vld [vmem:[%s7670_s0 + $0x10] sm:$0xff] }
   0xa   :  { %352 = vmatpush.msra.mxu0 %v86_v16  ;;  %372 = vmatpush.msra.mxu1 %v87_v17  ;;  %v27_v27 = vld [vmem:[%s7670_s0 + $0x18] sm:$0xff]  ;;  %v214_v28 = vld [vmem:[%s7670_s0 + $0x5f0] sm:$0x1]  ;;  %v216_v30 = vld [vmem:[%s7670_s0 + $0x600] sm:$0x1] }
   0xb   :  { %392 = vmatpush.msra.mxu2 %v88_v18  ;;  %412 = vmatpush.msra.mxu3 %v89_v19  ;;  %v215_v29 = vld [vmem:[%s7670_s0 + $0x5f8] sm:$0x1]  ;;  %v217_v31 = vld [vmem:[%s7670_s0 + $0x608] sm:$0x1]  ;;  %v184_v33 = vld [vmem:[%s7670_s0 + $0x500] sm:$0xff] }
   0xc   :  { %353 = vmatpush.msra.mxu0 %v55_v20  ;;  %373 = vmatpush.msra.mxu1 %v56_v21  ;;  %v183_v32 = vld [vmem:[%s7670_s0 + $0x4f8] sm:$0xff]  ;;  %v185_v34 = vld [vmem:[%s7670_s0 + $0x508] sm:$0xff]  ;;  %v186_v35 = vld [vmem:[%s7670_s0 + $0x510] sm:$0xff] }
   0xd   :  { %393 = vmatpush.msra.mxu2 %v57_v22  ;;  %413 = vmatpush.msra.mxu3 %v58_v23  ;;  %v152_v36 = vld [vmem:[%s7670_s0 + $0x400] sm:$0xff]  ;;  %v153_v37 = vld [vmem:[%s7670_s0 + $0x408] sm:$0xff]  ;;  %v154_v38 = vld [vmem:[%s7670_s0 + $0x410] sm:$0xff] }
   0xe   :  { %354 = vmatpush.msra.mxu0 %v24_v24  ;;  %374 = vmatpush.msra.mxu1 %v25_v25  ;;  %v155_v39 = vld [vmem:[%s7670_s0 + $0x418] sm:$0xff]  ;;  %v121_v40 = vld [vmem:[%s7670_s0 + $0x308] sm:$0xff]  ;;  %v122_v41 = vld [vmem:[%s7670_s0 + $0x310] sm:$0xff] }
   0xf   :  { %394 = vmatpush.msra.mxu2 %v26_v26  ;;  %414 = vmatpush.msra.mxu3 %v27_v27  ;;  %v123_v42 = vld [vmem:[%s7670_s0 + $0x318] sm:$0xff]  ;;  %v124_v43 = vld [vmem:[%s7670_s0 + $0x320] sm:$0xff]  ;;  %v90_v44 = vld [vmem:[%s7670_s0 + $0x210] sm:$0xff] }
  0x10   :  { %4015 = vmatpush.msk.msrb.mxu0 %vm245_vm0, %v214_v28  ;;  %4017 = vmatpush.msk.msrb.mxu1 %vm245_vm0, %v215_v29  ;;  %v91_v45 = vld [vmem:[%s7670_s0 + $0x218] sm:$0xff]  ;;  %v92_v46 = vld [vmem:[%s7670_s0 + $0x220] sm:$0xff]  ;;  %v93_v47 = vld [vmem:[%s7670_s0 + $0x228] sm:$0xff] }
  0x11   :  { %4019 = vmatpush.msk.msrb.mxu2 %vm245_vm0, %v216_v30  ;;  %4021 = vmatpush.msk.msrb.mxu3 %vm245_vm0, %v217_v31  ;;  %v59_v48 = vld [vmem:[%s7670_s0 + $0x118] sm:$0xff]  ;;  %v60_v49 = vld [vmem:[%s7670_s0 + $0x120] sm:$0xff]  ;;  %v61_v50 = vld [vmem:[%s7670_s0 + $0x128] sm:$0xff] }
  0x12   :  { %429 = vmatpush.msrb.mxu0 %v183_v32  ;;  %449 = vmatpush.msrb.mxu1 %v184_v33  ;;  %v62_v51 = vld [vmem:[%s7670_s0 + $0x130] sm:$0xff]  ;;  %v28_v52 = vld [vmem:[%s7670_s0 + $0x20] sm:$0xff]  ;;  %v29_v53 = vld [vmem:[%s7670_s0 + $0x28] sm:$0xff] }
  0x13   :  { %469 = vmatpush.msrb.mxu2 %v185_v34  ;;  %489 = vmatpush.msrb.mxu3 %v186_v35  ;;  %v30_v54 = vld [vmem:[%s7670_s0 + $0x30] sm:$0xff]  ;;  %v31_v55 = vld [vmem:[%s7670_s0 + $0x38] sm:$0xff]  ;;  %v4475_v56 = vld [vmem:[%s7671_s4] sm:$0xf] }
  0x14   :  { %430 = vmatpush.msrb.mxu0 %v152_v36  ;;  %450 = vmatpush.msrb.mxu1 %v153_v37  ;;  %v218_v57 = vld [vmem:[%s7670_s0 + $0x610] sm:$0x1]  ;;  %v219_v58 = vld [vmem:[%s7670_s0 + $0x618] sm:$0x1]  ;;  %v220_v59 = vld [vmem:[%s7670_s0 + $0x620] sm:$0x1] }
  0x15   :  { %470 = vmatpush.msrb.mxu2 %v154_v38  ;;  %490 = vmatpush.msrb.mxu3 %v155_v39  ;;  %v221_v60 = vld [vmem:[%s7670_s0 + $0x628] sm:$0x1]  ;;  %v187_v61 = vld [vmem:[%s7670_s0 + $0x518] sm:$0xff]  ;;  %v188_v62 = vld [vmem:[%s7670_s0 + $0x520] sm:$0xff] }
  0x16   :  { %431 = vmatpush.msrb.mxu0 %v121_v40  ;;  %451 = vmatpush.msrb.mxu1 %v122_v41  ;;  %v189_v63 = vld [vmem:[%s7670_s0 + $0x528] sm:$0xff]  ;;  %v190_v0 = vld [vmem:[%s7670_s0 + $0x530] sm:$0xff]  ;;  %v156_v1 = vld [vmem:[%s7670_s0 + $0x420] sm:$0xff] }
  0x17   :  { %471 = vmatpush.msrb.mxu2 %v123_v42  ;;  %491 = vmatpush.msrb.mxu3 %v124_v43  ;;  %v157_v2 = vld [vmem:[%s7670_s0 + $0x428] sm:$0xff]  ;;  %v158_v3 = vld [vmem:[%s7670_s0 + $0x430] sm:$0xff]  ;;  %v159_v4 = vld [vmem:[%s7670_s0 + $0x438] sm:$0xff] }
  0x18   :  { %432 = vmatpush.msrb.mxu0 %v90_v44  ;;  %452 = vmatpush.msrb.mxu1 %v91_v45  ;;  %v125_v5 = vld [vmem:[%s7670_s0 + $0x328] sm:$0xff]  ;;  %v126_v6 = vld [vmem:[%s7670_s0 + $0x330] sm:$0xff]  ;;  %v127_v7 = vld [vmem:[%s7670_s0 + $0x338] sm:$0xff] }
  0x19   :  { %472 = vmatpush.msrb.mxu2 %v92_v46  ;;  %492 = vmatpush.msrb.mxu3 %v93_v47  ;;  %v128_v8 = vld [vmem:[%s7670_s0 + $0x340] sm:$0xff]  ;;  %v94_v9 = vld [vmem:[%s7670_s0 + $0x230] sm:$0xff]  ;;  %v95_v10 = vld [vmem:[%s7670_s0 + $0x238] sm:$0xff] }
  0x1a   :  { %433 = vmatpush.msrb.mxu0 %v59_v48  ;;  %453 = vmatpush.msrb.mxu1 %v60_v49  ;;  %v96_v11 = vld [vmem:[%s7670_s0 + $0x240] sm:$0xff]  ;;  %v97_v12 = vld [vmem:[%s7670_s0 + $0x248] sm:$0xff]  ;;  %v63_v13 = vld [vmem:[%s7670_s0 + $0x138] sm:$0xff] }
  0x1b   :  { %473 = vmatpush.msrb.mxu2 %v61_v50  ;;  %493 = vmatpush.msrb.mxu3 %v62_v51  ;;  %v64_v14 = vld [vmem:[%s7670_s0 + $0x140] sm:$0xff]  ;;  %v65_v15 = vld [vmem:[%s7670_s0 + $0x148] sm:$0xff]  ;;  %v66_v16 = vld [vmem:[%s7670_s0 + $0x150] sm:$0xff] }
  0x1c   :  { %434 = vmatpush.msrb.mxu0 %v28_v52  ;;  %454 = vmatpush.msrb.mxu1 %v29_v53  ;;  %v32_v17 = vld [vmem:[%s7670_s0 + $0x40] sm:$0xff]  ;;  %v33_v18 = vld [vmem:[%s7670_s0 + $0x48] sm:$0xff]  ;;  %v34_v19 = vld [vmem:[%s7670_s0 + $0x50] sm:$0xff] }
  0x1d   :  { %474 = vmatpush.msrb.mxu2 %v30_v54  ;;  %494 = vmatpush.msrb.mxu3 %v31_v55  ;;  %v35_v20 = vld [vmem:[%s7670_s0 + $0x58] sm:$0xff]  ;;  %v222_v21 = vld [vmem:[%s7670_s0 + $0x630] sm:$0x1]  ;;  %v224_v23 = vld [vmem:[%s7670_s0 + $0x640] sm:$0x1] }
  0x1e   :  { %4008 = vmatmul.msk.f32.vlgmr.msra.gmra.mxu0 %vm241_vm1, %v4475_v56  ;;  %4010 = vmatmul.msk.f32.vlgmr.msra.gmra.mxu1 %vm241_vm1, %v4475_v56  ;;  %v223_v22 = vld [vmem:[%s7670_s0 + $0x638] sm:$0x1]  ;;  %v225_v24 = vld [vmem:[%s7670_s0 + $0x648] sm:$0x1]  ;;  %v192_v26 = vld [vmem:[%s7670_s0 + $0x540] sm:$0xff] }
  0x1f   :  { %4012 = vmatmul.msk.f32.vlgmr.msra.gmra.mxu2 %vm241_vm1, %v4475_v56  ;;  %4014 = vmatmul.msk.f32.vlgmr.msra.gmra.mxu3 %vm241_vm1, %v4475_v56  ;;  %v191_v25 = vld [vmem:[%s7670_s0 + $0x538] sm:$0xff]  ;;  %v193_v27 = vld [vmem:[%s7670_s0 + $0x548] sm:$0xff]  ;;  %v194_v28 = vld [vmem:[%s7670_s0 + $0x550] sm:$0xff] }
  0x20   :  { %4023 = vmatpush.msk.msra.mxu0 %vm245_vm0, %v218_v57  ;;  %4025 = vmatpush.msk.msra.mxu1 %vm245_vm0, %v219_v58  ;;  %v160_v29 = vld [vmem:[%s7670_s0 + $0x440] sm:$0xff]  ;;  %v161_v30 = vld [vmem:[%s7670_s0 + $0x448] sm:$0xff]  ;;  %v162_v31 = vld [vmem:[%s7670_s0 + $0x450] sm:$0xff] }
  0x21   :  { %4027 = vmatpush.msk.msra.mxu2 %vm245_vm0, %v220_v59  ;;  %4029 = vmatpush.msk.msra.mxu3 %vm245_vm0, %v221_v60  ;;  %v163_v32 = vld [vmem:[%s7670_s0 + $0x458] sm:$0xff]  ;;  %v129_v33 = vld [vmem:[%s7670_s0 + $0x348] sm:$0xff]  ;;  %v130_v34 = vld [vmem:[%s7670_s0 + $0x350] sm:$0xff] }
  0x22   :  { %509 = vmatpush.msra.mxu0 %v187_v61  ;;  %529 = vmatpush.msra.mxu1 %v188_v62  ;;  %v131_v35 = vld [vmem:[%s7670_s0 + $0x358] sm:$0xff]  ;;  %v132_v36 = vld [vmem:[%s7670_s0 + $0x360] sm:$0xff]  ;;  %v98_v37 = vld [vmem:[%s7670_s0 + $0x250] sm:$0xff] }
  0x23   :  { %549 = vmatpush.msra.mxu2 %v189_v63  ;;  %569 = vmatpush.msra.mxu3 %v190_v0  ;;  %v99_v38 = vld [vmem:[%s7670_s0 + $0x258] sm:$0xff]  ;;  %v100_v39 = vld [vmem:[%s7670_s0 + $0x260] sm:$0xff]  ;;  %v101_v40 = vld [vmem:[%s7670_s0 + $0x268] sm:$0xff] }
  0x24   :  { %510 = vmatpush.msra.mxu0 %v156_v1  ;;  %530 = vmatpush.msra.mxu1 %v157_v2  ;;  %v67_v41 = vld [vmem:[%s7670_s0 + $0x158] sm:$0xff]  ;;  %v68_v42 = vld [vmem:[%s7670_s0 + $0x160] sm:$0xff]  ;;  %v69_v43 = vld [vmem:[%s7670_s0 + $0x168] sm:$0xff] }
  0x25   :  { %550 = vmatpush.msra.mxu2 %v158_v3  ;;  %570 = vmatpush.msra.mxu3 %v159_v4  ;;  %v70_v44 = vld [vmem:[%s7670_s0 + $0x170] sm:$0xff]  ;;  %v36_v45 = vld [vmem:[%s7670_s0 + $0x60] sm:$0xff]  ;;  %v37_v46 = vld [vmem:[%s7670_s0 + $0x68] sm:$0xff] }
  0x26   :  { %511 = vmatpush.msra.mxu0 %v125_v5  ;;  %531 = vmatpush.msra.mxu1 %v126_v6  ;;  %v38_v47 = vld [vmem:[%s7670_s0 + $0x70] sm:$0xff]  ;;  %v39_v48 = vld [vmem:[%s7670_s0 + $0x78] sm:$0xff]  ;;  %v228_v51 = vld [vmem:[%s7670_s0 + $0x660] sm:$0x1] }
  0x27   :  { %551 = vmatpush.msra.mxu2 %v127_v7  ;;  %571 = vmatpush.msra.mxu3 %v128_v8  ;;  %v226_v49 = vld [vmem:[%s7670_s0 + $0x650] sm:$0x1]  ;;  %v227_v50 = vld [vmem:[%s7670_s0 + $0x658] sm:$0x1]  ;;  %v229_v52 = vld [vmem:[%s7670_s0 + $0x668] sm:$0x1] }
  0x28   :  { %512 = vmatpush.msra.mxu0 %v94_v9  ;;  %532 = vmatpush.msra.mxu1 %v95_v10  ;;  %v195_v53 = vld [vmem:[%s7670_s0 + $0x558] sm:$0xff]  ;;  %v196_v54 = vld [vmem:[%s7670_s0 + $0x560] sm:$0xff]  ;;  %v197_v55 = vld [vmem:[%s7670_s0 + $0x568] sm:$0xff] }
  0x29   :  { %552 = vmatpush.msra.mxu2 %v96_v11  ;;  %572 = vmatpush.msra.mxu3 %v97_v12  ;;  %v198_v57 = vld [vmem:[%s7670_s0 + $0x570] sm:$0xff]  ;;  %v164_v58 = vld [vmem:[%s7670_s0 + $0x460] sm:$0xff]  ;;  %v165_v59 = vld [vmem:[%s7670_s0 + $0x468] sm:$0xff] }
  0x2a   :  { %513 = vmatpush.msra.mxu0 %v63_v13  ;;  %533 = vmatpush.msra.mxu1 %v64_v14  ;;  %v166_v60 = vld [vmem:[%s7670_s0 + $0x470] sm:$0xff]  ;;  %v167_v61 = vld [vmem:[%s7670_s0 + $0x478] sm:$0xff]  ;;  %v133_v62 = vld [vmem:[%s7670_s0 + $0x368] sm:$0xff] }
  0x2b   :  { %553 = vmatpush.msra.mxu2 %v65_v15  ;;  %573 = vmatpush.msra.mxu3 %v66_v16  ;;  %v134_v63 = vld [vmem:[%s7670_s0 + $0x370] sm:$0xff]  ;;  %v135_v0 = vld [vmem:[%s7670_s0 + $0x378] sm:$0xff]  ;;  %v136_v1 = vld [vmem:[%s7670_s0 + $0x380] sm:$0xff] }
  0x2c   :  { %514 = vmatpush.msra.mxu0 %v32_v17  ;;  %534 = vmatpush.msra.mxu1 %v33_v18  ;;  %v102_v2 = vld [vmem:[%s7670_s0 + $0x270] sm:$0xff]  ;;  %v103_v3 = vld [vmem:[%s7670_s0 + $0x278] sm:$0xff]  ;;  %v104_v4 = vld [vmem:[%s7670_s0 + $0x280] sm:$0xff] }
  0x2d   :  { %554 = vmatpush.msra.mxu2 %v34_v19  ;;  %574 = vmatpush.msra.mxu3 %v35_v20  ;;  %v105_v5 = vld [vmem:[%s7670_s0 + $0x288] sm:$0xff]  ;;  %v71_v6 = vld [vmem:[%s7670_s0 + $0x178] sm:$0xff]  ;;  %v72_v7 = vld [vmem:[%s7670_s0 + $0x180] sm:$0xff] }
  0x2e   :  { %4016 = vmatmul.msk.f32.vlgmr.msrb.gmra.mxu0 %vm241_vm1, %v4475_v56  ;;  %4018 = vmatmul.msk.f32.vlgmr.msrb.gmra.mxu1 %vm241_vm1, %v4475_v56  ;;  %v73_v8 = vld [vmem:[%s7670_s0 + $0x188] sm:$0xff]  ;;  %v74_v9 = vld [vmem:[%s7670_s0 + $0x190] sm:$0xff]  ;;  %v40_v10 = vld [vmem:[%s7670_s0 + $0x80] sm:$0xff] }
  0x2f   :  { %4020 = vmatmul.msk.f32.vlgmr.msrb.gmra.mxu2 %vm241_vm1, %v4475_v56  ;;  %4022 = vmatmul.msk.f32.vlgmr.msrb.gmra.mxu3 %vm241_vm1, %v4475_v56  ;;  %v41_v11 = vld [vmem:[%s7670_s0 + $0x88] sm:$0xff]  ;;  %v42_v12 = vld [vmem:[%s7670_s0 + $0x90] sm:$0xff]  ;;  %v43_v13 = vld [vmem:[%s7670_s0 + $0x98] sm:$0xff] }
  0x30   :  { %4031 = vmatpush.msk.msrb.mxu0 %vm245_vm0, %v222_v21  ;;  %4033 = vmatpush.msk.msrb.mxu1 %vm245_vm0, %v223_v22  ;;  %v230_v14 = vld [vmem:[%s7670_s0 + $0x670] sm:$0x1]  ;;  %v231_v15 = vld [vmem:[%s7670_s0 + $0x678] sm:$0x1]  ;;  %v232_v16 = vld [vmem:[%s7670_s0 + $0x680] sm:$0x1] }
  0x31   :  { %4035 = vmatpush.msk.msrb.mxu2 %vm245_vm0, %v224_v23  ;;  %4037 = vmatpush.msk.msrb.mxu3 %vm245_vm0, %v225_v24  ;;  %v233_v17 = vld [vmem:[%s7670_s0 + $0x688] sm:$0x1]  ;;  %v199_v18 = vld [vmem:[%s7670_s0 + $0x578] sm:$0xff]  ;;  %v200_v19 = vld [vmem:[%s7670_s0 + $0x580] sm:$0xff] }
  0x32   :  { %589 = vmatpush.msrb.mxu0 %v191_v25  ;;  %609 = vmatpush.msrb.mxu1 %v192_v26  ;;  %v201_v20 = vld [vmem:[%s7670_s0 + $0x588] sm:$0xff]  ;;  %v202_v21 = vld [vmem:[%s7670_s0 + $0x590] sm:$0xff]  ;;  %v168_v22 = vld [vmem:[%s7670_s0 + $0x480] sm:$0xff] }
  0x33   :  { %629 = vmatpush.msrb.mxu2 %v193_v27  ;;  %649 = vmatpush.msrb.mxu3 %v194_v28  ;;  %v169_v23 = vld [vmem:[%s7670_s0 + $0x488] sm:$0xff]  ;;  %v170_v24 = vld [vmem:[%s7670_s0 + $0x490] sm:$0xff]  ;;  %v171_v25 = vld [vmem:[%s7670_s0 + $0x498] sm:$0xff] }
  0x34   :  { %590 = vmatpush.msrb.mxu0 %v160_v29  ;;  %610 = vmatpush.msrb.mxu1 %v161_v30  ;;  %v137_v26 = vld [vmem:[%s7670_s0 + $0x388] sm:$0xff]  ;;  %v138_v27 = vld [vmem:[%s7670_s0 + $0x390] sm:$0xff]  ;;  %v139_v28 = vld [vmem:[%s7670_s0 + $0x398] sm:$0xff] }
  0x35   :  { %630 = vmatpush.msrb.mxu2 %v162_v31  ;;  %650 = vmatpush.msrb.mxu3 %v163_v32  ;;  %v140_v29 = vld [vmem:[%s7670_s0 + $0x3a0] sm:$0xff]  ;;  %v106_v30 = vld [vmem:[%s7670_s0 + $0x290] sm:$0xff]  ;;  %v107_v31 = vld [vmem:[%s7670_s0 + $0x298] sm:$0xff] }
  0x36   :  { %591 = vmatpush.msrb.mxu0 %v129_v33  ;;  %611 = vmatpush.msrb.mxu1 %v130_v34  ;;  %v108_v32 = vld [vmem:[%s7670_s0 + $0x2a0] sm:$0xff]  ;;  %v109_v33 = vld [vmem:[%s7670_s0 + $0x2a8] sm:$0xff]  ;;  %v75_v34 = vld [vmem:[%s7670_s0 + $0x198] sm:$0xff] }
  0x37   :  { %631 = vmatpush.msrb.mxu2 %v131_v35  ;;  %651 = vmatpush.msrb.mxu3 %v132_v36  ;;  %v76_v35 = vld [vmem:[%s7670_s0 + $0x1a0] sm:$0xff]  ;;  %v77_v36 = vld [vmem:[%s7670_s0 + $0x1a8] sm:$0xff] }
  0x38   :  { %592 = vmatpush.msrb.mxu0 %v98_v37  ;;  %612 = vmatpush.msrb.mxu1 %v99_v38  ;;  %v78_v37 = vld [vmem:[%s7670_s0 + $0x1b0] sm:$0xff]  ;;  %v44_v38 = vld [vmem:[%s7670_s0 + $0xa0] sm:$0xff] }
  0x39   :  { %632 = vmatpush.msrb.mxu2 %v100_v39  ;;  %652 = vmatpush.msrb.mxu3 %v101_v40  ;;  %v45_v39 = vld [vmem:[%s7670_s0 + $0xa8] sm:$0xff]  ;;  %v46_v40 = vld [vmem:[%s7670_s0 + $0xb0] sm:$0xff] }
  0x3a   :  { %593 = vmatpush.msrb.mxu0 %v67_v41  ;;  %613 = vmatpush.msrb.mxu1 %v68_v42  ;;  %v47_v41 = vld [vmem:[%s7670_s0 + $0xb8] sm:$0xff]  ;;  %v234_v42 = vld [vmem:[%s7670_s0 + $0x690] sm:$0x1] }
  0x3b   :  { %633 = vmatpush.msrb.mxu2 %v69_v43  ;;  %653 = vmatpush.msrb.mxu3 %v70_v44  ;;  %v235_v43 = vld [vmem:[%s7670_s0 + $0x698] sm:$0x1]  ;;  %v236_v44 = vld [vmem:[%s7670_s0 + $0x6a0] sm:$0x1] }
  0x3c   :  { %594 = vmatpush.msrb.mxu0 %v36_v45  ;;  %614 = vmatpush.msrb.mxu1 %v37_v46  ;;  %v237_v45 = vld [vmem:[%s7670_s0 + $0x6a8] sm:$0x1]  ;;  %v203_v46 = vld [vmem:[%s7670_s0 + $0x598] sm:$0xff] }
  0x3d   :  { %634 = vmatpush.msrb.mxu2 %v38_v47  ;;  %654 = vmatpush.msrb.mxu3 %v39_v48  ;;  %v204_v47 = vld [vmem:[%s7670_s0 + $0x5a0] sm:$0xff]  ;;  %v205_v48 = vld [vmem:[%s7670_s0 + $0x5a8] sm:$0xff] }
  0x3e   :  { %4024 = vmatmul.msk.f32.vlgmr.msra.gmra.mxu0 %vm241_vm1, %v4475_v56  ;;  %4026 = vmatmul.msk.f32.vlgmr.msra.gmra.mxu1 %vm241_vm1, %v4475_v56 }
  0x3f   :  { %4028 = vmatmul.msk.f32.vlgmr.msra.gmra.mxu2 %vm241_vm1, %v4475_v56  ;;  %4030 = vmatmul.msk.f32.vlgmr.msra.gmra.mxu3 %vm241_vm1, %v4475_v56 }
  0x40   :  { %4039 = vmatpush.msk.msra.mxu0 %vm245_vm0, %v226_v49  ;;  %4041 = vmatpush.msk.msra.mxu1 %vm245_vm0, %v227_v50  ;;  %v206_v49 = vld [vmem:[%s7670_s0 + $0x5b0] sm:$0xff]  ;;  %v172_v50 = vld [vmem:[%s7670_s0 + $0x4a0] sm:$0xff] }
  0x41   :  { %4043 = vmatpush.msk.msra.mxu2 %vm245_vm0, %v228_v51  ;;  %4045 = vmatpush.msk.msra.mxu3 %vm245_vm0, %v229_v52  ;;  %v173_v51 = vld [vmem:[%s7670_s0 + $0x4a8] sm:$0xff]  ;;  %v174_v52 = vld [vmem:[%s7670_s0 + $0x4b0] sm:$0xff] }
  0x42   :  { %669 = vmatpush.msra.mxu0 %v195_v53  ;;  %689 = vmatpush.msra.mxu1 %v196_v54  ;;  %v175_v53 = vld [vmem:[%s7670_s0 + $0x4b8] sm:$0xff]  ;;  %v141_v54 = vld [vmem:[%s7670_s0 + $0x3a8] sm:$0xff] }
  0x43   :  { %709 = vmatpush.msra.mxu2 %v197_v55  ;;  %729 = vmatpush.msra.mxu3 %v198_v57  ;;  %v142_v55 = vld [vmem:[%s7670_s0 + $0x3b0] sm:$0xff]  ;;  %v143_v57 = vld [vmem:[%s7670_s0 + $0x3b8] sm:$0xff] }
  0x44   :  { %670 = vmatpush.msra.mxu0 %v164_v58  ;;  %690 = vmatpush.msra.mxu1 %v165_v59  ;;  %v144_v58 = vld [vmem:[%s7670_s0 + $0x3c0] sm:$0xff]  ;;  %v110_v59 = vld [vmem:[%s7670_s0 + $0x2b0] sm:$0xff] }
  0x45   :  { %710 = vmatpush.msra.mxu2 %v166_v60  ;;  %730 = vmatpush.msra.mxu3 %v167_v61  ;;  %v111_v60 = vld [vmem:[%s7670_s0 + $0x2b8] sm:$0xff]  ;;  %v112_v61 = vld [vmem:[%s7670_s0 + $0x2c0] sm:$0xff] }
  0x46   :  { %671 = vmatpush.msra.mxu0 %v133_v62  ;;  %691 = vmatpush.msra.mxu1 %v134_v63  ;;  %v113_v62 = vld [vmem:[%s7670_s0 + $0x2c8] sm:$0xff]  ;;  %v79_v63 = vld [vmem:[%s7670_s0 + $0x1b8] sm:$0xff] }
  0x47   :  { %711 = vmatpush.msra.mxu2 %v135_v0  ;;  %731 = vmatpush.msra.mxu3 %v136_v1  ;;  %v80_v0 = vld [vmem:[%s7670_s0 + $0x1c0] sm:$0xff]  ;;  %v81_v1 = vld [vmem:[%s7670_s0 + $0x1c8] sm:$0xff] }
  0x48   :  { %672 = vmatpush.msra.mxu0 %v102_v2  ;;  %692 = vmatpush.msra.mxu1 %v103_v3  ;;  %v82_v2 = vld [vmem:[%s7670_s0 + $0x1d0] sm:$0xff]  ;;  %v48_v3 = vld [vmem:[%s7670_s0 + $0xc0] sm:$0xff] }
  0x49   :  { %712 = vmatpush.msra.mxu2 %v104_v4  ;;  %732 = vmatpush.msra.mxu3 %v105_v5  ;;  %v49_v4 = vld [vmem:[%s7670_s0 + $0xc8] sm:$0xff]  ;;  %v50_v5 = vld [vmem:[%s7670_s0 + $0xd0] sm:$0xff] }
  0x4a   :  { %673 = vmatpush.msra.mxu0 %v71_v6  ;;  %693 = vmatpush.msra.mxu1 %v72_v7  ;;  %v51_v6 = vld [vmem:[%s7670_s0 + $0xd8] sm:$0xff]  ;;  %v238_v7 = vld [vmem:[%s7670_s0 + $0x6b0] sm:$0x1] }
  0x4b   :  { %713 = vmatpush.msra.mxu2 %v73_v8  ;;  %733 = vmatpush.msra.mxu3 %v74_v9  ;;  %v239_v8 = vld [vmem:[%s7670_s0 + $0x6b8] sm:$0x1]  ;;  %v240_v9 = vld [vmem:[%s7670_s0 + $0x6c0] sm:$0x1] }
  0x4c   :  { %674 = vmatpush.msra.mxu0 %v40_v10  ;;  %694 = vmatpush.msra.mxu1 %v41_v11  ;;  %v1145_v10 = vld [vmem:[%s7672_s1 + $0x5d0] sm:$0x1]  ;;  %v207_v11 = vld [vmem:[%s7670_s0 + $0x5b8] sm:$0xff] }
  0x4d   :  { %714 = vmatpush.msra.mxu2 %v42_v12  ;;  %734 = vmatpush.msra.mxu3 %v43_v13  ;;  %v208_v12 = vld [vmem:[%s7670_s0 + $0x5c0] sm:$0xff]  ;;  %v209_v13 = vld [vmem:[%s7670_s0 + $0x5c8] sm:$0xff] }
  0x4e   :  { %4032 = vmatmul.msk.f32.vlgmr.msrb.gmra.mxu0 %vm241_vm1, %v4475_v56  ;;  %4034 = vmatmul.msk.f32.vlgmr.msrb.gmra.mxu1 %vm241_vm1, %v4475_v56 }
  0x4f   :  { %4036 = vmatmul.msk.f32.vlgmr.msrb.gmra.mxu2 %vm241_vm1, %v4475_v56  ;;  %4038 = vmatmul.msk.f32.vlgmr.msrb.gmra.mxu3 %vm241_vm1, %v4475_v56 }
  0x50   :  { %4047 = vmatpush.msk.msrb.mxu0 %vm245_vm0, %v230_v14  ;;  %4049 = vmatpush.msk.msrb.mxu1 %vm245_vm0, %v231_v15  ;;  %v1114_v14 = vld [vmem:[%s7672_s1 + $0x4d8] sm:$0xff]  ;;  %v176_v15 = vld [vmem:[%s7670_s0 + $0x4c0] sm:$0xff] }
  0x51   :  { %4051 = vmatpush.msk.msrb.mxu2 %vm245_vm0, %v232_v16  ;;  %4053 = vmatpush.msk.msrb.mxu3 %vm245_vm0, %v233_v17  ;;  %v177_v16 = vld [vmem:[%s7670_s0 + $0x4c8] sm:$0xff]  ;;  %v178_v17 = vld [vmem:[%s7670_s0 + $0x4d0] sm:$0xff] }
  0x52   :  { %749 = vmatpush.msrb.mxu0 %v199_v18  ;;  %769 = vmatpush.msrb.mxu1 %v200_v19  ;;  %v1083_v18 = vld [vmem:[%s7672_s1 + $0x3e0] sm:$0xff]  ;;  %v145_v19 = vld [vmem:[%s7670_s0 + $0x3c8] sm:$0xff] }
  0x53   :  { %789 = vmatpush.msrb.mxu2 %v201_v20  ;;  %809 = vmatpush.msrb.mxu3 %v202_v21  ;;  %v146_v20 = vld [vmem:[%s7670_s0 + $0x3d0] sm:$0xff]  ;;  %v147_v21 = vld [vmem:[%s7670_s0 + $0x3d8] sm:$0xff] }
  0x54   :  { %750 = vmatpush.msrb.mxu0 %v168_v22  ;;  %770 = vmatpush.msrb.mxu1 %v169_v23  ;;  %v1052_v22 = vld [vmem:[%s7672_s1 + $0x2e8] sm:$0xff]  ;;  %v114_v23 = vld [vmem:[%s7670_s0 + $0x2d0] sm:$0xff] }
  0x55   :  { %790 = vmatpush.msrb.mxu2 %v170_v24  ;;  %810 = vmatpush.msrb.mxu3 %v171_v25  ;;  %v115_v24 = vld [vmem:[%s7670_s0 + $0x2d8] sm:$0xff]  ;;  %v116_v25 = vld [vmem:[%s7670_s0 + $0x2e0] sm:$0xff] }
  0x56   :  { %751 = vmatpush.msrb.mxu0 %v137_v26  ;;  %771 = vmatpush.msrb.mxu1 %v138_v27  ;;  %v1021_v26 = vld [vmem:[%s7672_s1 + $0x1f0] sm:$0xff]  ;;  %v83_v27 = vld [vmem:[%s7670_s0 + $0x1d8] sm:$0xff] }
  0x57   :  { %791 = vmatpush.msrb.mxu2 %v139_v28  ;;  %811 = vmatpush.msrb.mxu3 %v140_v29  ;;  %v84_v28 = vld [vmem:[%s7670_s0 + $0x1e0] sm:$0xff]  ;;  %v85_v29 = vld [vmem:[%s7670_s0 + $0x1e8] sm:$0xff] }
  0x58   :  { %752 = vmatpush.msrb.mxu0 %v106_v30  ;;  %772 = vmatpush.msrb.mxu1 %v107_v31  ;;  %v990_v30 = vld [vmem:[%s7672_s1 + $0xf8] sm:$0xff]  ;;  %v52_v31 = vld [vmem:[%s7670_s0 + $0xe0] sm:$0xff] }
  0x59   :  { %792 = vmatpush.msrb.mxu2 %v108_v32  ;;  %812 = vmatpush.msrb.mxu3 %v109_v33  ;;  %v53_v32 = vld [vmem:[%s7670_s0 + $0xe8] sm:$0xff]  ;;  %v54_v33 = vld [vmem:[%s7670_s0 + $0xf0] sm:$0xff] }
  0x5a   :  { %753 = vmatpush.msrb.mxu0 %v75_v34  ;;  %773 = vmatpush.msrb.mxu1 %v76_v35  ;;  %v959_v34 = vld [vmem:[%s7672_s1] sm:$0xff]  ;;  %v1146_v35 = vld [vmem:[%s7672_s1 + $0x5d8] sm:$0x1] }
  0x5b   :  { %793 = vmatpush.msrb.mxu2 %v77_v36  ;;  %813 = vmatpush.msrb.mxu3 %v78_v37  ;;  %v1147_v36 = vld [vmem:[%s7672_s1 + $0x5e0] sm:$0x1]  ;;  %v1148_v37 = vld [vmem:[%s7672_s1 + $0x5e8] sm:$0x1] }
  0x5c   :  { %754 = vmatpush.msrb.mxu0 %v44_v38  ;;  %774 = vmatpush.msrb.mxu1 %v45_v39  ;;  %v1149_v38 = vld [vmem:[%s7672_s1 + $0x5f0] sm:$0x1]  ;;  %v1115_v39 = vld [vmem:[%s7672_s1 + $0x4e0] sm:$0xff] }
  0x5d   :  { %794 = vmatpush.msrb.mxu2 %v46_v40  ;;  %814 = vmatpush.msrb.mxu3 %v47_v41  ;;  %v1116_v40 = vld [vmem:[%s7672_s1 + $0x4e8] sm:$0xff]  ;;  %v1117_v41 = vld [vmem:[%s7672_s1 + $0x4f0] sm:$0xff] }
  0x5e   :  { %4040 = vmatmul.msk.f32.vlgmr.msra.gmra.mxu0 %vm241_vm1, %v4475_v56  ;;  %4042 = vmatmul.msk.f32.vlgmr.msra.gmra.mxu1 %vm241_vm1, %v4475_v56 }
  0x5f   :  { %4044 = vmatmul.msk.f32.vlgmr.msra.gmra.mxu2 %vm241_vm1, %v4475_v56  ;;  %4046 = vmatmul.msk.f32.vlgmr.msra.gmra.mxu3 %vm241_vm1, %v4475_v56 }
  0x60   :  { %4055 = vmatpush.msk.msra.mxu0 %vm245_vm0, %v234_v42  ;;  %4057 = vmatpush.msk.msra.mxu1 %vm245_vm0, %v235_v43  ;;  %v1118_v42 = vld [vmem:[%s7672_s1 + $0x4f8] sm:$0xff]  ;;  %v1084_v43 = vld [vmem:[%s7672_s1 + $0x3e8] sm:$0xff] }
  0x61   :  { %4059 = vmatpush.msk.msra.mxu2 %vm245_vm0, %v236_v44  ;;  %4061 = vmatpush.msk.msra.mxu3 %vm245_vm0, %v237_v45  ;;  %v1085_v44 = vld [vmem:[%s7672_s1 + $0x3f0] sm:$0xff]  ;;  %v1086_v45 = vld [vmem:[%s7672_s1 + $0x3f8] sm:$0xff] }
  0x62   :  { %829 = vmatpush.msra.mxu0 %v203_v46  ;;  %849 = vmatpush.msra.mxu1 %v204_v47  ;;  %v1087_v46 = vld [vmem:[%s7672_s1 + $0x400] sm:$0xff]  ;;  %v1053_v47 = vld [vmem:[%s7672_s1 + $0x2f0] sm:$0xff] }
  0x63   :  { %869 = vmatpush.msra.mxu2 %v205_v48  ;;  %889 = vmatpush.msra.mxu3 %v206_v49  ;;  %v1054_v48 = vld [vmem:[%s7672_s1 + $0x2f8] sm:$0xff]  ;;  %v1055_v49 = vld [vmem:[%s7672_s1 + $0x300] sm:$0xff] }
  0x64   :  { %830 = vmatpush.msra.mxu0 %v172_v50  ;;  %850 = vmatpush.msra.mxu1 %v173_v51  ;;  %v1056_v50 = vld [vmem:[%s7672_s1 + $0x308] sm:$0xff]  ;;  %v1022_v51 = vld [vmem:[%s7672_s1 + $0x1f8] sm:$0xff] }
  0x65   :  { %870 = vmatpush.msra.mxu2 %v174_v52  ;;  %890 = vmatpush.msra.mxu3 %v175_v53  ;;  %v1023_v52 = vld [vmem:[%s7672_s1 + $0x200] sm:$0xff]  ;;  %v1024_v53 = vld [vmem:[%s7672_s1 + $0x208] sm:$0xff] }
  0x66   :  { %831 = vmatpush.msra.mxu0 %v141_v54  ;;  %851 = vmatpush.msra.mxu1 %v142_v55  ;;  %v1025_v54 = vld [vmem:[%s7672_s1 + $0x210] sm:$0xff]  ;;  %v991_v55 = vld [vmem:[%s7672_s1 + $0x100] sm:$0xff] }
  0x67   :  { %871 = vmatpush.msra.mxu2 %v143_v57  ;;  %891 = vmatpush.msra.mxu3 %v144_v58  ;;  %v992_v57 = vld [vmem:[%s7672_s1 + $0x108] sm:$0xff]  ;;  %v993_v58 = vld [vmem:[%s7672_s1 + $0x110] sm:$0xff] }
  0x68   :  { %832 = vmatpush.msra.mxu0 %v110_v59  ;;  %852 = vmatpush.msra.mxu1 %v111_v60  ;;  %v994_v59 = vld [vmem:[%s7672_s1 + $0x118] sm:$0xff]  ;;  %v960_v60 = vld [vmem:[%s7672_s1 + $0x8] sm:$0xff] }
  0x69   :  { %872 = vmatpush.msra.mxu2 %v112_v61  ;;  %892 = vmatpush.msra.mxu3 %v113_v62  ;;  %v961_v61 = vld [vmem:[%s7672_s1 + $0x10] sm:$0xff]  ;;  %v962_v62 = vld [vmem:[%s7672_s1 + $0x18] sm:$0xff] }
  0x6a   :  { %4054 = vmatmul.msk.f32.vlgmr.msrb.gmra.mxu3 %vm241_vm1, %v4475_v56  ;;  %833 = vmatpush.msra.mxu0 %v79_v63  ;;  %v963_v63 = vld [vmem:[%s7672_s1 + $0x20] sm:$0xff] }
  0x6b   :  { %853 = vmatpush.msra.mxu1 %v80_v0  ;;  %873 = vmatpush.msra.mxu2 %v81_v1  ;;  %v1150_v0 = vld [vmem:[%s7672_s1 + $0x5f8] sm:$0x1]  ;;  %v1151_v1 = vld [vmem:[%s7672_s1 + $0x600] sm:$0x1] }
  0x6c   :  { %893 = vmatpush.msra.mxu3 %v82_v2  ;;  %834 = vmatpush.msra.mxu0 %v48_v3  ;;  %v1152_v2 = vld [vmem:[%s7672_s1 + $0x608] sm:$0x1]  ;;  %v1153_v3 = vld [vmem:[%s7672_s1 + $0x610] sm:$0x1] }
  0x6d   :  { %854 = vmatpush.msra.mxu1 %v49_v4  ;;  %874 = vmatpush.msra.mxu2 %v50_v5  ;;  %v1119_v4 = vld [vmem:[%s7672_s1 + $0x500] sm:$0xff]  ;;  %v1120_v5 = vld [vmem:[%s7672_s1 + $0x508] sm:$0xff] }
  0x6e   :  { %894 = vmatpush.msra.mxu3 %v51_v6  ;;  %4048 = vmatmul.msk.f32.vlgmr.msrb.gmra.mxu0 %vm241_vm1, %v4475_v56  ;;  %v1121_v6 = vld [vmem:[%s7672_s1 + $0x510] sm:$0xff] }
  0x6f   :  { %4050 = vmatmul.msk.f32.vlgmr.msrb.gmra.mxu1 %vm241_vm1, %v4475_v56  ;;  %4052 = vmatmul.msk.f32.vlgmr.msrb.gmra.mxu2 %vm241_vm1, %v4475_v56 }
  0x70   :  { %4063 = vmatpush.msk.msrb.mxu0 %vm245_vm0, %v238_v7  ;;  %4065 = vmatpush.msk.msrb.mxu1 %vm245_vm0, %v239_v8  ;;  %v1122_v7 = vld [vmem:[%s7672_s1 + $0x518] sm:$0xff]  ;;  %v1088_v8 = vld [vmem:[%s7672_s1 + $0x408] sm:$0xff] }
  0x71   :  { %4067 = vmatpush.msk.msrb.mxu2 %vm245_vm0, %v240_v9  ;;  %4069 = vmatpush.msk.msrb.mxu3 %vm245_vm0, %v1145_v10  ;;  %v1089_v9 = vld [vmem:[%s7672_s1 + $0x410] sm:$0xff]  ;;  %v1090_v10 = vld [vmem:[%s7672_s1 + $0x418] sm:$0xff] }
  0x72   :  { %909 = vmatpush.msrb.mxu0 %v207_v11  ;;  %929 = vmatpush.msrb.mxu1 %v208_v12  ;;  %v1091_v11 = vld [vmem:[%s7672_s1 + $0x420] sm:$0xff]  ;;  %v1057_v12 = vld [vmem:[%s7672_s1 + $0x310] sm:$0xff] }
  0x73   :  { %949 = vmatpush.msrb.mxu2 %v209_v13  ;;  %1279 = vmatpush.msrb.mxu3 %v1114_v14  ;;  %v1058_v13 = vld [vmem:[%s7672_s1 + $0x318] sm:$0xff]  ;;  %v1059_v14 = vld [vmem:[%s7672_s1 + $0x320] sm:$0xff] }
  0x74   :  { %910 = vmatpush.msrb.mxu0 %v176_v15  ;;  %930 = vmatpush.msrb.mxu1 %v177_v16  ;;  %v1060_v15 = vld [vmem:[%s7672_s1 + $0x328] sm:$0xff]  ;;  %v1026_v16 = vld [vmem:[%s7672_s1 + $0x218] sm:$0xff] }
  0x75   :  { %950 = vmatpush.msrb.mxu2 %v178_v17  ;;  %1280 = vmatpush.msrb.mxu3 %v1083_v18  ;;  %v1027_v17 = vld [vmem:[%s7672_s1 + $0x220] sm:$0xff]  ;;  %v1028_v18 = vld [vmem:[%s7672_s1 + $0x228] sm:$0xff] }
  0x76   :  { %4062 = vmatmul.msk.f32.vlgmr.msra.gmra.mxu3 %vm241_vm1, %v4475_v56  ;;  %911 = vmatpush.msrb.mxu0 %v145_v19  ;;  %v1029_v19 = vld [vmem:[%s7672_s1 + $0x230] sm:$0xff] }
  0x77   :  { %931 = vmatpush.msrb.mxu1 %v146_v20  ;;  %951 = vmatpush.msrb.mxu2 %v147_v21  ;;  %v995_v20 = vld [vmem:[%s7672_s1 + $0x120] sm:$0xff]  ;;  %v996_v21 = vld [vmem:[%s7672_s1 + $0x128] sm:$0xff] }
  0x78   :  { %1281 = vmatpush.msrb.mxu3 %v1052_v22  ;;  %912 = vmatpush.msrb.mxu0 %v114_v23  ;;  %v997_v22 = vld [vmem:[%s7672_s1 + $0x130] sm:$0xff]  ;;  %v998_v23 = vld [vmem:[%s7672_s1 + $0x138] sm:$0xff] }
  0x79   :  { %932 = vmatpush.msrb.mxu1 %v115_v24  ;;  %952 = vmatpush.msrb.mxu2 %v116_v25  ;;  %v964_v24 = vld [vmem:[%s7672_s1 + $0x28] sm:$0xff]  ;;  %v965_v25 = vld [vmem:[%s7672_s1 + $0x30] sm:$0xff] }
  0x7a   :  { %1282 = vmatpush.msrb.mxu3 %v1021_v26  ;;  %4056 = vmatmul.msk.f32.vlgmr.msra.gmra.mxu0 %vm241_vm1, %v4475_v56  ;;  %v966_v26 = vld [vmem:[%s7672_s1 + $0x38] sm:$0xff] }
  0x7b   :  { %4058 = vmatmul.msk.f32.vlgmr.msra.gmra.mxu1 %vm241_vm1, %v4475_v56  ;;  %4060 = vmatmul.msk.f32.vlgmr.msra.gmra.mxu2 %vm241_vm1, %v4475_v56 }
  0x7c   :  { %913 = vmatpush.msrb.mxu0 %v83_v27  ;;  %933 = vmatpush.msrb.mxu1 %v84_v28  ;;  %v967_v27 = vld [vmem:[%s7672_s1 + $0x40] sm:$0xff]  ;;  %v1154_v28 = vld [vmem:[%s7672_s1 + $0x618] sm:$0x1] }
  0x7d   :  { %953 = vmatpush.msrb.mxu2 %v85_v29  ;;  %1283 = vmatpush.msrb.mxu3 %v990_v30  ;;  %v1155_v29 = vld [vmem:[%s7672_s1 + $0x620] sm:$0x1]  ;;  %v1156_v30 = vld [vmem:[%s7672_s1 + $0x628] sm:$0x1] }
  0x7e   :  { %914 = vmatpush.msrb.mxu0 %v52_v31  ;;  %934 = vmatpush.msrb.mxu1 %v53_v32  ;;  %v1157_v31 = vld [vmem:[%s7672_s1 + $0x630] sm:$0x1]  ;;  %v1123_v32 = vld [vmem:[%s7672_s1 + $0x520] sm:$0xff] }
  0x7f   :  { %954 = vmatpush.msrb.mxu2 %v54_v33  ;;  %1284 = vmatpush.msrb.mxu3 %v959_v34  ;;  %v1124_v33 = vld [vmem:[%s7672_s1 + $0x528] sm:$0xff]  ;;  %v1125_v34 = vld [vmem:[%s7672_s1 + $0x530] sm:$0xff] }
  0x80   :  { %4070 = vmatmul.msk.f32.vlgmr.msrb.gmra.mxu3 %vm241_vm1, %v4475_v56  ;;  %4071 = vmatpush.msk.msra.mxu0 %vm245_vm0, %v1146_v35  ;;  %v1092_v35 = vld [vmem:[%s7672_s1 + $0x428] sm:$0xff] }
  0x81   :  { %4073 = vmatpush.msk.msra.mxu1 %vm245_vm0, %v1147_v36  ;;  %4075 = vmatpush.msk.msra.mxu2 %vm245_vm0, %v1148_v37  ;;  %v1093_v36 = vld [vmem:[%s7672_s1 + $0x430] sm:$0xff]  ;;  %v1094_v37 = vld [vmem:[%s7672_s1 + $0x438] sm:$0xff] }
  0x82   :  { %4077 = vmatpush.msk.msra.mxu3 %vm245_vm0, %v1149_v38  ;;  %1299 = vmatpush.msra.mxu0 %v1115_v39  ;;  %v1095_v38 = vld [vmem:[%s7672_s1 + $0x440] sm:$0xff]  ;;  %v1061_v39 = vld [vmem:[%s7672_s1 + $0x330] sm:$0xff] }
  0x83   :  { %1319 = vmatpush.msra.mxu1 %v1116_v40  ;;  %1339 = vmatpush.msra.mxu2 %v1117_v41  ;;  %v1062_v40 = vld [vmem:[%s7672_s1 + $0x338] sm:$0xff]  ;;  %v1063_v41 = vld [vmem:[%s7672_s1 + $0x340] sm:$0xff] }
  0x84   :  { %1359 = vmatpush.msra.mxu3 %v1118_v42  ;;  %1300 = vmatpush.msra.mxu0 %v1084_v43  ;;  %v1064_v42 = vld [vmem:[%s7672_s1 + $0x348] sm:$0xff]  ;;  %v1030_v43 = vld [vmem:[%s7672_s1 + $0x238] sm:$0xff] }
  0x85   :  { %1320 = vmatpush.msra.mxu1 %v1085_v44  ;;  %1340 = vmatpush.msra.mxu2 %v1086_v45  ;;  %v1031_v44 = vld [vmem:[%s7672_s1 + $0x240] sm:$0xff]  ;;  %v1032_v45 = vld [vmem:[%s7672_s1 + $0x248] sm:$0xff] }
  0x86   :  { %1360 = vmatpush.msra.mxu3 %v1087_v46  ;;  %4064 = vmatmul.msk.f32.vlgmr.msrb.gmra.mxu0 %vm241_vm1, %v4475_v56  ;;  %v1033_v46 = vld [vmem:[%s7672_s1 + $0x250] sm:$0xff] }
  0x87   :  { %4066 = vmatmul.msk.f32.vlgmr.msrb.gmra.mxu1 %vm241_vm1, %v4475_v56  ;;  %4068 = vmatmul.msk.f32.vlgmr.msrb.gmra.mxu2 %vm241_vm1, %v4475_v56 }
  0x88   :  { %1301 = vmatpush.msra.mxu0 %v1053_v47  ;;  %1321 = vmatpush.msra.mxu1 %v1054_v48  ;;  %v999_v47 = vld [vmem:[%s7672_s1 + $0x140] sm:$0xff]  ;;  %v1000_v48 = vld [vmem:[%s7672_s1 + $0x148] sm:$0xff] }
  0x89   :  { %1341 = vmatpush.msra.mxu2 %v1055_v49  ;;  %1361 = vmatpush.msra.mxu3 %v1056_v50  ;;  %v1001_v49 = vld [vmem:[%s7672_s1 + $0x150] sm:$0xff]  ;;  %v1002_v50 = vld [vmem:[%s7672_s1 + $0x158] sm:$0xff] }
  0x8a   :  { %1302 = vmatpush.msra.mxu0 %v1022_v51  ;;  %1322 = vmatpush.msra.mxu1 %v1023_v52  ;;  %v968_v51 = vld [vmem:[%s7672_s1 + $0x48] sm:$0xff]  ;;  %v969_v52 = vld [vmem:[%s7672_s1 + $0x50] sm:$0xff] }
  0x8b   :  { %1342 = vmatpush.msra.mxu2 %v1024_v53  ;;  %1362 = vmatpush.msra.mxu3 %v1025_v54  ;;  %v970_v53 = vld [vmem:[%s7672_s1 + $0x58] sm:$0xff]  ;;  %v971_v54 = vld [vmem:[%s7672_s1 + $0x60] sm:$0xff] }
  0x8c   :  { %1303 = vmatpush.msra.mxu0 %v991_v55  ;;  %1323 = vmatpush.msra.mxu1 %v992_v57  ;;  %v1158_v55 = vld [vmem:[%s7672_s1 + $0x638] sm:$0x1]  ;;  %v1159_v57 = vld [vmem:[%s7672_s1 + $0x640] sm:$0x1] }
  0x8d   :  { %1343 = vmatpush.msra.mxu2 %v993_v58  ;;  %1363 = vmatpush.msra.mxu3 %v994_v59  ;;  %v5358_v58 = vld [vmem:[%s7671_s4] sm:$0xf]  ;;  %v1160_v59 = vld [vmem:[%s7672_s1 + $0x648] sm:$0x1] }
  0x8e   :  { %1304 = vmatpush.msra.mxu0 %v960_v60  ;;  %1324 = vmatpush.msra.mxu1 %v961_v61  ;;  %v1161_v60 = vld [vmem:[%s7672_s1 + $0x650] sm:$0x1]  ;;  %v1127_v61 = vld [vmem:[%s7672_s1 + $0x540] sm:$0xff] }
  0x8f   :  { %1344 = vmatpush.msra.mxu2 %v962_v62  ;;  %1364 = vmatpush.msra.mxu3 %v963_v63  ;;  %v1128_v62 = vld [vmem:[%s7672_s1 + $0x548] sm:$0xff]  ;;  %v1129_v63 = vld [vmem:[%s7672_s1 + $0x550] sm:$0xff] }
  0x90   :  { %4072 = vmatmul.msk.f32.vlgmr.msra.gmra.mxu0 %vm241_vm1, %v4475_v56  ;;  %4074 = vmatmul.msk.f32.vlgmr.msra.gmra.mxu1 %vm241_vm1, %v4475_v56 }
  0x91   :  { %4076 = vmatmul.msk.f32.vlgmr.msra.gmra.mxu2 %vm241_vm1, %v4475_v56  ;;  %4078 = vmatmul.msk.f32.vlgmr.msra.gmra.mxu3 %vm241_vm1, %v4475_v56 }
  0x92   :  { %4079 = vmatpush.msk.msrb.mxu0 %vm245_vm0, %v1150_v0  ;;  %4081 = vmatpush.msk.msrb.mxu1 %vm245_vm0, %v1151_v1  ;;  %v1130_v0 = vld [vmem:[%s7672_s1 + $0x558] sm:$0xff]  ;;  %v1096_v1 = vld [vmem:[%s7672_s1 + $0x448] sm:$0xff] }
  0x93   :  { %4083 = vmatpush.msk.msrb.mxu2 %vm245_vm0, %v1152_v2  ;;  %4085 = vmatpush.msk.msrb.mxu3 %vm245_vm0, %v1153_v3  ;;  %v1097_v2 = vld [vmem:[%s7672_s1 + $0x450] sm:$0xff]  ;;  %v1098_v3 = vld [vmem:[%s7672_s1 + $0x458] sm:$0xff] }
  0x94   :  { %1379 = vmatpush.msrb.mxu0 %v1119_v4  ;;  %1399 = vmatpush.msrb.mxu1 %v1120_v5  ;;  %v1099_v4 = vld [vmem:[%s7672_s1 + $0x460] sm:$0xff]  ;;  %v1065_v5 = vld [vmem:[%s7672_s1 + $0x350] sm:$0xff] }
  0x95   :  { %1419 = vmatpush.msrb.mxu2 %v1121_v6  ;;  %1439 = vmatpush.msrb.mxu3 %v1122_v7  ;;  %v1066_v6 = vld [vmem:[%s7672_s1 + $0x358] sm:$0xff]  ;;  %v1067_v7 = vld [vmem:[%s7672_s1 + $0x360] sm:$0xff] }
  0x96   :  { %1380 = vmatpush.msrb.mxu0 %v1088_v8  ;;  %1400 = vmatpush.msrb.mxu1 %v1089_v9  ;;  %v1068_v8 = vld [vmem:[%s7672_s1 + $0x368] sm:$0xff]  ;;  %v1034_v9 = vld [vmem:[%s7672_s1 + $0x258] sm:$0xff] }
  0x97   :  { %1420 = vmatpush.msrb.mxu2 %v1090_v10  ;;  %1440 = vmatpush.msrb.mxu3 %v1091_v11  ;;  %v1035_v10 = vld [vmem:[%s7672_s1 + $0x260] sm:$0xff]  ;;  %v1036_v11 = vld [vmem:[%s7672_s1 + $0x268] sm:$0xff] }
  0x98   :  { %1381 = vmatpush.msrb.mxu0 %v1057_v12  ;;  %1401 = vmatpush.msrb.mxu1 %v1058_v13  ;;  %v1037_v12 = vld [vmem:[%s7672_s1 + $0x270] sm:$0xff]  ;;  %v1003_v13 = vld [vmem:[%s7672_s1 + $0x160] sm:$0xff] }
  0x99   :  { %1421 = vmatpush.msrb.mxu2 %v1059_v14  ;;  %1441 = vmatpush.msrb.mxu3 %v1060_v15  ;;  %v1004_v14 = vld [vmem:[%s7672_s1 + $0x168] sm:$0xff]  ;;  %v1005_v15 = vld [vmem:[%s7672_s1 + $0x170] sm:$0xff] }
  0x9a   :  { %1382 = vmatpush.msrb.mxu0 %v1026_v16  ;;  %1402 = vmatpush.msrb.mxu1 %v1027_v17  ;;  %v1006_v16 = vld [vmem:[%s7672_s1 + $0x178] sm:$0xff]  ;;  %v972_v17 = vld [vmem:[%s7672_s1 + $0x68] sm:$0xff] }
  0x9b   :  { %1422 = vmatpush.msrb.mxu2 %v1028_v18  ;;  %1442 = vmatpush.msrb.mxu3 %v1029_v19  ;;  %v973_v18 = vld [vmem:[%s7672_s1 + $0x70] sm:$0xff]  ;;  %v974_v19 = vld [vmem:[%s7672_s1 + $0x78] sm:$0xff] }
  0x9c   :  { %1383 = vmatpush.msrb.mxu0 %v995_v20  ;;  %1403 = vmatpush.msrb.mxu1 %v996_v21  ;;  %v975_v20 = vld [vmem:[%s7672_s1 + $0x80] sm:$0xff]  ;;  %v1162_v21 = vld [vmem:[%s7672_s1 + $0x658] sm:$0x1] }
  0x9d   :  { %1423 = vmatpush.msrb.mxu2 %v997_v22  ;;  %1443 = vmatpush.msrb.mxu3 %v998_v23  ;;  %v1163_v22 = vld [vmem:[%s7672_s1 + $0x660] sm:$0x1]  ;;  %v1164_v23 = vld [vmem:[%s7672_s1 + $0x668] sm:$0x1] }
  0x9e   :  { %1384 = vmatpush.msrb.mxu0 %v964_v24  ;;  %1404 = vmatpush.msrb.mxu1 %v965_v25  ;;  %v1165_v24 = vld [vmem:[%s7672_s1 + $0x670] sm:$0x1]  ;;  %v1131_v25 = vld [vmem:[%s7672_s1 + $0x560] sm:$0xff] }
  0x9f   :  { %1424 = vmatpush.msrb.mxu2 %v966_v26  ;;  %1444 = vmatpush.msrb.mxu3 %v967_v27  ;;  %v1132_v26 = vld [vmem:[%s7672_s1 + $0x568] sm:$0xff]  ;;  %v1133_v27 = vld [vmem:[%s7672_s1 + $0x570] sm:$0xff] }
  0xa0   :  { %4080 = vmatmul.msk.f32.vlgmr.msrb.gmra.mxu0 %vm241_vm1, %v4475_v56  ;;  %4082 = vmatmul.msk.f32.vlgmr.msrb.gmra.mxu1 %vm241_vm1, %v4475_v56 }
  0xa1   :  { %4084 = vmatmul.msk.f32.vlgmr.msrb.gmra.mxu2 %vm241_vm1, %v4475_v56  ;;  %4086 = vmatmul.msk.f32.vlgmr.msrb.gmra.mxu3 %vm241_vm1, %v4475_v56  ;;  %v1126_v56 = vld [vmem:[%s7672_s1 + $0x538] sm:$0xff] }
  0xa2   :  { %4087 = vmatpush.msk.msra.mxu0 %vm245_vm0, %v1154_v28  ;;  %4089 = vmatpush.msk.msra.mxu1 %vm245_vm0, %v1155_v29  ;;  %v1134_v28 = vld [vmem:[%s7672_s1 + $0x578] sm:$0xff]  ;;  %v1100_v29 = vld [vmem:[%s7672_s1 + $0x468] sm:$0xff] }
  0xa3   :  { %4091 = vmatpush.msk.msra.mxu2 %vm245_vm0, %v1156_v30  ;;  %4093 = vmatpush.msk.msra.mxu3 %vm245_vm0, %v1157_v31  ;;  %v1101_v30 = vld [vmem:[%s7672_s1 + $0x470] sm:$0xff]  ;;  %v1102_v31 = vld [vmem:[%s7672_s1 + $0x478] sm:$0xff] }
  0xa4   :  { %1459 = vmatpush.msra.mxu0 %v1123_v32  ;;  %1479 = vmatpush.msra.mxu1 %v1124_v33  ;;  %v1103_v32 = vld [vmem:[%s7672_s1 + $0x480] sm:$0xff]  ;;  %v1069_v33 = vld [vmem:[%s7672_s1 + $0x370] sm:$0xff] }
  0xa5   :  { %1499 = vmatpush.msra.mxu2 %v1125_v34  ;;  %1519 = vmatpush.msra.mxu3 %v1126_v56  ;;  %v1070_v34 = vld [vmem:[%s7672_s1 + $0x378] sm:$0xff]  ;;  %v1071_v56 = vld [vmem:[%s7672_s1 + $0x380] sm:$0xff] }
  0xa6   :  { %1460 = vmatpush.msra.mxu0 %v1092_v35  ;;  %1480 = vmatpush.msra.mxu1 %v1093_v36  ;;  %v1072_v35 = vld [vmem:[%s7672_s1 + $0x388] sm:$0xff]  ;;  %v1038_v36 = vld [vmem:[%s7672_s1 + $0x278] sm:$0xff] }
  0xa7   :  { %1500 = vmatpush.msra.mxu2 %v1094_v37  ;;  %1520 = vmatpush.msra.mxu3 %v1095_v38  ;;  %v1039_v37 = vld [vmem:[%s7672_s1 + $0x280] sm:$0xff]  ;;  %v1040_v38 = vld [vmem:[%s7672_s1 + $0x288] sm:$0xff] }
  0xa8   :  { %1461 = vmatpush.msra.mxu0 %v1061_v39  ;;  %1481 = vmatpush.msra.mxu1 %v1062_v40  ;;  %v1041_v39 = vld [vmem:[%s7672_s1 + $0x290] sm:$0xff]  ;;  %v1007_v40 = vld [vmem:[%s7672_s1 + $0x180] sm:$0xff] }
  0xa9   :  { %1501 = vmatpush.msra.mxu2 %v1063_v41  ;;  %1521 = vmatpush.msra.mxu3 %v1064_v42  ;;  %v1008_v41 = vld [vmem:[%s7672_s1 + $0x188] sm:$0xff]  ;;  %v1009_v42 = vld [vmem:[%s7672_s1 + $0x190] sm:$0xff] }
  0xaa   :  { %1462 = vmatpush.msra.mxu0 %v1030_v43  ;;  %1482 = vmatpush.msra.mxu1 %v1031_v44  ;;  %v1010_v43 = vld [vmem:[%s7672_s1 + $0x198] sm:$0xff]  ;;  %v976_v44 = vld [vmem:[%s7672_s1 + $0x88] sm:$0xff] }
  0xab   :  { %1502 = vmatpush.msra.mxu2 %v1032_v45  ;;  %1522 = vmatpush.msra.mxu3 %v1033_v46  ;;  %v977_v45 = vld [vmem:[%s7672_s1 + $0x90] sm:$0xff]  ;;  %v978_v46 = vld [vmem:[%s7672_s1 + $0x98] sm:$0xff] }
  0xac   :  { %1463 = vmatpush.msra.mxu0 %v999_v47  ;;  %1483 = vmatpush.msra.mxu1 %v1000_v48  ;;  %v979_v47 = vld [vmem:[%s7672_s1 + $0xa0] sm:$0xff]  ;;  %v1166_v48 = vld [vmem:[%s7672_s1 + $0x678] sm:$0x1] }
  0xad   :  { %1503 = vmatpush.msra.mxu2 %v1001_v49  ;;  %1523 = vmatpush.msra.mxu3 %v1002_v50  ;;  %v1167_v49 = vld [vmem:[%s7672_s1 + $0x680] sm:$0x1]  ;;  %v1168_v50 = vld [vmem:[%s7672_s1 + $0x688] sm:$0x1] }
  0xae   :  { %1464 = vmatpush.msra.mxu0 %v968_v51  ;;  %1484 = vmatpush.msra.mxu1 %v969_v52  ;;  %v1169_v51 = vld [vmem:[%s7672_s1 + $0x690] sm:$0x1]  ;;  %v1135_v52 = vld [vmem:[%s7672_s1 + $0x580] sm:$0xff] }
  0xaf   :  { %1504 = vmatpush.msra.mxu2 %v970_v53  ;;  %1524 = vmatpush.msra.mxu3 %v971_v54  ;;  %v1136_v53 = vld [vmem:[%s7672_s1 + $0x588] sm:$0xff]  ;;  %v1137_v54 = vld [vmem:[%s7672_s1 + $0x590] sm:$0xff] }
  0xb0   :  { %4088 = vmatmul.msk.f32.vlgmr.msra.gmra.mxu0 %vm241_vm1, %v5358_v58  ;;  %4090 = vmatmul.msk.f32.vlgmr.msra.gmra.mxu1 %vm241_vm1, %v5358_v58 }
  0xb1   :  { %4092 = vmatmul.msk.f32.vlgmr.msra.gmra.mxu2 %vm241_vm1, %v5358_v58  ;;  %4094 = vmatmul.msk.f32.vlgmr.msra.gmra.mxu3 %vm241_vm1, %v5358_v58 }
  0xb2   :  { %4095 = vmatpush.msk.msrb.mxu0 %vm245_vm0, %v1158_v55  ;;  %4097 = vmatpush.msk.msrb.mxu1 %vm245_vm0, %v1159_v57  ;;  %v1138_v55 = vld [vmem:[%s7672_s1 + $0x598] sm:$0xff]  ;;  %v1104_v57 = vld [vmem:[%s7672_s1 + $0x488] sm:$0xff] }
  0xb3   :  { %4099 = vmatpush.msk.msrb.mxu2 %vm245_vm0, %v1160_v59  ;;  %4101 = vmatpush.msk.msrb.mxu3 %vm245_vm0, %v1161_v60  ;;  %v1105_v59 = vld [vmem:[%s7672_s1 + $0x490] sm:$0xff]  ;;  %v1106_v60 = vld [vmem:[%s7672_s1 + $0x498] sm:$0xff] }
  0xb4   :  { %1539 = vmatpush.msrb.mxu0 %v1127_v61  ;;  %1559 = vmatpush.msrb.mxu1 %v1128_v62  ;;  %v1107_v61 = vld [vmem:[%s7672_s1 + $0x4a0] sm:$0xff]  ;;  %v1073_v62 = vld [vmem:[%s7672_s1 + $0x390] sm:$0xff] }
  0xb5   :  { %1579 = vmatpush.msrb.mxu2 %v1129_v63  ;;  %1599 = vmatpush.msrb.mxu3 %v1130_v0  ;;  %v1074_v63 = vld [vmem:[%s7672_s1 + $0x398] sm:$0xff]  ;;  %v1075_v0 = vld [vmem:[%s7672_s1 + $0x3a0] sm:$0xff] }
  0xb6   :  { %1540 = vmatpush.msrb.mxu0 %v1096_v1  ;;  %1560 = vmatpush.msrb.mxu1 %v1097_v2  ;;  %v1076_v1 = vld [vmem:[%s7672_s1 + $0x3a8] sm:$0xff]  ;;  %v1042_v2 = vld [vmem:[%s7672_s1 + $0x298] sm:$0xff] }
  0xb7   :  { %1580 = vmatpush.msrb.mxu2 %v1098_v3  ;;  %1600 = vmatpush.msrb.mxu3 %v1099_v4  ;;  %v1043_v3 = vld [vmem:[%s7672_s1 + $0x2a0] sm:$0xff]  ;;  %v1044_v4 = vld [vmem:[%s7672_s1 + $0x2a8] sm:$0xff] }
  0xb8   :  { %1541 = vmatpush.msrb.mxu0 %v1065_v5  ;;  %1561 = vmatpush.msrb.mxu1 %v1066_v6  ;;  %v1045_v5 = vld [vmem:[%s7672_s1 + $0x2b0] sm:$0xff]  ;;  %v1011_v6 = vld [vmem:[%s7672_s1 + $0x1a0] sm:$0xff] }
  0xb9   :  { %1581 = vmatpush.msrb.mxu2 %v1067_v7  ;;  %1601 = vmatpush.msrb.mxu3 %v1068_v8  ;;  %v1012_v7 = vld [vmem:[%s7672_s1 + $0x1a8] sm:$0xff]  ;;  %v1013_v8 = vld [vmem:[%s7672_s1 + $0x1b0] sm:$0xff] }
  0xba   :  { %1542 = vmatpush.msrb.mxu0 %v1034_v9  ;;  %1562 = vmatpush.msrb.mxu1 %v1035_v10  ;;  %v1014_v9 = vld [vmem:[%s7672_s1 + $0x1b8] sm:$0xff]  ;;  %v980_v10 = vld [vmem:[%s7672_s1 + $0xa8] sm:$0xff] }
  0xbb   :  { %1582 = vmatpush.msrb.mxu2 %v1036_v11  ;;  %1602 = vmatpush.msrb.mxu3 %v1037_v12  ;;  %v981_v11 = vld [vmem:[%s7672_s1 + $0xb0] sm:$0xff]  ;;  %v982_v12 = vld [vmem:[%s7672_s1 + $0xb8] sm:$0xff] }
  0xbc   :  { %1543 = vmatpush.msrb.mxu0 %v1003_v13  ;;  %1563 = vmatpush.msrb.mxu1 %v1004_v14  ;;  %v983_v13 = vld [vmem:[%s7672_s1 + $0xc0] sm:$0xff]  ;;  %v1170_v14 = vld [vmem:[%s7672_s1 + $0x698] sm:$0x1] }
  0xbd   :  { %1583 = vmatpush.msrb.mxu2 %v1005_v15  ;;  %1603 = vmatpush.msrb.mxu3 %v1006_v16  ;;  %v1171_v15 = vld [vmem:[%s7672_s1 + $0x6a0] sm:$0x1]  ;;  %v1172_v16 = vld [vmem:[%s7672_s1 + $0x6a8] sm:$0x1] }
  0xbe   :  { %1544 = vmatpush.msrb.mxu0 %v972_v17  ;;  %1564 = vmatpush.msrb.mxu1 %v973_v18  ;;  %v1173_v17 = vld [vmem:[%s7672_s1 + $0x6b0] sm:$0x1]  ;;  %v1139_v18 = vld [vmem:[%s7672_s1 + $0x5a0] sm:$0xff] }
  0xbf   :  { %1584 = vmatpush.msrb.mxu2 %v974_v19  ;;  %1604 = vmatpush.msrb.mxu3 %v975_v20  ;;  %v1140_v19 = vld [vmem:[%s7672_s1 + $0x5a8] sm:$0xff]  ;;  %v1141_v20 = vld [vmem:[%s7672_s1 + $0x5b0] sm:$0xff] }
  0xc0   :  { %4096 = vmatmul.msk.f32.vlgmr.msrb.gmra.mxu0 %vm241_vm1, %v5358_v58  ;;  %4098 = vmatmul.msk.f32.vlgmr.msrb.gmra.mxu1 %vm241_vm1, %v5358_v58 }
  0xc1   :  { %4100 = vmatmul.msk.f32.vlgmr.msrb.gmra.mxu2 %vm241_vm1, %v5358_v58  ;;  %4102 = vmatmul.msk.f32.vlgmr.msrb.gmra.mxu3 %vm241_vm1, %v5358_v58 }
  0xc2   :  { %4103 = vmatpush.msk.msra.mxu0 %vm245_vm0, %v1162_v21  ;;  %4105 = vmatpush.msk.msra.mxu1 %vm245_vm0, %v1163_v22  ;;  %v1142_v21 = vld [vmem:[%s7672_s1 + $0x5b8] sm:$0xff]  ;;  %v1108_v22 = vld [vmem:[%s7672_s1 + $0x4a8] sm:$0xff] }
  0xc3   :  { %4107 = vmatpush.msk.msra.mxu2 %vm245_vm0, %v1164_v23  ;;  %4109 = vmatpush.msk.msra.mxu3 %vm245_vm0, %v1165_v24  ;;  %v1109_v23 = vld [vmem:[%s7672_s1 + $0x4b0] sm:$0xff]  ;;  %v1110_v24 = vld [vmem:[%s7672_s1 + $0x4b8] sm:$0xff] }
  0xc4   :  { %1619 = vmatpush.msra.mxu0 %v1131_v25  ;;  %1639 = vmatpush.msra.mxu1 %v1132_v26  ;;  %v1111_v25 = vld [vmem:[%s7672_s1 + $0x4c0] sm:$0xff]  ;;  %v1077_v26 = vld [vmem:[%s7672_s1 + $0x3b0] sm:$0xff] }
  0xc5   :  { %1659 = vmatpush.msra.mxu2 %v1133_v27  ;;  %1679 = vmatpush.msra.mxu3 %v1134_v28  ;;  %v1078_v27 = vld [vmem:[%s7672_s1 + $0x3b8] sm:$0xff]  ;;  %v1079_v28 = vld [vmem:[%s7672_s1 + $0x3c0] sm:$0xff] }
  0xc6   :  { %1620 = vmatpush.msra.mxu0 %v1100_v29  ;;  %1640 = vmatpush.msra.mxu1 %v1101_v30  ;;  %v1080_v29 = vld [vmem:[%s7672_s1 + $0x3c8] sm:$0xff]  ;;  %v1046_v30 = vld [vmem:[%s7672_s1 + $0x2b8] sm:$0xff] }
  0xc7   :  { %1660 = vmatpush.msra.mxu2 %v1102_v31  ;;  %1680 = vmatpush.msra.mxu3 %v1103_v32  ;;  %v1047_v31 = vld [vmem:[%s7672_s1 + $0x2c0] sm:$0xff]  ;;  %v1048_v32 = vld [vmem:[%s7672_s1 + $0x2c8] sm:$0xff] }
  0xc8   :  { %1621 = vmatpush.msra.mxu0 %v1069_v33  ;;  %1641 = vmatpush.msra.mxu1 %v1070_v34  ;;  %v1049_v33 = vld [vmem:[%s7672_s1 + $0x2d0] sm:$0xff]  ;;  %v1015_v34 = vld [vmem:[%s7672_s1 + $0x1c0] sm:$0xff] }
  0xc9   :  { %1661 = vmatpush.msra.mxu2 %v1071_v56  ;;  %1681 = vmatpush.msra.mxu3 %v1072_v35  ;;  %v1016_v56 = vld [vmem:[%s7672_s1 + $0x1c8] sm:$0xff]  ;;  %v1017_v35 = vld [vmem:[%s7672_s1 + $0x1d0] sm:$0xff] }
  0xca   :  { %1622 = vmatpush.msra.mxu0 %v1038_v36  ;;  %1642 = vmatpush.msra.mxu1 %v1039_v37  ;;  %v1018_v36 = vld [vmem:[%s7672_s1 + $0x1d8] sm:$0xff]  ;;  %v984_v37 = vld [vmem:[%s7672_s1 + $0xc8] sm:$0xff] }
  0xcb   :  { %1662 = vmatpush.msra.mxu2 %v1040_v38  ;;  %1682 = vmatpush.msra.mxu3 %v1041_v39  ;;  %v985_v38 = vld [vmem:[%s7672_s1 + $0xd0] sm:$0xff]  ;;  %v986_v39 = vld [vmem:[%s7672_s1 + $0xd8] sm:$0xff] }
  0xcc   :  { %1623 = vmatpush.msra.mxu0 %v1007_v40  ;;  %1643 = vmatpush.msra.mxu1 %v1008_v41  ;;  %v987_v40 = vld [vmem:[%s7672_s1 + $0xe0] sm:$0xff]  ;;  %v1174_v41 = vld [vmem:[%s7672_s1 + $0x6b8] sm:$0x1] }
  0xcd   :  { %1663 = vmatpush.msra.mxu2 %v1009_v42  ;;  %1683 = vmatpush.msra.mxu3 %v1010_v43  ;;  %v1175_v42 = vld [vmem:[%s7672_s1 + $0x6c0] sm:$0x1]  ;;  %v2075_v43 = vld [vmem:[%s7673_s2 + $0x5d0] sm:$0x1] }
  0xce   :  { %1624 = vmatpush.msra.mxu0 %v976_v44  ;;  %1644 = vmatpush.msra.mxu1 %v977_v45  ;;  %v2076_v44 = vld [vmem:[%s7673_s2 + $0x5d8] sm:$0x1]  ;;  %v1143_v45 = vld [vmem:[%s7672_s1 + $0x5c0] sm:$0xff] }
  0xcf   :  { %1664 = vmatpush.msra.mxu2 %v978_v46  ;;  %1684 = vmatpush.msra.mxu3 %v979_v47  ;;  %v1144_v46 = vld [vmem:[%s7672_s1 + $0x5c8] sm:$0xff]  ;;  %v2044_v47 = vld [vmem:[%s7673_s2 + $0x4d8] sm:$0xff] }
  0xd0   :  { %4104 = vmatmul.msk.f32.vlgmr.msra.gmra.mxu0 %vm241_vm1, %v5358_v58  ;;  %4106 = vmatmul.msk.f32.vlgmr.msra.gmra.mxu1 %vm241_vm1, %v5358_v58 }
  0xd1   :  { %4108 = vmatmul.msk.f32.vlgmr.msra.gmra.mxu2 %vm241_vm1, %v5358_v58  ;;  %4110 = vmatmul.msk.f32.vlgmr.msra.gmra.mxu3 %vm241_vm1, %v5358_v58 }
  0xd2   :  { %4111 = vmatpush.msk.msrb.mxu0 %vm245_vm0, %v1166_v48  ;;  %4113 = vmatpush.msk.msrb.mxu1 %vm245_vm0, %v1167_v49  ;;  %v2045_v48 = vld [vmem:[%s7673_s2 + $0x4e0] sm:$0xff]  ;;  %v1112_v49 = vld [vmem:[%s7672_s1 + $0x4c8] sm:$0xff] }
  0xd3   :  { %4115 = vmatpush.msk.msrb.mxu2 %vm245_vm0, %v1168_v50  ;;  %4117 = vmatpush.msk.msrb.mxu3 %vm245_vm0, %v1169_v51  ;;  %v1113_v50 = vld [vmem:[%s7672_s1 + $0x4d0] sm:$0xff]  ;;  %v2013_v51 = vld [vmem:[%s7673_s2 + $0x3e0] sm:$0xff] }
  0xd4   :  { %1699 = vmatpush.msrb.mxu0 %v1135_v52  ;;  %1719 = vmatpush.msrb.mxu1 %v1136_v53  ;;  %v2014_v52 = vld [vmem:[%s7673_s2 + $0x3e8] sm:$0xff]  ;;  %v1081_v53 = vld [vmem:[%s7672_s1 + $0x3d0] sm:$0xff] }
  0xd5   :  { %1739 = vmatpush.msrb.mxu2 %v1137_v54  ;;  %1759 = vmatpush.msrb.mxu3 %v1138_v55  ;;  %v1082_v54 = vld [vmem:[%s7672_s1 + $0x3d8] sm:$0xff]  ;;  %v1982_v55 = vld [vmem:[%s7673_s2 + $0x2e8] sm:$0xff] }
  0xd6   :  { %1700 = vmatpush.msrb.mxu0 %v1104_v57  ;;  %1720 = vmatpush.msrb.mxu1 %v1105_v59  ;;  %v1983_v57 = vld [vmem:[%s7673_s2 + $0x2f0] sm:$0xff]  ;;  %v1050_v59 = vld [vmem:[%s7672_s1 + $0x2d8] sm:$0xff] }
  0xd7   :  { %1740 = vmatpush.msrb.mxu2 %v1106_v60  ;;  %1760 = vmatpush.msrb.mxu3 %v1107_v61  ;;  %v1051_v60 = vld [vmem:[%s7672_s1 + $0x2e0] sm:$0xff]  ;;  %v1951_v61 = vld [vmem:[%s7673_s2 + $0x1f0] sm:$0xff] }
  0xd8   :  { %1701 = vmatpush.msrb.mxu0 %v1073_v62  ;;  %1721 = vmatpush.msrb.mxu1 %v1074_v63  ;;  %v1952_v62 = vld [vmem:[%s7673_s2 + $0x1f8] sm:$0xff]  ;;  %v1019_v63 = vld [vmem:[%s7672_s1 + $0x1e0] sm:$0xff] }
  0xd9   :  { %1741 = vmatpush.msrb.mxu2 %v1075_v0  ;;  %1761 = vmatpush.msrb.mxu3 %v1076_v1  ;;  %v1020_v0 = vld [vmem:[%s7672_s1 + $0x1e8] sm:$0xff]  ;;  %v1920_v1 = vld [vmem:[%s7673_s2 + $0xf8] sm:$0xff] }
  0xda   :  { %1702 = vmatpush.msrb.mxu0 %v1042_v2  ;;  %1722 = vmatpush.msrb.mxu1 %v1043_v3  ;;  %v1921_v2 = vld [vmem:[%s7673_s2 + $0x100] sm:$0xff]  ;;  %v988_v3 = vld [vmem:[%s7672_s1 + $0xe8] sm:$0xff] }
  0xdb   :  { %1742 = vmatpush.msrb.mxu2 %v1044_v4  ;;  %1762 = vmatpush.msrb.mxu3 %v1045_v5  ;;  %v989_v4 = vld [vmem:[%s7672_s1 + $0xf0] sm:$0xff]  ;;  %v1889_v5 = vld [vmem:[%s7673_s2] sm:$0xff] }
  0xdc   :  { %1703 = vmatpush.msrb.mxu0 %v1011_v6  ;;  %1723 = vmatpush.msrb.mxu1 %v1012_v7  ;;  %v1890_v6 = vld [vmem:[%s7673_s2 + $0x8] sm:$0xff]  ;;  %v2077_v7 = vld [vmem:[%s7673_s2 + $0x5e0] sm:$0x1] }
  0xdd   :  { %1743 = vmatpush.msrb.mxu2 %v1013_v8  ;;  %1763 = vmatpush.msrb.mxu3 %v1014_v9  ;;  %v2078_v8 = vld [vmem:[%s7673_s2 + $0x5e8] sm:$0x1]  ;;  %v2079_v9 = vld [vmem:[%s7673_s2 + $0x5f0] sm:$0x1] }
  0xde   :  { %1704 = vmatpush.msrb.mxu0 %v980_v10  ;;  %1724 = vmatpush.msrb.mxu1 %v981_v11  ;;  %v2080_v10 = vld [vmem:[%s7673_s2 + $0x5f8] sm:$0x1]  ;;  %v2046_v11 = vld [vmem:[%s7673_s2 + $0x4e8] sm:$0xff] }
  0xdf   :  { %1744 = vmatpush.msrb.mxu2 %v982_v12  ;;  %1764 = vmatpush.msrb.mxu3 %v983_v13  ;;  %v2047_v12 = vld [vmem:[%s7673_s2 + $0x4f0] sm:$0xff]  ;;  %v2048_v13 = vld [vmem:[%s7673_s2 + $0x4f8] sm:$0xff] }
  0xe0   :  { %4112 = vmatmul.msk.f32.vlgmr.msrb.gmra.mxu0 %vm241_vm1, %v5358_v58  ;;  %4114 = vmatmul.msk.f32.vlgmr.msrb.gmra.mxu1 %vm241_vm1, %v5358_v58 }
  0xe1   :  { %4116 = vmatmul.msk.f32.vlgmr.msrb.gmra.mxu2 %vm241_vm1, %v5358_v58  ;;  %4118 = vmatmul.msk.f32.vlgmr.msrb.gmra.mxu3 %vm241_vm1, %v5358_v58 }
  0xe2   :  { %4119 = vmatpush.msk.msra.mxu0 %vm245_vm0, %v1170_v14  ;;  %4121 = vmatpush.msk.msra.mxu1 %vm245_vm0, %v1171_v15  ;;  %v2049_v14 = vld [vmem:[%s7673_s2 + $0x500] sm:$0xff]  ;;  %v2015_v15 = vld [vmem:[%s7673_s2 + $0x3f0] sm:$0xff] }
  0xe3   :  { %4123 = vmatpush.msk.msra.mxu2 %vm245_vm0, %v1172_v16  ;;  %4125 = vmatpush.msk.msra.mxu3 %vm245_vm0, %v1173_v17  ;;  %v2016_v16 = vld [vmem:[%s7673_s2 + $0x3f8] sm:$0xff]  ;;  %v2017_v17 = vld [vmem:[%s7673_s2 + $0x400] sm:$0xff] }
  0xe4   :  { %1779 = vmatpush.msra.mxu0 %v1139_v18  ;;  %1799 = vmatpush.msra.mxu1 %v1140_v19  ;;  %v2018_v18 = vld [vmem:[%s7673_s2 + $0x408] sm:$0xff]  ;;  %v1984_v19 = vld [vmem:[%s7673_s2 + $0x2f8] sm:$0xff] }
  0xe5   :  { %1819 = vmatpush.msra.mxu2 %v1141_v20  ;;  %1839 = vmatpush.msra.mxu3 %v1142_v21  ;;  %v1985_v20 = vld [vmem:[%s7673_s2 + $0x300] sm:$0xff]  ;;  %v1986_v21 = vld [vmem:[%s7673_s2 + $0x308] sm:$0xff] }
  0xe6   :  { %1780 = vmatpush.msra.mxu0 %v1108_v22  ;;  %1800 = vmatpush.msra.mxu1 %v1109_v23  ;;  %v1987_v22 = vld [vmem:[%s7673_s2 + $0x310] sm:$0xff]  ;;  %v1953_v23 = vld [vmem:[%s7673_s2 + $0x200] sm:$0xff] }
  0xe7   :  { %1820 = vmatpush.msra.mxu2 %v1110_v24  ;;  %1840 = vmatpush.msra.mxu3 %v1111_v25  ;;  %v1954_v24 = vld [vmem:[%s7673_s2 + $0x208] sm:$0xff]  ;;  %v1955_v25 = vld [vmem:[%s7673_s2 + $0x210] sm:$0xff] }
  0xe8   :  { %1781 = vmatpush.msra.mxu0 %v1077_v26  ;;  %1801 = vmatpush.msra.mxu1 %v1078_v27  ;;  %v1956_v26 = vld [vmem:[%s7673_s2 + $0x218] sm:$0xff]  ;;  %v1922_v27 = vld [vmem:[%s7673_s2 + $0x108] sm:$0xff] }
  0xe9   :  { %1821 = vmatpush.msra.mxu2 %v1079_v28  ;;  %1841 = vmatpush.msra.mxu3 %v1080_v29  ;;  %v1923_v28 = vld [vmem:[%s7673_s2 + $0x110] sm:$0xff]  ;;  %v1924_v29 = vld [vmem:[%s7673_s2 + $0x118] sm:$0xff] }
  0xea   :  { %1782 = vmatpush.msra.mxu0 %v1046_v30  ;;  %1802 = vmatpush.msra.mxu1 %v1047_v31  ;;  %v1925_v30 = vld [vmem:[%s7673_s2 + $0x120] sm:$0xff]  ;;  %v1891_v31 = vld [vmem:[%s7673_s2 + $0x10] sm:$0xff] }
  0xeb   :  { %1822 = vmatpush.msra.mxu2 %v1048_v32  ;;  %1842 = vmatpush.msra.mxu3 %v1049_v33  ;;  %v1892_v32 = vld [vmem:[%s7673_s2 + $0x18] sm:$0xff]  ;;  %v1893_v33 = vld [vmem:[%s7673_s2 + $0x20] sm:$0xff] }
  0xec   :  { %1783 = vmatpush.msra.mxu0 %v1015_v34  ;;  %1803 = vmatpush.msra.mxu1 %v1016_v56  ;;  %v1894_v34 = vld [vmem:[%s7673_s2 + $0x28] sm:$0xff]  ;;  %v2081_v56 = vld [vmem:[%s7673_s2 + $0x600] sm:$0x1] }
  0xed   :  { %1823 = vmatpush.msra.mxu2 %v1017_v35  ;;  %1843 = vmatpush.msra.mxu3 %v1018_v36  ;;  %v2082_v35 = vld [vmem:[%s7673_s2 + $0x608] sm:$0x1]  ;;  %v2083_v36 = vld [vmem:[%s7673_s2 + $0x610] sm:$0x1] }
  0xee   :  { %1784 = vmatpush.msra.mxu0 %v984_v37  ;;  %1804 = vmatpush.msra.mxu1 %v985_v38  ;;  %v2084_v37 = vld [vmem:[%s7673_s2 + $0x618] sm:$0x1]  ;;  %v2050_v38 = vld [vmem:[%s7673_s2 + $0x508] sm:$0xff] }
  0xef   :  { %1824 = vmatpush.msra.mxu2 %v986_v39  ;;  %1844 = vmatpush.msra.mxu3 %v987_v40  ;;  %v2051_v39 = vld [vmem:[%s7673_s2 + $0x510] sm:$0xff]  ;;  %v2052_v40 = vld [vmem:[%s7673_s2 + $0x518] sm:$0xff] }
  0xf0   :  { %4120 = vmatmul.msk.f32.vlgmr.msra.gmra.mxu0 %vm241_vm1, %v5358_v58  ;;  %4122 = vmatmul.msk.f32.vlgmr.msra.gmra.mxu1 %vm241_vm1, %v5358_v58 }
  0xf1   :  { %4124 = vmatmul.msk.f32.vlgmr.msra.gmra.mxu2 %vm241_vm1, %v5358_v58  ;;  %4126 = vmatmul.msk.f32.vlgmr.msra.gmra.mxu3 %vm241_vm1, %v5358_v58 }
  0xf2   :  { %4127 = vmatpush.msk.msrb.mxu0 %vm245_vm0, %v1174_v41  ;;  %4129 = vmatpush.msk.msrb.mxu1 %vm245_vm0, %v1175_v42  ;;  %v2053_v41 = vld [vmem:[%s7673_s2 + $0x520] sm:$0xff]  ;;  %v2019_v42 = vld [vmem:[%s7673_s2 + $0x410] sm:$0xff] }
  0xf3   :  { %4131 = vmatpush.msk.msrb.mxu2 %vm245_vm0, %v2075_v43  ;;  %4133 = vmatpush.msk.msrb.mxu3 %vm245_vm0, %v2076_v44  ;;  %v2020_v43 = vld [vmem:[%s7673_s2 + $0x418] sm:$0xff]  ;;  %v2021_v44 = vld [vmem:[%s7673_s2 + $0x420] sm:$0xff] }
  0xf4   :  { %1859 = vmatpush.msrb.mxu0 %v1143_v45  ;;  %1879 = vmatpush.msrb.mxu1 %v1144_v46  ;;  %v2022_v45 = vld [vmem:[%s7673_s2 + $0x428] sm:$0xff]  ;;  %v1988_v46 = vld [vmem:[%s7673_s2 + $0x318] sm:$0xff] }
  0xf5   :  { %2209 = vmatpush.msrb.mxu2 %v2044_v47  ;;  %2229 = vmatpush.msrb.mxu3 %v2045_v48  ;;  %v1989_v47 = vld [vmem:[%s7673_s2 + $0x320] sm:$0xff]  ;;  %v1990_v48 = vld [vmem:[%s7673_s2 + $0x328] sm:$0xff] }
  0xf6   :  { %1860 = vmatpush.msrb.mxu0 %v1112_v49  ;;  %1880 = vmatpush.msrb.mxu1 %v1113_v50  ;;  %v1991_v49 = vld [vmem:[%s7673_s2 + $0x330] sm:$0xff]  ;;  %v1957_v50 = vld [vmem:[%s7673_s2 + $0x220] sm:$0xff] }
  0xf7   :  { %2210 = vmatpush.msrb.mxu2 %v2013_v51  ;;  %2230 = vmatpush.msrb.mxu3 %v2014_v52  ;;  %v1958_v51 = vld [vmem:[%s7673_s2 + $0x228] sm:$0xff]  ;;  %v1959_v52 = vld [vmem:[%s7673_s2 + $0x230] sm:$0xff] }
  0xf8   :  { %1861 = vmatpush.msrb.mxu0 %v1081_v53  ;;  %1881 = vmatpush.msrb.mxu1 %v1082_v54  ;;  %v1960_v53 = vld [vmem:[%s7673_s2 + $0x238] sm:$0xff]  ;;  %v1926_v54 = vld [vmem:[%s7673_s2 + $0x128] sm:$0xff] }
  0xf9   :  { %2211 = vmatpush.msrb.mxu2 %v1982_v55  ;;  %2231 = vmatpush.msrb.mxu3 %v1983_v57  ;;  %v1927_v55 = vld [vmem:[%s7673_s2 + $0x130] sm:$0xff]  ;;  %v1928_v57 = vld [vmem:[%s7673_s2 + $0x138] sm:$0xff] }
  0xfa   :  { %1862 = vmatpush.msrb.mxu0 %v1050_v59  ;;  %1882 = vmatpush.msrb.mxu1 %v1051_v60  ;;  %v1929_v59 = vld [vmem:[%s7673_s2 + $0x140] sm:$0xff]  ;;  %v1895_v60 = vld [vmem:[%s7673_s2 + $0x30] sm:$0xff] }
  0xfb   :  { %2212 = vmatpush.msrb.mxu2 %v1951_v61  ;;  %2232 = vmatpush.msrb.mxu3 %v1952_v62  ;;  %v1896_v61 = vld [vmem:[%s7673_s2 + $0x38] sm:$0xff]  ;;  %v1897_v62 = vld [vmem:[%s7673_s2 + $0x40] sm:$0xff] }
  0xfc   :  { %1863 = vmatpush.msrb.mxu0 %v1019_v63  ;;  %1883 = vmatpush.msrb.mxu1 %v1020_v0  ;;  %v1898_v63 = vld [vmem:[%s7673_s2 + $0x48] sm:$0xff]  ;;  %v2085_v0 = vld [vmem:[%s7673_s2 + $0x620] sm:$0x1] }
  0xfd   :  { %2213 = vmatpush.msrb.mxu2 %v1920_v1  ;;  %2233 = vmatpush.msrb.mxu3 %v1921_v2  ;;  %v2086_v1 = vld [vmem:[%s7673_s2 + $0x628] sm:$0x1]  ;;  %v2087_v2 = vld [vmem:[%s7673_s2 + $0x630] sm:$0x1] }
  0xfe   :  { %1864 = vmatpush.msrb.mxu0 %v988_v3  ;;  %1884 = vmatpush.msrb.mxu1 %v989_v4  ;;  %v2088_v3 = vld [vmem:[%s7673_s2 + $0x638] sm:$0x1]  ;;  %v2054_v4 = vld [vmem:[%s7673_s2 + $0x528] sm:$0xff] }
  0xff   :  { %2214 = vmatpush.msrb.mxu2 %v1889_v5  ;;  %2234 = vmatpush.msrb.mxu3 %v1890_v6  ;;  %v2055_v5 = vld [vmem:[%s7673_s2 + $0x530] sm:$0xff]  ;;  %v2056_v6 = vld [vmem:[%s7673_s2 + $0x538] sm:$0xff] }
 0x100   :  { %4128 = vmatmul.msk.f32.vlgmr.msrb.gmra.mxu0 %vm241_vm1, %v5358_v58  ;;  %4130 = vmatmul.msk.f32.vlgmr.msrb.gmra.mxu1 %vm241_vm1, %v5358_v58 }
 0x101   :  { %4135 = vmatpush.msk.msra.mxu0 %vm245_vm0, %v2077_v7  ;;  %4137 = vmatpush.msk.msra.mxu1 %vm245_vm0, %v2078_v8  ;;  %v2057_v7 = vld [vmem:[%s7673_s2 + $0x540] sm:$0xff]  ;;  %v2023_v8 = vld [vmem:[%s7673_s2 + $0x430] sm:$0xff] }
 0x102   :  { %4139 = vmatpush.msk.msra.mxu2 %vm245_vm0, %v2079_v9  ;;  %4141 = vmatpush.msk.msra.mxu3 %vm245_vm0, %v2080_v10  ;;  %v2024_v9 = vld [vmem:[%s7673_s2 + $0x438] sm:$0xff]  ;;  %v2025_v10 = vld [vmem:[%s7673_s2 + $0x440] sm:$0xff] }
 0x103   :  { %2249 = vmatpush.msra.mxu0 %v2046_v11  ;;  %2269 = vmatpush.msra.mxu1 %v2047_v12  ;;  %v2026_v11 = vld [vmem:[%s7673_s2 + $0x448] sm:$0xff]  ;;  %v1992_v12 = vld [vmem:[%s7673_s2 + $0x338] sm:$0xff] }
 0x104   :  { %2289 = vmatpush.msra.mxu2 %v2048_v13  ;;  %2309 = vmatpush.msra.mxu3 %v2049_v14  ;;  %v1993_v13 = vld [vmem:[%s7673_s2 + $0x340] sm:$0xff]  ;;  %v1994_v14 = vld [vmem:[%s7673_s2 + $0x348] sm:$0xff] }
 0x105   :  { %2250 = vmatpush.msra.mxu0 %v2015_v15  ;;  %2270 = vmatpush.msra.mxu1 %v2016_v16  ;;  %v1995_v15 = vld [vmem:[%s7673_s2 + $0x350] sm:$0xff]  ;;  %v1961_v16 = vld [vmem:[%s7673_s2 + $0x240] sm:$0xff] }
 0x106   :  { %2290 = vmatpush.msra.mxu2 %v2017_v17  ;;  %2310 = vmatpush.msra.mxu3 %v2018_v18  ;;  %v1962_v17 = vld [vmem:[%s7673_s2 + $0x248] sm:$0xff]  ;;  %v1963_v18 = vld [vmem:[%s7673_s2 + $0x250] sm:$0xff] }
 0x107   :  { %2251 = vmatpush.msra.mxu0 %v1984_v19  ;;  %2271 = vmatpush.msra.mxu1 %v1985_v20  ;;  %v1964_v19 = vld [vmem:[%s7673_s2 + $0x258] sm:$0xff]  ;;  %v1930_v20 = vld [vmem:[%s7673_s2 + $0x148] sm:$0xff] }
 0x108   :  { %2291 = vmatpush.msra.mxu2 %v1986_v21  ;;  %2311 = vmatpush.msra.mxu3 %v1987_v22  ;;  %v1931_v21 = vld [vmem:[%s7673_s2 + $0x150] sm:$0xff]  ;;  %v1932_v22 = vld [vmem:[%s7673_s2 + $0x158] sm:$0xff] }
 0x109   :  { %2252 = vmatpush.msra.mxu0 %v1953_v23  ;;  %2272 = vmatpush.msra.mxu1 %v1954_v24  ;;  %v1933_v23 = vld [vmem:[%s7673_s2 + $0x160] sm:$0xff]  ;;  %v1899_v24 = vld [vmem:[%s7673_s2 + $0x50] sm:$0xff] }
 0x10a   :  { %2292 = vmatpush.msra.mxu2 %v1955_v25  ;;  %2312 = vmatpush.msra.mxu3 %v1956_v26  ;;  %v1900_v25 = vld [vmem:[%s7673_s2 + $0x58] sm:$0xff]  ;;  %v1901_v26 = vld [vmem:[%s7673_s2 + $0x60] sm:$0xff] }
 0x10b   :  { %2253 = vmatpush.msra.mxu0 %v1922_v27  ;;  %2273 = vmatpush.msra.mxu1 %v1923_v28  ;;  %v1902_v27 = vld [vmem:[%s7673_s2 + $0x68] sm:$0xff]  ;;  %v2089_v28 = vld [vmem:[%s7673_s2 + $0x640] sm:$0x1] }
 0x10c   :  { %2293 = vmatpush.msra.mxu2 %v1924_v29  ;;  %2313 = vmatpush.msra.mxu3 %v1925_v30  ;;  %v2090_v29 = vld [vmem:[%s7673_s2 + $0x648] sm:$0x1]  ;;  %v2091_v30 = vld [vmem:[%s7673_s2 + $0x650] sm:$0x1] }
 0x10d   :  { %2254 = vmatpush.msra.mxu0 %v1891_v31  ;;  %2274 = vmatpush.msra.mxu1 %v1892_v32  ;;  %v2092_v31 = vld [vmem:[%s7673_s2 + $0x658] sm:$0x1]  ;;  %v2058_v32 = vld [vmem:[%s7673_s2 + $0x548] sm:$0xff] }
 0x10e   :  { %2294 = vmatpush.msra.mxu2 %v1893_v33  ;;  %2314 = vmatpush.msra.mxu3 %v1894_v34  ;;  %v2059_v33 = vld [vmem:[%s7673_s2 + $0x550] sm:$0xff]  ;;  %v2060_v34 = vld [vmem:[%s7673_s2 + $0x558] sm:$0xff] }
 0x10f   :  { %4132 = vmatmul.msk.f32.vlgmr.msrb.gmra.mxu2 %vm241_vm1, %v5358_v58  ;;  %4134 = vmatmul.msk.f32.vlgmr.msrb.gmra.mxu3 %vm241_vm1, %v5358_v58 }
 0x110   :  { %4143 = vmatpush.msk.msrb.mxu0 %vm245_vm0, %v2081_v56  ;;  %4145 = vmatpush.msk.msrb.mxu1 %vm245_vm0, %v2082_v35  ;;  %v2027_v56 = vld [vmem:[%s7673_s2 + $0x450] sm:$0xff]  ;;  %v2028_v35 = vld [vmem:[%s7673_s2 + $0x458] sm:$0xff] }
 0x111   :  { %4147 = vmatpush.msk.msrb.mxu2 %vm245_vm0, %v2083_v36  ;;  %4149 = vmatpush.msk.msrb.mxu3 %vm245_vm0, %v2084_v37  ;;  %v2029_v36 = vld [vmem:[%s7673_s2 + $0x460] sm:$0xff]  ;;  %v2030_v37 = vld [vmem:[%s7673_s2 + $0x468] sm:$0xff] }
 0x112   :  { %2329 = vmatpush.msrb.mxu0 %v2050_v38  ;;  %2349 = vmatpush.msrb.mxu1 %v2051_v39  ;;  %v1996_v38 = vld [vmem:[%s7673_s2 + $0x358] sm:$0xff]  ;;  %v1997_v39 = vld [vmem:[%s7673_s2 + $0x360] sm:$0xff] }
 0x113   :  { %2369 = vmatpush.msrb.mxu2 %v2052_v40  ;;  %2389 = vmatpush.msrb.mxu3 %v2053_v41  ;;  %v1998_v40 = vld [vmem:[%s7673_s2 + $0x368] sm:$0xff]  ;;  %v1999_v41 = vld [vmem:[%s7673_s2 + $0x370] sm:$0xff] }
 0x114   :  { %2330 = vmatpush.msrb.mxu0 %v2019_v42  ;;  %2350 = vmatpush.msrb.mxu1 %v2020_v43  ;;  %v6174_v42 = vpop.f32.mrf.mxu1  ;;  %v1965_v43 = vld [vmem:[%s7673_s2 + $0x260] sm:$0xff] }
 0x115   :  { %2370 = vmatpush.msrb.mxu2 %v2021_v44  ;;  %2390 = vmatpush.msrb.mxu3 %v2022_v45  ;;  %v1966_v44 = vld [vmem:[%s7673_s2 + $0x268] sm:$0xff]  ;;  %v1967_v45 = vld [vmem:[%s7673_s2 + $0x270] sm:$0xff] }
 0x116   :  { %2331 = vmatpush.msrb.mxu0 %v1988_v46  ;;  %2351 = vmatpush.msrb.mxu1 %v1989_v47  ;;  %v1968_v46 = vld [vmem:[%s7673_s2 + $0x278] sm:$0xff]  ;;  %v1934_v47 = vld [vmem:[%s7673_s2 + $0x168] sm:$0xff] }
 0x117   :  { %2371 = vmatpush.msrb.mxu2 %v1990_v48  ;;  %2391 = vmatpush.msrb.mxu3 %v1991_v49  ;;  %v1935_v48 = vld [vmem:[%s7673_s2 + $0x170] sm:$0xff]  ;;  %v1936_v49 = vld [vmem:[%s7673_s2 + $0x178] sm:$0xff] }
 0x118   :  { %2332 = vmatpush.msrb.mxu0 %v1957_v50  ;;  %2352 = vmatpush.msrb.mxu1 %v1958_v51  ;;  %v1937_v50 = vld [vmem:[%s7673_s2 + $0x180] sm:$0xff]  ;;  %v1903_v51 = vld [vmem:[%s7673_s2 + $0x70] sm:$0xff] }
 0x119   :  { %2372 = vmatpush.msrb.mxu2 %v1959_v52  ;;  %2392 = vmatpush.msrb.mxu3 %v1960_v53  ;;  %v1904_v52 = vld [vmem:[%s7673_s2 + $0x78] sm:$0xff]  ;;  %v1905_v53 = vld [vmem:[%s7673_s2 + $0x80] sm:$0xff] }
 0x11a   :  { %2333 = vmatpush.msrb.mxu0 %v1926_v54  ;;  %2353 = vmatpush.msrb.mxu1 %v1927_v55  ;;  %v1906_v54 = vld [vmem:[%s7673_s2 + $0x88] sm:$0xff] }
 0x11b   :  { %2373 = vmatpush.msrb.mxu2 %v1928_v57  ;;  %2393 = vmatpush.msrb.mxu3 %v1929_v59  ;;  %v2093_v57 = vld [vmem:[%s7673_s2 + $0x660] sm:$0x1]  ;;  %v2094_v59 = vld [vmem:[%s7673_s2 + $0x668] sm:$0x1] }
 0x11c   :  { %2334 = vmatpush.msrb.mxu0 %v1895_v60  ;;  %2354 = vmatpush.msrb.mxu1 %v1896_v61  ;;  %v6212_v55 = vpop.f32.mrf.mxu1  ;;  %v6220_v60 = vpop.f32.mrf.mxu0  ;;  %v6225_v61 = vld [vmem:[%s7671_s4] sm:$0xf] }
 0x11d   :  { %2374 = vmatpush.msrb.mxu2 %v1897_v62  ;;  %2394 = vmatpush.msrb.mxu3 %v1898_v63  ;;  %v2095_v62 = vld [vmem:[%s7673_s2 + $0x670] sm:$0x1]  ;;  %v2096_v63 = vld [vmem:[%s7673_s2 + $0x678] sm:$0x1] }
 0x11e   :  { %4136 = vmatmul.msk.f32.vlgmr.msra.gmra.mxu0 %vm241_vm1, %v5358_v58  ;;  %4138 = vmatmul.msk.f32.vlgmr.msra.gmra.mxu1 %vm241_vm1, %v5358_v58 }
 0x11f   :  { %4140 = vmatmul.msk.f32.vlgmr.msra.gmra.mxu2 %vm241_vm1, %v5358_v58  ;;  %4142 = vmatmul.msk.f32.vlgmr.msra.gmra.mxu3 %vm241_vm1, %v5358_v58 }
 0x120   :  { %4151 = vmatpush.msk.msra.mxu0 %vm245_vm0, %v2085_v0  ;;  %4153 = vmatpush.msk.msra.mxu1 %vm245_vm0, %v2086_v1  ;;  %v2062_v0 = vld [vmem:[%s7673_s2 + $0x568] sm:$0xff]  ;;  %v2063_v1 = vld [vmem:[%s7673_s2 + $0x570] sm:$0xff] }
 0x121   :  { %4155 = vmatpush.msk.msra.mxu2 %vm245_vm0, %v2087_v2  ;;  %4157 = vmatpush.msk.msra.mxu3 %vm245_vm0, %v2088_v3  ;;  %v6247_v2 = vpop.f32.mrf.mxu3  ;;  %v2064_v3 = vld [vmem:[%s7673_s2 + $0x578] sm:$0xff] }
 0x122   :  { %2409 = vmatpush.msra.mxu0 %v2054_v4  ;;  %2429 = vmatpush.msra.mxu1 %v2055_v5  ;;  %v2065_v4 = vld [vmem:[%s7673_s2 + $0x580] sm:$0xff]  ;;  %v2031_v5 = vld [vmem:[%s7673_s2 + $0x470] sm:$0xff] }
 0x123   :  { %2449 = vmatpush.msra.mxu2 %v2056_v6  ;;  %2469 = vmatpush.msra.mxu3 %v2057_v7  ;;  %v2032_v6 = vld [vmem:[%s7673_s2 + $0x478] sm:$0xff]  ;;  %v2033_v7 = vld [vmem:[%s7673_s2 + $0x480] sm:$0xff] }
 0x124   :  { %2410 = vmatpush.msra.mxu0 %v2023_v8  ;;  %2430 = vmatpush.msra.mxu1 %v2024_v9  ;;  %v2034_v8 = vld [vmem:[%s7673_s2 + $0x488] sm:$0xff]  ;;  %v6271_v9 = vpop.f32.mrf.mxu2 }
 0x125   :  { %2450 = vmatpush.msra.mxu2 %v2025_v10  ;;  %2470 = vmatpush.msra.mxu3 %v2026_v11  ;;  %v2000_v10 = vld [vmem:[%s7673_s2 + $0x378] sm:$0xff]  ;;  %v2001_v11 = vld [vmem:[%s7673_s2 + $0x380] sm:$0xff] }
 0x126   :  { %2411 = vmatpush.msra.mxu0 %v1992_v12  ;;  %2431 = vmatpush.msra.mxu1 %v1993_v13  ;;  %v2002_v12 = vld [vmem:[%s7673_s2 + $0x388] sm:$0xff]  ;;  %v2003_v13 = vld [vmem:[%s7673_s2 + $0x390] sm:$0xff] }
 0x127   :  { %2451 = vmatpush.msra.mxu2 %v1994_v14  ;;  %2471 = vmatpush.msra.mxu3 %v1995_v15  ;;  %v6285_v14 = vpop.f32.mrf.mxu1  ;;  %v1969_v15 = vld [vmem:[%s7673_s2 + $0x280] sm:$0xff] }
 0x128   :  { %2412 = vmatpush.msra.mxu0 %v1961_v16  ;;  %2432 = vmatpush.msra.mxu1 %v1962_v17  ;;  %v1970_v16 = vld [vmem:[%s7673_s2 + $0x288] sm:$0xff]  ;;  %v6293_v17 = vpop.f32.mrf.mxu0 }
 0x129   :  { %2452 = vmatpush.msra.mxu2 %v1963_v18  ;;  %2472 = vmatpush.msra.mxu3 %v1964_v19  ;;  %v1971_v18 = vld [vmem:[%s7673_s2 + $0x290] sm:$0xff]  ;;  %v1972_v19 = vld [vmem:[%s7673_s2 + $0x298] sm:$0xff] }
 0x12a   :  { %2413 = vmatpush.msra.mxu0 %v1930_v20  ;;  %2433 = vmatpush.msra.mxu1 %v1931_v21  ;;  %v1938_v20 = vld [vmem:[%s7673_s2 + $0x188] sm:$0xff]  ;;  %v1939_v21 = vld [vmem:[%s7673_s2 + $0x190] sm:$0xff] }
 0x12b   :  { %2453 = vmatpush.msra.mxu2 %v1932_v22  ;;  %2473 = vmatpush.msra.mxu3 %v1933_v23  ;;  %v6307_v22 = vpop.f32.mrf.mxu3  ;;  %v1940_v23 = vld [vmem:[%s7673_s2 + $0x198] sm:$0xff] }
 0x12c   :  { %2414 = vmatpush.msra.mxu0 %v1899_v24  ;;  %2434 = vmatpush.msra.mxu1 %v1900_v25  ;;  %v1941_v24 = vld [vmem:[%s7673_s2 + $0x1a0] sm:$0xff]  ;;  %v1907_v25 = vld [vmem:[%s7673_s2 + $0x90] sm:$0xff] }
 0x12d   :  { %2454 = vmatpush.msra.mxu2 %v1901_v26  ;;  %2474 = vmatpush.msra.mxu3 %v1902_v27  ;;  %v1908_v26 = vld [vmem:[%s7673_s2 + $0x98] sm:$0xff]  ;;  %v1909_v27 = vld [vmem:[%s7673_s2 + $0xa0] sm:$0xff] }
 0x12e   :  { %4144 = vmatmul.msk.f32.vlgmr.msrb.gmra.mxu0 %vm241_vm1, %v5358_v58  ;;  %4146 = vmatmul.msk.f32.vlgmr.msrb.gmra.mxu1 %vm241_vm1, %v5358_v58 }
 0x12f   :  { %4148 = vmatmul.msk.f32.vlgmr.msrb.gmra.mxu2 %vm241_vm1, %v5358_v58  ;;  %4150 = vmatmul.msk.f32.vlgmr.msrb.gmra.mxu3 %vm241_vm1, %v5358_v58  ;;  %v2061_v58 = vld [vmem:[%s7673_s2 + $0x560] sm:$0xff] }
 0x130   :  { %4159 = vmatpush.msk.msrb.mxu0 %vm245_vm0, %v2089_v28  ;;  %4161 = vmatpush.msk.msrb.mxu1 %vm245_vm0, %v2090_v29  ;;  %v1910_v28 = vld [vmem:[%s7673_s2 + $0xa8] sm:$0xff]  ;;  %v6327_v29 = vpop.f32.mrf.mxu2 }
 0x131   :  { %4163 = vmatpush.msk.msrb.mxu2 %vm245_vm0, %v2091_v30  ;;  %4165 = vmatpush.msk.msrb.mxu3 %vm245_vm0, %v2092_v31  ;;  %v6329_v30 = vpop.f32.mrf.mxu1  ;;  %v2097_v31 = vld [vmem:[%s7673_s2 + $0x680] sm:$0x1] }
 0x132   :  { %2489 = vmatpush.msrb.mxu0 %v2058_v32  ;;  %2509 = vmatpush.msrb.mxu1 %v2059_v33  ;;  %v2098_v32 = vld [vmem:[%s7673_s2 + $0x688] sm:$0x1]  ;;  %v6337_v33 = vpop.f32.mrf.mxu0 }
 0x133   :  { %2529 = vmatpush.msrb.mxu2 %v2060_v34  ;;  %2549 = vmatpush.msrb.mxu3 %v2061_v58  ;;  %v2099_v34 = vld [vmem:[%s7673_s2 + $0x690] sm:$0x1]  ;;  %v2100_v58 = vld [vmem:[%s7673_s2 + $0x698] sm:$0x1] }
 0x134   :  { %2490 = vmatpush.msrb.mxu0 %v2027_v56  ;;  %2510 = vmatpush.msrb.mxu1 %v2028_v35  ;;  %v2066_v56 = vld [vmem:[%s7673_s2 + $0x588] sm:$0xff]  ;;  %v2067_v35 = vld [vmem:[%s7673_s2 + $0x590] sm:$0xff] }
 0x135   :  { %2530 = vmatpush.msrb.mxu2 %v2029_v36  ;;  %2550 = vmatpush.msrb.mxu3 %v2030_v37  ;;  %v6359_v36 = vpop.f32.mrf.mxu3  ;;  %v2068_v37 = vld [vmem:[%s7673_s2 + $0x598] sm:$0xff] }
 0x136   :  { %2491 = vmatpush.msrb.mxu0 %v1996_v38  ;;  %2511 = vmatpush.msrb.mxu1 %v1997_v39  ;;  %v2069_v38 = vld [vmem:[%s7673_s2 + $0x5a0] sm:$0xff]  ;;  %v2035_v39 = vld [vmem:[%s7673_s2 + $0x490] sm:$0xff] }
 0x137   :  { %2531 = vmatpush.msrb.mxu2 %v1998_v40  ;;  %2551 = vmatpush.msrb.mxu3 %v1999_v41  ;;  %v2036_v40 = vld [vmem:[%s7673_s2 + $0x498] sm:$0xff]  ;;  %v2037_v41 = vld [vmem:[%s7673_s2 + $0x4a0] sm:$0xff] }
 0x138   :  { %2492 = vmatpush.msrb.mxu0 %v1965_v43  ;;  %2512 = vmatpush.msrb.mxu1 %v1966_v44  ;;  %v2038_v43 = vld [vmem:[%s7673_s2 + $0x4a8] sm:$0xff]  ;;  %v6383_v44 = vpop.f32.mrf.mxu2 }
 0x139   :  { %2532 = vmatpush.msrb.mxu2 %v1967_v45  ;;  %2552 = vmatpush.msrb.mxu3 %v1968_v46  ;;  %v2004_v45 = vld [vmem:[%s7673_s2 + $0x398] sm:$0xff]  ;;  %v2005_v46 = vld [vmem:[%s7673_s2 + $0x3a0] sm:$0xff] }
 0x13a   :  { %2493 = vmatpush.msrb.mxu0 %v1934_v47  ;;  %2513 = vmatpush.msrb.mxu1 %v1935_v48  ;;  %v2006_v47 = vld [vmem:[%s7673_s2 + $0x3a8] sm:$0xff]  ;;  %v2007_v48 = vld [vmem:[%s7673_s2 + $0x3b0] sm:$0xff] }
 0x13b   :  { %2533 = vmatpush.msrb.mxu2 %v1936_v49  ;;  %2553 = vmatpush.msrb.mxu3 %v1937_v50  ;;  %v6397_v49 = vpop.f32.mrf.mxu1  ;;  %v1973_v50 = vld [vmem:[%s7673_s2 + $0x2a0] sm:$0xff] }
 0x13c   :  { %2494 = vmatpush.msrb.mxu0 %v1903_v51  ;;  %2514 = vmatpush.msrb.mxu1 %v1904_v52  ;;  %7677 = vst [vmem:[#allocation2_spill] sm:$0xff] %v6397_v49  ;;  %v1974_v51 = vld [vmem:[%s7673_s2 + $0x2a8] sm:$0xff]  ;;  %v6405_v52 = vpop.f32.mrf.mxu0  ;;  %v2941_v49 = vld [vmem:[%s7674_s3 + $0x3d0] sm:$0xff] }
 0x13d   :  { %2534 = vmatpush.msrb.mxu2 %v1905_v53  ;;  %2554 = vmatpush.msrb.mxu3 %v1906_v54  ;;  %v1975_v53 = vld [vmem:[%s7673_s2 + $0x2b0] sm:$0xff]  ;;  %v1976_v54 = vld [vmem:[%s7673_s2 + $0x2b8] sm:$0xff] }
 0x13e   :  { %4152 = vmatmul.msk.f32.vlgmr.msra.gmra.mxu0 %vm241_vm1, %v6225_v61  ;;  %4154 = vmatmul.msk.f32.vlgmr.msra.gmra.mxu1 %vm241_vm1, %v6225_v61 }
 0x13f   :  { %4156 = vmatmul.msk.f32.vlgmr.msra.gmra.mxu2 %vm241_vm1, %v6225_v61  ;;  %4158 = vmatmul.msk.f32.vlgmr.msra.gmra.mxu3 %vm241_vm1, %v6225_v61 }
 0x140   :  { %4167 = vmatpush.msk.msra.mxu0 %vm245_vm0, %v2093_v57  ;;  %4169 = vmatpush.msk.msra.mxu1 %vm245_vm0, %v2094_v59  ;;  %v1942_v57 = vld [vmem:[%s7673_s2 + $0x1a8] sm:$0xff]  ;;  %v1943_v59 = vld [vmem:[%s7673_s2 + $0x1b0] sm:$0xff] }
 0x141   :  { %4171 = vmatpush.msk.msra.mxu2 %vm245_vm0, %v2095_v62  ;;  %4173 = vmatpush.msk.msra.mxu3 %vm245_vm0, %v2096_v63  ;;  %v6419_v62 = vpop.f32.mrf.mxu3  ;;  %v1944_v63 = vld [vmem:[%s7673_s2 + $0x1b8] sm:$0xff] }
 0x142   :  { %2569 = vmatpush.msra.mxu0 %v2062_v0  ;;  %2589 = vmatpush.msra.mxu1 %v2063_v1  ;;  %v1945_v0 = vld [vmem:[%s7673_s2 + $0x1c0] sm:$0xff]  ;;  %v1911_v1 = vld [vmem:[%s7673_s2 + $0xb0] sm:$0xff] }
 0x143   :  { %2609 = vmatpush.msra.mxu2 %v2064_v3  ;;  %2629 = vmatpush.msra.mxu3 %v2065_v4  ;;  %v1912_v3 = vld [vmem:[%s7673_s2 + $0xb8] sm:$0xff]  ;;  %v1913_v4 = vld [vmem:[%s7673_s2 + $0xc0] sm:$0xff] }
 0x144   :  { %2570 = vmatpush.msra.mxu0 %v2031_v5  ;;  %2590 = vmatpush.msra.mxu1 %v2032_v6  ;;  %v1914_v5 = vld [vmem:[%s7673_s2 + $0xc8] sm:$0xff]  ;;  %v6439_v6 = vpop.f32.mrf.mxu2 }
 0x145   :  { %2610 = vmatpush.msra.mxu2 %v2033_v7  ;;  %2630 = vmatpush.msra.mxu3 %v2034_v8  ;;  %v2101_v7 = vld [vmem:[%s7673_s2 + $0x6a0] sm:$0x1]  ;;  %v2102_v8 = vld [vmem:[%s7673_s2 + $0x6a8] sm:$0x1] }
 0x146   :  { %2571 = vmatpush.msra.mxu0 %v2000_v10  ;;  %2591 = vmatpush.msra.mxu1 %v2001_v11  ;;  %v6447_v10 = vpop.f32.mrf.mxu0  ;;  %v2103_v11 = vld [vmem:[%s7673_s2 + $0x6b0] sm:$0x1] }
 0x147   :  { %2611 = vmatpush.msra.mxu2 %v2002_v12  ;;  %2631 = vmatpush.msra.mxu3 %v2003_v13  ;;  %v2104_v12 = vld [vmem:[%s7673_s2 + $0x6b8] sm:$0x1]  ;;  %v6459_v13 = vpop.f32.mrf.mxu1 }
 0x148   :  { %2572 = vmatpush.msra.mxu0 %v1969_v15  ;;  %2592 = vmatpush.msra.mxu1 %v1970_v16  ;;  %7678 = vst [vmem:[#allocation3_spill] sm:$0xff] %v6459_v13  ;;  %v2070_v15 = vld [vmem:[%s7673_s2 + $0x5a8] sm:$0xff]  ;;  %v2071_v16 = vld [vmem:[%s7673_s2 + $0x5b0] sm:$0xff]  ;;  %v2966_v13 = vld [vmem:[%s7674_s3 + $0x498] sm:$0xff] }
 0x149   :  { %2612 = vmatpush.msra.mxu2 %v1971_v18  ;;  %2632 = vmatpush.msra.mxu3 %v1972_v19  ;;  %v6471_v18 = vpop.f32.mrf.mxu3  ;;  %v2072_v19 = vld [vmem:[%s7673_s2 + $0x5b8] sm:$0xff] }
 0x14a   :  { %2573 = vmatpush.msra.mxu0 %v1938_v20  ;;  %2593 = vmatpush.msra.mxu1 %v1939_v21  ;;  %7679 = vst [vmem:[#allocation4_spill] sm:$0xff] %v6471_v18  ;;  %v2073_v20 = vld [vmem:[%s7673_s2 + $0x5c0] sm:$0xff]  ;;  %v2039_v21 = vld [vmem:[%s7673_s2 + $0x4b0] sm:$0xff]  ;;  %v2904_v18 = vld [vmem:[%s7674_s3 + $0x2a8] sm:$0xff] }
 0x14b   :  { %2613 = vmatpush.msra.mxu2 %v1940_v23  ;;  %2633 = vmatpush.msra.mxu3 %v1941_v24  ;;  %v2040_v23 = vld [vmem:[%s7673_s2 + $0x4b8] sm:$0xff]  ;;  %v2041_v24 = vld [vmem:[%s7673_s2 + $0x4c0] sm:$0xff] }
 0x14c   :  { %2574 = vmatpush.msra.mxu0 %v1907_v25  ;;  %2594 = vmatpush.msra.mxu1 %v1908_v26  ;;  %v2042_v25 = vld [vmem:[%s7673_s2 + $0x4c8] sm:$0xff]  ;;  %v6495_v26 = vpop.f32.mrf.mxu2 }
 0x14d   :  { %2614 = vmatpush.msra.mxu2 %v1909_v27  ;;  %2634 = vmatpush.msra.mxu3 %v1910_v28  ;;  %7680 = vst [vmem:[#allocation5_spill] sm:$0xff] %v6495_v26  ;;  %v2008_v27 = vld [vmem:[%s7673_s2 + $0x3b8] sm:$0xff]  ;;  %v2009_v28 = vld [vmem:[%s7673_s2 + $0x3c0] sm:$0xff] }
 0x14e   :  { %4160 = vmatmul.msk.f32.vlgmr.msrb.gmra.mxu0 %vm241_vm1, %v6225_v61  ;;  %4162 = vmatmul.msk.f32.vlgmr.msrb.gmra.mxu1 %vm241_vm1, %v6225_v61 }
 0x14f   :  { %4164 = vmatmul.msk.f32.vlgmr.msrb.gmra.mxu2 %vm241_vm1, %v6225_v61  ;;  %4166 = vmatmul.msk.f32.vlgmr.msrb.gmra.mxu3 %vm241_vm1, %v6225_v61 }
 0x150   :  { %4175 = vmatpush.msk.msrb.mxu0 %vm245_vm0, %v2097_v31  ;;  %4177 = vmatpush.msk.msrb.mxu1 %vm245_vm0, %v2098_v32  ;;  %v2010_v31 = vld [vmem:[%s7673_s2 + $0x3c8] sm:$0xff]  ;;  %v2011_v32 = vld [vmem:[%s7673_s2 + $0x3d0] sm:$0xff] }
 0x151   :  { %4179 = vmatpush.msk.msrb.mxu2 %vm245_vm0, %v2099_v34  ;;  %4181 = vmatpush.msk.msrb.mxu3 %vm245_vm0, %v2100_v58  ;;  %v1977_v34 = vld [vmem:[%s7673_s2 + $0x2c0] sm:$0xff]  ;;  %v1978_v58 = vld [vmem:[%s7673_s2 + $0x2c8] sm:$0xff] }
 0x152   :  { %2649 = vmatpush.msrb.mxu0 %v2066_v56  ;;  %2669 = vmatpush.msrb.mxu1 %v2067_v35  ;;  %v1979_v56 = vld [vmem:[%s7673_s2 + $0x2d0] sm:$0xff]  ;;  %v1980_v35 = vld [vmem:[%s7673_s2 + $0x2d8] sm:$0xff] }
 0x153   :  { %2689 = vmatpush.msrb.mxu2 %v2068_v37  ;;  %2709 = vmatpush.msrb.mxu3 %v2069_v38  ;;  %v6521_v37 = vpop.f32.mrf.mxu0  ;;  %v1946_v38 = vld [vmem:[%s7673_s2 + $0x1c8] sm:$0xff] }
 0x154   :  { %2650 = vmatpush.msrb.mxu0 %v2035_v39  ;;  %2670 = vmatpush.msrb.mxu1 %v2036_v40  ;;  %7681 = vst [vmem:[#allocation6_spill] sm:$0xff] %v6521_v37  ;;  %v6526_v39 = vpop.f32.mrf.mxu1  ;;  %v1947_v40 = vld [vmem:[%s7673_s2 + $0x1d0] sm:$0xff] }
 0x155   :  { %2690 = vmatpush.msrb.mxu2 %v2037_v41  ;;  %2710 = vmatpush.msrb.mxu3 %v2038_v43  ;;  %7682 = vst [vmem:[#allocation7_spill] sm:$0xff] %v6526_v39  ;;  %v1948_v41 = vld [vmem:[%s7673_s2 + $0x1d8] sm:$0xff]  ;;  %v6534_v43 = vpop.f32.mrf.mxu3 }
 0x156   :  { %2651 = vmatpush.msrb.mxu0 %v2004_v45  ;;  %2671 = vmatpush.msrb.mxu1 %v2005_v46  ;;  %7683 = vst [vmem:[#allocation8_spill] sm:$0xff] %v6534_v43  ;;  %v1949_v45 = vld [vmem:[%s7673_s2 + $0x1e0] sm:$0xff]  ;;  %v1915_v46 = vld [vmem:[%s7673_s2 + $0xd0] sm:$0xff]  ;;  %v2962_v39 = vld [vmem:[%s7674_s3 + $0x478] sm:$0xff] }
 0x157   :  { %2691 = vmatpush.msrb.mxu2 %v2006_v47  ;;  %2711 = vmatpush.msrb.mxu3 %v2007_v48  ;;  %v6546_v47 = vpop.f32.mrf.mxu2  ;;  %v1916_v48 = vld [vmem:[%s7673_s2 + $0xd8] sm:$0xff]  ;;  %v2933_v43 = vld [vmem:[%s7674_s3 + $0x390] sm:$0xff] }
 0x158   :  { %2652 = vmatpush.msrb.mxu0 %v1973_v50  ;;  %2672 = vmatpush.msrb.mxu1 %v1974_v51  ;;  %7684 = vst [vmem:[#allocation9_spill] sm:$0xff] %v6546_v47  ;;  %v1917_v50 = vld [vmem:[%s7673_s2 + $0xe0] sm:$0xff]  ;;  %v1918_v51 = vld [vmem:[%s7673_s2 + $0xe8] sm:$0xff] }
 0x159   :  { %2692 = vmatpush.msrb.mxu2 %v1975_v53  ;;  %2712 = vmatpush.msrb.mxu3 %v1976_v54  ;;  %v2105_v53 = vld [vmem:[%s7673_s2 + $0x6c0] sm:$0x1]  ;;  %v3005_v54 = vld [vmem:[%s7674_s3 + $0x5d0] sm:$0x1] }
 0x15a   :  { %2653 = vmatpush.msrb.mxu0 %v1942_v57  ;;  %2673 = vmatpush.msrb.mxu1 %v1943_v59  ;;  %v3006_v57 = vld [vmem:[%s7674_s3 + $0x5d8] sm:$0x1]  ;;  %v3007_v59 = vld [vmem:[%s7674_s3 + $0x5e0] sm:$0x1] }
 0x15b   :  { %2693 = vmatpush.msrb.mxu2 %v1944_v63  ;;  %2713 = vmatpush.msrb.mxu3 %v1945_v0  ;;  %v2074_v63 = vld [vmem:[%s7673_s2 + $0x5c8] sm:$0xff]  ;;  %v2974_v0 = vld [vmem:[%s7674_s3 + $0x4d8] sm:$0xff] }
 0x15c   :  { %2654 = vmatpush.msrb.mxu0 %v1911_v1  ;;  %2674 = vmatpush.msrb.mxu1 %v1912_v3  ;;  %v2975_v1 = vld [vmem:[%s7674_s3 + $0x4e0] sm:$0xff]  ;;  %v2976_v3 = vld [vmem:[%s7674_s3 + $0x4e8] sm:$0xff] }
 0x15d   :  { %2694 = vmatpush.msrb.mxu2 %v1913_v4  ;;  %2714 = vmatpush.msrb.mxu3 %v1914_v5  ;;  %v2043_v4 = vld [vmem:[%s7673_s2 + $0x4d0] sm:$0xff]  ;;  %v2943_v5 = vld [vmem:[%s7674_s3 + $0x3e0] sm:$0xff] }
 0x15e   :  { %4168 = vmatmul.msk.f32.vlgmr.msra.gmra.mxu0 %vm241_vm1, %v6225_v61  ;;  %4170 = vmatmul.msk.f32.vlgmr.msra.gmra.mxu1 %vm241_vm1, %v6225_v61 }
 0x15f   :  { %4172 = vmatmul.msk.f32.vlgmr.msra.gmra.mxu2 %vm241_vm1, %v6225_v61  ;;  %4174 = vmatmul.msk.f32.vlgmr.msra.gmra.mxu3 %vm241_vm1, %v6225_v61 }
 0x160   :  { %4183 = vmatpush.msk.msra.mxu0 %vm245_vm0, %v2101_v7  ;;  %4185 = vmatpush.msk.msra.mxu1 %vm245_vm0, %v2102_v8  ;;  %v6595_v7 = vpop.f32.mrf.mxu0  ;;  %v2944_v8 = vld [vmem:[%s7674_s3 + $0x3e8] sm:$0xff] }
 0x161   :  { %4187 = vmatpush.msk.msra.mxu2 %vm245_vm0, %v2103_v11  ;;  %4189 = vmatpush.msk.msra.mxu3 %vm245_vm0, %v2104_v12  ;;  %7685 = vst [vmem:[#allocation10_spill] sm:$0xff] %v6595_v7  ;;  %v2945_v11 = vld [vmem:[%s7674_s3 + $0x3f0] sm:$0xff]  ;;  %v6603_v12 = vpop.f32.mrf.mxu2 }
 0x162   :  { %2729 = vmatpush.msra.mxu0 %v2070_v15  ;;  %2749 = vmatpush.msra.mxu1 %v2071_v16  ;;  %7686 = vst [vmem:[#allocation11_spill] sm:$0xff] %v6603_v12  ;;  %v6605_v15 = vpop.f32.mrf.mxu1  ;;  %v6607_v16 = vpop.f32.mrf.mxu3  ;;  %v2929_v12 = vld [vmem:[%s7674_s3 + $0x370] sm:$0xff] }
 0x163   :  { %2769 = vmatpush.msra.mxu2 %v2072_v19  ;;  %2789 = vmatpush.msra.mxu3 %v2073_v20  ;;  %7687 = vst [vmem:[#allocation12_spill] sm:$0xff] %v6605_v15  ;;  %v2012_v19 = vld [vmem:[%s7673_s2 + $0x3d8] sm:$0xff]  ;;  %v2912_v20 = vld [vmem:[%s7674_s3 + $0x2e8] sm:$0xff] }
 0x164   :  { %2730 = vmatpush.msra.mxu0 %v2039_v21  ;;  %2750 = vmatpush.msra.mxu1 %v2040_v23  ;;  %7688 = vst [vmem:[#allocation13_spill] sm:$0xff] %v6607_v16  ;;  %v2913_v21 = vld [vmem:[%s7674_s3 + $0x2f0] sm:$0xff]  ;;  %v2914_v23 = vld [vmem:[%s7674_s3 + $0x2f8] sm:$0xff] }
 0x165   :  { %2770 = vmatpush.msra.mxu2 %v2041_v24  ;;  %2790 = vmatpush.msra.mxu3 %v2042_v25  ;;  %v1981_v24 = vld [vmem:[%s7673_s2 + $0x2e0] sm:$0xff]  ;;  %v2881_v25 = vld [vmem:[%s7674_s3 + $0x1f0] sm:$0xff] }
 0x166   :  { %2731 = vmatpush.msra.mxu0 %v2008_v27  ;;  %2751 = vmatpush.msra.mxu1 %v2009_v28  ;;  %v2882_v27 = vld [vmem:[%s7674_s3 + $0x1f8] sm:$0xff]  ;;  %v2883_v28 = vld [vmem:[%s7674_s3 + $0x200] sm:$0xff] }
 0x167   :  { %2771 = vmatpush.msra.mxu2 %v2010_v31  ;;  %2791 = vmatpush.msra.mxu3 %v2011_v32  ;;  %v1950_v31 = vld [vmem:[%s7673_s2 + $0x1e8] sm:$0xff]  ;;  %v2850_v32 = vld [vmem:[%s7674_s3 + $0xf8] sm:$0xff] }
 0x168   :  { %2732 = vmatpush.msra.mxu0 %v1977_v34  ;;  %2752 = vmatpush.msra.mxu1 %v1978_v58  ;;  %v2851_v34 = vld [vmem:[%s7674_s3 + $0x100] sm:$0xff]  ;;  %v2852_v58 = vld [vmem:[%s7674_s3 + $0x108] sm:$0xff] }
 0x169   :  { %2772 = vmatpush.msra.mxu2 %v1979_v56  ;;  %2792 = vmatpush.msra.mxu3 %v1980_v35  ;;  %v1919_v56 = vld [vmem:[%s7673_s2 + $0xf0] sm:$0xff]  ;;  %v2819_v35 = vld [vmem:[%s7674_s3] sm:$0xff] }
 0x16a   :  { %4178 = vmatmul.msk.f32.vlgmr.msrb.gmra.mxu1 %vm241_vm1, %v6225_v61  ;;  %4180 = vmatmul.msk.f32.vlgmr.msrb.gmra.mxu2 %vm241_vm1, %v6225_v61 }
 0x16b   :  { %4182 = vmatmul.msk.f32.vlgmr.msrb.gmra.mxu3 %vm241_vm1, %v6225_v61  ;;  %2733 = vmatpush.msra.mxu0 %v1946_v38  ;;  %v6659_v38 = vpop.f32.mrf.mxu0 }
 0x16c   :  { %2753 = vmatpush.msra.mxu1 %v1947_v40  ;;  %2773 = vmatpush.msra.mxu2 %v1948_v41  ;;  %7689 = vst [vmem:[#allocation14_spill] sm:$0xff] %v6659_v38  ;;  %v2820_v40 = vld [vmem:[%s7674_s3 + $0x8] sm:$0xff]  ;;  %v2821_v41 = vld [vmem:[%s7674_s3 + $0x10] sm:$0xff] }
 0x16d   :  { %2793 = vmatpush.msra.mxu3 %v1949_v45  ;;  %2734 = vmatpush.msra.mxu0 %v1915_v46  ;;  %v6667_v45 = vpop.f32.mrf.mxu2  ;;  %v6669_v46 = vpop.f32.mrf.mxu1  ;;  %v2960_v38 = vld [vmem:[%s7674_s3 + $0x468] sm:$0xff] }
 0x16e   :  { %2754 = vmatpush.msra.mxu1 %v1916_v48  ;;  %2774 = vmatpush.msra.mxu2 %v1917_v50  ;;  %7690 = vst [vmem:[#allocation15_spill] sm:$0xff] %v6667_v45  ;;  %v6671_v48 = vpop.f32.mrf.mxu3  ;;  %v3008_v50 = vld [vmem:[%s7674_s3 + $0x5e8] sm:$0x1] }
 0x16f   :  { %2794 = vmatpush.msra.mxu3 %v1918_v51  ;;  %4176 = vmatmul.msk.f32.vlgmr.msrb.gmra.mxu0 %vm241_vm1, %v6225_v61  ;;  %v3009_v51 = vld [vmem:[%s7674_s3 + $0x5f0] sm:$0x1] }
 0x170   :  { %4191 = vmatpush.msk.msrb.mxu0 %vm245_vm0, %v2105_v53  ;;  %4193 = vmatpush.msk.msrb.mxu1 %vm245_vm0, %v3005_v54  ;;  %v3010_v53 = vld [vmem:[%s7674_s3 + $0x5f8] sm:$0x1]  ;;  %v3011_v54 = vld [vmem:[%s7674_s3 + $0x600] sm:$0x1] }
 0x171   :  { %4195 = vmatpush.msk.msrb.mxu2 %vm245_vm0, %v3006_v57  ;;  %4197 = vmatpush.msk.msrb.mxu3 %vm245_vm0, %v3007_v59  ;;  %v2977_v57 = vld [vmem:[%s7674_s3 + $0x4f0] sm:$0xff]  ;;  %v2978_v59 = vld [vmem:[%s7674_s3 + $0x4f8] sm:$0xff] }
 0x172   :  { %2809 = vmatpush.msrb.mxu0 %v2074_v63  ;;  %3139 = vmatpush.msrb.mxu1 %v2974_v0  ;;  %v2979_v63 = vld [vmem:[%s7674_s3 + $0x500] sm:$0xff]  ;;  %v2980_v0 = vld [vmem:[%s7674_s3 + $0x508] sm:$0xff] }
 0x173   :  { %3159 = vmatpush.msrb.mxu2 %v2975_v1  ;;  %3179 = vmatpush.msrb.mxu3 %v2976_v3  ;;  %v2946_v1 = vld [vmem:[%s7674_s3 + $0x3f8] sm:$0xff]  ;;  %v2947_v3 = vld [vmem:[%s7674_s3 + $0x400] sm:$0xff] }
 0x174   :  { %2810 = vmatpush.msrb.mxu0 %v2043_v4  ;;  %3140 = vmatpush.msrb.mxu1 %v2943_v5  ;;  %v2948_v4 = vld [vmem:[%s7674_s3 + $0x408] sm:$0xff]  ;;  %v2949_v5 = vld [vmem:[%s7674_s3 + $0x410] sm:$0xff] }
 0x175   :  { %3160 = vmatpush.msrb.mxu2 %v2944_v8  ;;  %3180 = vmatpush.msrb.mxu3 %v2945_v11  ;;  %v6719_v8 = vpop.f32.mrf.mxu1  ;;  %v2915_v11 = vld [vmem:[%s7674_s3 + $0x300] sm:$0xff] }
 0x176   :  { %4186 = vmatmul.msk.f32.vlgmr.msra.gmra.mxu1 %vm241_vm1, %v6225_v61  ;;  %4188 = vmatmul.msk.f32.vlgmr.msra.gmra.mxu2 %vm241_vm1, %v6225_v61 }
 0x177   :  { %4190 = vmatmul.msk.f32.vlgmr.msra.gmra.mxu3 %vm241_vm1, %v6225_v61  ;;  %2811 = vmatpush.msrb.mxu0 %v2012_v19  ;;  %v2916_v19 = vld [vmem:[%s7674_s3 + $0x308] sm:$0xff] }
 0x178   :  { %3141 = vmatpush.msrb.mxu1 %v2912_v20  ;;  %3161 = vmatpush.msrb.mxu2 %v2913_v21  ;;  %v6727_v20 = vpop.f32.mrf.mxu0  ;;  %v6729_v21 = vpop.f32.mrf.mxu3 }
 0x179   :  { %3181 = vmatpush.msrb.mxu3 %v2914_v23  ;;  %2812 = vmatpush.msrb.mxu0 %v1981_v24  ;;  %v2917_v23 = vld [vmem:[%s7674_s3 + $0x310] sm:$0xff]  ;;  %v2918_v24 = vld [vmem:[%s7674_s3 + $0x318] sm:$0xff] }
 0x17a   :  { %3142 = vmatpush.msrb.mxu1 %v2881_v25  ;;  %3162 = vmatpush.msrb.mxu2 %v2882_v27  ;;  %v6737_v25 = vpop.f32.mrf.mxu2  ;;  %v2884_v27 = vld [vmem:[%s7674_s3 + $0x208] sm:$0xff] }
 0x17b   :  { %3182 = vmatpush.msrb.mxu3 %v2883_v28  ;;  %4184 = vmatmul.msk.f32.vlgmr.msra.gmra.mxu0 %vm241_vm1, %v6225_v61  ;;  %v2885_v28 = vld [vmem:[%s7674_s3 + $0x210] sm:$0xff] }
 0x17c   :  { %2813 = vmatpush.msrb.mxu0 %v1950_v31  ;;  %3143 = vmatpush.msrb.mxu1 %v2850_v32  ;;  %v2886_v31 = vld [vmem:[%s7674_s3 + $0x218] sm:$0xff]  ;;  %v2887_v32 = vld [vmem:[%s7674_s3 + $0x220] sm:$0xff] }
 0x17d   :  { %3163 = vmatpush.msrb.mxu2 %v2851_v34  ;;  %3183 = vmatpush.msrb.mxu3 %v2852_v58  ;;  %v2853_v34 = vld [vmem:[%s7674_s3 + $0x110] sm:$0xff]  ;;  %v2854_v58 = vld [vmem:[%s7674_s3 + $0x118] sm:$0xff] }
 0x17e   :  { %2814 = vmatpush.msrb.mxu0 %v1919_v56  ;;  %3144 = vmatpush.msrb.mxu1 %v2819_v35  ;;  %v2855_v56 = vld [vmem:[%s7674_s3 + $0x120] sm:$0xff]  ;;  %v2856_v35 = vld [vmem:[%s7674_s3 + $0x128] sm:$0xff] }
 0x17f   :  { %3164 = vmatpush.msrb.mxu2 %v2820_v40  ;;  %3184 = vmatpush.msrb.mxu3 %v2821_v41  ;;  %v2822_v40 = vld [vmem:[%s7674_s3 + $0x18] sm:$0xff]  ;;  %v2823_v41 = vld [vmem:[%s7674_s3 + $0x20] sm:$0xff] }
 0x180   :  { %4194 = vmatmul.msk.f32.vlgmr.msrb.gmra.mxu1 %vm241_vm1, %v6225_v61  ;;  %4196 = vmatmul.msk.f32.vlgmr.msrb.gmra.mxu2 %vm241_vm1, %v6225_v61 }
 0x181   :  { %4198 = vmatmul.msk.f32.vlgmr.msrb.gmra.mxu3 %vm241_vm1, %v6225_v61  ;;  %4199 = vmatpush.msk.msra.mxu0 %vm245_vm0, %v3008_v50  ;;  %v2824_v50 = vld [vmem:[%s7674_s3 + $0x28] sm:$0xff] }
 0x182   :  { %4201 = vmatpush.msk.msra.mxu1 %vm245_vm0, %v3009_v51  ;;  %4203 = vmatpush.msk.msra.mxu2 %vm245_vm0, %v3010_v53  ;;  %v2825_v51 = vld [vmem:[%s7674_s3 + $0x30] sm:$0xff]  ;;  %v6777_v53 = vpop.f32.mrf.mxu1 }
 0x183   :  { %4205 = vmatpush.msk.msra.mxu3 %vm245_vm0, %v3011_v54  ;;  %3199 = vmatpush.msra.mxu0 %v2977_v57  ;;  %v6779_v54 = vpop.f32.mrf.mxu0  ;;  %v6781_v57 = vpop.f32.mrf.mxu3 }
 0x184   :  { %3219 = vmatpush.msra.mxu1 %v2978_v59  ;;  %3239 = vmatpush.msra.mxu2 %v2979_v63  ;;  %v6783_v59 = vpop.f32.mrf.mxu2  ;;  %v3012_v63 = vld [vmem:[%s7674_s3 + $0x608] sm:$0x1] }
 0x185   :  { %3259 = vmatpush.msra.mxu3 %v2980_v0  ;;  %3200 = vmatpush.msra.mxu0 %v2946_v1  ;;  %v3013_v0 = vld [vmem:[%s7674_s3 + $0x610] sm:$0x1]  ;;  %v3014_v1 = vld [vmem:[%s7674_s3 + $0x618] sm:$0x1] }
 0x186   :  { %3220 = vmatpush.msra.mxu1 %v2947_v3  ;;  %3240 = vmatpush.msra.mxu2 %v2948_v4  ;;  %v3015_v3 = vld [vmem:[%s7674_s3 + $0x620] sm:$0x1]  ;;  %v2981_v4 = vld [vmem:[%s7674_s3 + $0x510] sm:$0xff] }
 0x187   :  { %3260 = vmatpush.msra.mxu3 %v2949_v5  ;;  %4192 = vmatmul.msk.f32.vlgmr.msrb.gmra.mxu0 %vm241_vm1, %v6225_v61  ;;  %v3842_v5 = vld [vmem:[%s7675_s5] sm:$0xf] }
 0x188   :  { %3201 = vmatpush.msra.mxu0 %v2915_v11  ;;  %3221 = vmatpush.msra.mxu1 %v2916_v19  ;;  %v2982_v11 = vld [vmem:[%s7674_s3 + $0x518] sm:$0xff]  ;;  %v2983_v19 = vld [vmem:[%s7674_s3 + $0x520] sm:$0xff] }
 0x189   :  { %3241 = vmatpush.msra.mxu2 %v2917_v23  ;;  %3261 = vmatpush.msra.mxu3 %v2918_v24  ;;  %v2984_v23 = vld [vmem:[%s7674_s3 + $0x528] sm:$0xff]  ;;  %v4260_v24 = vmov 0  }
 0x18a   :  { %3202 = vmatpush.msra.mxu0 %v2884_v27  ;;  %3222 = vmatpush.msra.mxu1 %v2885_v28  ;;  %v2950_v27 = vld [vmem:[%s7674_s3 + $0x418] sm:$0xff]  ;;  %v2951_v28 = vld [vmem:[%s7674_s3 + $0x420] sm:$0xff] }
 0x18b   :  { %3242 = vmatpush.msra.mxu2 %v2886_v31  ;;  %3262 = vmatpush.msra.mxu3 %v2887_v32  ;;  %v6830_v31 = vpop.f32.mrf.mxu1  ;;  %v2952_v32 = vld [vmem:[%s7674_s3 + $0x428] sm:$0xff] }
 0x18c   :  { %3203 = vmatpush.msra.mxu0 %v2853_v34  ;;  %3223 = vmatpush.msra.mxu1 %v2854_v58  ;;  %v2953_v34 = vld [vmem:[%s7674_s3 + $0x430] sm:$0xff]  ;;  %v6838_v58 = vpop.f32.mrf.mxu0 }
 0x18d   :  { %3243 = vmatpush.msra.mxu2 %v2855_v56  ;;  %3263 = vmatpush.msra.mxu3 %v2856_v35  ;;  %v6840_v56 = vpop.f32.mrf.mxu3  ;;  %v2919_v35 = vld [vmem:[%s7674_s3 + $0x320] sm:$0xff] }
 0x18e   :  { %3204 = vmatpush.msra.mxu0 %v2822_v40  ;;  %3224 = vmatpush.msra.mxu1 %v2823_v41  ;;  %v2920_v40 = vld [vmem:[%s7674_s3 + $0x328] sm:$0xff]  ;;  %v6848_v41 = vpop.f32.mrf.mxu2 }
 0x18f   :  { %3244 = vmatpush.msra.mxu2 %v2824_v50  ;;  %3264 = vmatpush.msra.mxu3 %v2825_v51  ;;  %v2921_v50 = vld [vmem:[%s7674_s3 + $0x330] sm:$0xff]  ;;  %v2922_v51 = vld [vmem:[%s7674_s3 + $0x338] sm:$0xff] }
 0x190   :  { %4200 = vmatmul.msk.f32.vlgmr.msra.gmra.mxu0 %vm241_vm1, %v6225_v61  ;;  %4202 = vmatmul.msk.f32.vlgmr.msra.gmra.mxu1 %vm241_vm1, %v6225_v61 }
 0x191   :  { %4204 = vmatmul.msk.f32.vlgmr.msra.gmra.mxu2 %vm241_vm1, %v6225_v61  ;;  %4206 = vmatmul.msk.f32.vlgmr.msra.gmra.mxu3 %vm241_vm1, %v6225_v61 }
 0x192   :  { %4207 = vmatpush.msk.msrb.mxu0 %vm245_vm0, %v3012_v63  ;;  %4209 = vmatpush.msk.msrb.mxu1 %vm245_vm0, %v3013_v0  ;;  %v2888_v63 = vld [vmem:[%s7674_s3 + $0x228] sm:$0xff]  ;;  %v2889_v0 = vld [vmem:[%s7674_s3 + $0x230] sm:$0xff] }
 0x193   :  { %4211 = vmatpush.msk.msrb.mxu2 %vm245_vm0, %v3014_v1  ;;  %4213 = vmatpush.msk.msrb.mxu3 %vm245_vm0, %v3015_v3  ;;  %v2890_v1 = vld [vmem:[%s7674_s3 + $0x238] sm:$0xff]  ;;  %v2891_v3 = vld [vmem:[%s7674_s3 + $0x240] sm:$0xff] }
 0x194   :  { %4256 = vset.pattern.permute.xlu0 %v4260_v24  ;;  %3279 = vmatpush.msrb.mxu0 %v2981_v4  ;;  %v2857_v4 = vld [vmem:[%s7674_s3 + $0x130] sm:$0xff]  ;;  %v2827_v24 = vld [vmem:[%s7674_s3 + $0x40] sm:$0xff] }
 0x195   :  { %3845 = vperm.xlu0 %4256, %v3842_v5   ;;  %3299 = vmatpush.msrb.mxu1 %v2982_v11  ;;  %v2858_v5 = vld [vmem:[%s7674_s3 + $0x138] sm:$0xff]  ;;  %v2859_v11 = vld [vmem:[%s7674_s3 + $0x140] sm:$0xff] }
 0x196   :  { %3319 = vmatpush.msrb.mxu2 %v2983_v19  ;;  %3339 = vmatpush.msrb.mxu3 %v2984_v23  ;;  %v2860_v19 = vld [vmem:[%s7674_s3 + $0x148] sm:$0xff]  ;;  %v2826_v23 = vld [vmem:[%s7674_s3 + $0x38] sm:$0xff] }
 0x197   :  { %3280 = vmatpush.msrb.mxu0 %v2950_v27  ;;  %3300 = vmatpush.msrb.mxu1 %v2951_v28  ;;  %v6886_v27 = vpop.f32.mrf.mxu1  ;;  %v2828_v28 = vld [vmem:[%s7674_s3 + $0x48] sm:$0xff] }
 0x198   :  { %3320 = vmatpush.msrb.mxu2 %v2952_v32  ;;  %3340 = vmatpush.msrb.mxu3 %v2953_v34  ;;  %7691 = vst [vmem:[#allocation16_spill] sm:$0xff] %v6886_v27  ;;  %v2829_v32 = vld [vmem:[%s7674_s3 + $0x50] sm:$0xff]  ;;  %v6894_v34 = vpop.f32.mrf.mxu0  ;;  %v2970_v27 = vld [vmem:[%s7674_s3 + $0x4b8] sm:$0xff] }
 0x199   :  { %3281 = vmatpush.msrb.mxu0 %v2919_v35  ;;  %3301 = vmatpush.msrb.mxu1 %v2920_v40  ;;  %v6896_v35 = vpop.f32.mrf.mxu3  ;;  %v6898_v40 = vpop.f32.mrf.mxu2 }
 0x19a   :  { %3321 = vmatpush.msrb.mxu2 %v2921_v50  ;;  %3341 = vmatpush.msrb.mxu3 %v2922_v51  ;;  %v3016_v50 = vld [vmem:[%s7674_s3 + $0x628] sm:$0x1]  ;;  %v3017_v51 = vld [vmem:[%s7674_s3 + $0x630] sm:$0x1] }
 0x19b   :  { %3282 = vmatpush.msrb.mxu0 %v2888_v63  ;;  %3302 = vmatpush.msrb.mxu1 %v2889_v0  ;;  %v3018_v63 = vld [vmem:[%s7674_s3 + $0x638] sm:$0x1]  ;;  %v3019_v0 = vld [vmem:[%s7674_s3 + $0x640] sm:$0x1] }
 0x19c   :  { %3322 = vmatpush.msrb.mxu2 %v2890_v1  ;;  %3342 = vmatpush.msrb.mxu3 %v2891_v3  ;;  %v2985_v1 = vld [vmem:[%s7674_s3 + $0x530] sm:$0xff]  ;;  %v2986_v3 = vld [vmem:[%s7674_s3 + $0x538] sm:$0xff] }
 0x19d   :  { %3283 = vmatpush.msrb.mxu0 %v2857_v4  ;;  %3303 = vmatpush.msrb.mxu1 %v2858_v5  ;;  %v2987_v4 = vld [vmem:[%s7674_s3 + $0x540] sm:$0xff]  ;;  %v2988_v5 = vld [vmem:[%s7674_s3 + $0x548] sm:$0xff] }
 0x19e   :  { %3323 = vmatpush.msrb.mxu2 %v2859_v11  ;;  %3343 = vmatpush.msrb.mxu3 %v2860_v19  ;;  %v2954_v11 = vld [vmem:[%s7674_s3 + $0x438] sm:$0xff]  ;;  %v2955_v19 = vld [vmem:[%s7674_s3 + $0x440] sm:$0xff] }
 0x19f   :  { %3284 = vmatpush.msrb.mxu0 %v2826_v23  ;;  %3304 = vmatpush.msrb.mxu1 %v2827_v24  ;;  %v6942_v23 = vpop.f32.mrf.mxu1  ;;  %v2956_v24 = vld [vmem:[%s7674_s3 + $0x448] sm:$0xff] }
 0x1a0   :  { %3324 = vmatpush.msrb.mxu2 %v2828_v28  ;;  %3344 = vmatpush.msrb.mxu3 %v2829_v32  ;;  %7692 = vst [vmem:[#allocation17_spill] sm:$0xff] %v6942_v23  ;;  %v2957_v28 = vld [vmem:[%s7674_s3 + $0x450] sm:$0xff]  ;;  %v6950_v32 = vpop.f32.mrf.mxu0 }
 0x1a1   :  { %4208 = vmatmul.msk.f32.vlgmr.msrb.gmra.mxu0 %vm241_vm1, %v6225_v61  ;;  %4210 = vmatmul.msk.f32.vlgmr.msrb.gmra.mxu1 %vm241_vm1, %v6225_v61  ;;  %7693 = vst [vmem:[#allocation18_spill] sm:$0xff] %v6950_v32  ;;  %v3029_v23 = vld [vmem:[%s7674_s3 + $0x690] sm:$0x1] }
 0x1a2   :  { %4212 = vmatmul.msk.f32.vlgmr.msrb.gmra.mxu2 %vm241_vm1, %v6225_v61  ;;  %4214 = vmatmul.msk.f32.vlgmr.msrb.gmra.mxu3 %vm241_vm1, %v6225_v61 }
 0x1a3   :  { %4215 = vmatpush.msk.msra.mxu0 %vm245_vm0, %v3016_v50  ;;  %4217 = vmatpush.msk.msra.mxu1 %vm245_vm0, %v3017_v51  ;;  %v6952_v50 = vpop.f32.mrf.mxu3  ;;  %v2923_v51 = vld [vmem:[%s7674_s3 + $0x340] sm:$0xff] }
 0x1a4   :  { %4219 = vmatpush.msk.msra.mxu2 %vm245_vm0, %v3018_v63  ;;  %4221 = vmatpush.msk.msra.mxu3 %vm245_vm0, %v3019_v0  ;;  %7694 = vst [vmem:[#allocation19_spill] sm:$0xff] %v6952_v50  ;;  %v2924_v63 = vld [vmem:[%s7674_s3 + $0x348] sm:$0xff]  ;;  %v6960_v0 = vpop.f32.mrf.mxu2  ;;  %v2937_v50 = vld [vmem:[%s7674_s3 + $0x3b0] sm:$0xff] }
 0x1a5   :  { %3359 = vmatpush.msra.mxu0 %v2985_v1  ;;  %3379 = vmatpush.msra.mxu1 %v2986_v3  ;;  %7695 = vst [vmem:[#allocation20_spill] sm:$0xff] %v6960_v0  ;;  %v2925_v1 = vld [vmem:[%s7674_s3 + $0x350] sm:$0xff]  ;;  %v2926_v3 = vld [vmem:[%s7674_s3 + $0x358] sm:$0xff]  ;;  %v2907_v0 = vld [vmem:[%s7674_s3 + $0x2c0] sm:$0xff] }
 0x1a6   :  { %3399 = vmatpush.msra.mxu2 %v2987_v4  ;;  %3419 = vmatpush.msra.mxu3 %v2988_v5  ;;  %v2892_v4 = vld [vmem:[%s7674_s3 + $0x248] sm:$0xff]  ;;  %v2893_v5 = vld [vmem:[%s7674_s3 + $0x250] sm:$0xff] }
 0x1a7   :  { %3360 = vmatpush.msra.mxu0 %v2954_v11  ;;  %3380 = vmatpush.msra.mxu1 %v2955_v19  ;;  %v2894_v11 = vld [vmem:[%s7674_s3 + $0x258] sm:$0xff]  ;;  %v2895_v19 = vld [vmem:[%s7674_s3 + $0x260] sm:$0xff] }
 0x1a8   :  { %3400 = vmatpush.msra.mxu2 %v2956_v24  ;;  %3420 = vmatpush.msra.mxu3 %v2957_v28  ;;  %v2861_v24 = vld [vmem:[%s7674_s3 + $0x150] sm:$0xff]  ;;  %v2862_v28 = vld [vmem:[%s7674_s3 + $0x158] sm:$0xff] }
 0x1a9   :  { %3361 = vmatpush.msra.mxu0 %v2923_v51  ;;  %3381 = vmatpush.msra.mxu1 %v2924_v63  ;;  %v2863_v51 = vld [vmem:[%s7674_s3 + $0x160] sm:$0xff]  ;;  %v2864_v63 = vld [vmem:[%s7674_s3 + $0x168] sm:$0xff] }
 0x1aa   :  { %3401 = vmatpush.msra.mxu2 %v2925_v1  ;;  %3421 = vmatpush.msra.mxu3 %v2926_v3  ;;  %v2830_v1 = vld [vmem:[%s7674_s3 + $0x58] sm:$0xff]  ;;  %v2831_v3 = vld [vmem:[%s7674_s3 + $0x60] sm:$0xff] }
 0x1ab   :  { %3362 = vmatpush.msra.mxu0 %v2892_v4  ;;  %3382 = vmatpush.msra.mxu1 %v2893_v5  ;;  %v6998_v4 = vpop.f32.mrf.mxu1  ;;  %v2832_v5 = vld [vmem:[%s7674_s3 + $0x68] sm:$0xff]  ;;  %v7008_v45 = vpop.f32.mrf.mxu3 }
 0x1ac   :  { %3402 = vmatpush.msra.mxu2 %v2894_v11  ;;  %3422 = vmatpush.msra.mxu3 %v2895_v19  ;;  %7696 = vst [vmem:[#allocation21_spill] sm:$0xff] %v6998_v4  ;;  %v2833_v11 = vld [vmem:[%s7674_s3 + $0x70] sm:$0xff]  ;;  %v7006_v19 = vpop.f32.mrf.mxu0  ;;  %v7010_v15 = vpop.f32.mrf.mxu2 }
 0x1ad   :  { %3363 = vmatpush.msra.mxu0 %v2861_v24  ;;  %3383 = vmatpush.msra.mxu1 %v2862_v28  ;;  %7697 = vst [vmem:[#allocation22_spill] sm:$0xff] %v7006_v19  ;;  %v3020_v24 = vld [vmem:[%s7674_s3 + $0x648] sm:$0x1]  ;;  %v3021_v28 = vld [vmem:[%s7674_s3 + $0x650] sm:$0x1] }
 0x1ae   :  { %7698 = vst [vmem:[#allocation23_spill] sm:$0xff] %v7008_v45  ;;  %3403 = vmatpush.msra.mxu2 %v2863_v51  ;;  %3423 = vmatpush.msra.mxu3 %v2864_v63  ;;  %v3022_v51 = vld [vmem:[%s7674_s3 + $0x658] sm:$0x1]  ;;  %v3023_v63 = vld [vmem:[%s7674_s3 + $0x660] sm:$0x1] }
 0x1af   :  { %7699 = vst [vmem:[#allocation24_spill] sm:$0xff] %v7010_v15  ;;  %3364 = vmatpush.msra.mxu0 %v2830_v1  ;;  %3384 = vmatpush.msra.mxu1 %v2831_v3  ;;  %v2989_v1 = vld [vmem:[%s7674_s3 + $0x550] sm:$0xff]  ;;  %v2990_v3 = vld [vmem:[%s7674_s3 + $0x558] sm:$0xff] }
 0x1b0   :  { %3404 = vmatpush.msra.mxu2 %v2832_v5  ;;  %3424 = vmatpush.msra.mxu3 %v2833_v11  ;;  %v2991_v5 = vld [vmem:[%s7674_s3 + $0x560] sm:$0xff]  ;;  %v2958_v11 = vld [vmem:[%s7674_s3 + $0x458] sm:$0xff]  ;;  %v2901_v15 = vld [vmem:[%s7674_s3 + $0x290] sm:$0xff] }
 0x1b1   :  { %4216 = vmatmul.msk.f32.vlgmr.msra.gmra.mxu0 %vm241_vm1, %v6225_v61  ;;  %4218 = vmatmul.msk.f32.vlgmr.msra.gmra.mxu1 %vm241_vm1, %v6225_v61 }
 0x1b2   :  { %4220 = vmatmul.msk.f32.vlgmr.msra.gmra.mxu2 %vm241_vm1, %v6225_v61  ;;  %4222 = vmatmul.msk.f32.vlgmr.msra.gmra.mxu3 %vm241_vm1, %v6225_v61  ;;  %v2992_v61 = vld [vmem:[%s7674_s3 + $0x568] sm:$0xff] }
 0x1b3   :  { %4223 = vmatpush.msk.msrb.mxu0 %vm245_vm0, %v3020_v24  ;;  %4225 = vmatpush.msk.msrb.mxu1 %vm245_vm0, %v3021_v28  ;;  %v2959_v24 = vld [vmem:[%s7674_s3 + $0x460] sm:$0xff]  ;;  %v7054_v28 = vpop.f32.mrf.mxu1  ;;  %v7064_v16 = vpop.f32.mrf.mxu3 }
 0x1b4   :  { %4227 = vmatpush.msk.msrb.mxu2 %vm245_vm0, %v3022_v51  ;;  %4229 = vmatpush.msk.msrb.mxu3 %vm245_vm0, %v3023_v63  ;;  %7700 = vst [vmem:[#allocation25_spill] sm:$0xff] %v7054_v28  ;;  %v2961_v51 = vld [vmem:[%s7674_s3 + $0x470] sm:$0xff]  ;;  %v7062_v63 = vpop.f32.mrf.mxu0  ;;  %v2927_v28 = vld [vmem:[%s7674_s3 + $0x360] sm:$0xff] }
 0x1b5   :  { %3439 = vmatpush.msrb.mxu0 %v2989_v1  ;;  %3459 = vmatpush.msrb.mxu1 %v2990_v3  ;;  %7701 = vst [vmem:[#allocation26_spill] sm:$0xff] %v7062_v63  ;;  %v2928_v1 = vld [vmem:[%s7674_s3 + $0x368] sm:$0xff]  ;;  %v7072_v3 = vpop.f32.mrf.mxu2 }
 0x1b6   :  { %7702 = vst [vmem:[#allocation27_spill] sm:$0xff] %v7064_v16  ;;  %3479 = vmatpush.msrb.mxu2 %v2991_v5  ;;  %3499 = vmatpush.msrb.mxu3 %v2992_v61  ;;  %v2930_v5 = vld [vmem:[%s7674_s3 + $0x378] sm:$0xff]  ;;  %v2896_v61 = vld [vmem:[%s7674_s3 + $0x268] sm:$0xff]  ;;  %v2897_v16 = vld [vmem:[%s7674_s3 + $0x270] sm:$0xff] }
 0x1b7   :  { %7703 = vst [vmem:[#allocation28_spill] sm:$0xff] %v7072_v3  ;;  %3440 = vmatpush.msrb.mxu0 %v2958_v11  ;;  %3460 = vmatpush.msrb.mxu1 %v2959_v24  ;;  %v2898_v11 = vld [vmem:[%s7674_s3 + $0x278] sm:$0xff]  ;;  %v2899_v24 = vld [vmem:[%s7674_s3 + $0x280] sm:$0xff] }
 0x1b8   :  { %3480 = vmatpush.msrb.mxu2 %v2960_v38  ;;  %3500 = vmatpush.msrb.mxu3 %v2961_v51  ;;  %v2865_v38 = vld [vmem:[%s7674_s3 + $0x170] sm:$0xff]  ;;  %v2866_v51 = vld [vmem:[%s7674_s3 + $0x178] sm:$0xff] }
 0x1b9   :  { %3441 = vmatpush.msrb.mxu0 %v2927_v28  ;;  %3461 = vmatpush.msrb.mxu1 %v2928_v1  ;;  %v2867_v28 = vld [vmem:[%s7674_s3 + $0x180] sm:$0xff]  ;;  %v2868_v1 = vld [vmem:[%s7674_s3 + $0x188] sm:$0xff] }
 0x1ba   :  { %3481 = vmatpush.msrb.mxu2 %v2929_v12  ;;  %3501 = vmatpush.msrb.mxu3 %v2930_v5  ;;  %v2834_v12 = vld [vmem:[%s7674_s3 + $0x78] sm:$0xff]  ;;  %v2835_v5 = vld [vmem:[%s7674_s3 + $0x80] sm:$0xff] }
 0x1bb   :  { %3442 = vmatpush.msrb.mxu0 %v2896_v61  ;;  %3462 = vmatpush.msrb.mxu1 %v2897_v16  ;;  %v2836_v16 = vld [vmem:[%s7674_s3 + $0x88] sm:$0xff]  ;;  %v2837_v61 = vld [vmem:[%s7674_s3 + $0x90] sm:$0xff]  ;;  %v7120_v3 = vpop.f32.mrf.mxu3 }
 0x1bc   :  { %3482 = vmatpush.msrb.mxu2 %v2898_v11  ;;  %3502 = vmatpush.msrb.mxu3 %v2899_v24  ;;  %v7116_v11 = vpop.f32.mrf.mxu1  ;;  %v7118_v24 = vpop.f32.mrf.mxu0 }
 0x1bd   :  { %3443 = vmatpush.msrb.mxu0 %v2865_v38  ;;  %3463 = vmatpush.msrb.mxu1 %v2866_v51  ;;  %7704 = vst [vmem:[#allocation29_spill] sm:$0xff] %v7118_v24  ;;  %v7122_v4 = vpop.f32.mrf.mxu2  ;;  %v3024_v38 = vld [vmem:[%s7674_s3 + $0x668] sm:$0x1]  ;;  %v3025_v51 = vld [vmem:[%s7674_s3 + $0x670] sm:$0x1] }
 0x1be   :  { %3483 = vmatpush.msrb.mxu2 %v2867_v28  ;;  %3503 = vmatpush.msrb.mxu3 %v2868_v1  ;;  %v7133_v24 = vld [vmem:[%s7671_s4] sm:$0xf]  ;;  %v3026_v28 = vld [vmem:[%s7674_s3 + $0x678] sm:$0x1] }
 0x1bf   :  { %3444 = vmatpush.msrb.mxu0 %v2834_v12  ;;  %3464 = vmatpush.msrb.mxu1 %v2835_v5  ;;  %v3027_v1 = vld [vmem:[%s7674_s3 + $0x680] sm:$0x1]  ;;  %v2993_v12 = vld [vmem:[%s7674_s3 + $0x570] sm:$0xff]  ;;  %v2994_v5 = vld [vmem:[%s7674_s3 + $0x578] sm:$0xff] }
 0x1c0   :  { %3484 = vmatpush.msrb.mxu2 %v2836_v16  ;;  %3504 = vmatpush.msrb.mxu3 %v2837_v61  ;;  %v2995_v16 = vld [vmem:[%s7674_s3 + $0x580] sm:$0xff]  ;;  %v2996_v61 = vld [vmem:[%s7674_s3 + $0x588] sm:$0xff] }
 0x1c1   :  { %4224 = vmatmul.msk.f32.vlgmr.msrb.gmra.mxu0 %vm241_vm1, %v7133_v24  ;;  %4226 = vmatmul.msk.f32.vlgmr.msrb.gmra.mxu1 %vm241_vm1, %v7133_v24 }
 0x1c2   :  { %4228 = vmatmul.msk.f32.vlgmr.msrb.gmra.mxu2 %vm241_vm1, %v7133_v24  ;;  %4230 = vmatmul.msk.f32.vlgmr.msrb.gmra.mxu3 %vm241_vm1, %v7133_v24 }
 0x1c3   :  { %4231 = vmatpush.msk.msra.mxu0 %vm245_vm0, %v3024_v38  ;;  %4233 = vmatpush.msk.msra.mxu1 %vm245_vm0, %v3025_v51  ;;  %v2963_v38 = vld [vmem:[%s7674_s3 + $0x480] sm:$0xff]  ;;  %v2964_v51 = vld [vmem:[%s7674_s3 + $0x488] sm:$0xff]  ;;  %v7181_v7 = vpop.f32.mrf.mxu3 }
 0x1c4   :  { %4235 = vmatpush.msk.msra.mxu2 %vm245_vm0, %v3026_v28  ;;  %4237 = vmatpush.msk.msra.mxu3 %vm245_vm0, %v3027_v1  ;;  %v2965_v28 = vld [vmem:[%s7674_s3 + $0x490] sm:$0xff]  ;;  %v7177_v63 = vpop.f32.mrf.mxu1  ;;  %v7179_v1 = vpop.f32.mrf.mxu0 }
 0x1c5   :  { %3519 = vmatpush.msra.mxu0 %v2993_v12  ;;  %3539 = vmatpush.msra.mxu1 %v2994_v5  ;;  %v2931_v12 = vld [vmem:[%s7674_s3 + $0x380] sm:$0xff]  ;;  %v2932_v5 = vld [vmem:[%s7674_s3 + $0x388] sm:$0xff]  ;;  %v7189_v45 = vpop.f32.mrf.mxu2 }
 0x1c6   :  { %3559 = vmatpush.msra.mxu2 %v2995_v16  ;;  %3579 = vmatpush.msra.mxu3 %v2996_v61  ;;  %v2934_v16 = vld [vmem:[%s7674_s3 + $0x398] sm:$0xff]  ;;  %v2900_v61 = vld [vmem:[%s7674_s3 + $0x288] sm:$0xff] }
 0x1c7   :  { %3520 = vmatpush.msra.mxu0 %v2962_v39  ;;  %3540 = vmatpush.msra.mxu1 %v2963_v38  ;;  %v2902_v39 = vld [vmem:[%s7674_s3 + $0x298] sm:$0xff]  ;;  %v2903_v38 = vld [vmem:[%s7674_s3 + $0x2a0] sm:$0xff] }
 0x1c8   :  { %3560 = vmatpush.msra.mxu2 %v2964_v51  ;;  %3580 = vmatpush.msra.mxu3 %v2965_v28  ;;  %v2869_v51 = vld [vmem:[%s7674_s3 + $0x190] sm:$0xff]  ;;  %v2870_v28 = vld [vmem:[%s7674_s3 + $0x198] sm:$0xff] }
 0x1c9   :  { %3521 = vmatpush.msra.mxu0 %v2931_v12  ;;  %3541 = vmatpush.msra.mxu1 %v2932_v5  ;;  %v2871_v12 = vld [vmem:[%s7674_s3 + $0x1a0] sm:$0xff]  ;;  %v2872_v5 = vld [vmem:[%s7674_s3 + $0x1a8] sm:$0xff] }
 0x1ca   :  { %3561 = vmatpush.msra.mxu2 %v2933_v43  ;;  %3581 = vmatpush.msra.mxu3 %v2934_v16  ;;  %v2838_v43 = vld [vmem:[%s7674_s3 + $0x98] sm:$0xff]  ;;  %v2839_v16 = vld [vmem:[%s7674_s3 + $0xa0] sm:$0xff] }
 0x1cb   :  { %3522 = vmatpush.msra.mxu0 %v2900_v61  ;;  %3542 = vmatpush.msra.mxu1 %v2901_v15  ;;  %v2840_v15 = vld [vmem:[%s7674_s3 + $0xa8] sm:$0xff]  ;;  %v2841_v61 = vld [vmem:[%s7674_s3 + $0xb0] sm:$0xff]  ;;  %v7237_v47 = vpop.f32.mrf.mxu3 }
 0x1cc   :  { %3562 = vmatpush.msra.mxu2 %v2902_v39  ;;  %3582 = vmatpush.msra.mxu3 %v2903_v38  ;;  %v7233_v39 = vpop.f32.mrf.mxu1  ;;  %v7235_v38 = vpop.f32.mrf.mxu0 }
 0x1cd   :  { %3523 = vmatpush.msra.mxu0 %v2869_v51  ;;  %3543 = vmatpush.msra.mxu1 %v2870_v28  ;;  %v7239_v51 = vpop.f32.mrf.mxu2  ;;  %v3028_v28 = vld [vmem:[%s7674_s3 + $0x688] sm:$0x1] }
 0x1ce   :  { %3563 = vmatpush.msra.mxu2 %v2871_v12  ;;  %3583 = vmatpush.msra.mxu3 %v2872_v5  ;;  %v3030_v12 = vld [vmem:[%s7674_s3 + $0x698] sm:$0x1]  ;;  %v3031_v5 = vld [vmem:[%s7674_s3 + $0x6a0] sm:$0x1] }
 0x1cf   :  { %3524 = vmatpush.msra.mxu0 %v2838_v43  ;;  %3544 = vmatpush.msra.mxu1 %v2839_v16  ;;  %v2997_v43 = vld [vmem:[%s7674_s3 + $0x590] sm:$0xff]  ;;  %v2998_v16 = vld [vmem:[%s7674_s3 + $0x598] sm:$0xff] }
 0x1d0   :  { %3564 = vmatpush.msra.mxu2 %v2840_v15  ;;  %3584 = vmatpush.msra.mxu3 %v2841_v61  ;;  %v2999_v15 = vld [vmem:[%s7674_s3 + $0x5a0] sm:$0xff]  ;;  %v3000_v61 = vld [vmem:[%s7674_s3 + $0x5a8] sm:$0xff] }
 0x1d1   :  { %4232 = vmatmul.msk.f32.vlgmr.msra.gmra.mxu0 %vm241_vm1, %v7133_v24  ;;  %4234 = vmatmul.msk.f32.vlgmr.msra.gmra.mxu1 %vm241_vm1, %v7133_v24 }
 0x1d2   :  { %4236 = vmatmul.msk.f32.vlgmr.msra.gmra.mxu2 %vm241_vm1, %v7133_v24  ;;  %4238 = vmatmul.msk.f32.vlgmr.msra.gmra.mxu3 %vm241_vm1, %v7133_v24 }
 0x1d3   :  { %4239 = vmatpush.msk.msrb.mxu0 %vm245_vm0, %v3028_v28  ;;  %4241 = vmatpush.msk.msrb.mxu1 %vm245_vm0, %v3029_v23  ;;  %v2967_v23 = vld [vmem:[%s7674_s3 + $0x4a0] sm:$0xff]  ;;  %v2968_v28 = vld [vmem:[%s7674_s3 + $0x4a8] sm:$0xff]  ;;  %v7299_v37 = vpop.f32.mrf.mxu3 }
 0x1d4   :  { %4243 = vmatpush.msk.msrb.mxu2 %vm245_vm0, %v3030_v12  ;;  %4245 = vmatpush.msk.msrb.mxu3 %vm245_vm0, %v3031_v5  ;;  %v2969_v12 = vld [vmem:[%s7674_s3 + $0x4b0] sm:$0xff]  ;;  %v7289_v19 = vpop.f32.mrf.mxu1  ;;  %v2935_v5 = vld [vmem:[%s7674_s3 + $0x3a0] sm:$0xff] }
 0x1d5   :  { %3599 = vmatpush.msrb.mxu0 %v2997_v43  ;;  %3619 = vmatpush.msrb.mxu1 %v2998_v16  ;;  %v2936_v43 = vld [vmem:[%s7674_s3 + $0x3a8] sm:$0xff]  ;;  %v7297_v16 = vpop.f32.mrf.mxu0 }
 0x1d6   :  { %3639 = vmatpush.msrb.mxu2 %v2999_v15  ;;  %3659 = vmatpush.msrb.mxu3 %v3000_v61  ;;  %v2938_v15 = vld [vmem:[%s7674_s3 + $0x3b8] sm:$0xff]  ;;  %v7307_v61 = vpop.f32.mrf.mxu2 }
 0x1d7   :  { %3600 = vmatpush.msrb.mxu0 %v2966_v13  ;;  %3620 = vmatpush.msrb.mxu1 %v2967_v23  ;;  %v2905_v13 = vld [vmem:[%s7674_s3 + $0x2b0] sm:$0xff]  ;;  %v2906_v23 = vld [vmem:[%s7674_s3 + $0x2b8] sm:$0xff] }
 0x1d8   :  { %3640 = vmatpush.msrb.mxu2 %v2968_v28  ;;  %3660 = vmatpush.msrb.mxu3 %v2969_v12  ;;  %v2873_v28 = vld [vmem:[%s7674_s3 + $0x1b0] sm:$0xff]  ;;  %v2874_v12 = vld [vmem:[%s7674_s3 + $0x1b8] sm:$0xff] }
 0x1d9   :  { %3601 = vmatpush.msrb.mxu0 %v2935_v5  ;;  %3621 = vmatpush.msrb.mxu1 %v2936_v43  ;;  %v2875_v5 = vld [vmem:[%s7674_s3 + $0x1c0] sm:$0xff]  ;;  %v2876_v43 = vld [vmem:[%s7674_s3 + $0x1c8] sm:$0xff] }
 0x1da   :  { %3641 = vmatpush.msrb.mxu2 %v2937_v50  ;;  %3661 = vmatpush.msrb.mxu3 %v2938_v15  ;;  %v2842_v50 = vld [vmem:[%s7674_s3 + $0xb8] sm:$0xff]  ;;  %v2843_v15 = vld [vmem:[%s7674_s3 + $0xc0] sm:$0xff] }
 0x1db   :  { %3602 = vmatpush.msrb.mxu0 %v2904_v18  ;;  %3622 = vmatpush.msrb.mxu1 %v2905_v13  ;;  %v2844_v18 = vld [vmem:[%s7674_s3 + $0xc8] sm:$0xff]  ;;  %v2845_v13 = vld [vmem:[%s7674_s3 + $0xd0] sm:$0xff] }
 0x1dc   :  { %3642 = vmatpush.msrb.mxu2 %v2906_v23  ;;  %3662 = vmatpush.msrb.mxu3 %v2907_v0  ;;  %v7347_v23 = vpop.f32.mrf.mxu3 }
 0x1dd   :  { %3603 = vmatpush.msrb.mxu0 %v2873_v28  ;;  %3623 = vmatpush.msrb.mxu1 %v2874_v12  ;;  %v7345_v0 = vpop.f32.mrf.mxu0  ;;  %7705 = vst [vmem:[#allocation30_spill] sm:$0xff] %v7347_v23  ;;  %v7351_v28 = vpop.f32.mrf.mxu1  ;;  %v3032_v12 = vld [vmem:[%s7674_s3 + $0x6a8] sm:$0x1] }
 0x1de   :  { %3643 = vmatpush.msrb.mxu2 %v2875_v5  ;;  %3663 = vmatpush.msrb.mxu3 %v2876_v43  ;;  %v7349_v26 = vpop.f32.mrf.mxu2  ;;  %7706 = vst [vmem:[#allocation31_spill] sm:$0xff] %v7351_v28  ;;  %v3033_v5 = vld [vmem:[%s7674_s3 + $0x6b0] sm:$0x1]  ;;  %v3034_v43 = vld [vmem:[%s7674_s3 + $0x6b8] sm:$0x1]  ;;  %v3004_v28 = vld [vmem:[%s7674_s3 + $0x5c8] sm:$0xff] }
 0x1df   :  { %3604 = vmatpush.msrb.mxu0 %v2842_v50  ;;  %3624 = vmatpush.msrb.mxu1 %v2843_v15  ;;  %v3035_v50 = vld [vmem:[%s7674_s3 + $0x6c0] sm:$0x1]  ;;  %v3001_v15 = vld [vmem:[%s7674_s3 + $0x5b0] sm:$0xff]  ;;  %v2940_v23 = vld [vmem:[%s7674_s3 + $0x3c8] sm:$0xff] }
 0x1e0   :  { %3644 = vmatpush.msrb.mxu2 %v2844_v18  ;;  %3664 = vmatpush.msrb.mxu3 %v2845_v13  ;;  %v3002_v18 = vld [vmem:[%s7674_s3 + $0x5b8] sm:$0xff]  ;;  %v3003_v13 = vld [vmem:[%s7674_s3 + $0x5c0] sm:$0xff] }
 0x1e1   :  { %4240 = vmatmul.msk.f32.vlgmr.msrb.gmra.mxu0 %vm241_vm1, %v7133_v24  ;;  %4242 = vmatmul.msk.f32.vlgmr.msrb.gmra.mxu1 %vm241_vm1, %v7133_v24 }
 0x1e2   :  { %4244 = vmatmul.msk.f32.vlgmr.msrb.gmra.mxu2 %vm241_vm1, %v7133_v24  ;;  %4246 = vmatmul.msk.f32.vlgmr.msrb.gmra.mxu3 %vm241_vm1, %v7133_v24 }
 0x1e3   :  { %4247 = vmatpush.msk.msra.mxu0 %vm245_vm0, %v3032_v12  ;;  %4249 = vmatpush.msk.msra.mxu1 %vm245_vm0, %v3033_v5  ;;  %v2971_v12 = vld [vmem:[%s7674_s3 + $0x4c0] sm:$0xff]  ;;  %v2972_v5 = vld [vmem:[%s7674_s3 + $0x4c8] sm:$0xff] }
 0x1e4   :  { %4251 = vmatpush.msk.msra.mxu2 %vm245_vm0, %v3034_v43  ;;  %4253 = vmatpush.msk.msra.mxu3 %vm245_vm0, %v3035_v50  ;;  %v2973_v43 = vld [vmem:[%s7674_s3 + $0x4d0] sm:$0xff]  ;;  %v2939_v50 = vld [vmem:[%s7674_s3 + $0x3c0] sm:$0xff] }
 0x1e5   :  { %3679 = vmatpush.msra.mxu0 %v3001_v15  ;;  %3699 = vmatpush.msra.mxu1 %v3002_v18  ;;  %v7407_v15 = vpop.f32.mrf.mxu0  ;;  %v7409_v18 = vpop.f32.mrf.mxu3 }
 0x1e6   :  { %3719 = vmatpush.msra.mxu2 %v3003_v13  ;;  %3739 = vmatpush.msra.mxu3 %v3004_v28  ;;  %7707 = vst [vmem:[#allocation32_spill] sm:$0xff] %v7407_v15  ;;  %v2942_v28 = vld [vmem:[%s7674_s3 + $0x3d8] sm:$0xff]  ;;  %v7417_v13 = vpop.f32.mrf.mxu2  ;;  %v2908_v15 = vld [vmem:[%s7674_s3 + $0x2c8] sm:$0xff] }
 0x1e7   :  { %7708 = vst [vmem:[#allocation33_spill] sm:$0xff] %v7409_v18  ;;  %3680 = vmatpush.msra.mxu0 %v2970_v27  ;;  %3700 = vmatpush.msra.mxu1 %v2971_v12  ;;  %v2909_v27 = vld [vmem:[%s7674_s3 + $0x2d0] sm:$0xff]  ;;  %v2910_v12 = vld [vmem:[%s7674_s3 + $0x2d8] sm:$0xff]  ;;  %v2911_v18 = vld [vmem:[%s7674_s3 + $0x2e0] sm:$0xff] }
 0x1e8   :  { %7709 = vst [vmem:[#allocation34_spill] sm:$0xff] %v7417_v13  ;;  %3720 = vmatpush.msra.mxu2 %v2972_v5  ;;  %3740 = vmatpush.msra.mxu3 %v2973_v43  ;;  %v7431_v5 = vpop.f32.mrf.mxu1  ;;  %v2877_v43 = vld [vmem:[%s7674_s3 + $0x1d0] sm:$0xff] }
 0x1e9   :  { %3681 = vmatpush.msra.mxu0 %v2939_v50  ;;  %3701 = vmatpush.msra.mxu1 %v2940_v23  ;;  %7710 = vst [vmem:[#allocation35_spill] sm:$0xff] %v7431_v5  ;;  %v2878_v23 = vld [vmem:[%s7674_s3 + $0x1d8] sm:$0xff]  ;;  %v2879_v50 = vld [vmem:[%s7674_s3 + $0x1e0] sm:$0xff]  ;;  %v2880_v5 = vld [vmem:[%s7674_s3 + $0x1e8] sm:$0xff] }
 0x1ea   :  { %3721 = vmatpush.msra.mxu2 %v2941_v49  ;;  %3741 = vmatpush.msra.mxu3 %v2942_v28  ;;  %v2846_v49 = vld [vmem:[%s7674_s3 + $0xd8] sm:$0xff]  ;;  %v2847_v28 = vld [vmem:[%s7674_s3 + $0xe0] sm:$0xff] }
 0x1eb   :  { %3682 = vmatpush.msra.mxu0 %v2908_v15  ;;  %3702 = vmatpush.msra.mxu1 %v2909_v27  ;;  %v2848_v15 = vld [vmem:[%s7674_s3 + $0xe8] sm:$0xff]  ;;  %v2849_v27 = vld [vmem:[%s7674_s3 + $0xf0] sm:$0xff] }
 0x1ec   :  { %3722 = vmatpush.msra.mxu2 %v2910_v12  ;;  %3742 = vmatpush.msra.mxu3 %v2911_v18 }
 0x1ed   :  { %3683 = vmatpush.msra.mxu0 %v2877_v43  ;;  %3703 = vmatpush.msra.mxu1 %v2878_v23  ;;  %v7459_v12 = vpop.f32.mrf.mxu0 }
 0x1ee   :  { %3723 = vmatpush.msra.mxu2 %v2879_v50  ;;  %3743 = vmatpush.msra.mxu3 %v2880_v5  ;;  %v7457_v18 = vpop.f32.mrf.mxu2  ;;  %7712 = vst [vmem:[#allocation37_spill] sm:$0xff] %v7459_v12  ;;  %v7461_v43 = vpop.f32.mrf.mxu3  ;;  %v3750_v12 = vmax.f32 %v6174_v42, %v6727_v20 }
 0x1ef   :  { %3684 = vmatpush.msra.mxu0 %v2846_v49  ;;  %3704 = vmatpush.msra.mxu1 %v2847_v28  ;;  %7711 = vst [vmem:[#allocation36_spill] sm:$0xff] %v7457_v18 }
 0x1f0   :  { %3724 = vmatpush.msra.mxu2 %v2848_v15  ;;  %3744 = vmatpush.msra.mxu3 %v2849_v27  ;;  %7713 = vst [vmem:[#allocation38_spill] sm:$0xff] %v7461_v43  ;;  %v3749_v15 = vmax.f32 %v6220_v60, %v6671_v48 }
 0x1f1   :  { %4248 = vmatmul.msk.f32.vlgmr.msra.gmra.mxu0 %vm241_vm1, %v7133_v24  ;;  %4250 = vmatmul.msk.f32.vlgmr.msra.gmra.mxu1 %vm241_vm1, %v7133_v24 }
 0x1f2   :  { %4252 = vmatmul.msk.f32.vlgmr.msra.gmra.mxu2 %vm241_vm1, %v7133_v24  ;;  %4254 = vmatmul.msk.f32.vlgmr.msra.gmra.mxu3 %vm241_vm1, %v7133_v24 }
 0x1f3   :  { %v7471_v5 = vpop.f32.mrf.mxu1 }
 0x1f4   :  { %7714 = vst [vmem:[#allocation39_spill] sm:$0xff] %v7471_v5 }
 0x1f8   :  { %v7475_v50 = vpop.f32.mrf.mxu0 }
 0x1f9   :  { %v7473_v23 = vpop.f32.mrf.mxu2  ;;  %7716 = vst [vmem:[#allocation41_spill] sm:$0xff] %v7475_v50  ;;  %v3751_v50 = vmax.f32 %v6271_v9, %v6669_v46 }
 0x1fa   :  { %7715 = vst [vmem:[#allocation40_spill] sm:$0xff] %v7473_v23  ;;  %v7477_v49 = vpop.f32.mrf.mxu3 }
 0x1fb   :  { %7717 = vst [vmem:[#allocation42_spill] sm:$0xff] %v7477_v49 }
 0x1fd   :  { %v3146_v28 = vpop.f32.mrf.mxu1 }
 0x1fe   :  { %v3780_v27 = vmax.f32 %v7122_v4, %v3146_v28 }
 0x200   :  { %v3811_v43 = vmax.f32 %v3749_v15, %v3780_v27 }
 0x203   :  { %v3166_v18 = vpop.f32.mrf.mxu2 }
 0x204   :  { %v7484_v24 = vpop.f32.mrf.mxu0  ;;  %v3781_v5 = vmax.f32 %v7120_v3, %v3166_v18  ;;  %v3186_v23 = vpop.f32.mrf.mxu3  ;;  %v3752_v3 = vmax.f32 %v6247_v2, %v6737_v25 }
 0x205   :  { %v3782_v49 = vmax.f32 %v7179_v1, %v3186_v23 }
 0x206   :  { %v3812_v13 = vmax.f32 %v3750_v12, %v3781_v5  ;;  %v3753_v5 = vmax.f32 %v6293_v17, %v6729_v21 }
 0x207   :  { %v7490_v32 = vpop.permute.xlu0 %3845  ;;  %v3813_v60 = vmax.f32 %v3751_v50, %v3782_v49 }
 0x208   :  { %v3848_v48 = vadd.f32 %v7490_v32, %v3811_v43  ;;  %v3849_v4 = vadd.f32 %v7490_v32, %v3812_v13 }
 0x209   :  { %v3850_v12 = vadd.f32 %v7490_v32, %v3813_v60 }
 0x20a   :  { %v3880_v28 = vmax.f32 %v3849_v4, 0.0  ;;  %v3879_v42 = vmax.f32 %v3848_v48, 0.0 }
 0x20b   :  { %v3881_v49 = vmax.f32 %v3850_v12, 0.0 }
 0x20c   :  { %v3940_v20 = vrot.slane %v3880_v28, 4 }
 0x20d   :  { %v3206_v15 = vpop.f32.mrf.mxu0  ;;  %v3226_v1 = vpop.f32.mrf.mxu1 }
 0x20e   :  { %v3956_v9 = vsel %vm3955_vm2, %v3879_v42, %v3940_v20  ;;  %v3783_v46 = vmax.f32 %v7116_v11, %v3206_v15  ;;  %v3784_v13 = vmax.f32 %v7189_v45, %v3226_v1  ;;  %v3754_v11 = vmax.f32 %v6212_v55, %v6779_v54 }
 0x20f   :  { %3986 = vst [vmem:[%s7676_s6] sm:$0xff] %v3956_v9  ;;  %v3756_v20 = vmax.f32 %v6307_v22, %v6783_v59  ;;  %v3757_v22 = vmax.f32 %v6337_v33, %v6781_v57 }
 0x210   :  { %v3814_v18 = vmax.f32 %v3752_v3, %v3783_v46  ;;  %v3815_v23 = vmax.f32 %v3753_v5, %v3784_v13 }
 0x212   :  { %v3851_v43 = vadd.f32 %v7490_v32, %v3814_v18  ;;  %v3852_v17 = vadd.f32 %v7490_v32, %v3815_v23 }
 0x214   :  { %v3882_v2 = vmax.f32 %v3851_v43, 0.0  ;;  %v3246_v25 = vpop.f32.mrf.mxu2  ;;  %v3266_v4 = vpop.f32.mrf.mxu3  ;;  %v3883_v54 = vmax.f32 %v3852_v17, 0.0 }
 0x215   :  { %v3785_v50 = vmax.f32 %v7181_v7, %v3246_v25  ;;  %v3786_v55 = vmax.f32 %v7235_v38, %v3266_v4  ;;  %v3755_v7 = vmax.f32 %v6327_v29, %v6719_v8 }
 0x216   :  { %v3941_v27 = vrot.slane %v3882_v2, 4 }
 0x217   :  { %v3816_v48 = vmax.f32 %v3754_v11, %v3785_v50  ;;  %v3817_v3 = vmax.f32 %v3755_v7, %v3786_v55 }
 0x218   :  { %v3957_v45 = vsel %vm3955_vm2, %v3881_v49, %v3941_v27  ;;  %v3760_v49 = vmax.f32 %v6359_v36, %v6848_v41  ;;  %v3761_v36 = vmax.f32 %v6405_v52, %v6840_v56 }
 0x219   :  { %3987 = vst [vmem:[%s7676_s6 + $0x8] sm:$0xff] %v3957_v45  ;;  %v3853_v21 = vadd.f32 %v7490_v32, %v3816_v48  ;;  %v3854_v29 = vadd.f32 %v7490_v32, %v3817_v3 }
 0x21b   :  { %v3884_v60 = vmax.f32 %v3853_v21, 0.0  ;;  %v3885_v43 = vmax.f32 %v3854_v29, 0.0 }
 0x21d   :  { %v3942_v28 = vrot.slane %v3884_v60, 4 }
 0x21e   :  { %v3286_v42 = vpop.f32.mrf.mxu0  ;;  %v3306_v46 = vpop.f32.mrf.mxu1 }
 0x21f   :  { %v3958_v15 = vsel %vm3955_vm2, %v3883_v54, %v3942_v28  ;;  %v3787_v9 = vmax.f32 %v7177_v63, %v3286_v42  ;;  %v3788_v1 = vmax.f32 %v7239_v51, %v3306_v46  ;;  %v3758_v63 = vmax.f32 %v6285_v14, %v6838_v58 }
 0x220   :  { %3988 = vst [vmem:[%s7676_s6 + $0x10] sm:$0xff] %v3958_v15 }
 0x221   :  { %v3818_v38 = vmax.f32 %v3756_v20, %v3787_v9  ;;  %v3819_v13 = vmax.f32 %v3757_v22, %v3788_v1  ;;  %v3764_v9 = vmax.f32 %v6419_v62, %v6898_v40  ;;  %v3765_v62 = vmax.f32 %v6447_v10, %v6896_v35 }
 0x223   :  { %v3855_v8 = vadd.f32 %v7490_v32, %v3818_v38  ;;  %v3856_v33 = vadd.f32 %v7490_v32, %v3819_v13  ;;  %v7720_v13 = vld [vmem:[#allocation30_spill] sm:$0xff] }
 0x225   :  { %v3886_v59 = vmax.f32 %v3855_v8, 0.0  ;;  %v3326_v18 = vpop.f32.mrf.mxu2  ;;  %v3346_v25 = vpop.f32.mrf.mxu3  ;;  %v3887_v58 = vmax.f32 %v3856_v33, 0.0 }
 0x226   :  { %v3789_v12 = vmax.f32 %v7237_v47, %v3326_v18  ;;  %v3790_v11 = vmax.f32 %v7297_v16, %v3346_v25  ;;  %v3759_v47 = vmax.f32 %v6383_v44, %v6777_v53 }
 0x227   :  { %v3943_v5 = vrot.slane %v3886_v59, 4  ;;  %v7719_v59 = vld [vmem:[#allocation2_spill] sm:$0xff] }
 0x228   :  { %v3820_v2 = vmax.f32 %v3758_v63, %v3789_v12  ;;  %v3821_v27 = vmax.f32 %v3759_v47, %v3790_v11  ;;  %v7722_v11 = vld [vmem:[#allocation16_spill] sm:$0xff] }
 0x229   :  { %v3959_v51 = vsel %vm3955_vm2, %v3885_v43, %v3943_v5 }
 0x22a   :  { %3989 = vst [vmem:[%s7676_s6 + $0x18] sm:$0xff] %v3959_v51  ;;  %v3857_v57 = vadd.f32 %v7490_v32, %v3820_v2  ;;  %v3858_v44 = vadd.f32 %v7490_v32, %v3821_v27  ;;  %v7721_v51 = vld [vmem:[#allocation32_spill] sm:$0xff] }
 0x22b   :  { %v7725_v27 = vld [vmem:[#allocation4_spill] sm:$0xff] }
 0x22c   :  { %v3888_v14 = vmax.f32 %v3857_v57, 0.0  ;;  %v3889_v7 = vmax.f32 %v3858_v44, 0.0 }
 0x22e   :  { %v3944_v23 = vrot.slane %v3888_v14, 4  ;;  %v3366_v50 = vpop.f32.mrf.mxu0  ;;  %v3386_v45 = vpop.f32.mrf.mxu1  ;;  %v7723_v14 = vld [vmem:[#allocation5_spill] sm:$0xff] }
 0x22f   :  { %v3791_v48 = vmax.f32 %v7233_v39, %v3366_v50  ;;  %v3792_v17 = vmax.f32 %v7307_v61, %v3386_v45  ;;  %v3762_v39 = vmax.f32 %v6329_v30, %v6894_v34  ;;  %v3767_v47 = vmax.f32 %v7723_v14, %v7722_v11 }
 0x230   :  { %v3960_v4 = vsel %vm3955_vm2, %v3887_v58, %v3944_v23 }
 0x231   :  { %3990 = vst [vmem:[%s7676_s6 + $0x20] sm:$0xff] %v3960_v4  ;;  %v3822_v16 = vmax.f32 %v3760_v49, %v3791_v48  ;;  %v3823_v60 = vmax.f32 %v3761_v36, %v3792_v17  ;;  %v7724_v49 = vld [vmem:[#allocation20_spill] sm:$0xff]  ;;  %v7726_v4 = vld [vmem:[#allocation31_spill] sm:$0xff]  ;;  %v7727_v36 = vld [vmem:[#allocation34_spill] sm:$0xff] }
 0x232   :  { %v3768_v48 = vmax.f32 %v7725_v27, %v7724_v49  ;;  %v7744_v49 = vld [vmem:[#allocation38_spill] sm:$0xff] }
 0x233   :  { %v3859_v53 = vadd.f32 %v7490_v32, %v3822_v16  ;;  %v3860_v52 = vadd.f32 %v7490_v32, %v3823_v60  ;;  %v7728_v60 = vld [vmem:[#allocation19_spill] sm:$0xff] }
 0x235   :  { %v3890_v41 = vmax.f32 %v3859_v53, 0.0  ;;  %v3406_v21 = vpop.f32.mrf.mxu2  ;;  %v3426_v42 = vpop.f32.mrf.mxu3  ;;  %v3891_v34 = vmax.f32 %v3860_v52, 0.0 }
 0x236   :  { %v3793_v55 = vmax.f32 %v7299_v37, %v3406_v21  ;;  %v3794_v20 = vmax.f32 %v7345_v0, %v3426_v42  ;;  %v3763_v37 = vmax.f32 %v6439_v6, %v6830_v31  ;;  %v7730_v42 = vld [vmem:[#allocation22_spill] sm:$0xff] }
 0x237   :  { %v3945_v54 = vrot.slane %v3890_v41, 4 }
 0x238   :  { %v3824_v28 = vmax.f32 %v3762_v39, %v3793_v55  ;;  %v3825_v46 = vmax.f32 %v3763_v37, %v3794_v20  ;;  %v7729_v55 = vld [vmem:[#allocation6_spill] sm:$0xff]  ;;  %v7732_v20 = vld [vmem:[#allocation33_spill] sm:$0xff] }
 0x239   :  { %v3961_v61 = vsel %vm3955_vm2, %v3889_v7, %v3945_v54  ;;  %v3769_v7 = vmax.f32 %v7729_v55, %v7728_v60  ;;  %v7747_v60 = vld [vmem:[#allocation11_spill] sm:$0xff] }
 0x23a   :  { %3991 = vst [vmem:[%s7676_s6 + $0x28] sm:$0xff] %v3961_v61  ;;  %v3861_v56 = vadd.f32 %v7490_v32, %v3824_v28  ;;  %v3862_v6 = vadd.f32 %v7490_v32, %v3825_v46  ;;  %v7731_v61 = vld [vmem:[#allocation3_spill] sm:$0xff] }
 0x23b   :  { %v3770_v52 = vmax.f32 %v7731_v61, %v7730_v42  ;;  %v7748_v42 = vld [vmem:[#allocation28_spill] sm:$0xff]  ;;  %v7749_v61 = vld [vmem:[#allocation13_spill] sm:$0xff] }
 0x23c   :  { %v3892_v30 = vmax.f32 %v3861_v56, 0.0  ;;  %v3893_v43 = vmax.f32 %v3862_v6, 0.0  ;;  %v7735_v6 = vld [vmem:[#allocation9_spill] sm:$0xff] }
 0x23e   :  { %v3946_v15 = vrot.slane %v3892_v30, 4  ;;  %v3446_v3 = vpop.f32.mrf.mxu0  ;;  %v3466_v1 = vpop.f32.mrf.mxu1 }
 0x23f   :  { %v3795_v38 = vmax.f32 %v7289_v19, %v3446_v3  ;;  %v3796_v8 = vmax.f32 %v7349_v26, %v3466_v1  ;;  %v7718_v19 = vld [vmem:[#allocation18_spill] sm:$0xff]  ;;  %v7733_v1 = vld [vmem:[#allocation37_spill] sm:$0xff] }
 0x240   :  { %v3962_v29 = vsel %vm3955_vm2, %v3891_v34, %v3946_v15  ;;  %v3766_v18 = vmax.f32 %v7719_v59, %v7718_v19  ;;  %v7736_v19 = vld [vmem:[#allocation24_spill] sm:$0xff] }
 0x241   :  { %3992 = vst [vmem:[%s7676_s6 + $0x30] sm:$0xff] %v3962_v29  ;;  %v3826_v0 = vmax.f32 %v3764_v9, %v3795_v38  ;;  %v3827_v63 = vmax.f32 %v3765_v62, %v3796_v8  ;;  %v7734_v8 = vld [vmem:[#allocation17_spill] sm:$0xff]  ;;  %v7737_v59 = vld [vmem:[#allocation8_spill] sm:$0xff] }
 0x243   :  { %v3863_v31 = vadd.f32 %v7490_v32, %v3826_v0  ;;  %v3864_v10 = vadd.f32 %v7490_v32, %v3827_v63 }
 0x245   :  { %v3894_v40 = vmax.f32 %v3863_v31, 0.0  ;;  %v3486_v22 = vpop.f32.mrf.mxu2  ;;  %v3506_v25 = vpop.f32.mrf.mxu3  ;;  %v3895_v58 = vmax.f32 %v3864_v10, 0.0  ;;  %v3771_v31 = vmax.f32 %v7735_v6, %v7734_v8  ;;  %v7754_v8 = vld [vmem:[#allocation29_spill] sm:$0xff]  ;;  %v7755_v6 = vld [vmem:[#allocation12_spill] sm:$0xff] }
 0x246   :  { %v3797_v12 = vmax.f32 %v7720_v13, %v3486_v22  ;;  %v3798_v33 = vmax.f32 %v7721_v51, %v3506_v25  ;;  %v7738_v13 = vld [vmem:[#allocation35_spill] sm:$0xff]  ;;  %v7739_v25 = vld [vmem:[#allocation36_spill] sm:$0xff] }
 0x247   :  { %v3947_v5 = vrot.slane %v3894_v40, 4  ;;  %v7740_v51 = vld [vmem:[#allocation23_spill] sm:$0xff] }
 0x248   :  { %v3828_v2 = vmax.f32 %v3766_v18, %v3797_v12  ;;  %v3829_v45 = vmax.f32 %v3767_v47, %v3798_v33  ;;  %v3772_v18 = vmax.f32 %v7737_v59, %v7736_v19  ;;  %v7741_v33 = vld [vmem:[#allocation10_spill] sm:$0xff]  ;;  %v7756_v19 = vld [vmem:[#allocation25_spill] sm:$0xff]  ;;  %v7757_v59 = vld [vmem:[#allocation15_spill] sm:$0xff] }
 0x249   :  { %v3963_v26 = vsel %vm3955_vm2, %v3893_v43, %v3947_v5  ;;  %v7742_v47 = vld [vmem:[#allocation26_spill] sm:$0xff] }
 0x24a   :  { %3993 = vst [vmem:[%s7676_s6 + $0x38] sm:$0xff] %v3963_v26  ;;  %v3865_v35 = vadd.f32 %v7490_v32, %v3828_v2  ;;  %v3866_v21 = vadd.f32 %v7490_v32, %v3829_v45 }
 0x24c   :  { %v3896_v57 = vmax.f32 %v3865_v35, 0.0  ;;  %v3897_v37 = vmax.f32 %v3866_v21, 0.0 }
 0x24e   :  { %v3948_v23 = vrot.slane %v3896_v57, 4  ;;  %v3526_v50 = vpop.f32.mrf.mxu0  ;;  %v3546_v17 = vpop.f32.mrf.mxu1  ;;  %v3773_v57 = vmax.f32 %v7741_v33, %v7740_v51 }
 0x24f   :  { %v3799_v16 = vmax.f32 %v7726_v4, %v3526_v50  ;;  %v3800_v41 = vmax.f32 %v7727_v36, %v3546_v17  ;;  %v7745_v36 = vld [vmem:[#allocation41_spill] sm:$0xff] }
 0x250   :  { %v3964_v44 = vsel %vm3955_vm2, %v3895_v58, %v3948_v23  ;;  %v7743_v58 = vld [vmem:[#allocation7_spill] sm:$0xff] }
 0x251   :  { %3994 = vst [vmem:[%s7676_s6 + $0x40] sm:$0xff] %v3964_v44  ;;  %v3830_v53 = vmax.f32 %v3768_v48, %v3799_v16  ;;  %v3831_v56 = vmax.f32 %v3769_v7, %v3800_v41  ;;  %v3774_v23 = vmax.f32 %v7743_v58, %v7742_v47 }
 0x253   :  { %v3867_v39 = vadd.f32 %v7490_v32, %v3830_v53  ;;  %v3868_v46 = vadd.f32 %v7490_v32, %v3831_v56 }
 0x255   :  { %v3898_v54 = vmax.f32 %v3867_v39, 0.0  ;;  %v3566_v28 = vpop.f32.mrf.mxu2  ;;  %v3586_v3 = vpop.f32.mrf.mxu3  ;;  %v3899_v62 = vmax.f32 %v3868_v46, 0.0  ;;  %v7746_v39 = vld [vmem:[#allocation21_spill] sm:$0xff] }
 0x256   :  { %v3801_v30 = vmax.f32 %v7732_v20, %v3566_v28  ;;  %v3802_v29 = vmax.f32 %v7733_v1, %v3586_v3  ;;  %v3775_v55 = vmax.f32 %v7747_v60, %v7746_v39  ;;  %v7750_v20 = vld [vmem:[#allocation39_spill] sm:$0xff]  ;;  %v7751_v3 = vld [vmem:[#allocation40_spill] sm:$0xff] }
 0x257   :  { %v3949_v34 = vrot.slane %v3898_v54, 4  ;;  %v7752_v1 = vld [vmem:[#allocation27_spill] sm:$0xff] }
 0x258   :  { %v3832_v15 = vmax.f32 %v3770_v52, %v3801_v30  ;;  %v3833_v63 = vmax.f32 %v3771_v31, %v3802_v29  ;;  %v3776_v52 = vmax.f32 %v7749_v61, %v7748_v42  ;;  %v7753_v29 = vld [vmem:[#allocation14_spill] sm:$0xff]  ;;  %v3778_v31 = vmax.f32 %v7755_v6, %v7754_v8 }
 0x259   :  { %v3965_v9 = vsel %vm3955_vm2, %v3897_v37, %v3949_v34 }
 0x25a   :  { %3995 = vst [vmem:[%s7676_s6 + $0x48] sm:$0xff] %v3965_v9  ;;  %v3869_v38 = vadd.f32 %v7490_v32, %v3832_v15  ;;  %v3870_v10 = vadd.f32 %v7490_v32, %v3833_v63 }
 0x25c   :  { %v3900_v0 = vmax.f32 %v3869_v38, 0.0  ;;  %v3901_v48 = vmax.f32 %v3870_v10, 0.0 }
 0x25e   :  { %v3950_v40 = vrot.slane %v3900_v0, 4  ;;  %v3606_v22 = vpop.f32.mrf.mxu0  ;;  %v3626_v43 = vpop.f32.mrf.mxu1  ;;  %v3777_v0 = vmax.f32 %v7753_v29, %v7752_v1 }
 0x25f   :  { %v3803_v12 = vmax.f32 %v7738_v13, %v3606_v22  ;;  %v3804_v26 = vmax.f32 %v7739_v25, %v3626_v43  ;;  %v7758_v13 = vld [vmem:[#allocation42_spill] sm:$0xff] }
 0x260   :  { %v3966_v5 = vsel %vm3955_vm2, %v3899_v62, %v3950_v40 }
 0x261   :  { %3996 = vst [vmem:[%s7676_s6 + $0x50] sm:$0xff] %v3966_v5  ;;  %v3834_v2 = vmax.f32 %v3772_v18, %v3803_v12  ;;  %v3835_v50 = vmax.f32 %v3773_v57, %v3804_v26  ;;  %v3779_v18 = vmax.f32 %v7757_v59, %v7756_v19 }
 0x263   :  { %v3871_v35 = vadd.f32 %v7490_v32, %v3834_v2  ;;  %v3872_v44 = vadd.f32 %v7490_v32, %v3835_v50 }
 0x265   :  { %v3902_v11 = vmax.f32 %v3871_v35, 0.0  ;;  %v3646_v14 = vpop.f32.mrf.mxu2  ;;  %v3666_v16 = vpop.f32.mrf.mxu3  ;;  %v3903_v7 = vmax.f32 %v3872_v44, 0.0 }
 0x266   :  { %v3805_v27 = vmax.f32 %v7744_v49, %v3646_v14  ;;  %v3806_v41 = vmax.f32 %v7745_v36, %v3666_v16 }
 0x267   :  { %v3951_v45 = vrot.slane %v3902_v11, 4 }
 0x268   :  { %v3836_v4 = vmax.f32 %v3774_v23, %v3805_v27  ;;  %v3837_v56 = vmax.f32 %v3775_v55, %v3806_v41 }
 0x269   :  { %v3967_v17 = vsel %vm3955_vm2, %v3901_v48, %v3951_v45 }
 0x26a   :  { %3997 = vst [vmem:[%s7676_s6 + $0x58] sm:$0xff] %v3967_v17  ;;  %v3873_v53 = vadd.f32 %v7490_v32, %v3836_v4  ;;  %v3874_v46 = vadd.f32 %v7490_v32, %v3837_v56 }
 0x26c   :  { %v3904_v21 = vmax.f32 %v3873_v53, 0.0  ;;  %v3905_v5 = vmax.f32 %v3874_v46, 0.0 }
 0x26e   :  { %v3952_v54 = vrot.slane %v3904_v21, 4  ;;  %v3686_v28 = vpop.f32.mrf.mxu0  ;;  %v3706_v37 = vpop.f32.mrf.mxu1 }
 0x26f   :  { %v3807_v30 = vmax.f32 %v7750_v20, %v3686_v28  ;;  %v3808_v9 = vmax.f32 %v7751_v3, %v3706_v37 }
 0x270   :  { %v3968_v34 = vsel %vm3955_vm2, %v3903_v7, %v3952_v54 }
 0x271   :  { %3998 = vst [vmem:[%s7676_s6 + $0x60] sm:$0xff] %v3968_v34  ;;  %v3838_v15 = vmax.f32 %v3776_v52, %v3807_v30  ;;  %v3839_v63 = vmax.f32 %v3777_v0, %v3808_v9 }
 0x273   :  { %v3875_v38 = vadd.f32 %v7490_v32, %v3838_v15  ;;  %v3876_v35 = vadd.f32 %v7490_v32, %v3839_v63 }
 0x275   :  { %v3906_v62 = vmax.f32 %v3875_v38, 0.0  ;;  %v3726_v40 = vpop.f32.mrf.mxu2  ;;  %v3746_v22 = vpop.f32.mrf.mxu3 }
 0x276   :  { %v3809_v12 = vmax.f32 %v7758_v13, %v3726_v40  ;;  %v3810_v43 = vmax.f32 %v7484_v24, %v3746_v22  ;;  %v3907_v24 = vmax.f32 %v3876_v35, 0.0 }
 0x277   :  { %v3953_v2 = vrot.slane %v3906_v62, 4 }
 0x278   :  { %v3840_v25 = vmax.f32 %v3778_v31, %v3809_v12  ;;  %v3841_v26 = vmax.f32 %v3779_v18, %v3810_v43 }
 0x279   :  { %v3969_v10 = vsel %vm3955_vm2, %v3905_v5, %v3953_v2 }
 0x27a   :  { %3999 = vst [vmem:[%s7676_s6 + $0x68] sm:$0xff] %v3969_v10  ;;  %v3877_v51 = vadd.f32 %v7490_v32, %v3840_v25  ;;  %v3878_v33 = vadd.f32 %v7490_v32, %v3841_v26 }
 0x27c   :  { %v3908_v57 = vmax.f32 %v3877_v51, 0.0  ;;  %v3909_v11 = vmax.f32 %v3878_v33, 0.0 }
 0x27e   :  { %v3954_v14 = vrot.slane %v3908_v57, 4  ;;  %4002 = vst.msk [vmem:[%s7676_s6 + $0x78] sm:$0xf] %vm4001_vm3, %v3909_v11 }
 0x280   :  { %v3970_v47 = vsel %vm3955_vm2, %v3907_v24, %v3954_v14 }
 0x281   :  { %4000 = vst [vmem:[%s7676_s6 + $0x70] sm:$0xff] %v3970_v47 }

// kernel: baseline_token_cnn_forward.5
= control target key start
LH: loop header
LB: loop body
LE: loop exit
PB: predicated region body
PF: predicated region fallthrough
CT: control target
= control target key end

     0   :  { %vm119_vm0 = vcmask 1043456   ;;  %vm115_vm1 = vcmask 818176   ;;  %vm1084_vm2 = vcmask 261120   ;;  %s2388_s0 = inlined_call_operand.vmem [shape: f32[100,800], index: 0, kind: input, shape index: {}]   ;;  %s2389_s1 = inlined_call_operand.vmem [shape: f32[100,800], index: 1, kind: input, shape index: {}]   ;;  %s2390_s4 = inlined_call_operand.vmem [shape: f32[8,100], index: 4, kind: input, shape index: {}]   ;;  %s2391_s2 = inlined_call_operand.vmem [shape: f32[100,800], index: 2, kind: input, shape index: {}]   ;;  %s2392_s3 = inlined_call_operand.vmem [shape: f32[100,800], index: 3, kind: input, shape index: {}]   ;;  %s2393_s5 = inlined_call_operand.vmem [shape: f32[8,1], index: 5, kind: input, shape index: {}]   ;;  %s2394_s6 = inlined_call_operand.vmem [shape: f32[8,800], index: 6, kind: output, shape index: {}]  }
   0x1   :  { %v108_v0 = vld [vmem:[%s2388_s0 + $0x2a0] sm:$0xf]  ;;  %v109_v1 = vld [vmem:[%s2388_s0 + $0x2a8] sm:$0xf]  ;;  %v110_v2 = vld [vmem:[%s2388_s0 + $0x2b0] sm:$0xf] }
   0x2   :  { %1090 = vmatpush.msk.msra.mxu0 %vm119_vm0, %v108_v0  ;;  %1092 = vmatpush.msk.msra.mxu1 %vm119_vm0, %v109_v1  ;;  %v111_v3 = vld [vmem:[%s2388_s0 + $0x2b8] sm:$0xf]  ;;  %v101_v4 = vld [vmem:[%s2388_s0 + $0x268] sm:$0xff]  ;;  %v102_v5 = vld [vmem:[%s2388_s0 + $0x270] sm:$0xff] }
   0x3   :  { %1094 = vmatpush.msk.msra.mxu2 %vm119_vm0, %v110_v2  ;;  %1096 = vmatpush.msk.msra.mxu3 %vm119_vm0, %v111_v3  ;;  %v103_v6 = vld [vmem:[%s2388_s0 + $0x278] sm:$0xff]  ;;  %v104_v7 = vld [vmem:[%s2388_s0 + $0x280] sm:$0xff]  ;;  %v94_v8 = vld [vmem:[%s2388_s0 + $0x230] sm:$0xff] }
   0x4   :  { %145 = vmatpush.msra.mxu0 %v101_v4  ;;  %165 = vmatpush.msra.mxu1 %v102_v5  ;;  %v95_v9 = vld [vmem:[%s2388_s0 + $0x238] sm:$0xff]  ;;  %v96_v10 = vld [vmem:[%s2388_s0 + $0x240] sm:$0xff]  ;;  %v97_v11 = vld [vmem:[%s2388_s0 + $0x248] sm:$0xff] }
   0x5   :  { %185 = vmatpush.msra.mxu2 %v103_v6  ;;  %205 = vmatpush.msra.mxu3 %v104_v7  ;;  %v87_v12 = vld [vmem:[%s2388_s0 + $0x1f8] sm:$0xff]  ;;  %v88_v13 = vld [vmem:[%s2388_s0 + $0x200] sm:$0xff]  ;;  %v89_v14 = vld [vmem:[%s2388_s0 + $0x208] sm:$0xff] }
   0x6   :  { %146 = vmatpush.msra.mxu0 %v94_v8  ;;  %166 = vmatpush.msra.mxu1 %v95_v9  ;;  %v90_v15 = vld [vmem:[%s2388_s0 + $0x210] sm:$0xff]  ;;  %v80_v16 = vld [vmem:[%s2388_s0 + $0x1c0] sm:$0xff]  ;;  %v81_v17 = vld [vmem:[%s2388_s0 + $0x1c8] sm:$0xff] }
   0x7   :  { %186 = vmatpush.msra.mxu2 %v96_v10  ;;  %206 = vmatpush.msra.mxu3 %v97_v11  ;;  %v82_v18 = vld [vmem:[%s2388_s0 + $0x1d0] sm:$0xff]  ;;  %v83_v19 = vld [vmem:[%s2388_s0 + $0x1d8] sm:$0xff]  ;;  %v73_v20 = vld [vmem:[%s2388_s0 + $0x188] sm:$0xff] }
   0x8   :  { %147 = vmatpush.msra.mxu0 %v87_v12  ;;  %167 = vmatpush.msra.mxu1 %v88_v13  ;;  %v74_v21 = vld [vmem:[%s2388_s0 + $0x190] sm:$0xff]  ;;  %v75_v22 = vld [vmem:[%s2388_s0 + $0x198] sm:$0xff]  ;;  %v76_v23 = vld [vmem:[%s2388_s0 + $0x1a0] sm:$0xff] }
   0x9   :  { %187 = vmatpush.msra.mxu2 %v89_v14  ;;  %207 = vmatpush.msra.mxu3 %v90_v15  ;;  %v66_v24 = vld [vmem:[%s2388_s0 + $0x150] sm:$0xff]  ;;  %v67_v25 = vld [vmem:[%s2388_s0 + $0x158] sm:$0xff]  ;;  %v68_v26 = vld [vmem:[%s2388_s0 + $0x160] sm:$0xff] }
   0xa   :  { %148 = vmatpush.msra.mxu0 %v80_v16  ;;  %168 = vmatpush.msra.mxu1 %v81_v17  ;;  %v69_v27 = vld [vmem:[%s2388_s0 + $0x168] sm:$0xff]  ;;  %v59_v28 = vld [vmem:[%s2388_s0 + $0x118] sm:$0xff]  ;;  %v60_v29 = vld [vmem:[%s2388_s0 + $0x120] sm:$0xff] }
   0xb   :  { %188 = vmatpush.msra.mxu2 %v82_v18  ;;  %208 = vmatpush.msra.mxu3 %v83_v19  ;;  %v61_v30 = vld [vmem:[%s2388_s0 + $0x128] sm:$0xff]  ;;  %v62_v31 = vld [vmem:[%s2388_s0 + $0x130] sm:$0xff]  ;;  %v52_v32 = vld [vmem:[%s2388_s0 + $0xe0] sm:$0xff] }
   0xc   :  { %149 = vmatpush.msra.mxu0 %v73_v20  ;;  %169 = vmatpush.msra.mxu1 %v74_v21  ;;  %v53_v33 = vld [vmem:[%s2388_s0 + $0xe8] sm:$0xff]  ;;  %v54_v34 = vld [vmem:[%s2388_s0 + $0xf0] sm:$0xff]  ;;  %v55_v35 = vld [vmem:[%s2388_s0 + $0xf8] sm:$0xff] }
   0xd   :  { %189 = vmatpush.msra.mxu2 %v75_v22  ;;  %209 = vmatpush.msra.mxu3 %v76_v23  ;;  %v45_v36 = vld [vmem:[%s2388_s0 + $0xa8] sm:$0xff]  ;;  %v46_v37 = vld [vmem:[%s2388_s0 + $0xb0] sm:$0xff]  ;;  %v47_v38 = vld [vmem:[%s2388_s0 + $0xb8] sm:$0xff] }
   0xe   :  { %150 = vmatpush.msra.mxu0 %v66_v24  ;;  %170 = vmatpush.msra.mxu1 %v67_v25  ;;  %v48_v39 = vld [vmem:[%s2388_s0 + $0xc0] sm:$0xff]  ;;  %v38_v40 = vld [vmem:[%s2388_s0 + $0x70] sm:$0xff]  ;;  %v39_v41 = vld [vmem:[%s2388_s0 + $0x78] sm:$0xff] }
   0xf   :  { %190 = vmatpush.msra.mxu2 %v68_v26  ;;  %210 = vmatpush.msra.mxu3 %v69_v27  ;;  %v40_v42 = vld [vmem:[%s2388_s0 + $0x80] sm:$0xff]  ;;  %v41_v43 = vld [vmem:[%s2388_s0 + $0x88] sm:$0xff]  ;;  %v31_v44 = vld [vmem:[%s2388_s0 + $0x38] sm:$0xff] }
  0x10   :  { %151 = vmatpush.msra.mxu0 %v59_v28  ;;  %171 = vmatpush.msra.mxu1 %v60_v29  ;;  %v32_v45 = vld [vmem:[%s2388_s0 + $0x40] sm:$0xff]  ;;  %v33_v46 = vld [vmem:[%s2388_s0 + $0x48] sm:$0xff]  ;;  %v34_v47 = vld [vmem:[%s2388_s0 + $0x50] sm:$0xff] }
  0x11   :  { %191 = vmatpush.msra.mxu2 %v61_v30  ;;  %211 = vmatpush.msra.mxu3 %v62_v31  ;;  %v24_v48 = vld [vmem:[%s2388_s0] sm:$0xff]  ;;  %v25_v49 = vld [vmem:[%s2388_s0 + $0x8] sm:$0xff]  ;;  %v26_v50 = vld [vmem:[%s2388_s0 + $0x10] sm:$0xff] }
  0x12   :  { %152 = vmatpush.msra.mxu0 %v52_v32  ;;  %172 = vmatpush.msra.mxu1 %v53_v33  ;;  %v27_v51 = vld [vmem:[%s2388_s0 + $0x18] sm:$0xff]  ;;  %v112_v52 = vld [vmem:[%s2388_s0 + $0x2c0] sm:$0xf]  ;;  %v113_v53 = vld [vmem:[%s2388_s0 + $0x2c8] sm:$0xf] }
  0x13   :  { %192 = vmatpush.msra.mxu2 %v54_v34  ;;  %212 = vmatpush.msra.mxu3 %v55_v35  ;;  %v114_v54 = vld [vmem:[%s2388_s0 + $0x2d0] sm:$0xf]  ;;  %v365_v55 = vld [vmem:[%s2389_s1 + $0x2a0] sm:$0xf]  ;;  %v105_v56 = vld [vmem:[%s2388_s0 + $0x288] sm:$0xff] }
  0x14   :  { %153 = vmatpush.msra.mxu0 %v45_v36  ;;  %173 = vmatpush.msra.mxu1 %v46_v37  ;;  %v106_v57 = vld [vmem:[%s2388_s0 + $0x290] sm:$0xff]  ;;  %v107_v58 = vld [vmem:[%s2388_s0 + $0x298] sm:$0xff]  ;;  %v358_v59 = vld [vmem:[%s2389_s1 + $0x268] sm:$0xff] }
  0x15   :  { %193 = vmatpush.msra.mxu2 %v47_v38  ;;  %213 = vmatpush.msra.mxu3 %v48_v39  ;;  %v98_v60 = vld [vmem:[%s2388_s0 + $0x250] sm:$0xff]  ;;  %v99_v61 = vld [vmem:[%s2388_s0 + $0x258] sm:$0xff]  ;;  %v100_v62 = vld [vmem:[%s2388_s0 + $0x260] sm:$0xff] }
  0x16   :  { %154 = vmatpush.msra.mxu0 %v38_v40  ;;  %174 = vmatpush.msra.mxu1 %v39_v41  ;;  %v351_v63 = vld [vmem:[%s2389_s1 + $0x230] sm:$0xff]  ;;  %v91_v0 = vld [vmem:[%s2388_s0 + $0x218] sm:$0xff]  ;;  %v92_v1 = vld [vmem:[%s2388_s0 + $0x220] sm:$0xff] }
  0x17   :  { %194 = vmatpush.msra.mxu2 %v40_v42  ;;  %214 = vmatpush.msra.mxu3 %v41_v43  ;;  %v93_v2 = vld [vmem:[%s2388_s0 + $0x228] sm:$0xff]  ;;  %v344_v3 = vld [vmem:[%s2389_s1 + $0x1f8] sm:$0xff]  ;;  %v84_v4 = vld [vmem:[%s2388_s0 + $0x1e0] sm:$0xff] }
  0x18   :  { %155 = vmatpush.msra.mxu0 %v31_v44  ;;  %175 = vmatpush.msra.mxu1 %v32_v45  ;;  %v85_v5 = vld [vmem:[%s2388_s0 + $0x1e8] sm:$0xff]  ;;  %v86_v6 = vld [vmem:[%s2388_s0 + $0x1f0] sm:$0xff]  ;;  %v337_v7 = vld [vmem:[%s2389_s1 + $0x1c0] sm:$0xff] }
  0x19   :  { %195 = vmatpush.msra.mxu2 %v33_v46  ;;  %215 = vmatpush.msra.mxu3 %v34_v47  ;;  %v77_v8 = vld [vmem:[%s2388_s0 + $0x1a8] sm:$0xff]  ;;  %v78_v9 = vld [vmem:[%s2388_s0 + $0x1b0] sm:$0xff]  ;;  %v79_v10 = vld [vmem:[%s2388_s0 + $0x1b8] sm:$0xff] }
  0x1a   :  { %156 = vmatpush.msra.mxu0 %v24_v48  ;;  %176 = vmatpush.msra.mxu1 %v25_v49  ;;  %v330_v11 = vld [vmem:[%s2389_s1 + $0x188] sm:$0xff]  ;;  %v70_v12 = vld [vmem:[%s2388_s0 + $0x170] sm:$0xff]  ;;  %v71_v13 = vld [vmem:[%s2388_s0 + $0x178] sm:$0xff] }
  0x1b   :  { %196 = vmatpush.msra.mxu2 %v26_v50  ;;  %216 = vmatpush.msra.mxu3 %v27_v51  ;;  %v72_v14 = vld [vmem:[%s2388_s0 + $0x180] sm:$0xff]  ;;  %v323_v15 = vld [vmem:[%s2389_s1 + $0x150] sm:$0xff]  ;;  %v63_v16 = vld [vmem:[%s2388_s0 + $0x138] sm:$0xff] }
  0x1c   :  { %1098 = vmatpush.msk.msrb.mxu0 %vm119_vm0, %v112_v52  ;;  %1100 = vmatpush.msk.msrb.mxu1 %vm119_vm0, %v113_v53  ;;  %v64_v17 = vld [vmem:[%s2388_s0 + $0x140] sm:$0xff]  ;;  %v65_v18 = vld [vmem:[%s2388_s0 + $0x148] sm:$0xff]  ;;  %v316_v19 = vld [vmem:[%s2389_s1 + $0x118] sm:$0xff] }
  0x1d   :  { %1102 = vmatpush.msk.msrb.mxu2 %vm119_vm0, %v114_v54  ;;  %1104 = vmatpush.msk.msrb.mxu3 %vm119_vm0, %v365_v55  ;;  %v56_v20 = vld [vmem:[%s2388_s0 + $0x100] sm:$0xff]  ;;  %v57_v21 = vld [vmem:[%s2388_s0 + $0x108] sm:$0xff]  ;;  %v58_v22 = vld [vmem:[%s2388_s0 + $0x110] sm:$0xff] }
  0x1e   :  { %225 = vmatpush.msrb.mxu0 %v105_v56  ;;  %245 = vmatpush.msrb.mxu1 %v106_v57  ;;  %v309_v23 = vld [vmem:[%s2389_s1 + $0xe0] sm:$0xff]  ;;  %v49_v25 = vld [vmem:[%s2388_s0 + $0xc8] sm:$0xff]  ;;  %v50_v26 = vld [vmem:[%s2388_s0 + $0xd0] sm:$0xff] }
  0x1f   :  { %265 = vmatpush.msrb.mxu2 %v107_v58  ;;  %397 = vmatpush.msrb.mxu3 %v358_v59  ;;  %v1460_v24 = vld [vmem:[%s2390_s4] sm:$0xff]  ;;  %v51_v27 = vld [vmem:[%s2388_s0 + $0xd8] sm:$0xff]  ;;  %v302_v28 = vld [vmem:[%s2389_s1 + $0xa8] sm:$0xff] }
  0x20   :  { %226 = vmatpush.msrb.mxu0 %v98_v60  ;;  %246 = vmatpush.msrb.mxu1 %v99_v61  ;;  %v42_v29 = vld [vmem:[%s2388_s0 + $0x90] sm:$0xff]  ;;  %v43_v30 = vld [vmem:[%s2388_s0 + $0x98] sm:$0xff]  ;;  %v44_v31 = vld [vmem:[%s2388_s0 + $0xa0] sm:$0xff] }
  0x21   :  { %266 = vmatpush.msrb.mxu2 %v100_v62  ;;  %398 = vmatpush.msrb.mxu3 %v351_v63  ;;  %v295_v32 = vld [vmem:[%s2389_s1 + $0x70] sm:$0xff]  ;;  %v35_v33 = vld [vmem:[%s2388_s0 + $0x58] sm:$0xff]  ;;  %v36_v34 = vld [vmem:[%s2388_s0 + $0x60] sm:$0xff] }
  0x22   :  { %227 = vmatpush.msrb.mxu0 %v91_v0  ;;  %247 = vmatpush.msrb.mxu1 %v92_v1  ;;  %v37_v35 = vld [vmem:[%s2388_s0 + $0x68] sm:$0xff]  ;;  %v288_v36 = vld [vmem:[%s2389_s1 + $0x38] sm:$0xff]  ;;  %v28_v37 = vld [vmem:[%s2388_s0 + $0x20] sm:$0xff] }
  0x23   :  { %267 = vmatpush.msrb.mxu2 %v93_v2  ;;  %399 = vmatpush.msrb.mxu3 %v344_v3  ;;  %v29_v38 = vld [vmem:[%s2388_s0 + $0x28] sm:$0xff]  ;;  %v30_v39 = vld [vmem:[%s2388_s0 + $0x30] sm:$0xff]  ;;  %v281_v40 = vld [vmem:[%s2389_s1] sm:$0xff] }
  0x24   :  { %228 = vmatpush.msrb.mxu0 %v84_v4  ;;  %248 = vmatpush.msrb.mxu1 %v85_v5  ;;  %v366_v41 = vld [vmem:[%s2389_s1 + $0x2a8] sm:$0xf]  ;;  %v367_v42 = vld [vmem:[%s2389_s1 + $0x2b0] sm:$0xf]  ;;  %v368_v43 = vld [vmem:[%s2389_s1 + $0x2b8] sm:$0xf] }
  0x25   :  { %268 = vmatpush.msrb.mxu2 %v86_v6  ;;  %400 = vmatpush.msrb.mxu3 %v337_v7  ;;  %v369_v44 = vld [vmem:[%s2389_s1 + $0x2c0] sm:$0xf]  ;;  %v359_v45 = vld [vmem:[%s2389_s1 + $0x270] sm:$0xff]  ;;  %v360_v46 = vld [vmem:[%s2389_s1 + $0x278] sm:$0xff] }
  0x26   :  { %229 = vmatpush.msrb.mxu0 %v77_v8  ;;  %249 = vmatpush.msrb.mxu1 %v78_v9  ;;  %v361_v47 = vld [vmem:[%s2389_s1 + $0x280] sm:$0xff]  ;;  %v362_v48 = vld [vmem:[%s2389_s1 + $0x288] sm:$0xff]  ;;  %v352_v49 = vld [vmem:[%s2389_s1 + $0x238] sm:$0xff] }
  0x27   :  { %269 = vmatpush.msrb.mxu2 %v79_v10  ;;  %401 = vmatpush.msrb.mxu3 %v330_v11  ;;  %v353_v50 = vld [vmem:[%s2389_s1 + $0x240] sm:$0xff]  ;;  %v354_v51 = vld [vmem:[%s2389_s1 + $0x248] sm:$0xff]  ;;  %v355_v52 = vld [vmem:[%s2389_s1 + $0x250] sm:$0xff] }
  0x28   :  { %230 = vmatpush.msrb.mxu0 %v70_v12  ;;  %250 = vmatpush.msrb.mxu1 %v71_v13  ;;  %v345_v53 = vld [vmem:[%s2389_s1 + $0x200] sm:$0xff]  ;;  %v346_v54 = vld [vmem:[%s2389_s1 + $0x208] sm:$0xff]  ;;  %v347_v55 = vld [vmem:[%s2389_s1 + $0x210] sm:$0xff] }
  0x29   :  { %270 = vmatpush.msrb.mxu2 %v72_v14  ;;  %402 = vmatpush.msrb.mxu3 %v323_v15  ;;  %v348_v56 = vld [vmem:[%s2389_s1 + $0x218] sm:$0xff]  ;;  %v338_v57 = vld [vmem:[%s2389_s1 + $0x1c8] sm:$0xff]  ;;  %v339_v58 = vld [vmem:[%s2389_s1 + $0x1d0] sm:$0xff] }
  0x2a   :  { %231 = vmatpush.msrb.mxu0 %v63_v16  ;;  %251 = vmatpush.msrb.mxu1 %v64_v17  ;;  %v340_v59 = vld [vmem:[%s2389_s1 + $0x1d8] sm:$0xff]  ;;  %v341_v60 = vld [vmem:[%s2389_s1 + $0x1e0] sm:$0xff]  ;;  %v331_v61 = vld [vmem:[%s2389_s1 + $0x190] sm:$0xff] }
  0x2b   :  { %271 = vmatpush.msrb.mxu2 %v65_v18  ;;  %403 = vmatpush.msrb.mxu3 %v316_v19  ;;  %v332_v62 = vld [vmem:[%s2389_s1 + $0x198] sm:$0xff]  ;;  %v333_v63 = vld [vmem:[%s2389_s1 + $0x1a0] sm:$0xff]  ;;  %v334_v0 = vld [vmem:[%s2389_s1 + $0x1a8] sm:$0xff] }
  0x2c   :  { %232 = vmatpush.msrb.mxu0 %v56_v20  ;;  %252 = vmatpush.msrb.mxu1 %v57_v21  ;;  %v324_v1 = vld [vmem:[%s2389_s1 + $0x158] sm:$0xff]  ;;  %v325_v2 = vld [vmem:[%s2389_s1 + $0x160] sm:$0xff]  ;;  %v326_v3 = vld [vmem:[%s2389_s1 + $0x168] sm:$0xff] }
  0x2d   :  { %272 = vmatpush.msrb.mxu2 %v58_v22  ;;  %404 = vmatpush.msrb.mxu3 %v309_v23  ;;  %v327_v4 = vld [vmem:[%s2389_s1 + $0x170] sm:$0xff]  ;;  %v317_v5 = vld [vmem:[%s2389_s1 + $0x120] sm:$0xff]  ;;  %v318_v6 = vld [vmem:[%s2389_s1 + $0x128] sm:$0xff] }
  0x2e   :  { %1097 = vmatmul.msk.f32.vlgmr.msra.gmra.mxu3 %vm115_vm1, %v1460_v24  ;;  %233 = vmatpush.msrb.mxu0 %v49_v25  ;;  %v319_v7 = vld [vmem:[%s2389_s1 + $0x130] sm:$0xff]  ;;  %v320_v8 = vld [vmem:[%s2389_s1 + $0x138] sm:$0xff]  ;;  %v310_v9 = vld [vmem:[%s2389_s1 + $0xe8] sm:$0xff] }
  0x2f   :  { %253 = vmatpush.msrb.mxu1 %v50_v26  ;;  %273 = vmatpush.msrb.mxu2 %v51_v27  ;;  %v311_v10 = vld [vmem:[%s2389_s1 + $0xf0] sm:$0xff]  ;;  %v312_v11 = vld [vmem:[%s2389_s1 + $0xf8] sm:$0xff]  ;;  %v313_v12 = vld [vmem:[%s2389_s1 + $0x100] sm:$0xff] }
  0x30   :  { %405 = vmatpush.msrb.mxu3 %v302_v28  ;;  %234 = vmatpush.msrb.mxu0 %v42_v29  ;;  %v303_v13 = vld [vmem:[%s2389_s1 + $0xb0] sm:$0xff]  ;;  %v304_v14 = vld [vmem:[%s2389_s1 + $0xb8] sm:$0xff]  ;;  %v305_v15 = vld [vmem:[%s2389_s1 + $0xc0] sm:$0xff] }
  0x31   :  { %254 = vmatpush.msrb.mxu1 %v43_v30  ;;  %274 = vmatpush.msrb.mxu2 %v44_v31  ;;  %v306_v16 = vld [vmem:[%s2389_s1 + $0xc8] sm:$0xff]  ;;  %v296_v17 = vld [vmem:[%s2389_s1 + $0x78] sm:$0xff]  ;;  %v297_v18 = vld [vmem:[%s2389_s1 + $0x80] sm:$0xff] }
  0x32   :  { %406 = vmatpush.msrb.mxu3 %v295_v32  ;;  %235 = vmatpush.msrb.mxu0 %v35_v33  ;;  %v298_v19 = vld [vmem:[%s2389_s1 + $0x88] sm:$0xff]  ;;  %v299_v20 = vld [vmem:[%s2389_s1 + $0x90] sm:$0xff]  ;;  %v289_v21 = vld [vmem:[%s2389_s1 + $0x40] sm:$0xff] }
  0x33   :  { %255 = vmatpush.msrb.mxu1 %v36_v34  ;;  %275 = vmatpush.msrb.mxu2 %v37_v35  ;;  %v290_v22 = vld [vmem:[%s2389_s1 + $0x48] sm:$0xff]  ;;  %v291_v23 = vld [vmem:[%s2389_s1 + $0x50] sm:$0xff]  ;;  %v292_v25 = vld [vmem:[%s2389_s1 + $0x58] sm:$0xff] }
  0x34   :  { %407 = vmatpush.msrb.mxu3 %v288_v36  ;;  %236 = vmatpush.msrb.mxu0 %v28_v37  ;;  %v282_v26 = vld [vmem:[%s2389_s1 + $0x8] sm:$0xff]  ;;  %v283_v27 = vld [vmem:[%s2389_s1 + $0x10] sm:$0xff]  ;;  %v284_v28 = vld [vmem:[%s2389_s1 + $0x18] sm:$0xff] }
  0x35   :  { %256 = vmatpush.msrb.mxu1 %v29_v38  ;;  %276 = vmatpush.msrb.mxu2 %v30_v39  ;;  %v285_v29 = vld [vmem:[%s2389_s1 + $0x20] sm:$0xff]  ;;  %v370_v30 = vld [vmem:[%s2389_s1 + $0x2c8] sm:$0xf]  ;;  %v371_v31 = vld [vmem:[%s2389_s1 + $0x2d0] sm:$0xf] }
  0x36   :  { %408 = vmatpush.msrb.mxu3 %v281_v40  ;;  %1091 = vmatmul.msk.f32.vlgmr.msra.gmra.mxu0 %vm115_vm1, %v1460_v24  ;;  %v617_v32 = vld [vmem:[%s2391_s2 + $0x2a0] sm:$0xf]  ;;  %v618_v33 = vld [vmem:[%s2391_s2 + $0x2a8] sm:$0xf]  ;;  %v363_v34 = vld [vmem:[%s2389_s1 + $0x290] sm:$0xff] }
  0x37   :  { %1093 = vmatmul.msk.f32.vlgmr.msra.gmra.mxu1 %vm115_vm1, %v1460_v24  ;;  %1095 = vmatmul.msk.f32.vlgmr.msra.gmra.mxu2 %vm115_vm1, %v1460_v24  ;;  %v364_v35 = vld [vmem:[%s2389_s1 + $0x298] sm:$0xff]  ;;  %v610_v36 = vld [vmem:[%s2391_s2 + $0x268] sm:$0xff]  ;;  %v611_v37 = vld [vmem:[%s2391_s2 + $0x270] sm:$0xff] }
  0x38   :  { %1105 = vmatmul.msk.f32.vlgmr.msrb.gmra.mxu3 %vm115_vm1, %v1460_v24  ;;  %1106 = vmatpush.msk.msra.mxu0 %vm119_vm0, %v366_v41  ;;  %v356_v38 = vld [vmem:[%s2389_s1 + $0x258] sm:$0xff]  ;;  %v357_v39 = vld [vmem:[%s2389_s1 + $0x260] sm:$0xff]  ;;  %v603_v40 = vld [vmem:[%s2391_s2 + $0x230] sm:$0xff] }
  0x39   :  { %1108 = vmatpush.msk.msra.mxu1 %vm119_vm0, %v367_v42  ;;  %1110 = vmatpush.msk.msra.mxu2 %vm119_vm0, %v368_v43  ;;  %v604_v41 = vld [vmem:[%s2391_s2 + $0x238] sm:$0xff]  ;;  %v349_v42 = vld [vmem:[%s2389_s1 + $0x220] sm:$0xff]  ;;  %v350_v43 = vld [vmem:[%s2389_s1 + $0x228] sm:$0xff] }
  0x3a   :  { %1112 = vmatpush.msk.msra.mxu3 %vm119_vm0, %v369_v44  ;;  %417 = vmatpush.msra.mxu0 %v359_v45  ;;  %v596_v44 = vld [vmem:[%s2391_s2 + $0x1f8] sm:$0xff]  ;;  %v597_v45 = vld [vmem:[%s2391_s2 + $0x200] sm:$0xff] }
  0x3b   :  { %437 = vmatpush.msra.mxu1 %v360_v46  ;;  %457 = vmatpush.msra.mxu2 %v361_v47  ;;  %v342_v46 = vld [vmem:[%s2389_s1 + $0x1e8] sm:$0xff]  ;;  %v343_v47 = vld [vmem:[%s2389_s1 + $0x1f0] sm:$0xff] }
  0x3c   :  { %477 = vmatpush.msra.mxu3 %v362_v48  ;;  %418 = vmatpush.msra.mxu0 %v352_v49  ;;  %v589_v48 = vld [vmem:[%s2391_s2 + $0x1c0] sm:$0xff]  ;;  %v590_v49 = vld [vmem:[%s2391_s2 + $0x1c8] sm:$0xff] }
  0x3d   :  { %438 = vmatpush.msra.mxu1 %v353_v50  ;;  %458 = vmatpush.msra.mxu2 %v354_v51  ;;  %v335_v50 = vld [vmem:[%s2389_s1 + $0x1b0] sm:$0xff]  ;;  %v336_v51 = vld [vmem:[%s2389_s1 + $0x1b8] sm:$0xff] }
  0x3e   :  { %478 = vmatpush.msra.mxu3 %v355_v52  ;;  %419 = vmatpush.msra.mxu0 %v345_v53  ;;  %v582_v52 = vld [vmem:[%s2391_s2 + $0x188] sm:$0xff]  ;;  %v583_v53 = vld [vmem:[%s2391_s2 + $0x190] sm:$0xff] }
  0x3f   :  { %439 = vmatpush.msra.mxu1 %v346_v54  ;;  %459 = vmatpush.msra.mxu2 %v347_v55  ;;  %v328_v54 = vld [vmem:[%s2389_s1 + $0x178] sm:$0xff]  ;;  %v329_v55 = vld [vmem:[%s2389_s1 + $0x180] sm:$0xff] }
  0x40   :  { %479 = vmatpush.msra.mxu3 %v348_v56  ;;  %420 = vmatpush.msra.mxu0 %v338_v57  ;;  %v575_v56 = vld [vmem:[%s2391_s2 + $0x150] sm:$0xff]  ;;  %v576_v57 = vld [vmem:[%s2391_s2 + $0x158] sm:$0xff] }
  0x41   :  { %440 = vmatpush.msra.mxu1 %v339_v58  ;;  %460 = vmatpush.msra.mxu2 %v340_v59  ;;  %v321_v58 = vld [vmem:[%s2389_s1 + $0x140] sm:$0xff]  ;;  %v322_v59 = vld [vmem:[%s2389_s1 + $0x148] sm:$0xff] }
  0x42   :  { %480 = vmatpush.msra.mxu3 %v341_v60  ;;  %421 = vmatpush.msra.mxu0 %v331_v61  ;;  %v568_v60 = vld [vmem:[%s2391_s2 + $0x118] sm:$0xff]  ;;  %v569_v61 = vld [vmem:[%s2391_s2 + $0x120] sm:$0xff] }
  0x43   :  { %441 = vmatpush.msra.mxu1 %v332_v62  ;;  %461 = vmatpush.msra.mxu2 %v333_v63  ;;  %v314_v62 = vld [vmem:[%s2389_s1 + $0x108] sm:$0xff]  ;;  %v315_v63 = vld [vmem:[%s2389_s1 + $0x110] sm:$0xff] }
  0x44   :  { %481 = vmatpush.msra.mxu3 %v334_v0  ;;  %422 = vmatpush.msra.mxu0 %v324_v1  ;;  %v561_v0 = vld [vmem:[%s2391_s2 + $0xe0] sm:$0xff]  ;;  %v562_v1 = vld [vmem:[%s2391_s2 + $0xe8] sm:$0xff] }
  0x45   :  { %442 = vmatpush.msra.mxu1 %v325_v2  ;;  %462 = vmatpush.msra.mxu2 %v326_v3  ;;  %v307_v2 = vld [vmem:[%s2389_s1 + $0xd0] sm:$0xff]  ;;  %v308_v3 = vld [vmem:[%s2389_s1 + $0xd8] sm:$0xff] }
  0x46   :  { %482 = vmatpush.msra.mxu3 %v327_v4  ;;  %423 = vmatpush.msra.mxu0 %v317_v5  ;;  %v554_v4 = vld [vmem:[%s2391_s2 + $0xa8] sm:$0xff]  ;;  %v555_v5 = vld [vmem:[%s2391_s2 + $0xb0] sm:$0xff] }
  0x47   :  { %443 = vmatpush.msra.mxu1 %v318_v6  ;;  %463 = vmatpush.msra.mxu2 %v319_v7  ;;  %v300_v6 = vld [vmem:[%s2389_s1 + $0x98] sm:$0xff]  ;;  %v301_v7 = vld [vmem:[%s2389_s1 + $0xa0] sm:$0xff] }
  0x48   :  { %483 = vmatpush.msra.mxu3 %v320_v8  ;;  %424 = vmatpush.msra.mxu0 %v310_v9  ;;  %v547_v8 = vld [vmem:[%s2391_s2 + $0x70] sm:$0xff]  ;;  %v548_v9 = vld [vmem:[%s2391_s2 + $0x78] sm:$0xff] }
  0x49   :  { %444 = vmatpush.msra.mxu1 %v311_v10  ;;  %464 = vmatpush.msra.mxu2 %v312_v11  ;;  %v293_v10 = vld [vmem:[%s2389_s1 + $0x60] sm:$0xff]  ;;  %v294_v11 = vld [vmem:[%s2389_s1 + $0x68] sm:$0xff] }
  0x4a   :  { %484 = vmatpush.msra.mxu3 %v313_v12  ;;  %1099 = vmatmul.msk.f32.vlgmr.msrb.gmra.mxu0 %vm115_vm1, %v1460_v24  ;;  %v540_v12 = vld [vmem:[%s2391_s2 + $0x38] sm:$0xff] }
  0x4b   :  { %1101 = vmatmul.msk.f32.vlgmr.msrb.gmra.mxu1 %vm115_vm1, %v1460_v24  ;;  %1103 = vmatmul.msk.f32.vlgmr.msrb.gmra.mxu2 %vm115_vm1, %v1460_v24 }
  0x4c   :  { %425 = vmatpush.msra.mxu0 %v303_v13  ;;  %445 = vmatpush.msra.mxu1 %v304_v14  ;;  %v541_v13 = vld [vmem:[%s2391_s2 + $0x40] sm:$0xff]  ;;  %v286_v14 = vld [vmem:[%s2389_s1 + $0x28] sm:$0xff] }
  0x4d   :  { %465 = vmatpush.msra.mxu2 %v305_v15  ;;  %485 = vmatpush.msra.mxu3 %v306_v16  ;;  %v287_v15 = vld [vmem:[%s2389_s1 + $0x30] sm:$0xff]  ;;  %v533_v16 = vld [vmem:[%s2391_s2] sm:$0xff] }
  0x4e   :  { %426 = vmatpush.msra.mxu0 %v296_v17  ;;  %446 = vmatpush.msra.mxu1 %v297_v18  ;;  %v534_v17 = vld [vmem:[%s2391_s2 + $0x8] sm:$0xff]  ;;  %v619_v18 = vld [vmem:[%s2391_s2 + $0x2b0] sm:$0xf] }
  0x4f   :  { %466 = vmatpush.msra.mxu2 %v298_v19  ;;  %486 = vmatpush.msra.mxu3 %v299_v20  ;;  %v620_v19 = vld [vmem:[%s2391_s2 + $0x2b8] sm:$0xf]  ;;  %v621_v20 = vld [vmem:[%s2391_s2 + $0x2c0] sm:$0xf] }
  0x50   :  { %427 = vmatpush.msra.mxu0 %v289_v21  ;;  %447 = vmatpush.msra.mxu1 %v290_v22  ;;  %v622_v21 = vld [vmem:[%s2391_s2 + $0x2c8] sm:$0xf]  ;;  %v612_v22 = vld [vmem:[%s2391_s2 + $0x278] sm:$0xff] }
  0x51   :  { %467 = vmatpush.msra.mxu2 %v291_v23  ;;  %487 = vmatpush.msra.mxu3 %v292_v25  ;;  %v613_v23 = vld [vmem:[%s2391_s2 + $0x280] sm:$0xff]  ;;  %v614_v25 = vld [vmem:[%s2391_s2 + $0x288] sm:$0xff] }
  0x52   :  { %428 = vmatpush.msra.mxu0 %v282_v26  ;;  %448 = vmatpush.msra.mxu1 %v283_v27  ;;  %v615_v26 = vld [vmem:[%s2391_s2 + $0x290] sm:$0xff]  ;;  %v605_v27 = vld [vmem:[%s2391_s2 + $0x240] sm:$0xff] }
  0x53   :  { %468 = vmatpush.msra.mxu2 %v284_v28  ;;  %488 = vmatpush.msra.mxu3 %v285_v29  ;;  %v606_v28 = vld [vmem:[%s2391_s2 + $0x248] sm:$0xff]  ;;  %v607_v29 = vld [vmem:[%s2391_s2 + $0x250] sm:$0xff] }
  0x54   :  { %1107 = vmatmul.msk.f32.vlgmr.msra.gmra.mxu0 %vm115_vm1, %v1460_v24  ;;  %1109 = vmatmul.msk.f32.vlgmr.msra.gmra.mxu1 %vm115_vm1, %v1460_v24 }
  0x55   :  { %1111 = vmatmul.msk.f32.vlgmr.msra.gmra.mxu2 %vm115_vm1, %v1460_v24  ;;  %1113 = vmatmul.msk.f32.vlgmr.msra.gmra.mxu3 %vm115_vm1, %v1460_v24 }
  0x56   :  { %1114 = vmatpush.msk.msrb.mxu0 %vm119_vm0, %v370_v30  ;;  %1116 = vmatpush.msk.msrb.mxu1 %vm119_vm0, %v371_v31  ;;  %v608_v30 = vld [vmem:[%s2391_s2 + $0x258] sm:$0xff]  ;;  %v598_v31 = vld [vmem:[%s2391_s2 + $0x208] sm:$0xff] }
  0x57   :  { %1118 = vmatpush.msk.msrb.mxu2 %vm119_vm0, %v617_v32  ;;  %1120 = vmatpush.msk.msrb.mxu3 %vm119_vm0, %v618_v33  ;;  %v599_v32 = vld [vmem:[%s2391_s2 + $0x210] sm:$0xff]  ;;  %v600_v33 = vld [vmem:[%s2391_s2 + $0x218] sm:$0xff] }
  0x58   :  { %497 = vmatpush.msrb.mxu0 %v363_v34  ;;  %517 = vmatpush.msrb.mxu1 %v364_v35  ;;  %v601_v34 = vld [vmem:[%s2391_s2 + $0x220] sm:$0xff]  ;;  %v591_v35 = vld [vmem:[%s2391_s2 + $0x1d0] sm:$0xff] }
  0x59   :  { %649 = vmatpush.msrb.mxu2 %v610_v36  ;;  %669 = vmatpush.msrb.mxu3 %v611_v37  ;;  %v592_v36 = vld [vmem:[%s2391_s2 + $0x1d8] sm:$0xff]  ;;  %v593_v37 = vld [vmem:[%s2391_s2 + $0x1e0] sm:$0xff] }
  0x5a   :  { %498 = vmatpush.msrb.mxu0 %v356_v38  ;;  %518 = vmatpush.msrb.mxu1 %v357_v39  ;;  %v594_v38 = vld [vmem:[%s2391_s2 + $0x1e8] sm:$0xff]  ;;  %v584_v39 = vld [vmem:[%s2391_s2 + $0x198] sm:$0xff] }
  0x5b   :  { %650 = vmatpush.msrb.mxu2 %v603_v40  ;;  %670 = vmatpush.msrb.mxu3 %v604_v41  ;;  %v585_v40 = vld [vmem:[%s2391_s2 + $0x1a0] sm:$0xff]  ;;  %v586_v41 = vld [vmem:[%s2391_s2 + $0x1a8] sm:$0xff] }
  0x5c   :  { %499 = vmatpush.msrb.mxu0 %v349_v42  ;;  %519 = vmatpush.msrb.mxu1 %v350_v43  ;;  %v587_v42 = vld [vmem:[%s2391_s2 + $0x1b0] sm:$0xff]  ;;  %v577_v43 = vld [vmem:[%s2391_s2 + $0x160] sm:$0xff] }
  0x5d   :  { %651 = vmatpush.msrb.mxu2 %v596_v44  ;;  %671 = vmatpush.msrb.mxu3 %v597_v45  ;;  %v578_v44 = vld [vmem:[%s2391_s2 + $0x168] sm:$0xff]  ;;  %v579_v45 = vld [vmem:[%s2391_s2 + $0x170] sm:$0xff] }
  0x5e   :  { %500 = vmatpush.msrb.mxu0 %v342_v46  ;;  %520 = vmatpush.msrb.mxu1 %v343_v47  ;;  %v580_v46 = vld [vmem:[%s2391_s2 + $0x178] sm:$0xff]  ;;  %v570_v47 = vld [vmem:[%s2391_s2 + $0x128] sm:$0xff] }
  0x5f   :  { %652 = vmatpush.msrb.mxu2 %v589_v48  ;;  %672 = vmatpush.msrb.mxu3 %v590_v49  ;;  %v571_v48 = vld [vmem:[%s2391_s2 + $0x130] sm:$0xff]  ;;  %v572_v49 = vld [vmem:[%s2391_s2 + $0x138] sm:$0xff] }
  0x60   :  { %501 = vmatpush.msrb.mxu0 %v335_v50  ;;  %521 = vmatpush.msrb.mxu1 %v336_v51  ;;  %v573_v50 = vld [vmem:[%s2391_s2 + $0x140] sm:$0xff]  ;;  %v563_v51 = vld [vmem:[%s2391_s2 + $0xf0] sm:$0xff] }
  0x61   :  { %653 = vmatpush.msrb.mxu2 %v582_v52  ;;  %673 = vmatpush.msrb.mxu3 %v583_v53  ;;  %v564_v52 = vld [vmem:[%s2391_s2 + $0xf8] sm:$0xff]  ;;  %v565_v53 = vld [vmem:[%s2391_s2 + $0x100] sm:$0xff] }
  0x62   :  { %502 = vmatpush.msrb.mxu0 %v328_v54  ;;  %522 = vmatpush.msrb.mxu1 %v329_v55  ;;  %v566_v54 = vld [vmem:[%s2391_s2 + $0x108] sm:$0xff]  ;;  %v556_v55 = vld [vmem:[%s2391_s2 + $0xb8] sm:$0xff] }
  0x63   :  { %654 = vmatpush.msrb.mxu2 %v575_v56  ;;  %674 = vmatpush.msrb.mxu3 %v576_v57  ;;  %v557_v56 = vld [vmem:[%s2391_s2 + $0xc0] sm:$0xff]  ;;  %v558_v57 = vld [vmem:[%s2391_s2 + $0xc8] sm:$0xff] }
  0x64   :  { %503 = vmatpush.msrb.mxu0 %v321_v58  ;;  %523 = vmatpush.msrb.mxu1 %v322_v59  ;;  %v559_v58 = vld [vmem:[%s2391_s2 + $0xd0] sm:$0xff]  ;;  %v549_v59 = vld [vmem:[%s2391_s2 + $0x80] sm:$0xff] }
  0x65   :  { %655 = vmatpush.msrb.mxu2 %v568_v60  ;;  %675 = vmatpush.msrb.mxu3 %v569_v61  ;;  %v550_v60 = vld [vmem:[%s2391_s2 + $0x88] sm:$0xff]  ;;  %v551_v61 = vld [vmem:[%s2391_s2 + $0x90] sm:$0xff] }
  0x66   :  { %504 = vmatpush.msrb.mxu0 %v314_v62  ;;  %524 = vmatpush.msrb.mxu1 %v315_v63  ;;  %v552_v62 = vld [vmem:[%s2391_s2 + $0x98] sm:$0xff]  ;;  %v542_v63 = vld [vmem:[%s2391_s2 + $0x48] sm:$0xff] }
  0x67   :  { %656 = vmatpush.msrb.mxu2 %v561_v0  ;;  %676 = vmatpush.msrb.mxu3 %v562_v1  ;;  %v543_v0 = vld [vmem:[%s2391_s2 + $0x50] sm:$0xff]  ;;  %v544_v1 = vld [vmem:[%s2391_s2 + $0x58] sm:$0xff] }
  0x68   :  { %505 = vmatpush.msrb.mxu0 %v307_v2  ;;  %525 = vmatpush.msrb.mxu1 %v308_v3  ;;  %v545_v2 = vld [vmem:[%s2391_s2 + $0x60] sm:$0xff]  ;;  %v535_v3 = vld [vmem:[%s2391_s2 + $0x10] sm:$0xff] }
  0x69   :  { %657 = vmatpush.msrb.mxu2 %v554_v4  ;;  %677 = vmatpush.msrb.mxu3 %v555_v5  ;;  %v536_v4 = vld [vmem:[%s2391_s2 + $0x18] sm:$0xff]  ;;  %v537_v5 = vld [vmem:[%s2391_s2 + $0x20] sm:$0xff] }
  0x6a   :  { %506 = vmatpush.msrb.mxu0 %v300_v6  ;;  %526 = vmatpush.msrb.mxu1 %v301_v7  ;;  %v538_v6 = vld [vmem:[%s2391_s2 + $0x28] sm:$0xff]  ;;  %v623_v7 = vld [vmem:[%s2391_s2 + $0x2d0] sm:$0xf] }
  0x6b   :  { %658 = vmatpush.msrb.mxu2 %v547_v8  ;;  %678 = vmatpush.msrb.mxu3 %v548_v9  ;;  %v869_v8 = vld [vmem:[%s2392_s3 + $0x2a0] sm:$0xf]  ;;  %v870_v9 = vld [vmem:[%s2392_s3 + $0x2a8] sm:$0xf] }
  0x6c   :  { %507 = vmatpush.msrb.mxu0 %v293_v10  ;;  %527 = vmatpush.msrb.mxu1 %v294_v11  ;;  %v871_v10 = vld [vmem:[%s2392_s3 + $0x2b0] sm:$0xf]  ;;  %v616_v11 = vld [vmem:[%s2391_s2 + $0x298] sm:$0xff] }
  0x6d   :  { %659 = vmatpush.msrb.mxu2 %v540_v12  ;;  %679 = vmatpush.msrb.mxu3 %v541_v13  ;;  %v862_v12 = vld [vmem:[%s2392_s3 + $0x268] sm:$0xff]  ;;  %v863_v13 = vld [vmem:[%s2392_s3 + $0x270] sm:$0xff] }
  0x6e   :  { %508 = vmatpush.msrb.mxu0 %v286_v14  ;;  %528 = vmatpush.msrb.mxu1 %v287_v15  ;;  %v864_v14 = vld [vmem:[%s2392_s3 + $0x278] sm:$0xff]  ;;  %v609_v15 = vld [vmem:[%s2391_s2 + $0x260] sm:$0xff] }
  0x6f   :  { %660 = vmatpush.msrb.mxu2 %v533_v16  ;;  %680 = vmatpush.msrb.mxu3 %v534_v17  ;;  %v855_v16 = vld [vmem:[%s2392_s3 + $0x230] sm:$0xff]  ;;  %v856_v17 = vld [vmem:[%s2392_s3 + $0x238] sm:$0xff] }
  0x70   :  { %1115 = vmatmul.msk.f32.vlgmr.msrb.gmra.mxu0 %vm115_vm1, %v1460_v24  ;;  %1117 = vmatmul.msk.f32.vlgmr.msrb.gmra.mxu1 %vm115_vm1, %v1460_v24 }
  0x71   :  { %1122 = vmatpush.msk.msra.mxu0 %vm119_vm0, %v619_v18  ;;  %1124 = vmatpush.msk.msra.mxu1 %vm119_vm0, %v620_v19  ;;  %v857_v18 = vld [vmem:[%s2392_s3 + $0x240] sm:$0xff]  ;;  %v602_v19 = vld [vmem:[%s2391_s2 + $0x228] sm:$0xff] }
  0x72   :  { %1126 = vmatpush.msk.msra.mxu2 %vm119_vm0, %v621_v20  ;;  %1128 = vmatpush.msk.msra.mxu3 %vm119_vm0, %v622_v21  ;;  %v848_v20 = vld [vmem:[%s2392_s3 + $0x1f8] sm:$0xff]  ;;  %v849_v21 = vld [vmem:[%s2392_s3 + $0x200] sm:$0xff] }
  0x73   :  { %689 = vmatpush.msra.mxu0 %v612_v22  ;;  %709 = vmatpush.msra.mxu1 %v613_v23  ;;  %v850_v22 = vld [vmem:[%s2392_s3 + $0x208] sm:$0xff]  ;;  %v595_v23 = vld [vmem:[%s2391_s2 + $0x1f0] sm:$0xff] }
  0x74   :  { %729 = vmatpush.msra.mxu2 %v614_v25  ;;  %749 = vmatpush.msra.mxu3 %v615_v26  ;;  %v841_v25 = vld [vmem:[%s2392_s3 + $0x1c0] sm:$0xff]  ;;  %v842_v26 = vld [vmem:[%s2392_s3 + $0x1c8] sm:$0xff] }
  0x75   :  { %690 = vmatpush.msra.mxu0 %v605_v27  ;;  %710 = vmatpush.msra.mxu1 %v606_v28  ;;  %v843_v27 = vld [vmem:[%s2392_s3 + $0x1d0] sm:$0xff]  ;;  %v588_v28 = vld [vmem:[%s2391_s2 + $0x1b8] sm:$0xff] }
  0x76   :  { %730 = vmatpush.msra.mxu2 %v607_v29  ;;  %750 = vmatpush.msra.mxu3 %v608_v30  ;;  %v834_v29 = vld [vmem:[%s2392_s3 + $0x188] sm:$0xff]  ;;  %v835_v30 = vld [vmem:[%s2392_s3 + $0x190] sm:$0xff] }
  0x77   :  { %691 = vmatpush.msra.mxu0 %v598_v31  ;;  %711 = vmatpush.msra.mxu1 %v599_v32  ;;  %v836_v31 = vld [vmem:[%s2392_s3 + $0x198] sm:$0xff]  ;;  %v581_v32 = vld [vmem:[%s2391_s2 + $0x180] sm:$0xff] }
  0x78   :  { %731 = vmatpush.msra.mxu2 %v600_v33  ;;  %751 = vmatpush.msra.mxu3 %v601_v34  ;;  %v827_v33 = vld [vmem:[%s2392_s3 + $0x150] sm:$0xff]  ;;  %v828_v34 = vld [vmem:[%s2392_s3 + $0x158] sm:$0xff] }
  0x79   :  { %692 = vmatpush.msra.mxu0 %v591_v35  ;;  %712 = vmatpush.msra.mxu1 %v592_v36  ;;  %v829_v35 = vld [vmem:[%s2392_s3 + $0x160] sm:$0xff]  ;;  %v574_v36 = vld [vmem:[%s2391_s2 + $0x148] sm:$0xff] }
  0x7a   :  { %732 = vmatpush.msra.mxu2 %v593_v37  ;;  %752 = vmatpush.msra.mxu3 %v594_v38  ;;  %v820_v37 = vld [vmem:[%s2392_s3 + $0x118] sm:$0xff]  ;;  %v821_v38 = vld [vmem:[%s2392_s3 + $0x120] sm:$0xff] }
  0x7b   :  { %693 = vmatpush.msra.mxu0 %v584_v39  ;;  %713 = vmatpush.msra.mxu1 %v585_v40  ;;  %v822_v39 = vld [vmem:[%s2392_s3 + $0x128] sm:$0xff]  ;;  %v567_v40 = vld [vmem:[%s2391_s2 + $0x110] sm:$0xff] }
  0x7c   :  { %733 = vmatpush.msra.mxu2 %v586_v41  ;;  %753 = vmatpush.msra.mxu3 %v587_v42  ;;  %v813_v41 = vld [vmem:[%s2392_s3 + $0xe0] sm:$0xff]  ;;  %v814_v42 = vld [vmem:[%s2392_s3 + $0xe8] sm:$0xff] }
  0x7d   :  { %694 = vmatpush.msra.mxu0 %v577_v43  ;;  %714 = vmatpush.msra.mxu1 %v578_v44  ;;  %v815_v43 = vld [vmem:[%s2392_s3 + $0xf0] sm:$0xff]  ;;  %v560_v44 = vld [vmem:[%s2391_s2 + $0xd8] sm:$0xff] }
  0x7e   :  { %734 = vmatpush.msra.mxu2 %v579_v45  ;;  %754 = vmatpush.msra.mxu3 %v580_v46  ;;  %v806_v45 = vld [vmem:[%s2392_s3 + $0xa8] sm:$0xff]  ;;  %v807_v46 = vld [vmem:[%s2392_s3 + $0xb0] sm:$0xff] }
  0x7f   :  { %695 = vmatpush.msra.mxu0 %v570_v47  ;;  %715 = vmatpush.msra.mxu1 %v571_v48  ;;  %v808_v47 = vld [vmem:[%s2392_s3 + $0xb8] sm:$0xff]  ;;  %v553_v48 = vld [vmem:[%s2391_s2 + $0xa0] sm:$0xff] }
  0x80   :  { %735 = vmatpush.msra.mxu2 %v572_v49  ;;  %755 = vmatpush.msra.mxu3 %v573_v50  ;;  %v799_v49 = vld [vmem:[%s2392_s3 + $0x70] sm:$0xff]  ;;  %v800_v50 = vld [vmem:[%s2392_s3 + $0x78] sm:$0xff] }
  0x81   :  { %696 = vmatpush.msra.mxu0 %v563_v51  ;;  %716 = vmatpush.msra.mxu1 %v564_v52  ;;  %v801_v51 = vld [vmem:[%s2392_s3 + $0x80] sm:$0xff]  ;;  %v546_v52 = vld [vmem:[%s2391_s2 + $0x68] sm:$0xff] }
  0x82   :  { %736 = vmatpush.msra.mxu2 %v565_v53  ;;  %756 = vmatpush.msra.mxu3 %v566_v54  ;;  %v792_v53 = vld [vmem:[%s2392_s3 + $0x38] sm:$0xff]  ;;  %v793_v54 = vld [vmem:[%s2392_s3 + $0x40] sm:$0xff] }
  0x83   :  { %697 = vmatpush.msra.mxu0 %v556_v55  ;;  %717 = vmatpush.msra.mxu1 %v557_v56  ;;  %v794_v55 = vld [vmem:[%s2392_s3 + $0x48] sm:$0xff]  ;;  %v539_v56 = vld [vmem:[%s2391_s2 + $0x30] sm:$0xff] }
  0x84   :  { %737 = vmatpush.msra.mxu2 %v558_v57  ;;  %757 = vmatpush.msra.mxu3 %v559_v58  ;;  %v785_v57 = vld [vmem:[%s2392_s3] sm:$0xff]  ;;  %v786_v58 = vld [vmem:[%s2392_s3 + $0x8] sm:$0xff] }
  0x85   :  { %698 = vmatpush.msra.mxu0 %v549_v59  ;;  %718 = vmatpush.msra.mxu1 %v550_v60  ;;  %v787_v59 = vld [vmem:[%s2392_s3 + $0x10] sm:$0xff]  ;;  %v872_v60 = vld [vmem:[%s2392_s3 + $0x2b8] sm:$0xf] }
  0x86   :  { %738 = vmatpush.msra.mxu2 %v551_v61  ;;  %758 = vmatpush.msra.mxu3 %v552_v62  ;;  %v873_v61 = vld [vmem:[%s2392_s3 + $0x2c0] sm:$0xf]  ;;  %v874_v62 = vld [vmem:[%s2392_s3 + $0x2c8] sm:$0xf] }
  0x87   :  { %699 = vmatpush.msra.mxu0 %v542_v63  ;;  %719 = vmatpush.msra.mxu1 %v543_v0  ;;  %v875_v63 = vld [vmem:[%s2392_s3 + $0x2d0] sm:$0xf]  ;;  %v865_v0 = vld [vmem:[%s2392_s3 + $0x280] sm:$0xff] }
  0x88   :  { %739 = vmatpush.msra.mxu2 %v544_v1  ;;  %759 = vmatpush.msra.mxu3 %v545_v2  ;;  %v866_v1 = vld [vmem:[%s2392_s3 + $0x288] sm:$0xff]  ;;  %v867_v2 = vld [vmem:[%s2392_s3 + $0x290] sm:$0xff] }
  0x89   :  { %700 = vmatpush.msra.mxu0 %v535_v3  ;;  %720 = vmatpush.msra.mxu1 %v536_v4  ;;  %v868_v3 = vld [vmem:[%s2392_s3 + $0x298] sm:$0xff]  ;;  %v859_v4 = vld [vmem:[%s2392_s3 + $0x250] sm:$0xff] }
  0x8a   :  { %740 = vmatpush.msra.mxu2 %v537_v5  ;;  %760 = vmatpush.msra.mxu3 %v538_v6  ;;  %v860_v5 = vld [vmem:[%s2392_s3 + $0x258] sm:$0xff]  ;;  %v861_v6 = vld [vmem:[%s2392_s3 + $0x260] sm:$0xff] }
  0x8b   :  { %1119 = vmatmul.msk.f32.vlgmr.msrb.gmra.mxu2 %vm115_vm1, %v1460_v24  ;;  %1121 = vmatmul.msk.f32.vlgmr.msrb.gmra.mxu3 %vm115_vm1, %v1460_v24 }
  0x8c   :  { %1130 = vmatpush.msk.msrb.mxu0 %vm119_vm0, %v623_v7  ;;  %1132 = vmatpush.msk.msrb.mxu1 %vm119_vm0, %v869_v8  ;;  %v851_v7 = vld [vmem:[%s2392_s3 + $0x210] sm:$0xff]  ;;  %v852_v8 = vld [vmem:[%s2392_s3 + $0x218] sm:$0xff] }
  0x8d   :  { %1134 = vmatpush.msk.msrb.mxu2 %vm119_vm0, %v870_v9  ;;  %1136 = vmatpush.msk.msrb.mxu3 %vm119_vm0, %v871_v10  ;;  %v853_v9 = vld [vmem:[%s2392_s3 + $0x220] sm:$0xff]  ;;  %v854_v10 = vld [vmem:[%s2392_s3 + $0x228] sm:$0xff] }
  0x8e   :  { %769 = vmatpush.msrb.mxu0 %v616_v11  ;;  %901 = vmatpush.msrb.mxu1 %v862_v12  ;;  %v844_v11 = vld [vmem:[%s2392_s3 + $0x1d8] sm:$0xff]  ;;  %v845_v12 = vld [vmem:[%s2392_s3 + $0x1e0] sm:$0xff] }
  0x8f   :  { %921 = vmatpush.msrb.mxu2 %v863_v13  ;;  %941 = vmatpush.msrb.mxu3 %v864_v14  ;;  %v846_v13 = vld [vmem:[%s2392_s3 + $0x1e8] sm:$0xff]  ;;  %v847_v14 = vld [vmem:[%s2392_s3 + $0x1f0] sm:$0xff] }
  0x90   :  { %770 = vmatpush.msrb.mxu0 %v609_v15  ;;  %902 = vmatpush.msrb.mxu1 %v855_v16  ;;  %v837_v15 = vld [vmem:[%s2392_s3 + $0x1a0] sm:$0xff]  ;;  %v838_v16 = vld [vmem:[%s2392_s3 + $0x1a8] sm:$0xff] }
  0x91   :  { %922 = vmatpush.msrb.mxu2 %v856_v17  ;;  %942 = vmatpush.msrb.mxu3 %v857_v18  ;;  %v839_v17 = vld [vmem:[%s2392_s3 + $0x1b0] sm:$0xff]  ;;  %v840_v18 = vld [vmem:[%s2392_s3 + $0x1b8] sm:$0xff] }
  0x92   :  { %771 = vmatpush.msrb.mxu0 %v602_v19  ;;  %903 = vmatpush.msrb.mxu1 %v848_v20  ;;  %v830_v19 = vld [vmem:[%s2392_s3 + $0x168] sm:$0xff]  ;;  %v831_v20 = vld [vmem:[%s2392_s3 + $0x170] sm:$0xff] }
  0x93   :  { %923 = vmatpush.msrb.mxu2 %v849_v21  ;;  %943 = vmatpush.msrb.mxu3 %v850_v22  ;;  %v832_v21 = vld [vmem:[%s2392_s3 + $0x178] sm:$0xff]  ;;  %v833_v22 = vld [vmem:[%s2392_s3 + $0x180] sm:$0xff] }
  0x94   :  { %772 = vmatpush.msrb.mxu0 %v595_v23  ;;  %904 = vmatpush.msrb.mxu1 %v841_v25  ;;  %v823_v23 = vld [vmem:[%s2392_s3 + $0x130] sm:$0xff]  ;;  %v824_v25 = vld [vmem:[%s2392_s3 + $0x138] sm:$0xff] }
  0x95   :  { %924 = vmatpush.msrb.mxu2 %v842_v26  ;;  %944 = vmatpush.msrb.mxu3 %v843_v27  ;;  %v825_v26 = vld [vmem:[%s2392_s3 + $0x140] sm:$0xff]  ;;  %v826_v27 = vld [vmem:[%s2392_s3 + $0x148] sm:$0xff] }
  0x96   :  { %773 = vmatpush.msrb.mxu0 %v588_v28  ;;  %905 = vmatpush.msrb.mxu1 %v834_v29  ;;  %v1149_v28 = vmov 0   ;;  %v1058_v29 = vld [vmem:[%s2393_s5] sm:$0xff] }
  0x97   :  { %925 = vmatpush.msrb.mxu2 %v835_v30  ;;  %945 = vmatpush.msrb.mxu3 %v836_v31  ;;  %v816_v30 = vld [vmem:[%s2392_s3 + $0xf8] sm:$0xff]  ;;  %v817_v31 = vld [vmem:[%s2392_s3 + $0x100] sm:$0xff] }
  0x98   :  { %774 = vmatpush.msrb.mxu0 %v581_v32  ;;  %906 = vmatpush.msrb.mxu1 %v827_v33  ;;  %v818_v32 = vld [vmem:[%s2392_s3 + $0x108] sm:$0xff]  ;;  %v819_v33 = vld [vmem:[%s2392_s3 + $0x110] sm:$0xff] }
  0x99   :  { %926 = vmatpush.msrb.mxu2 %v828_v34  ;;  %946 = vmatpush.msrb.mxu3 %v829_v35  ;;  %v809_v34 = vld [vmem:[%s2392_s3 + $0xc0] sm:$0xff]  ;;  %v810_v35 = vld [vmem:[%s2392_s3 + $0xc8] sm:$0xff] }
  0x9a   :  { %775 = vmatpush.msrb.mxu0 %v574_v36  ;;  %907 = vmatpush.msrb.mxu1 %v820_v37  ;;  %v811_v36 = vld [vmem:[%s2392_s3 + $0xd0] sm:$0xff]  ;;  %v812_v37 = vld [vmem:[%s2392_s3 + $0xd8] sm:$0xff] }
  0x9b   :  { %927 = vmatpush.msrb.mxu2 %v821_v38  ;;  %947 = vmatpush.msrb.mxu3 %v822_v39  ;;  %v1148_v38 = vld [vmem:[%s2390_s4] sm:$0xff]  ;;  %v802_v39 = vld [vmem:[%s2392_s3 + $0x88] sm:$0xff] }
  0x9c   :  { %776 = vmatpush.msrb.mxu0 %v567_v40  ;;  %908 = vmatpush.msrb.mxu1 %v813_v41  ;;  %v803_v40 = vld [vmem:[%s2392_s3 + $0x90] sm:$0xff]  ;;  %v804_v41 = vld [vmem:[%s2392_s3 + $0x98] sm:$0xff] }
  0x9d   :  { %928 = vmatpush.msrb.mxu2 %v814_v42  ;;  %948 = vmatpush.msrb.mxu3 %v815_v43  ;;  %v805_v42 = vld [vmem:[%s2392_s3 + $0xa0] sm:$0xff]  ;;  %v795_v43 = vld [vmem:[%s2392_s3 + $0x50] sm:$0xff] }
  0x9e   :  { %1125 = vmatmul.msk.f32.vlgmr.msra.gmra.mxu1 %vm115_vm1, %v1460_v24  ;;  %1127 = vmatmul.msk.f32.vlgmr.msra.gmra.mxu2 %vm115_vm1, %v1460_v24 }
  0x9f   :  { %1129 = vmatmul.msk.f32.vlgmr.msra.gmra.mxu3 %vm115_vm1, %v1460_v24  ;;  %777 = vmatpush.msrb.mxu0 %v560_v44  ;;  %v796_v44 = vld [vmem:[%s2392_s3 + $0x58] sm:$0xff] }
  0xa0   :  { %909 = vmatpush.msrb.mxu1 %v806_v45  ;;  %929 = vmatpush.msrb.mxu2 %v807_v46  ;;  %v797_v45 = vld [vmem:[%s2392_s3 + $0x60] sm:$0xff]  ;;  %v798_v46 = vld [vmem:[%s2392_s3 + $0x68] sm:$0xff] }
  0xa1   :  { %949 = vmatpush.msrb.mxu3 %v808_v47  ;;  %778 = vmatpush.msrb.mxu0 %v553_v48  ;;  %v788_v47 = vld [vmem:[%s2392_s3 + $0x18] sm:$0xff]  ;;  %v789_v48 = vld [vmem:[%s2392_s3 + $0x20] sm:$0xff] }
  0xa2   :  { %910 = vmatpush.msrb.mxu1 %v799_v49  ;;  %930 = vmatpush.msrb.mxu2 %v800_v50  ;;  %v790_v49 = vld [vmem:[%s2392_s3 + $0x28] sm:$0xff]  ;;  %v791_v50 = vld [vmem:[%s2392_s3 + $0x30] sm:$0xff] }
  0xa3   :  { %950 = vmatpush.msrb.mxu3 %v801_v51  ;;  %779 = vmatpush.msrb.mxu0 %v546_v52 }
  0xa4   :  { %911 = vmatpush.msrb.mxu1 %v792_v53  ;;  %931 = vmatpush.msrb.mxu2 %v793_v54 }
  0xa5   :  { %951 = vmatpush.msrb.mxu3 %v794_v55  ;;  %780 = vmatpush.msrb.mxu0 %v539_v56 }
  0xa6   :  { %912 = vmatpush.msrb.mxu1 %v785_v57  ;;  %932 = vmatpush.msrb.mxu2 %v786_v58 }
  0xa7   :  { %952 = vmatpush.msrb.mxu3 %v787_v59  ;;  %1123 = vmatmul.msk.f32.vlgmr.msra.gmra.mxu0 %vm115_vm1, %v1460_v24 }
  0xa8   :  { %1133 = vmatmul.msk.f32.vlgmr.msrb.gmra.mxu1 %vm115_vm1, %v1460_v24  ;;  %1135 = vmatmul.msk.f32.vlgmr.msrb.gmra.mxu2 %vm115_vm1, %v1460_v24 }
  0xa9   :  { %1137 = vmatmul.msk.f32.vlgmr.msrb.gmra.mxu3 %vm115_vm1, %v1460_v24  ;;  %1138 = vmatpush.msk.msra.mxu0 %vm119_vm0, %v872_v60  ;;  %v858_v24 = vld [vmem:[%s2392_s3 + $0x248] sm:$0xff] }
  0xaa   :  { %1140 = vmatpush.msk.msra.mxu1 %vm119_vm0, %v873_v61  ;;  %1142 = vmatpush.msk.msra.mxu2 %vm119_vm0, %v874_v62 }
  0xab   :  { %1144 = vmatpush.msk.msra.mxu3 %vm119_vm0, %v875_v63  ;;  %961 = vmatpush.msra.mxu0 %v865_v0 }
  0xac   :  { %981 = vmatpush.msra.mxu1 %v866_v1  ;;  %1001 = vmatpush.msra.mxu2 %v867_v2 }
  0xad   :  { %1021 = vmatpush.msra.mxu3 %v868_v3  ;;  %962 = vmatpush.msra.mxu0 %v858_v24 }
  0xae   :  { %982 = vmatpush.msra.mxu1 %v859_v4  ;;  %1002 = vmatpush.msra.mxu2 %v860_v5 }
  0xaf   :  { %1022 = vmatpush.msra.mxu3 %v861_v6  ;;  %963 = vmatpush.msra.mxu0 %v851_v7 }
  0xb0   :  { %983 = vmatpush.msra.mxu1 %v852_v8  ;;  %1003 = vmatpush.msra.mxu2 %v853_v9 }
  0xb1   :  { %1023 = vmatpush.msra.mxu3 %v854_v10  ;;  %964 = vmatpush.msra.mxu0 %v844_v11  ;;  %v218_v53 = vpop.f32.mrf.mxu3 }
  0xb2   :  { %984 = vmatpush.msra.mxu1 %v845_v12  ;;  %1004 = vmatpush.msra.mxu2 %v846_v13 }
  0xb3   :  { %1024 = vmatpush.msra.mxu3 %v847_v14  ;;  %965 = vmatpush.msra.mxu0 %v837_v15  ;;  %v158_v56 = vpop.f32.mrf.mxu0 }
  0xb4   :  { %985 = vmatpush.msra.mxu1 %v838_v16  ;;  %1005 = vmatpush.msra.mxu2 %v839_v17  ;;  %v178_v51 = vpop.f32.mrf.mxu1 }
  0xb5   :  { %1025 = vmatpush.msra.mxu3 %v840_v18  ;;  %966 = vmatpush.msra.mxu0 %v830_v19 }
  0xb6   :  { %986 = vmatpush.msra.mxu1 %v831_v20  ;;  %1006 = vmatpush.msra.mxu2 %v832_v21 }
  0xb7   :  { %1026 = vmatpush.msra.mxu3 %v833_v22  ;;  %1147 = vset.pattern.permute.xlu0 %v1149_v28 }
  0xb8   :  { %967 = vmatpush.msra.mxu0 %v823_v23  ;;  %987 = vmatpush.msra.mxu1 %v824_v25 }
  0xb9   :  { %1007 = vmatpush.msra.mxu2 %v825_v26  ;;  %1027 = vmatpush.msra.mxu3 %v826_v27 }
  0xba   :  { %1061 = vperm.xlu0 %1147, %v1058_v29   ;;  %968 = vmatpush.msra.mxu0 %v816_v30  ;;  %v198_v52 = vpop.f32.mrf.mxu2 }
  0xbb   :  { %988 = vmatpush.msra.mxu1 %v817_v31  ;;  %1008 = vmatpush.msra.mxu2 %v818_v32  ;;  %v410_v57 = vpop.f32.mrf.mxu3 }
  0xbc   :  { %1028 = vmatpush.msra.mxu3 %v819_v33  ;;  %1131 = vmatmul.msk.f32.vlgmr.msrb.gmra.mxu0 %vm115_vm1, %v1148_v38  ;;  %v1037_v7 = vmax.f32 %v158_v56, %v410_v57 }
  0xbd   :  { %969 = vmatpush.msra.mxu0 %v809_v34  ;;  %989 = vmatpush.msra.mxu1 %v810_v35 }
  0xbe   :  { %1009 = vmatpush.msra.mxu2 %v811_v36  ;;  %1029 = vmatpush.msra.mxu3 %v812_v37 }
  0xbf   :  { %970 = vmatpush.msra.mxu0 %v802_v39  ;;  %990 = vmatpush.msra.mxu1 %v803_v40 }
  0xc0   :  { %1010 = vmatpush.msra.mxu2 %v804_v41  ;;  %1030 = vmatpush.msra.mxu3 %v805_v42 }
  0xc1   :  { %971 = vmatpush.msra.mxu0 %v795_v43  ;;  %991 = vmatpush.msra.mxu1 %v796_v44 }
  0xc2   :  { %1011 = vmatpush.msra.mxu2 %v797_v45  ;;  %1031 = vmatpush.msra.mxu3 %v798_v46 }
  0xc3   :  { %972 = vmatpush.msra.mxu0 %v788_v47  ;;  %992 = vmatpush.msra.mxu1 %v789_v48 }
  0xc4   :  { %1012 = vmatpush.msra.mxu2 %v790_v49  ;;  %1032 = vmatpush.msra.mxu3 %v791_v50 }
  0xc5   :  { %1139 = vmatmul.msk.f32.vlgmr.msra.gmra.mxu0 %vm115_vm1, %v1148_v38  ;;  %1141 = vmatmul.msk.f32.vlgmr.msra.gmra.mxu1 %vm115_vm1, %v1148_v38 }
  0xc6   :  { %1143 = vmatmul.msk.f32.vlgmr.msra.gmra.mxu2 %vm115_vm1, %v1148_v38  ;;  %1145 = vmatmul.msk.f32.vlgmr.msra.gmra.mxu3 %vm115_vm1, %v1148_v38 }
  0xc7   :  { %v238_v59 = vpop.f32.mrf.mxu0 }
  0xc8   :  { %v258_v54 = vpop.f32.mrf.mxu1 }
  0xce   :  { %v278_v55 = vpop.f32.mrf.mxu2 }
  0xd1   :  { %v450_v58 = vpop.f32.mrf.mxu1  ;;  %v430_v0 = vpop.f32.mrf.mxu0 }
  0xd2   :  { %v1038_v11 = vmax.f32 %v178_v51, %v430_v0  ;;  %v1039_v15 = vmax.f32 %v198_v52, %v450_v58 }
  0xd8   :  { %v470_v60 = vpop.f32.mrf.mxu2  ;;  %v490_v61 = vpop.f32.mrf.mxu3 }
  0xd9   :  { %v1040_v29 = vmax.f32 %v218_v53, %v470_v60  ;;  %v1041_v30 = vmax.f32 %v238_v59, %v490_v61 }
  0xed   :  { %v530_v62 = vpop.f32.mrf.mxu1  ;;  %v510_v24 = vpop.f32.mrf.mxu0 }
  0xee   :  { %v1042_v41 = vmax.f32 %v258_v54, %v510_v24  ;;  %v1043_v42 = vmax.f32 %v278_v55, %v530_v62 }
 0x10e   :  { %v662_v63 = vpop.f32.mrf.mxu2  ;;  %v682_v1 = vpop.f32.mrf.mxu3 }
 0x11b   :  { %v722_v2 = vpop.f32.mrf.mxu1 }
 0x121   :  { %v742_v3 = vpop.f32.mrf.mxu2 }
 0x122   :  { %v762_v4 = vpop.f32.mrf.mxu3 }
 0x124   :  { %v702_v9 = vpop.f32.mrf.mxu0 }
 0x125   :  { %v914_v5 = vpop.f32.mrf.mxu1 }
 0x126   :  { %v1044_v6 = vmax.f32 %v662_v63, %v914_v5 }
 0x128   :  { %v1051_v8 = vmax.f32 %v1037_v7, %v1044_v6 }
 0x12b   :  { %v934_v10 = vpop.f32.mrf.mxu2 }
 0x12c   :  { %v1062_v12 = vpop.permute.xlu0 %1061  ;;  %v1045_v13 = vmax.f32 %v682_v1, %v934_v10  ;;  %v954_v14 = vpop.f32.mrf.mxu3 }
 0x12d   :  { %v1064_v16 = vadd.f32 %v1062_v12, %v1051_v8  ;;  %v1046_v17 = vmax.f32 %v702_v9, %v954_v14 }
 0x12e   :  { %v1052_v18 = vmax.f32 %v1038_v11, %v1045_v13 }
 0x12f   :  { %v1071_v19 = vmax.f32 %v1064_v16, 0.0  ;;  %v1053_v20 = vmax.f32 %v1039_v15, %v1046_v17 }
 0x130   :  { %v1065_v21 = vadd.f32 %v1062_v12, %v1052_v18 }
 0x131   :  { %1078 = vst [vmem:[%s2394_s6] sm:$0xff] %v1071_v19  ;;  %v1066_v22 = vadd.f32 %v1062_v12, %v1053_v20 }
 0x132   :  { %v1072_v23 = vmax.f32 %v1065_v21, 0.0 }
 0x133   :  { %v1073_v25 = vmax.f32 %v1066_v22, 0.0 }
 0x134   :  { %1079 = vst [vmem:[%s2394_s6 + $0x8] sm:$0xff] %v1072_v23 }
 0x135   :  { %1080 = vst [vmem:[%s2394_s6 + $0x10] sm:$0xff] %v1073_v25 }
 0x139   :  { %v782_v26 = vpop.f32.mrf.mxu0 }
 0x142   :  { %v974_v27 = vpop.f32.mrf.mxu0  ;;  %v994_v28 = vpop.f32.mrf.mxu1 }
 0x143   :  { %v1047_v31 = vmax.f32 %v722_v2, %v974_v27  ;;  %v1048_v32 = vmax.f32 %v742_v3, %v994_v28 }
 0x145   :  { %v1054_v33 = vmax.f32 %v1040_v29, %v1047_v31  ;;  %v1055_v34 = vmax.f32 %v1041_v30, %v1048_v32 }
 0x147   :  { %v1067_v35 = vadd.f32 %v1062_v12, %v1054_v33  ;;  %v1068_v36 = vadd.f32 %v1062_v12, %v1055_v34 }
 0x149   :  { %v1074_v37 = vmax.f32 %v1067_v35, 0.0  ;;  %v1075_v38 = vmax.f32 %v1068_v36, 0.0  ;;  %v1014_v39 = vpop.f32.mrf.mxu2  ;;  %v1034_v40 = vpop.f32.mrf.mxu3 }
 0x14a   :  { %v1049_v43 = vmax.f32 %v762_v4, %v1014_v39  ;;  %v1050_v44 = vmax.f32 %v782_v26, %v1034_v40 }
 0x14b   :  { %1081 = vst [vmem:[%s2394_s6 + $0x18] sm:$0xff] %v1074_v37 }
 0x14c   :  { %1082 = vst [vmem:[%s2394_s6 + $0x20] sm:$0xff] %v1075_v38  ;;  %v1056_v45 = vmax.f32 %v1042_v41, %v1049_v43  ;;  %v1057_v46 = vmax.f32 %v1043_v42, %v1050_v44 }
 0x14e   :  { %v1069_v47 = vadd.f32 %v1062_v12, %v1056_v45  ;;  %v1070_v48 = vadd.f32 %v1062_v12, %v1057_v46 }
 0x150   :  { %v1076_v49 = vmax.f32 %v1069_v47, 0.0  ;;  %v1077_v50 = vmax.f32 %v1070_v48, 0.0 }
 0x152   :  { %1083 = vst [vmem:[%s2394_s6 + $0x28] sm:$0xff] %v1076_v49 }
 0x153   :  { %1085 = vst.msk [vmem:[%s2394_s6 + $0x30] sm:$0xff] %vm1084_vm2, %v1077_v50 }

// kernel: baseline_token_cnn_forward.6
= control target key start
LH: loop header
LB: loop body
LE: loop exit
PB: predicated region body
PF: predicated region fallthrough
CT: control target
= control target key end

     0   :  { %vm43_vm0 = vcmask 588800   ;;  %vm321_vm1 = vcmask 277504   ;;  %s661_s1 = inlined_call_operand.vmem [shape: f32[72,162], index: 1, kind: input, shape index: {}]   ;;  %s662_s0 = inlined_call_operand.vmem [shape: f32[72,162], index: 0, kind: input, shape index: {}]   ;;  %s663_s3 = inlined_call_operand.vmem [shape: f32[72,162], index: 3, kind: input, shape index: {}]   ;;  %s664_s4 = inlined_call_operand.vmem [shape: f32[16,72], index: 4, kind: input, shape index: {}]   ;;  %s665_s2 = inlined_call_operand.vmem [shape: f32[72,162], index: 2, kind: input, shape index: {}]   ;;  %s666_s5 = inlined_call_operand.vmem [shape: f32[16,1], index: 5, kind: input, shape index: {}]   ;;  %s667_s6 = inlined_call_operand.vmem [shape: f32[16,162], index: 6, kind: output, shape index: {}]  }
   0x1   :  { %v112_v0 = vld [vmem:[%s661_s1 + $0x80] sm:$0xff]  ;;  %v113_v1 = vld [vmem:[%s661_s1 + $0x88] sm:$0xff]  ;;  %v110_v2 = vld [vmem:[%s661_s1 + $0x70] sm:$0xff] }
   0x2   :  { %121 = vmatpush.msra.mxu2 %v112_v0  ;;  %144 = vmatpush.msra.mxu3 %v113_v1  ;;  %v111_v3 = vld [vmem:[%s661_s1 + $0x78] sm:$0xff]  ;;  %v108_v4 = vld [vmem:[%s661_s1 + $0x60] sm:$0xff]  ;;  %v109_v5 = vld [vmem:[%s661_s1 + $0x68] sm:$0xff] }
   0x3   :  { %v41_v6 = vld [vmem:[%s662_s0 + $0x80] sm:$0xff]  ;;  %v42_v7 = vld [vmem:[%s662_s0 + $0x88] sm:$0xff]  ;;  %v39_v8 = vld [vmem:[%s662_s0 + $0x70] sm:$0xff] }
   0x4   :  { %122 = vmatpush.msra.mxu2 %v110_v2  ;;  %145 = vmatpush.msra.mxu3 %v111_v3  ;;  %v40_v9 = vld [vmem:[%s662_s0 + $0x78] sm:$0xff]  ;;  %v106_v10 = vld [vmem:[%s661_s1 + $0x50] sm:$0xff]  ;;  %v37_v12 = vld [vmem:[%s662_s0 + $0x60] sm:$0xff] }
   0x5   :  { %57 = vmatpush.msra.mxu0 %v41_v6  ;;  %80 = vmatpush.msra.mxu1 %v42_v7  ;;  %v107_v11 = vld [vmem:[%s661_s1 + $0x58] sm:$0xff]  ;;  %v38_v13 = vld [vmem:[%s662_s0 + $0x68] sm:$0xff]  ;;  %v104_v14 = vld [vmem:[%s661_s1 + $0x40] sm:$0xff] }
   0x6   :  { %123 = vmatpush.msra.mxu2 %v108_v4  ;;  %146 = vmatpush.msra.mxu3 %v109_v5  ;;  %v105_v15 = vld [vmem:[%s661_s1 + $0x48] sm:$0xff]  ;;  %v35_v16 = vld [vmem:[%s662_s0 + $0x50] sm:$0xff]  ;;  %v36_v17 = vld [vmem:[%s662_s0 + $0x58] sm:$0xff] }
   0x7   :  { %58 = vmatpush.msra.mxu0 %v39_v8  ;;  %81 = vmatpush.msra.mxu1 %v40_v9  ;;  %v102_v18 = vld [vmem:[%s661_s1 + $0x30] sm:$0xff]  ;;  %v103_v19 = vld [vmem:[%s661_s1 + $0x38] sm:$0xff]  ;;  %v33_v20 = vld [vmem:[%s662_s0 + $0x40] sm:$0xff] }
   0x8   :  { %124 = vmatpush.msra.mxu2 %v106_v10  ;;  %147 = vmatpush.msra.mxu3 %v107_v11  ;;  %v34_v21 = vld [vmem:[%s662_s0 + $0x48] sm:$0xff]  ;;  %v100_v22 = vld [vmem:[%s661_s1 + $0x20] sm:$0xff]  ;;  %v31_v24 = vld [vmem:[%s662_s0 + $0x30] sm:$0xff]  ;;  %v347_v11 = vmov 0  }
   0x9   :  { %59 = vmatpush.msra.mxu0 %v37_v12  ;;  %82 = vmatpush.msra.mxu1 %v38_v13  ;;  %v101_v23 = vld [vmem:[%s661_s1 + $0x28] sm:$0xff]  ;;  %v32_v25 = vld [vmem:[%s662_s0 + $0x38] sm:$0xff]  ;;  %v98_v26 = vld [vmem:[%s661_s1 + $0x10] sm:$0xff] }
   0xa   :  { %125 = vmatpush.msra.mxu2 %v104_v14  ;;  %148 = vmatpush.msra.mxu3 %v105_v15  ;;  %v99_v27 = vld [vmem:[%s661_s1 + $0x18] sm:$0xff]  ;;  %v29_v28 = vld [vmem:[%s662_s0 + $0x20] sm:$0xff]  ;;  %v30_v29 = vld [vmem:[%s662_s0 + $0x28] sm:$0xff] }
   0xb   :  { %60 = vmatpush.msra.mxu0 %v35_v16  ;;  %83 = vmatpush.msra.mxu1 %v36_v17  ;;  %v96_v30 = vld [vmem:[%s661_s1] sm:$0xff]  ;;  %v97_v31 = vld [vmem:[%s661_s1 + $0x8] sm:$0xff]  ;;  %v238_v35 = vld [vmem:[%s663_s3 + $0x70] sm:$0xff] }
   0xc   :  { %126 = vmatpush.msra.mxu2 %v102_v18  ;;  %149 = vmatpush.msra.mxu3 %v103_v19  ;;  %v240_v32 = vld [vmem:[%s663_s3 + $0x80] sm:$0xff]  ;;  %v241_v33 = vld [vmem:[%s663_s3 + $0x88] sm:$0xff]  ;;  %v239_v36 = vld [vmem:[%s663_s3 + $0x78] sm:$0xff] }
   0xd   :  { %61 = vmatpush.msra.mxu0 %v33_v20  ;;  %84 = vmatpush.msra.mxu1 %v34_v21  ;;  %v488_v34 = vld [vmem:[%s664_s4] sm:$0xff]  ;;  %v27_v37 = vld [vmem:[%s662_s0 + $0x10] sm:$0xff]  ;;  %v28_v38 = vld [vmem:[%s662_s0 + $0x18] sm:$0xff] }
   0xe   :  { %127 = vmatpush.msra.mxu2 %v100_v22  ;;  %150 = vmatpush.msra.mxu3 %v101_v23  ;;  %v236_v39 = vld [vmem:[%s663_s3 + $0x60] sm:$0xff]  ;;  %v237_v40 = vld [vmem:[%s663_s3 + $0x68] sm:$0xff]  ;;  %v234_v45 = vld [vmem:[%s663_s3 + $0x50] sm:$0xff] }
   0xf   :  { %62 = vmatpush.msra.mxu0 %v31_v24  ;;  %85 = vmatpush.msra.mxu1 %v32_v25  ;;  %v25_v41 = vld [vmem:[%s662_s0] sm:$0xff]  ;;  %v26_v42 = vld [vmem:[%s662_s0 + $0x8] sm:$0xff]  ;;  %v235_v46 = vld [vmem:[%s663_s3 + $0x58] sm:$0xff] }
  0x10   :  { %128 = vmatpush.msra.mxu2 %v98_v26  ;;  %151 = vmatpush.msra.mxu3 %v99_v27  ;;  %v176_v43 = vld [vmem:[%s665_s2 + $0x80] sm:$0xff]  ;;  %v177_v44 = vld [vmem:[%s665_s2 + $0x88] sm:$0xff]  ;;  %v174_v47 = vld [vmem:[%s665_s2 + $0x70] sm:$0xff] }
  0x11   :  { %63 = vmatpush.msra.mxu0 %v29_v28  ;;  %86 = vmatpush.msra.mxu1 %v30_v29  ;;  %v175_v48 = vld [vmem:[%s665_s2 + $0x78] sm:$0xff]  ;;  %v232_v49 = vld [vmem:[%s663_s3 + $0x40] sm:$0xff]  ;;  %v233_v50 = vld [vmem:[%s663_s3 + $0x48] sm:$0xff] }
  0x12   :  { %129 = vmatpush.msra.mxu2 %v96_v30  ;;  %152 = vmatpush.msra.mxu3 %v97_v31  ;;  %v549_v51 = vld [vmem:[%s664_s4 + $0x8] sm:$0xff]  ;;  %v172_v52 = vld [vmem:[%s665_s2 + $0x60] sm:$0xff]  ;;  %v230_v54 = vld [vmem:[%s663_s3 + $0x30] sm:$0xff] }
  0x13   :  { %333 = vmatmul.msk.f32.vlgmr.msra.gmra.mxu2 %vm43_vm0, %v488_v34  ;;  %335 = vmatmul.msk.f32.vlgmr.msra.gmra.mxu3 %vm43_vm0, %v488_v34  ;;  %v173_v53 = vld [vmem:[%s665_s2 + $0x68] sm:$0xff]  ;;  %v231_v55 = vld [vmem:[%s663_s3 + $0x38] sm:$0xff]  ;;  %v170_v56 = vld [vmem:[%s665_s2 + $0x50] sm:$0xff] }
  0x14   :  { %249 = vmatpush.msrb.mxu2 %v240_v32  ;;  %272 = vmatpush.msrb.mxu3 %v241_v33  ;;  %v171_v57 = vld [vmem:[%s665_s2 + $0x58] sm:$0xff]  ;;  %v228_v58 = vld [vmem:[%s663_s3 + $0x20] sm:$0xff]  ;;  %v229_v59 = vld [vmem:[%s663_s3 + $0x28] sm:$0xff] }
  0x15   :  { %64 = vmatpush.msra.mxu0 %v27_v37  ;;  %87 = vmatpush.msra.mxu1 %v28_v38  ;;  %v168_v60 = vld [vmem:[%s665_s2 + $0x40] sm:$0xff]  ;;  %v169_v61 = vld [vmem:[%s665_s2 + $0x48] sm:$0xff]  ;;  %v226_v62 = vld [vmem:[%s663_s3 + $0x10] sm:$0xff] }
  0x16   :  { %250 = vmatpush.msrb.mxu2 %v238_v35  ;;  %273 = vmatpush.msrb.mxu3 %v239_v36  ;;  %v227_v63 = vld [vmem:[%s663_s3 + $0x18] sm:$0xff]  ;;  %v166_v0 = vld [vmem:[%s665_s2 + $0x30] sm:$0xff]  ;;  %v224_v2 = vld [vmem:[%s663_s3] sm:$0xff] }
  0x17   :  { %65 = vmatpush.msra.mxu0 %v25_v41  ;;  %88 = vmatpush.msra.mxu1 %v26_v42  ;;  %v167_v1 = vld [vmem:[%s665_s2 + $0x38] sm:$0xff]  ;;  %v225_v3 = vld [vmem:[%s663_s3 + $0x8] sm:$0xff]  ;;  %v164_v4 = vld [vmem:[%s665_s2 + $0x20] sm:$0xff] }
  0x18   :  { %251 = vmatpush.msrb.mxu2 %v236_v39  ;;  %274 = vmatpush.msrb.mxu3 %v237_v40  ;;  %v165_v5 = vld [vmem:[%s665_s2 + $0x28] sm:$0xff]  ;;  %v162_v6 = vld [vmem:[%s665_s2 + $0x10] sm:$0xff]  ;;  %v163_v7 = vld [vmem:[%s665_s2 + $0x18] sm:$0xff] }
  0x19   :  { %185 = vmatpush.msrb.mxu0 %v176_v43  ;;  %208 = vmatpush.msrb.mxu1 %v177_v44  ;;  %v300_v8 = vld [vmem:[%s666_s5] sm:$0xff]  ;;  %v161_v10 = vld [vmem:[%s665_s2 + $0x8] sm:$0xff] }
  0x1a   :  { %252 = vmatpush.msrb.mxu2 %v234_v45  ;;  %275 = vmatpush.msrb.mxu3 %v235_v46  ;;  %v160_v9 = vld [vmem:[%s665_s2] sm:$0xff]  ;;  %v301_v12 = vld [vmem:[%s666_s5 + $0x8] sm:$0xff] }
  0x1b   :  { %329 = vmatmul.msk.f32.vlgmr.msra.gmra.mxu0 %vm43_vm0, %v488_v34  ;;  %331 = vmatmul.msk.f32.vlgmr.msra.gmra.mxu1 %vm43_vm0, %v488_v34 }
  0x1c   :  { %186 = vmatpush.msrb.mxu0 %v174_v47  ;;  %209 = vmatpush.msrb.mxu1 %v175_v48 }
  0x1d   :  { %253 = vmatpush.msrb.mxu2 %v232_v49  ;;  %276 = vmatpush.msrb.mxu3 %v233_v50 }
  0x1e   :  { %334 = vmatmul.msk.f32.gmra.mxu2 %vm43_vm0, %v549_v51  ;;  %336 = vmatmul.msk.f32.gmra.mxu3 %vm43_vm0, %v549_v51 }
  0x1f   :  { %187 = vmatpush.msrb.mxu0 %v172_v52  ;;  %210 = vmatpush.msrb.mxu1 %v173_v53 }
  0x20   :  { %254 = vmatpush.msrb.mxu2 %v230_v54  ;;  %277 = vmatpush.msrb.mxu3 %v231_v55 }
  0x21   :  { %188 = vmatpush.msrb.mxu0 %v170_v56  ;;  %211 = vmatpush.msrb.mxu1 %v171_v57 }
  0x22   :  { %255 = vmatpush.msrb.mxu2 %v228_v58  ;;  %278 = vmatpush.msrb.mxu3 %v229_v59 }
  0x23   :  { %189 = vmatpush.msrb.mxu0 %v168_v60  ;;  %212 = vmatpush.msrb.mxu1 %v169_v61 }
  0x24   :  { %256 = vmatpush.msrb.mxu2 %v226_v62  ;;  %279 = vmatpush.msrb.mxu3 %v227_v63 }
  0x25   :  { %330 = vmatmul.msk.f32.gmra.mxu0 %vm43_vm0, %v549_v51  ;;  %332 = vmatmul.msk.f32.gmra.mxu1 %vm43_vm0, %v549_v51 }
  0x26   :  { %190 = vmatpush.msrb.mxu0 %v166_v0  ;;  %213 = vmatpush.msrb.mxu1 %v167_v1 }
  0x27   :  { %257 = vmatpush.msrb.mxu2 %v224_v2  ;;  %280 = vmatpush.msrb.mxu3 %v225_v3 }
  0x28   :  { %341 = vmatmul.msk.f32.vlgmr.msrb.gmra.mxu2 %vm43_vm0, %v488_v34  ;;  %343 = vmatmul.msk.f32.vlgmr.msrb.gmra.mxu3 %vm43_vm0, %v488_v34 }
  0x29   :  { %191 = vmatpush.msrb.mxu0 %v164_v4  ;;  %214 = vmatpush.msrb.mxu1 %v165_v5 }
  0x2a   :  { %346 = vset.pattern.permute.xlu0 %v347_v11 }
  0x2b   :  { %192 = vmatpush.msrb.mxu0 %v162_v6  ;;  %215 = vmatpush.msrb.mxu1 %v163_v7 }
  0x2c   :  { %304 = vperm.xlu0 %346, %v300_v8  }
  0x2d   :  { %193 = vmatpush.msrb.mxu0 %v160_v9  ;;  %216 = vmatpush.msrb.mxu1 %v161_v10 }
  0x2e   :  { %337 = vmatmul.msk.f32.vlgmr.msrb.gmra.mxu0 %vm43_vm0, %v488_v34  ;;  %339 = vmatmul.msk.f32.vlgmr.msrb.gmra.mxu1 %vm43_vm0, %v488_v34 }
  0x30   :  { %342 = vmatmul.msk.f32.gmra.mxu2 %vm43_vm0, %v549_v51  ;;  %344 = vmatmul.msk.f32.gmra.mxu3 %vm43_vm0, %v549_v51 }
  0x34   :  { %309 = vperm.xlu0 %346, %v301_v12  }
  0x36   :  { %338 = vmatmul.msk.f32.gmra.mxu0 %vm43_vm0, %v549_v51  ;;  %340 = vmatmul.msk.f32.gmra.mxu1 %vm43_vm0, %v549_v51 }
  0x96   :  { %v131_v13 = vpop.f32.mrf.mxu2  ;;  %v154_v14 = vpop.f32.mrf.mxu3 }
  0x98   :  { %v67_v15 = vpop.f32.mrf.mxu0  ;;  %v90_v16 = vpop.f32.mrf.mxu1 }
  0x99   :  { %v288_v25 = vmax.f32 %v67_v15, %v131_v13  ;;  %v289_v26 = vmax.f32 %v90_v16, %v154_v14 }
  0x9e   :  { %v305_v29 = vpop.permute.xlu0 %304 }
  0xa1   :  { %v134_v17 = vpop.f32.mrf.mxu2  ;;  %v157_v18 = vpop.f32.mrf.mxu3 }
  0xa2   :  { %v70_v19 = vpop.f32.mrf.mxu0  ;;  %v93_v20 = vpop.f32.mrf.mxu1 }
  0xa3   :  { %v290_v40 = vmax.f32 %v70_v19, %v134_v17  ;;  %v291_v41 = vmax.f32 %v93_v20, %v157_v18 }
  0xa6   :  { %v310_v46 = vpop.permute.xlu0 %309 }
  0xab   :  { %v195_v21 = vpop.f32.mrf.mxu0  ;;  %v218_v22 = vpop.f32.mrf.mxu1 }
  0xac   :  { %v259_v23 = vpop.f32.mrf.mxu2  ;;  %v282_v24 = vpop.f32.mrf.mxu3 }
  0xad   :  { %v292_v27 = vmax.f32 %v195_v21, %v259_v23  ;;  %v293_v28 = vmax.f32 %v218_v22, %v282_v24 }
  0xaf   :  { %v296_v30 = vmax.f32 %v288_v25, %v292_v27  ;;  %v297_v31 = vmax.f32 %v289_v26, %v293_v28 }
  0xb1   :  { %v312_v32 = vadd.f32 %v305_v29, %v296_v30  ;;  %v313_v33 = vadd.f32 %v305_v29, %v297_v31 }
  0xb3   :  { %v316_v34 = vmax.f32 %v312_v32, 0.0  ;;  %v317_v35 = vmax.f32 %v313_v33, 0.0  ;;  %v198_v36 = vpop.f32.mrf.mxu0  ;;  %v221_v37 = vpop.f32.mrf.mxu1 }
  0xb4   :  { %v262_v38 = vpop.f32.mrf.mxu2  ;;  %v285_v39 = vpop.f32.mrf.mxu3 }
  0xb5   :  { %320 = vst [vmem:[%s667_s6] sm:$0xff] %v316_v34  ;;  %v294_v42 = vmax.f32 %v198_v36, %v262_v38  ;;  %v295_v43 = vmax.f32 %v221_v37, %v285_v39 }
  0xb6   :  { %322 = vst.msk [vmem:[%s667_s6 + $0x8] sm:$0xff] %vm321_vm1, %v317_v35 }
  0xb7   :  { %v298_v44 = vmax.f32 %v290_v40, %v294_v42  ;;  %v299_v45 = vmax.f32 %v291_v41, %v295_v43 }
  0xb9   :  { %v314_v47 = vadd.f32 %v310_v46, %v298_v44  ;;  %v315_v48 = vadd.f32 %v310_v46, %v299_v45 }
  0xbb   :  { %v318_v49 = vmax.f32 %v314_v47, 0.0  ;;  %v319_v50 = vmax.f32 %v315_v48, 0.0 }
  0xbd   :  { %323 = vst [vmem:[%s667_s6 + $0x10] sm:$0xff] %v318_v49 }
  0xbe   :  { %324 = vst.msk [vmem:[%s667_s6 + $0x18] sm:$0xff] %vm321_vm1, %v319_v50 }

// kernel: baseline_token_cnn_forward.7
= control target key start
LH: loop header
LB: loop body
LE: loop exit
PB: predicated region body
PF: predicated region fallthrough
CT: control target
= control target key end

     0   :  { %s5688_s0 = inlined_call_operand.vmem [shape: f32[2,1296], index: 0, kind: input, shape index: {}]   ;;  %s5689_s1 = inlined_call_operand.vmem [shape: f32[1296,600], index: 1, kind: input, shape index: {}]   ;;  %s5690_s2 = inlined_call_operand.vmem [shape: f32[1,600], index: 2, kind: input, shape index: {}]   ;;  %s5691_s3 = inlined_call_operand.vmem [shape: f32[600,200], index: 3, kind: input, shape index: {}]   ;;  %s5692_s4 = inlined_call_operand.vmem [shape: f32[1,200], index: 4, kind: input, shape index: {}]   ;;  %s5693_s5 = inlined_call_operand.vmem [shape: f32[200,10], index: 5, kind: input, shape index: {}]   ;;  %s5694_s6 = inlined_call_operand.vmem [shape: f32[1,10], index: 6, kind: input, shape index: {}]   ;;  %s5695_s7 = inlined_call_operand.hbm [shape: f32[2,10], index: 7, kind: output, shape index: {}]  }
   0x1   :  { %v105_v0 = vld [vmem:[%s5689_s1 + $0x258] sm:$0xff]  ;;  %v100_v4 = vld [vmem:[%s5689_s1 + $0x230] sm:$0xff]  ;;  %v95_v8 = vld [vmem:[%s5689_s1 + $0x208] sm:$0xff] }
   0x2   :  { %v185_v1 = vld [vmem:[%s5689_s1 + $0x4d8] sm:$0xff]  ;;  %883 = vmatpush.msra.mxu0 %v105_v0  ;;  %v180_v5 = vld [vmem:[%s5689_s1 + $0x4b0] sm:$0xff]  ;;  %v175_v9 = vld [vmem:[%s5689_s1 + $0x488] sm:$0xff] }
   0x3   :  { %v265_v2 = vld [vmem:[%s5689_s1 + $0x758] sm:$0xff]  ;;  %903 = vmatpush.msra.mxu1 %v185_v1  ;;  %v260_v6 = vld [vmem:[%s5689_s1 + $0x730] sm:$0xff]  ;;  %v255_v10 = vld [vmem:[%s5689_s1 + $0x708] sm:$0xff] }
   0x4   :  { %v345_v3 = vld [vmem:[%s5689_s1 + $0x9d8] sm:$0xff]  ;;  %923 = vmatpush.msra.mxu2 %v265_v2  ;;  %v340_v7 = vld [vmem:[%s5689_s1 + $0x9b0] sm:$0xff]  ;;  %884 = vmatpush.msra.mxu0 %v100_v4  ;;  %v335_v11 = vld [vmem:[%s5689_s1 + $0x988] sm:$0xff] }
   0x5   :  { %943 = vmatpush.msra.mxu3 %v345_v3  ;;  %904 = vmatpush.msra.mxu1 %v180_v5  ;;  %v90_v12 = vld [vmem:[%s5689_s1 + $0x1e0] sm:$0xff]  ;;  %v85_v16 = vld [vmem:[%s5689_s1 + $0x1b8] sm:$0xff]  ;;  %v80_v20 = vld [vmem:[%s5689_s1 + $0x190] sm:$0xff] }
   0x6   :  { %924 = vmatpush.msra.mxu2 %v260_v6  ;;  %v170_v13 = vld [vmem:[%s5689_s1 + $0x460] sm:$0xff]  ;;  %885 = vmatpush.msra.mxu0 %v95_v8  ;;  %v165_v17 = vld [vmem:[%s5689_s1 + $0x438] sm:$0xff]  ;;  %v160_v21 = vld [vmem:[%s5689_s1 + $0x410] sm:$0xff] }
   0x7   :  { %944 = vmatpush.msra.mxu3 %v340_v7  ;;  %905 = vmatpush.msra.mxu1 %v175_v9  ;;  %v250_v14 = vld [vmem:[%s5689_s1 + $0x6e0] sm:$0xff]  ;;  %v245_v18 = vld [vmem:[%s5689_s1 + $0x6b8] sm:$0xff]  ;;  %v240_v22 = vld [vmem:[%s5689_s1 + $0x690] sm:$0xff] }
   0x8   :  { %v330_v15 = vld [vmem:[%s5689_s1 + $0x960] sm:$0xff]  ;;  %925 = vmatpush.msra.mxu2 %v255_v10  ;;  %886 = vmatpush.msra.mxu0 %v90_v12  ;;  %v325_v19 = vld [vmem:[%s5689_s1 + $0x938] sm:$0xff]  ;;  %v320_v23 = vld [vmem:[%s5689_s1 + $0x910] sm:$0xff] }
   0x9   :  { %945 = vmatpush.msra.mxu3 %v335_v11  ;;  %906 = vmatpush.msra.mxu1 %v170_v13  ;;  %v75_v24 = vld [vmem:[%s5689_s1 + $0x168] sm:$0xff]  ;;  %v70_v28 = vld [vmem:[%s5689_s1 + $0x140] sm:$0xff]  ;;  %v65_v32 = vld [vmem:[%s5689_s1 + $0x118] sm:$0xff] }
   0xa   :  { %926 = vmatpush.msra.mxu2 %v250_v14  ;;  %887 = vmatpush.msra.mxu0 %v85_v16  ;;  %v155_v25 = vld [vmem:[%s5689_s1 + $0x3e8] sm:$0xff]  ;;  %v150_v29 = vld [vmem:[%s5689_s1 + $0x3c0] sm:$0xff]  ;;  %v145_v33 = vld [vmem:[%s5689_s1 + $0x398] sm:$0xff] }
   0xb   :  { %946 = vmatpush.msra.mxu3 %v330_v15  ;;  %907 = vmatpush.msra.mxu1 %v165_v17  ;;  %v235_v26 = vld [vmem:[%s5689_s1 + $0x668] sm:$0xff]  ;;  %v230_v30 = vld [vmem:[%s5689_s1 + $0x640] sm:$0xff]  ;;  %v225_v34 = vld [vmem:[%s5689_s1 + $0x618] sm:$0xff] }
   0xc   :  { %927 = vmatpush.msra.mxu2 %v245_v18  ;;  %888 = vmatpush.msra.mxu0 %v80_v20  ;;  %v315_v27 = vld [vmem:[%s5689_s1 + $0x8e8] sm:$0xff]  ;;  %v310_v31 = vld [vmem:[%s5689_s1 + $0x8c0] sm:$0xff]  ;;  %v305_v35 = vld [vmem:[%s5689_s1 + $0x898] sm:$0xff] }
   0xd   :  { %947 = vmatpush.msra.mxu3 %v325_v19  ;;  %908 = vmatpush.msra.mxu1 %v160_v21  ;;  %v60_v36 = vld [vmem:[%s5689_s1 + $0xf0] sm:$0xff]  ;;  %v55_v40 = vld [vmem:[%s5689_s1 + $0xc8] sm:$0xff]  ;;  %v50_v44 = vld [vmem:[%s5689_s1 + $0xa0] sm:$0xff] }
   0xe   :  { %928 = vmatpush.msra.mxu2 %v240_v22  ;;  %889 = vmatpush.msra.mxu0 %v75_v24  ;;  %v140_v37 = vld [vmem:[%s5689_s1 + $0x370] sm:$0xff]  ;;  %v135_v41 = vld [vmem:[%s5689_s1 + $0x348] sm:$0xff]  ;;  %v130_v45 = vld [vmem:[%s5689_s1 + $0x320] sm:$0xff] }
   0xf   :  { %948 = vmatpush.msra.mxu3 %v320_v23  ;;  %909 = vmatpush.msra.mxu1 %v155_v25  ;;  %v220_v38 = vld [vmem:[%s5689_s1 + $0x5f0] sm:$0xff]  ;;  %v215_v42 = vld [vmem:[%s5689_s1 + $0x5c8] sm:$0xff]  ;;  %v210_v46 = vld [vmem:[%s5689_s1 + $0x5a0] sm:$0xff] }
  0x10   :  { %929 = vmatpush.msra.mxu2 %v235_v26  ;;  %890 = vmatpush.msra.mxu0 %v70_v28  ;;  %v300_v39 = vld [vmem:[%s5689_s1 + $0x870] sm:$0xff]  ;;  %v295_v43 = vld [vmem:[%s5689_s1 + $0x848] sm:$0xff]  ;;  %v290_v47 = vld [vmem:[%s5689_s1 + $0x820] sm:$0xff] }
  0x11   :  { %949 = vmatpush.msra.mxu3 %v315_v27  ;;  %910 = vmatpush.msra.mxu1 %v150_v29  ;;  %v45_v48 = vld [vmem:[%s5689_s1 + $0x78] sm:$0xff]  ;;  %v40_v52 = vld [vmem:[%s5689_s1 + $0x50] sm:$0xff]  ;;  %v35_v56 = vld [vmem:[%s5689_s1 + $0x28] sm:$0xff] }
  0x12   :  { %930 = vmatpush.msra.mxu2 %v230_v30  ;;  %891 = vmatpush.msra.mxu0 %v65_v32  ;;  %v125_v49 = vld [vmem:[%s5689_s1 + $0x2f8] sm:$0xff]  ;;  %v120_v53 = vld [vmem:[%s5689_s1 + $0x2d0] sm:$0xff]  ;;  %v115_v57 = vld [vmem:[%s5689_s1 + $0x2a8] sm:$0xff] }
  0x13   :  { %950 = vmatpush.msra.mxu3 %v310_v31  ;;  %911 = vmatpush.msra.mxu1 %v145_v33  ;;  %v205_v50 = vld [vmem:[%s5689_s1 + $0x578] sm:$0xff]  ;;  %v200_v54 = vld [vmem:[%s5689_s1 + $0x550] sm:$0xff]  ;;  %v195_v58 = vld [vmem:[%s5689_s1 + $0x528] sm:$0xff] }
  0x14   :  { %931 = vmatpush.msra.mxu2 %v225_v34  ;;  %892 = vmatpush.msra.mxu0 %v60_v36  ;;  %v285_v51 = vld [vmem:[%s5689_s1 + $0x7f8] sm:$0xff]  ;;  %v280_v55 = vld [vmem:[%s5689_s1 + $0x7d0] sm:$0xff]  ;;  %v275_v59 = vld [vmem:[%s5689_s1 + $0x7a8] sm:$0xff] }
  0x15   :  { %951 = vmatpush.msra.mxu3 %v305_v35  ;;  %912 = vmatpush.msra.mxu1 %v140_v37  ;;  %v30_v60 = vld [vmem:[%s5689_s1] sm:$0xff]  ;;  %v425_v0 = vld [vmem:[%s5689_s1 + $0xc58] sm:$0xff]  ;;  %v420_v4 = vld [vmem:[%s5689_s1 + $0xc30] sm:$0xff] }
  0x16   :  { %932 = vmatpush.msra.mxu2 %v220_v38  ;;  %893 = vmatpush.msra.mxu0 %v55_v40  ;;  %v110_v61 = vld [vmem:[%s5689_s1 + $0x280] sm:$0xff]  ;;  %v505_v1 = vld [vmem:[%s5689_s1 + $0xed8] sm:$0xff]  ;;  %v500_v5 = vld [vmem:[%s5689_s1 + $0xeb0] sm:$0xff] }
  0x17   :  { %952 = vmatpush.msra.mxu3 %v300_v39  ;;  %913 = vmatpush.msra.mxu1 %v135_v41  ;;  %v190_v62 = vld [vmem:[%s5689_s1 + $0x500] sm:$0xff]  ;;  %v585_v2 = vld [vmem:[%s5689_s1 + $0x1158] sm:$0xff]  ;;  %v580_v6 = vld [vmem:[%s5689_s1 + $0x1130] sm:$0xff] }
  0x18   :  { %933 = vmatpush.msra.mxu2 %v215_v42  ;;  %894 = vmatpush.msra.mxu0 %v50_v44  ;;  %v270_v63 = vld [vmem:[%s5689_s1 + $0x780] sm:$0xff]  ;;  %v665_v3 = vld [vmem:[%s5689_s1 + $0x13d8] sm:$0xff]  ;;  %v660_v7 = vld [vmem:[%s5689_s1 + $0x13b0] sm:$0xff] }
  0x19   :  { %953 = vmatpush.msra.mxu3 %v295_v43  ;;  %914 = vmatpush.msra.mxu1 %v130_v45  ;;  %v415_v8 = vld [vmem:[%s5689_s1 + $0xc08] sm:$0xff]  ;;  %v410_v12 = vld [vmem:[%s5689_s1 + $0xbe0] sm:$0xff]  ;;  %v405_v16 = vld [vmem:[%s5689_s1 + $0xbb8] sm:$0xff] }
  0x1a   :  { %934 = vmatpush.msra.mxu2 %v210_v46  ;;  %895 = vmatpush.msra.mxu0 %v45_v48  ;;  %v495_v9 = vld [vmem:[%s5689_s1 + $0xe88] sm:$0xff]  ;;  %v490_v13 = vld [vmem:[%s5689_s1 + $0xe60] sm:$0xff]  ;;  %v485_v17 = vld [vmem:[%s5689_s1 + $0xe38] sm:$0xff] }
  0x1b   :  { %954 = vmatpush.msra.mxu3 %v290_v47  ;;  %915 = vmatpush.msra.mxu1 %v125_v49  ;;  %v575_v10 = vld [vmem:[%s5689_s1 + $0x1108] sm:$0xff]  ;;  %v570_v14 = vld [vmem:[%s5689_s1 + $0x10e0] sm:$0xff]  ;;  %v565_v19 = vld [vmem:[%s5689_s1 + $0x10b8] sm:$0xff] }
  0x1c   :  { %935 = vmatpush.msra.mxu2 %v205_v50  ;;  %896 = vmatpush.msra.mxu0 %v40_v52  ;;  %v655_v11 = vld [vmem:[%s5689_s1 + $0x1388] sm:$0xff]  ;;  %v650_v15 = vld [vmem:[%s5689_s1 + $0x1360] sm:$0xff]  ;;  %v645_v20 = vld [vmem:[%s5689_s1 + $0x1338] sm:$0xff] }
  0x1d   :  { %955 = vmatpush.msra.mxu3 %v285_v51  ;;  %916 = vmatpush.msra.mxu1 %v120_v53  ;;  %v27_v18 = vld [vmem:[%s5688_s0] sm:$0xff]  ;;  %v400_v21 = vld [vmem:[%s5689_s1 + $0xb90] sm:$0xff]  ;;  %v395_v25 = vld [vmem:[%s5689_s1 + $0xb68] sm:$0xff] }
  0x1e   :  { %936 = vmatpush.msra.mxu2 %v200_v54  ;;  %897 = vmatpush.msra.mxu0 %v35_v56  ;;  %855 = vst [vmem:[#allocation1] ss:$4 sm:$0xff] %v27_v18  ;;  %v480_v22 = vld [vmem:[%s5689_s1 + $0xe10] sm:$0xff]  ;;  %v475_v26 = vld [vmem:[%s5689_s1 + $0xde8] sm:$0xff]  ;;  %v390_v29 = vld [vmem:[%s5689_s1 + $0xb40] sm:$0xff] }
  0x1f   :  { %956 = vmatpush.msra.mxu3 %v280_v55  ;;  %917 = vmatpush.msra.mxu1 %v115_v57  ;;  %v560_v23 = vld [vmem:[%s5689_s1 + $0x1090] sm:$0xff]  ;;  %v555_v27 = vld [vmem:[%s5689_s1 + $0x1068] sm:$0xff]  ;;  %v470_v30 = vld [vmem:[%s5689_s1 + $0xdc0] sm:$0xff] }
  0x20   :  { %937 = vmatpush.msra.mxu2 %v195_v58  ;;  %898 = vmatpush.msra.mxu0 %v30_v60  ;;  %v640_v24 = vld [vmem:[%s5689_s1 + $0x1310] sm:$0xff]  ;;  %v635_v28 = vld [vmem:[%s5689_s1 + $0x12e8] sm:$0xff]  ;;  %v550_v31 = vld [vmem:[%s5689_s1 + $0x1040] sm:$0xff] }
  0x21   :  { %957 = vmatpush.msra.mxu3 %v275_v59  ;;  %918 = vmatpush.msra.mxu1 %v110_v61  ;;  %v630_v32 = vld [vmem:[%s5689_s1 + $0x12c0] sm:$0xff]  ;;  %v385_v33 = vld [vmem:[%s5689_s1 + $0xb18] sm:$0xff]  ;;  %v29_v37 = vld [vmem:[%s5688_s0 + $0x10] sm:$0x3f] }
  0x22   :  { %938 = vmatpush.msra.mxu2 %v190_v62  ;;  %963 = vmatpush.msrb.mxu0 %v425_v0  ;;  %v465_v34 = vld [vmem:[%s5689_s1 + $0xd98] sm:$0xff]  ;;  %v380_v42 = vld [vmem:[%s5689_s1 + $0xaf0] sm:$0xff]  ;;  %v28_v44 = vld [vmem:[%s5688_s0 + $0x8] sm:$0xff] }
  0x23   :  { %958 = vmatpush.msra.mxu3 %v270_v63  ;;  %983 = vmatpush.msrb.mxu1 %v505_v1  ;;  %v545_v35 = vld [vmem:[%s5689_s1 + $0x1018] sm:$0xff]  ;;  %v460_v43 = vld [vmem:[%s5689_s1 + $0xd70] sm:$0xff]  ;;  %857 = vst [vmem:[#allocation1 + $0x20] ss:$4 sm:$0xff] %v28_v44  ;;  %v375_v47 = vld [vmem:[%s5689_s1 + $0xac8] sm:$0xff] }
  0x24   :  { %1003 = vmatpush.msrb.mxu2 %v585_v2  ;;  %964 = vmatpush.msrb.mxu0 %v420_v4  ;;  %v625_v36 = vld [vmem:[%s5689_s1 + $0x1298] sm:$0xff]  ;;  %v540_v45 = vld [vmem:[%s5689_s1 + $0xff0] sm:$0xff]  ;;  %v455_v48 = vld [vmem:[%s5689_s1 + $0xd48] sm:$0xff] }
  0x25   :  { %1023 = vmatpush.msrb.mxu3 %v665_v3  ;;  %984 = vmatpush.msrb.mxu1 %v500_v5  ;;  %v2838_v38 = vld.sshfl [vmem:[#allocation1 + $0x10] sm:$0xff pattern:$0x73625140]  ;;  %v2840_v39 = vld.sshfl [vmem:[#allocation1] sm:$0xff pattern:$0x73625140] }
  0x26   :  { %1004 = vmatpush.msrb.mxu2 %v580_v6  ;;  %965 = vmatpush.msrb.mxu0 %v415_v8  ;;  %v2842_v40 = vld.sshfl [vmem:[#allocation1 + $0x8] sm:$0xff pattern:$0x73625140]  ;;  %v2844_v41 = vld.sshfl [vmem:[#allocation1 + $0x18] sm:$0xff pattern:$0x73625140] }
  0x27   :  { %1024 = vmatpush.msrb.mxu3 %v660_v7  ;;  %985 = vmatpush.msrb.mxu1 %v495_v9  ;;  %866 = vst [vmem:[#allocation1] ss:$4 sm:$0xff] %v29_v37  ;;  %v620_v46 = vld [vmem:[%s5689_s1 + $0x1270] sm:$0xff]  ;;  %v535_v49 = vld [vmem:[%s5689_s1 + $0xfc8] sm:$0xff]  ;;  %v370_v51 = vld [vmem:[%s5689_s1 + $0xaa0] sm:$0xff] }
  0x28   :  { %1005 = vmatpush.msrb.mxu2 %v575_v10  ;;  %966 = vmatpush.msrb.mxu0 %v410_v12  ;;  %v615_v50 = vld [vmem:[%s5689_s1 + $0x1248] sm:$0xff]  ;;  %v450_v52 = vld [vmem:[%s5689_s1 + $0xd20] sm:$0xff]  ;;  %v365_v55 = vld [vmem:[%s5689_s1 + $0xa78] sm:$0xff] }
  0x29   :  { %1025 = vmatpush.msrb.mxu3 %v655_v11  ;;  %986 = vmatpush.msrb.mxu1 %v490_v13  ;;  %v530_v53 = vld [vmem:[%s5689_s1 + $0xfa0] sm:$0xff]  ;;  %v445_v56 = vld [vmem:[%s5689_s1 + $0xcf8] sm:$0xff]  ;;  %v360_v59 = vld [vmem:[%s5689_s1 + $0xa50] sm:$0xff] }
  0x2a   :  { %1006 = vmatpush.msrb.mxu2 %v570_v14  ;;  %967 = vmatpush.msrb.mxu0 %v405_v16  ;;  %v610_v54 = vld [vmem:[%s5689_s1 + $0x1220] sm:$0xff]  ;;  %v525_v57 = vld [vmem:[%s5689_s1 + $0xf78] sm:$0xff]  ;;  %v440_v60 = vld [vmem:[%s5689_s1 + $0xcd0] sm:$0xff] }
  0x2b   :  { %1026 = vmatpush.msrb.mxu3 %v650_v15  ;;  %987 = vmatpush.msrb.mxu1 %v485_v17  ;;  %v605_v58 = vld [vmem:[%s5689_s1 + $0x11f8] sm:$0xff]  ;;  %v520_v61 = vld [vmem:[%s5689_s1 + $0xf50] sm:$0xff]  ;;  %v355_v63 = vld [vmem:[%s5689_s1 + $0xa28] sm:$0xff] }
  0x2c   :  { %1007 = vmatpush.msrb.mxu2 %v565_v19  ;;  %968 = vmatpush.msrb.mxu0 %v400_v21  ;;  %v600_v62 = vld [vmem:[%s5689_s1 + $0x11d0] sm:$0xff]  ;;  %v435_v0 = vld [vmem:[%s5689_s1 + $0xca8] sm:$0xff]  ;;  %v350_v3 = vld [vmem:[%s5689_s1 + $0xa00] sm:$0xff] }
  0x2d   :  { %1027 = vmatpush.msrb.mxu3 %v645_v20  ;;  %988 = vmatpush.msrb.mxu1 %v480_v22  ;;  %v515_v1 = vld [vmem:[%s5689_s1 + $0xf28] sm:$0xff]  ;;  %v430_v4 = vld [vmem:[%s5689_s1 + $0xc80] sm:$0xff]  ;;  %v745_v7 = vld [vmem:[%s5689_s1 + $0x1658] sm:$0xff] }
  0x2e   :  { %1008 = vmatpush.msrb.mxu2 %v560_v23  ;;  %969 = vmatpush.msrb.mxu0 %v395_v25  ;;  %v595_v2 = vld [vmem:[%s5689_s1 + $0x11a8] sm:$0xff]  ;;  %v510_v5 = vld [vmem:[%s5689_s1 + $0xf00] sm:$0xff]  ;;  %v825_v8 = vld [vmem:[%s5689_s1 + $0x18d8] sm:$0xff] }
  0x2f   :  { %1028 = vmatpush.msrb.mxu3 %v640_v24  ;;  %989 = vmatpush.msrb.mxu1 %v475_v26  ;;  %v590_v6 = vld [vmem:[%s5689_s1 + $0x1180] sm:$0xff]  ;;  %v835_v9 = vld [vmem:[%s5689_s1 + $0x1928] sm:$0xff]  ;;  %v740_v11 = vld [vmem:[%s5689_s1 + $0x1630] sm:$0xff] }
  0x30   :  { %1009 = vmatpush.msrb.mxu2 %v555_v27  ;;  %970 = vmatpush.msrb.mxu0 %v390_v29  ;;  %v106_v10 = vld [vmem:[%s5689_s1 + $0x260] sm:$0xff]  ;;  %v820_v12 = vld [vmem:[%s5689_s1 + $0x18b0] sm:$0xff]  ;;  %v101_v14 = vld [vmem:[%s5689_s1 + $0x238] sm:$0xff] }
  0x31   :  { %1029 = vmatpush.msrb.mxu3 %v635_v28  ;;  %990 = vmatpush.msrb.mxu1 %v470_v30  ;;  %v830_v13 = vld [vmem:[%s5689_s1 + $0x1900] sm:$0xff]  ;;  %v2961_v15 = vld.sshfl [vmem:[#allocation1 + $0x30] sm:$0xff pattern:$0x73625140]  ;;  %v735_v16 = vld [vmem:[%s5689_s1 + $0x1608] sm:$0xff] }
  0x32   :  { %1010 = vmatpush.msrb.mxu2 %v550_v31  ;;  %971 = vmatpush.msrb.mxu0 %v385_v33  ;;  %v186_v17 = vld [vmem:[%s5689_s1 + $0x4e0] sm:$0xff]  ;;  %v815_v18 = vld [vmem:[%s5689_s1 + $0x1888] sm:$0xff]  ;;  %v96_v19 = vld [vmem:[%s5689_s1 + $0x210] sm:$0xff] }
  0x33   :  { %1030 = vmatpush.msrb.mxu3 %v630_v32  ;;  %991 = vmatpush.msrb.mxu1 %v465_v34  ;;  %v730_v20 = vld [vmem:[%s5689_s1 + $0x15e0] sm:$0xff]  ;;  %v181_v21 = vld [vmem:[%s5689_s1 + $0x4b8] sm:$0xff]  ;;  %v91_v23 = vld [vmem:[%s5689_s1 + $0x1e8] sm:$0xff] }
  0x34   :  { %1011 = vmatpush.msrb.mxu2 %v545_v35  ;;  %972 = vmatpush.msrb.mxu0 %v380_v42  ;;  %v810_v22 = vld [vmem:[%s5689_s1 + $0x1860] sm:$0xff]  ;;  %v176_v25 = vld [vmem:[%s5689_s1 + $0x490] sm:$0xff]  ;;  %v2993_v26 = vld.sshfl [vmem:[#allocation1 + $0x38] sm:$0xff pattern:$0x73625140] }
  0x35   :  { %1031 = vmatpush.msrb.mxu3 %v625_v36  ;;  %992 = vmatpush.msrb.mxu1 %v460_v43  ;;  %v2988_v24 = vld.sshfl [vmem:[#allocation1 + $0x20] sm:$0xff pattern:$0x73625140] }
  0x36   :  { %1012 = vmatpush.msrb.mxu2 %v540_v45  ;;  %973 = vmatpush.msrb.mxu0 %v375_v47 }
  0x37   :  { %1032 = vmatpush.msrb.mxu3 %v620_v46  ;;  %993 = vmatpush.msrb.mxu1 %v455_v48 }
  0x38   :  { %1013 = vmatpush.msrb.mxu2 %v535_v49  ;;  %974 = vmatpush.msrb.mxu0 %v370_v51 }
  0x39   :  { %1033 = vmatpush.msrb.mxu3 %v615_v50  ;;  %994 = vmatpush.msrb.mxu1 %v450_v52 }
  0x3a   :  { %1014 = vmatpush.msrb.mxu2 %v530_v53  ;;  %975 = vmatpush.msrb.mxu0 %v365_v55 }
  0x3b   :  { %1034 = vmatpush.msrb.mxu3 %v610_v54  ;;  %995 = vmatpush.msrb.mxu1 %v445_v56 }
  0x3c   :  { %1015 = vmatpush.msrb.mxu2 %v525_v57  ;;  %976 = vmatpush.msrb.mxu0 %v360_v59 }
  0x3d   :  { %1035 = vmatpush.msrb.mxu3 %v605_v58  ;;  %939 = vmatmul.f32.vlgmr.msra.gmra.mxu2 %v2838_v38 }
  0x3e   :  { %996 = vmatpush.msrb.mxu1 %v440_v60  ;;  %1016 = vmatpush.msrb.mxu2 %v520_v61 }
  0x3f   :  { %1036 = vmatpush.msrb.mxu3 %v600_v62  ;;  %977 = vmatpush.msrb.mxu0 %v355_v63 }
  0x40   :  { %997 = vmatpush.msrb.mxu1 %v435_v0  ;;  %1017 = vmatpush.msrb.mxu2 %v515_v1 }
  0x41   :  { %1037 = vmatpush.msrb.mxu3 %v595_v2  ;;  %978 = vmatpush.msrb.mxu0 %v350_v3 }
  0x42   :  { %998 = vmatpush.msrb.mxu1 %v430_v4  ;;  %1018 = vmatpush.msrb.mxu2 %v510_v5 }
  0x43   :  { %1038 = vmatpush.msrb.mxu3 %v590_v6  ;;  %899 = vmatmul.f32.vlgmr.msra.gmra.mxu0 %v2840_v39 }
  0x44   :  { %919 = vmatmul.f32.vlgmr.msra.gmra.mxu1 %v2842_v40  ;;  %959 = vmatmul.f32.vlgmr.msra.gmra.mxu3 %v2844_v41 }
  0x45   :  { %1043 = vmatpush.msra.mxu0 %v745_v7  ;;  %1063 = vmatpush.msra.mxu1 %v825_v8 }
  0x46   :  { %1097 = vmatpush.msra.mxu2 %v835_v9  ;;  %1103 = vmatpush.msra.mxu3 %v106_v10 }
  0x47   :  { %1044 = vmatpush.msra.mxu0 %v740_v11  ;;  %1064 = vmatpush.msra.mxu1 %v820_v12 }
  0x48   :  { %1098 = vmatpush.msra.mxu2 %v830_v13  ;;  %1104 = vmatpush.msra.mxu3 %v101_v14 }
  0x49   :  { %1019 = vmatmul.f32.vlgmr.msrb.gmra.mxu2 %v2961_v15  ;;  %1045 = vmatpush.msra.mxu0 %v735_v16 }
  0x4a   :  { %1123 = vmatpush.msrb.mxu2 %v186_v17  ;;  %1065 = vmatpush.msra.mxu1 %v815_v18 }
  0x4b   :  { %1105 = vmatpush.msra.mxu3 %v96_v19  ;;  %1046 = vmatpush.msra.mxu0 %v730_v20 }
  0x4c   :  { %12 = vsyncpa [#allocation3], 0  ;;  %1124 = vmatpush.msrb.mxu2 %v181_v21  ;;  %1066 = vmatpush.msra.mxu1 %v810_v22  ;;  %v725_v27 = vld [vmem:[%s5689_s1 + $0x15b8] sm:$0xff]  ;;  %v86_v29 = vld [vmem:[%s5689_s1 + $0x1c0] sm:$0xff]  ;;  %vm880_vm0 = vcmask 130048   ;;  %vm2144_vm1 = vcmask 719872  }
  0x4d   :  { %v805_v28 = vld [vmem:[%s5689_s1 + $0x1838] sm:$0xff]  ;;  %1106 = vmatpush.msra.mxu3 %v91_v23  ;;  %979 = vmatmul.f32.vlgmr.msrb.gmra.mxu0 %v2988_v24  ;;  %v171_v30 = vld [vmem:[%s5689_s1 + $0x468] sm:$0xff]  ;;  %v720_v32 = vld [vmem:[%s5689_s1 + $0x1590] sm:$0xff]  ;;  %vm2379_vm2 = vcmask 588800   ;;  %s2432_s16 = sshll.u32 %s5695_s7, 4  ;;  %vm2423_vm3 = vcmask 74752   ;;  %s2433_s16 = int_to_ptr.hbm [resolvable:$true] %s2432_s16 }
  0x4e   :  { %1125 = vmatpush.msrb.mxu2 %v176_v25  ;;  %1039 = vmatmul.f32.vlgmr.msrb.gmra.mxu3 %v2993_v26  ;;  %v3009_v31 = vld.sshfl [vmem:[#allocation1 + $0x28] sm:$0xff pattern:$0x73625140]  ;;  %v800_v33 = vld [vmem:[%s5689_s1 + $0x1810] sm:$0xff]  ;;  %v81_v34 = vld [vmem:[%s5689_s1 + $0x198] sm:$0xff] }
  0x4f   :  { %1047 = vmatpush.msra.mxu0 %v725_v27  ;;  %1067 = vmatpush.msra.mxu1 %v805_v28  ;;  %v166_v35 = vld [vmem:[%s5689_s1 + $0x440] sm:$0xff]  ;;  %v715_v36 = vld [vmem:[%s5689_s1 + $0x1568] sm:$0xff]  ;;  %v76_v42 = vld [vmem:[%s5689_s1 + $0x170] sm:$0xff] }
  0x50   :  { %1107 = vmatpush.msra.mxu3 %v86_v29  ;;  %1126 = vmatpush.msrb.mxu2 %v171_v30  ;;  %v795_v37 = vld [vmem:[%s5689_s1 + $0x17e8] sm:$0xff]  ;;  %v161_v43 = vld [vmem:[%s5689_s1 + $0x418] sm:$0xff]  ;;  %v710_v44 = vld [vmem:[%s5689_s1 + $0x1540] sm:$0xff] }
  0x51   :  { %999 = vmatmul.f32.vlgmr.msrb.gmra.mxu1 %v3009_v31  ;;  %1048 = vmatpush.msra.mxu0 %v720_v32  ;;  %v790_v45 = vld [vmem:[%s5689_s1 + $0x17c0] sm:$0xff]  ;;  %v71_v46 = vld [vmem:[%s5689_s1 + $0x148] sm:$0xff]  ;;  %v156_v47 = vld [vmem:[%s5689_s1 + $0x3f0] sm:$0xff] }
  0x52   :  { %1068 = vmatpush.msra.mxu1 %v800_v33  ;;  %1108 = vmatpush.msra.mxu3 %v81_v34  ;;  %v705_v48 = vld [vmem:[%s5689_s1 + $0x1518] sm:$0xff]  ;;  %v66_v50 = vld [vmem:[%s5689_s1 + $0x120] sm:$0xff]  ;;  %v151_v51 = vld [vmem:[%s5689_s1 + $0x3c8] sm:$0xff] }
  0x53   :  { %1127 = vmatpush.msrb.mxu2 %v166_v35  ;;  %1049 = vmatpush.msra.mxu0 %v715_v36  ;;  %v785_v49 = vld [vmem:[%s5689_s1 + $0x1798] sm:$0xff]  ;;  %v700_v52 = vld [vmem:[%s5689_s1 + $0x14f0] sm:$0xff]  ;;  %v146_v55 = vld [vmem:[%s5689_s1 + $0x3a0] sm:$0xff] }
  0x54   :  { %1069 = vmatpush.msra.mxu1 %v795_v37  ;;  %1109 = vmatpush.msra.mxu3 %v76_v42  ;;  %v780_v53 = vld [vmem:[%s5689_s1 + $0x1770] sm:$0xff]  ;;  %v61_v54 = vld [vmem:[%s5689_s1 + $0xf8] sm:$0xff]  ;;  %v695_v56 = vld [vmem:[%s5689_s1 + $0x14c8] sm:$0xff] }
  0x55   :  { %1128 = vmatpush.msrb.mxu2 %v161_v43  ;;  %1050 = vmatpush.msra.mxu0 %v710_v44  ;;  %v775_v57 = vld [vmem:[%s5689_s1 + $0x1748] sm:$0xff]  ;;  %v56_v58 = vld [vmem:[%s5689_s1 + $0xd0] sm:$0xff]  ;;  %v141_v59 = vld [vmem:[%s5689_s1 + $0x378] sm:$0xff] }
  0x56   :  { %1070 = vmatpush.msra.mxu1 %v790_v45  ;;  %1110 = vmatpush.msra.mxu3 %v71_v46  ;;  %v690_v60 = vld [vmem:[%s5689_s1 + $0x14a0] sm:$0xff]  ;;  %v51_v62 = vld [vmem:[%s5689_s1 + $0xa8] sm:$0xff]  ;;  %v136_v63 = vld [vmem:[%s5689_s1 + $0x350] sm:$0xff] }
  0x57   :  { %1129 = vmatpush.msrb.mxu2 %v156_v47  ;;  %1051 = vmatpush.msra.mxu0 %v705_v48  ;;  %v770_v61 = vld [vmem:[%s5689_s1 + $0x1720] sm:$0xff]  ;;  %v685_v0 = vld [vmem:[%s5689_s1 + $0x1478] sm:$0xff]  ;;  %v131_v3 = vld [vmem:[%s5689_s1 + $0x328] sm:$0xff] }
  0x58   :  { %1071 = vmatpush.msra.mxu1 %v785_v49  ;;  %1111 = vmatpush.msra.mxu3 %v66_v50  ;;  %v765_v1 = vld [vmem:[%s5689_s1 + $0x16f8] sm:$0xff]  ;;  %v46_v2 = vld [vmem:[%s5689_s1 + $0x80] sm:$0xff]  ;;  %v680_v4 = vld [vmem:[%s5689_s1 + $0x1450] sm:$0xff] }
  0x59   :  { %1130 = vmatpush.msrb.mxu2 %v151_v51  ;;  %1052 = vmatpush.msra.mxu0 %v700_v52  ;;  %v760_v5 = vld [vmem:[%s5689_s1 + $0x16d0] sm:$0xff]  ;;  %v41_v6 = vld [vmem:[%s5689_s1 + $0x58] sm:$0xff]  ;;  %v126_v7 = vld [vmem:[%s5689_s1 + $0x300] sm:$0xff] }
  0x5a   :  { %1072 = vmatpush.msra.mxu1 %v780_v53  ;;  %1112 = vmatpush.msra.mxu3 %v61_v54  ;;  %v675_v8 = vld [vmem:[%s5689_s1 + $0x1428] sm:$0xff]  ;;  %v36_v10 = vld [vmem:[%s5689_s1 + $0x30] sm:$0xff]  ;;  %v670_v12 = vld [vmem:[%s5689_s1 + $0x1400] sm:$0xff] }
  0x5b   :  { %1131 = vmatpush.msrb.mxu2 %v146_v55  ;;  %1053 = vmatpush.msra.mxu0 %v695_v56  ;;  %v755_v9 = vld [vmem:[%s5689_s1 + $0x16a8] sm:$0xff]  ;;  %v3129_v11 = vld.sshfl [vmem:[#allocation1 + $0x10] sm:$0xff pattern:$0x73625140]  ;;  %v121_v13 = vld [vmem:[%s5689_s1 + $0x2d8] sm:$0xff] }
  0x5c   :  { %1073 = vmatpush.msra.mxu1 %v775_v57  ;;  %1113 = vmatpush.msra.mxu3 %v56_v58  ;;  %v750_v14 = vld [vmem:[%s5689_s1 + $0x1680] sm:$0xff]  ;;  %v31_v16 = vld [vmem:[%s5689_s1 + $0x8] sm:$0xff]  ;;  %v116_v18 = vld [vmem:[%s5689_s1 + $0x2b0] sm:$0xff] }
  0x5d   :  { %1132 = vmatpush.msrb.mxu2 %v141_v59  ;;  %1054 = vmatpush.msra.mxu0 %v690_v60  ;;  %v3143_v17 = vld.sshfl [vmem:[#allocation1] sm:$0xff pattern:$0x73625140]  ;;  %v3160_v22 = vld.sshfl [vmem:[#allocation1 + $0x8] sm:$0xff pattern:$0x73625140] }
  0x5e   :  { %1074 = vmatpush.msra.mxu1 %v770_v61  ;;  %1114 = vmatpush.msra.mxu3 %v51_v62  ;;  %v266_v19 = vld [vmem:[%s5689_s1 + $0x760] sm:$0xff]  ;;  %v111_v23 = vld [vmem:[%s5689_s1 + $0x288] sm:$0xff]  ;;  %v261_v25 = vld [vmem:[%s5689_s1 + $0x738] sm:$0xff] }
  0x5f   :  { %1133 = vmatpush.msrb.mxu2 %v136_v63  ;;  %1055 = vmatpush.msra.mxu0 %v685_v0  ;;  %v346_v20 = vld [vmem:[%s5689_s1 + $0x9e0] sm:$0xff]  ;;  %v341_v27 = vld [vmem:[%s5689_s1 + $0x9b8] sm:$0xff]  ;;  %v256_v30 = vld [vmem:[%s5689_s1 + $0x710] sm:$0xff] }
  0x60   :  { %1075 = vmatpush.msra.mxu1 %v765_v1  ;;  %1115 = vmatpush.msra.mxu3 %v46_v2  ;;  %v426_v21 = vld [vmem:[%s5689_s1 + $0xc60] sm:$0xff]  ;;  %v421_v28 = vld [vmem:[%s5689_s1 + $0xc38] sm:$0xff]  ;;  %v336_v32 = vld [vmem:[%s5689_s1 + $0x990] sm:$0xff] }
  0x61   :  { %1134 = vmatpush.msrb.mxu2 %v131_v3  ;;  %1056 = vmatpush.msra.mxu0 %v680_v4  ;;  %v506_v29 = vld [vmem:[%s5689_s1 + $0xee0] sm:$0xff]  ;;  %v416_v33 = vld [vmem:[%s5689_s1 + $0xc10] sm:$0xff]  ;;  %v501_v34 = vld [vmem:[%s5689_s1 + $0xeb8] sm:$0xff] }
  0x62   :  { %1076 = vmatpush.msra.mxu1 %v760_v5  ;;  %1116 = vmatpush.msra.mxu3 %v41_v6  ;;  %v251_v35 = vld [vmem:[%s5689_s1 + $0x6e8] sm:$0xff]  ;;  %v496_v42 = vld [vmem:[%s5689_s1 + $0xe90] sm:$0xff]  ;;  %v246_v43 = vld [vmem:[%s5689_s1 + $0x6c0] sm:$0xff] }
  0x63   :  { %1135 = vmatpush.msrb.mxu2 %v126_v7  ;;  %1057 = vmatpush.msra.mxu0 %v675_v8  ;;  %v331_v36 = vld [vmem:[%s5689_s1 + $0x968] sm:$0xff]  ;;  %v326_v44 = vld [vmem:[%s5689_s1 + $0x940] sm:$0xff]  ;;  %v241_v47 = vld [vmem:[%s5689_s1 + $0x698] sm:$0xff] }
  0x64   :  { %1077 = vmatpush.msra.mxu1 %v755_v9  ;;  %1117 = vmatpush.msra.mxu3 %v36_v10  ;;  %v411_v37 = vld [vmem:[%s5689_s1 + $0xbe8] sm:$0xff]  ;;  %v406_v45 = vld [vmem:[%s5689_s1 + $0xbc0] sm:$0xff]  ;;  %v321_v48 = vld [vmem:[%s5689_s1 + $0x918] sm:$0xff] }
  0x65   :  { %2441 = vmatmul.msk.f32.vlgmr.msra.gmra.mxu2 %vm880_vm0, %v3129_v11  ;;  %1058 = vmatpush.msra.mxu0 %v670_v12  ;;  %v491_v46 = vld [vmem:[%s5689_s1 + $0xe68] sm:$0xff]  ;;  %v401_v49 = vld [vmem:[%s5689_s1 + $0xb98] sm:$0xff]  ;;  %v486_v50 = vld [vmem:[%s5689_s1 + $0xe40] sm:$0xff] }
  0x66   :  { %1136 = vmatpush.msrb.mxu2 %v121_v13  ;;  %1078 = vmatpush.msra.mxu1 %v750_v14  ;;  %v236_v51 = vld [vmem:[%s5689_s1 + $0x670] sm:$0xff]  ;;  %v481_v54 = vld [vmem:[%s5689_s1 + $0xe18] sm:$0xff]  ;;  %v231_v55 = vld [vmem:[%s5689_s1 + $0x648] sm:$0xff] }
  0x67   :  { %1118 = vmatpush.msra.mxu3 %v31_v16  ;;  %1059 = vmatmul.f32.vlgmr.msra.gmra.mxu0 %v3143_v17  ;;  %v316_v52 = vld [vmem:[%s5689_s1 + $0x8f0] sm:$0xff]  ;;  %v311_v56 = vld [vmem:[%s5689_s1 + $0x8c8] sm:$0xff]  ;;  %v226_v59 = vld [vmem:[%s5689_s1 + $0x620] sm:$0xff] }
  0x68   :  { %1137 = vmatpush.msrb.mxu2 %v116_v18  ;;  %1143 = vmatpush.msrb.mxu0 %v266_v19  ;;  %v396_v53 = vld [vmem:[%s5689_s1 + $0xb70] sm:$0xff]  ;;  %v391_v57 = vld [vmem:[%s5689_s1 + $0xb48] sm:$0xff]  ;;  %v306_v60 = vld [vmem:[%s5689_s1 + $0x8a0] sm:$0xff] }
  0x69   :  { %1163 = vmatpush.msrb.mxu1 %v346_v20  ;;  %1183 = vmatpush.msrb.mxu3 %v426_v21  ;;  %v476_v58 = vld [vmem:[%s5689_s1 + $0xdf0] sm:$0xff]  ;;  %v386_v61 = vld [vmem:[%s5689_s1 + $0xb20] sm:$0xff]  ;;  %v471_v62 = vld [vmem:[%s5689_s1 + $0xdc8] sm:$0xff] }
  0x6a   :  { %1079 = vmatmul.f32.vlgmr.msra.gmra.mxu1 %v3160_v22  ;;  %1138 = vmatpush.msrb.mxu2 %v111_v23  ;;  %v221_v63 = vld [vmem:[%s5689_s1 + $0x5f8] sm:$0xff]  ;;  %v466_v2 = vld [vmem:[%s5689_s1 + $0xda0] sm:$0xff]  ;;  %v216_v3 = vld [vmem:[%s5689_s1 + $0x5d0] sm:$0xff] }
  0x6b   :  { %1144 = vmatpush.msrb.mxu0 %v261_v25  ;;  %1164 = vmatpush.msrb.mxu1 %v341_v27  ;;  %v301_v0 = vld [vmem:[%s5689_s1 + $0x878] sm:$0xff]  ;;  %v296_v4 = vld [vmem:[%s5689_s1 + $0x850] sm:$0xff]  ;;  %v211_v7 = vld [vmem:[%s5689_s1 + $0x5a8] sm:$0xff] }
  0x6c   :  { %1184 = vmatpush.msrb.mxu3 %v421_v28  ;;  %1203 = vmatpush.msra.mxu2 %v506_v29  ;;  %v381_v1 = vld [vmem:[%s5689_s1 + $0xaf8] sm:$0xff]  ;;  %v376_v5 = vld [vmem:[%s5689_s1 + $0xad0] sm:$0xff]  ;;  %v291_v8 = vld [vmem:[%s5689_s1 + $0x828] sm:$0xff] }
  0x6d   :  { %1145 = vmatpush.msrb.mxu0 %v256_v30  ;;  %1165 = vmatpush.msrb.mxu1 %v336_v32  ;;  %v461_v6 = vld [vmem:[%s5689_s1 + $0xd78] sm:$0xff]  ;;  %v371_v9 = vld [vmem:[%s5689_s1 + $0xaa8] sm:$0xff]  ;;  %v456_v10 = vld [vmem:[%s5689_s1 + $0xd50] sm:$0xff] }
  0x6e   :  { %1185 = vmatpush.msrb.mxu3 %v416_v33  ;;  %1204 = vmatpush.msra.mxu2 %v501_v34  ;;  %v206_v12 = vld [vmem:[%s5689_s1 + $0x580] sm:$0xff]  ;;  %v451_v16 = vld [vmem:[%s5689_s1 + $0xd28] sm:$0xff]  ;;  %v201_v18 = vld [vmem:[%s5689_s1 + $0x558] sm:$0xff] }
  0x6f   :  { %1146 = vmatpush.msrb.mxu0 %v251_v35  ;;  %1166 = vmatpush.msrb.mxu1 %v331_v36  ;;  %v286_v13 = vld [vmem:[%s5689_s1 + $0x800] sm:$0xff]  ;;  %v281_v19 = vld [vmem:[%s5689_s1 + $0x7d8] sm:$0xff]  ;;  %v196_v23 = vld [vmem:[%s5689_s1 + $0x530] sm:$0xff] }
  0x70   :  { %1186 = vmatpush.msrb.mxu3 %v411_v37  ;;  %1205 = vmatpush.msra.mxu2 %v496_v42  ;;  %v366_v14 = vld [vmem:[%s5689_s1 + $0xa80] sm:$0xff]  ;;  %v361_v20 = vld [vmem:[%s5689_s1 + $0xa58] sm:$0xff]  ;;  %v276_v25 = vld [vmem:[%s5689_s1 + $0x7b0] sm:$0xff] }
  0x71   :  { %1147 = vmatpush.msrb.mxu0 %v246_v43  ;;  %1167 = vmatpush.msrb.mxu1 %v326_v44  ;;  %v446_v21 = vld [vmem:[%s5689_s1 + $0xd00] sm:$0xff]  ;;  %v356_v27 = vld [vmem:[%s5689_s1 + $0xa30] sm:$0xff]  ;;  %v441_v28 = vld [vmem:[%s5689_s1 + $0xcd8] sm:$0xff] }
  0x72   :  { %1187 = vmatpush.msrb.mxu3 %v406_v45  ;;  %1206 = vmatpush.msra.mxu2 %v491_v46  ;;  %v191_v29 = vld [vmem:[%s5689_s1 + $0x508] sm:$0xff]  ;;  %v436_v33 = vld [vmem:[%s5689_s1 + $0xcb0] sm:$0xff]  ;;  %v586_v34 = vld [vmem:[%s5689_s1 + $0x1160] sm:$0xff] }
  0x73   :  { %1148 = vmatpush.msrb.mxu0 %v241_v47  ;;  %1168 = vmatpush.msrb.mxu1 %v321_v48  ;;  %v271_v30 = vld [vmem:[%s5689_s1 + $0x788] sm:$0xff]  ;;  %v666_v35 = vld [vmem:[%s5689_s1 + $0x13e0] sm:$0xff]  ;;  %v581_v37 = vld [vmem:[%s5689_s1 + $0x1138] sm:$0xff] }
  0x74   :  { %1188 = vmatpush.msrb.mxu3 %v401_v49  ;;  %1207 = vmatpush.msra.mxu2 %v486_v50  ;;  %v351_v32 = vld [vmem:[%s5689_s1 + $0xa08] sm:$0xff]  ;;  %v746_v36 = vld [vmem:[%s5689_s1 + $0x1660] sm:$0xff]  ;;  %v661_v43 = vld [vmem:[%s5689_s1 + $0x13b8] sm:$0xff] }
  0x75   :  { %1149 = vmatpush.msrb.mxu0 %v236_v51  ;;  %1169 = vmatpush.msrb.mxu1 %v316_v52  ;;  %v431_v42 = vld [vmem:[%s5689_s1 + $0xc88] sm:$0xff]  ;;  %v741_v44 = vld [vmem:[%s5689_s1 + $0x1638] sm:$0xff]  ;;  %v826_v45 = vld [vmem:[%s5689_s1 + $0x18e0] sm:$0xff] }
  0x76   :  { %1189 = vmatpush.msrb.mxu3 %v396_v53  ;;  %1208 = vmatpush.msra.mxu2 %v481_v54  ;;  %v576_v46 = vld [vmem:[%s5689_s1 + $0x1110] sm:$0xff]  ;;  %v821_v49 = vld [vmem:[%s5689_s1 + $0x18b8] sm:$0xff]  ;;  %v571_v50 = vld [vmem:[%s5689_s1 + $0x10e8] sm:$0xff] }
  0x77   :  { %1150 = vmatpush.msrb.mxu0 %v231_v55  ;;  %1170 = vmatpush.msrb.mxu1 %v311_v56  ;;  %v656_v47 = vld [vmem:[%s5689_s1 + $0x1390] sm:$0xff]  ;;  %v651_v51 = vld [vmem:[%s5689_s1 + $0x1368] sm:$0xff]  ;;  %v566_v54 = vld [vmem:[%s5689_s1 + $0x10c0] sm:$0xff] }
  0x78   :  { %1190 = vmatpush.msrb.mxu3 %v391_v57  ;;  %1209 = vmatpush.msra.mxu2 %v476_v58  ;;  %v736_v48 = vld [vmem:[%s5689_s1 + $0x1610] sm:$0xff]  ;;  %v731_v52 = vld [vmem:[%s5689_s1 + $0x15e8] sm:$0xff]  ;;  %v646_v55 = vld [vmem:[%s5689_s1 + $0x1340] sm:$0xff] }
  0x79   :  { %1151 = vmatpush.msrb.mxu0 %v226_v59  ;;  %1171 = vmatpush.msrb.mxu1 %v306_v60  ;;  %v816_v53 = vld [vmem:[%s5689_s1 + $0x1890] sm:$0xff]  ;;  %v726_v56 = vld [vmem:[%s5689_s1 + $0x15c0] sm:$0xff]  ;;  %v811_v57 = vld [vmem:[%s5689_s1 + $0x1868] sm:$0xff] }
  0x7a   :  { %1191 = vmatpush.msrb.mxu3 %v386_v61  ;;  %1210 = vmatpush.msra.mxu2 %v471_v62  ;;  %v561_v58 = vld [vmem:[%s5689_s1 + $0x1098] sm:$0xff]  ;;  %v556_v61 = vld [vmem:[%s5689_s1 + $0x1070] sm:$0xff] }
  0x7b   :  { %1152 = vmatpush.msrb.mxu0 %v221_v63  ;;  %1172 = vmatpush.msrb.mxu1 %v301_v0  ;;  %v641_v59 = vld [vmem:[%s5689_s1 + $0x1318] sm:$0xff]  ;;  %v636_v62 = vld [vmem:[%s5689_s1 + $0x12f0] sm:$0xff] }
  0x7c   :  { %1192 = vmatpush.msrb.mxu3 %v381_v1  ;;  %1211 = vmatpush.msra.mxu2 %v466_v2  ;;  %v721_v60 = vld [vmem:[%s5689_s1 + $0x1598] sm:$0xff]  ;;  %v716_v63 = vld [vmem:[%s5689_s1 + $0x1570] sm:$0xff]  ;;  %v631_v1 = vld [vmem:[%s5689_s1 + $0x12c8] sm:$0xff] }
  0x7d   :  { %1153 = vmatpush.msrb.mxu0 %v216_v3  ;;  %1173 = vmatpush.msrb.mxu1 %v296_v4  ;;  %v801_v0 = vld [vmem:[%s5689_s1 + $0x1818] sm:$0xff]  ;;  %v711_v2 = vld [vmem:[%s5689_s1 + $0x1548] sm:$0xff]  ;;  %v796_v3 = vld [vmem:[%s5689_s1 + $0x17f0] sm:$0xff] }
  0x7e   :  { %1193 = vmatpush.msrb.mxu3 %v376_v5  ;;  %1212 = vmatpush.msra.mxu2 %v461_v6  ;;  %v546_v4 = vld [vmem:[%s5689_s1 + $0x1020] sm:$0xff] }
  0x7f   :  { %1154 = vmatpush.msrb.mxu0 %v211_v7  ;;  %1174 = vmatpush.msrb.mxu1 %v291_v8  ;;  %v626_v5 = vld [vmem:[%s5689_s1 + $0x12a0] sm:$0xff]  ;;  %v791_v7 = vld [vmem:[%s5689_s1 + $0x17c8] sm:$0xff]  ;;  %v541_v8 = vld [vmem:[%s5689_s1 + $0xff8] sm:$0xff] }
  0x80   :  { %1194 = vmatpush.msrb.mxu3 %v371_v9  ;;  %1213 = vmatpush.msra.mxu2 %v456_v10  ;;  %v706_v6 = vld [vmem:[%s5689_s1 + $0x1520] sm:$0xff]  ;;  %v621_v9 = vld [vmem:[%s5689_s1 + $0x1278] sm:$0xff] }
  0x81   :  { %1155 = vmatpush.msrb.mxu0 %v206_v12  ;;  %1175 = vmatpush.msrb.mxu1 %v286_v13  ;;  %v701_v10 = vld [vmem:[%s5689_s1 + $0x14f8] sm:$0xff]  ;;  %v786_v12 = vld [vmem:[%s5689_s1 + $0x17a0] sm:$0xff]  ;;  %v536_v13 = vld [vmem:[%s5689_s1 + $0xfd0] sm:$0xff] }
  0x82   :  { %1195 = vmatpush.msrb.mxu3 %v366_v14  ;;  %1214 = vmatpush.msra.mxu2 %v451_v16  ;;  %v616_v14 = vld [vmem:[%s5689_s1 + $0x1250] sm:$0xff] }
  0x83   :  { %1156 = vmatpush.msrb.mxu0 %v201_v18  ;;  %1176 = vmatpush.msrb.mxu1 %v281_v19  ;;  %v696_v16 = vld [vmem:[%s5689_s1 + $0x14d0] sm:$0xff]  ;;  %v781_v18 = vld [vmem:[%s5689_s1 + $0x1778] sm:$0xff]  ;;  %v531_v19 = vld [vmem:[%s5689_s1 + $0xfa8] sm:$0xff] }
  0x84   :  { %1196 = vmatpush.msrb.mxu3 %v361_v20  ;;  %1215 = vmatpush.msra.mxu2 %v446_v21  ;;  %v611_v20 = vld [vmem:[%s5689_s1 + $0x1228] sm:$0xff] }
  0x85   :  { %1157 = vmatpush.msrb.mxu0 %v196_v23  ;;  %1177 = vmatpush.msrb.mxu1 %v276_v25  ;;  %v691_v21 = vld [vmem:[%s5689_s1 + $0x14a8] sm:$0xff]  ;;  %v776_v23 = vld [vmem:[%s5689_s1 + $0x1750] sm:$0xff]  ;;  %v526_v25 = vld [vmem:[%s5689_s1 + $0xf80] sm:$0xff] }
  0x86   :  { %1197 = vmatpush.msrb.mxu3 %v356_v27  ;;  %1216 = vmatpush.msra.mxu2 %v441_v28  ;;  %v606_v27 = vld [vmem:[%s5689_s1 + $0x1200] sm:$0xff] }
  0x87   :  { %1158 = vmatpush.msrb.mxu0 %v191_v29  ;;  %1178 = vmatpush.msrb.mxu1 %v271_v30  ;;  %v686_v28 = vld [vmem:[%s5689_s1 + $0x1480] sm:$0xff]  ;;  %v771_v29 = vld [vmem:[%s5689_s1 + $0x1728] sm:$0xff]  ;;  %v521_v30 = vld [vmem:[%s5689_s1 + $0xf58] sm:$0xff] }
  0x88   :  { %1198 = vmatpush.msrb.mxu3 %v351_v32  ;;  %1217 = vmatpush.msra.mxu2 %v436_v33  ;;  %v601_v32 = vld [vmem:[%s5689_s1 + $0x11d8] sm:$0xff] }
  0x89   :  { %1119 = vmatmul.f32.vlgmr.msra.gmra.mxu3 %v2840_v39  ;;  %1223 = vmatpush.msra.mxu0 %v586_v34  ;;  %v681_v33 = vld [vmem:[%s5689_s1 + $0x1458] sm:$0xff]  ;;  %v766_v34 = vld [vmem:[%s5689_s1 + $0x1700] sm:$0xff] }
  0x8a   :  { %1243 = vmatpush.msra.mxu1 %v666_v35  ;;  %1263 = vmatpush.msra.mxu3 %v746_v36  ;;  %v516_v35 = vld [vmem:[%s5689_s1 + $0xf30] sm:$0xff] }
  0x8b   :  { %1139 = vmatmul.f32.vlgmr.msrb.gmra.mxu2 %v2842_v40  ;;  %1224 = vmatpush.msra.mxu0 %v581_v37  ;;  %v596_v36 = vld [vmem:[%s5689_s1 + $0x11b0] sm:$0xff] }
  0x8c   :  { %1218 = vmatpush.msra.mxu2 %v431_v42  ;;  %1244 = vmatpush.msra.mxu1 %v661_v43  ;;  %v676_v37 = vld [vmem:[%s5689_s1 + $0x1430] sm:$0xff]  ;;  %v761_v42 = vld [vmem:[%s5689_s1 + $0x16d8] sm:$0xff]  ;;  %v511_v43 = vld [vmem:[%s5689_s1 + $0xf08] sm:$0xff] }
  0x8d   :  { %1264 = vmatpush.msra.mxu3 %v741_v44  ;;  %1225 = vmatpush.msra.mxu0 %v576_v46  ;;  %v591_v44 = vld [vmem:[%s5689_s1 + $0x1188] sm:$0xff]  ;;  %v756_v46 = vld [vmem:[%s5689_s1 + $0x16b0] sm:$0xff] }
  0x8e   :  { %1283 = vmatpush.msrb.mxu2 %v826_v45  ;;  %1245 = vmatpush.msra.mxu1 %v656_v47  ;;  %v671_v45 = vld [vmem:[%s5689_s1 + $0x1408] sm:$0xff]  ;;  %v836_v47 = vld [vmem:[%s5689_s1 + $0x1930] sm:$0xff] }
  0x8f   :  { %1265 = vmatpush.msra.mxu3 %v736_v48  ;;  %1226 = vmatpush.msra.mxu0 %v571_v50  ;;  %v107_v48 = vld [vmem:[%s5689_s1 + $0x268] sm:$0xff] }
  0x90   :  { %1284 = vmatpush.msrb.mxu2 %v821_v49  ;;  %1246 = vmatpush.msra.mxu1 %v651_v51  ;;  %v187_v49 = vld [vmem:[%s5689_s1 + $0x4e8] sm:$0xff] }
  0x91   :  { %1266 = vmatpush.msra.mxu3 %v731_v52  ;;  %1227 = vmatpush.msra.mxu0 %v566_v54  ;;  %v751_v50 = vld [vmem:[%s5689_s1 + $0x1688] sm:$0xff]  ;;  %v182_v52 = vld [vmem:[%s5689_s1 + $0x4c0] sm:$0xff]  ;;  %v97_v54 = vld [vmem:[%s5689_s1 + $0x218] sm:$0xff] }
  0x92   :  { %1285 = vmatpush.msrb.mxu2 %v816_v53  ;;  %1199 = vmatmul.f32.vlgmr.msrb.gmra.mxu3 %v2988_v24  ;;  %v806_v24 = vld [vmem:[%s5689_s1 + $0x1840] sm:$0xff]  ;;  %v831_v51 = vld [vmem:[%s5689_s1 + $0x1908] sm:$0xff] }
  0x93   :  { %1247 = vmatpush.msra.mxu1 %v646_v55  ;;  %1267 = vmatpush.msra.mxu3 %v726_v56  ;;  %v347_v53 = vld [vmem:[%s5689_s1 + $0x9e8] sm:$0xff]  ;;  %v262_v55 = vld [vmem:[%s5689_s1 + $0x740] sm:$0xff] }
  0x94   :  { %1286 = vmatpush.msrb.mxu2 %v811_v57  ;;  %1159 = vmatmul.f32.vlgmr.msrb.gmra.mxu0 %v2838_v38  ;;  %v342_v56 = vld [vmem:[%s5689_s1 + $0x9c0] sm:$0xff]  ;;  %v92_v57 = vld [vmem:[%s5689_s1 + $0x1f0] sm:$0xff] }
  0x95   :  { %1219 = vmatmul.f32.vlgmr.msra.gmra.mxu2 %v3009_v31  ;;  %1228 = vmatpush.msra.mxu0 %v561_v58  ;;  %v551_v31 = vld [vmem:[%s5689_s1 + $0x1048] sm:$0xff]  ;;  %v172_v58 = vld [vmem:[%s5689_s1 + $0x470] sm:$0xff] }
  0x96   :  { %1248 = vmatpush.msra.mxu1 %v641_v59  ;;  %1268 = vmatpush.msra.mxu3 %v721_v60  ;;  %v257_v59 = vld [vmem:[%s5689_s1 + $0x718] sm:$0xff]  ;;  %v87_v60 = vld [vmem:[%s5689_s1 + $0x1c8] sm:$0xff] }
  0x97   :  { %1287 = vmatpush.msrb.mxu2 %v806_v24  ;;  %1179 = vmatmul.f32.vlgmr.msrb.gmra.mxu1 %v2844_v41  ;;  %v167_v24 = vld [vmem:[%s5689_s1 + $0x448] sm:$0xff] }
  0x98   :  { %1229 = vmatpush.msra.mxu0 %v556_v61  ;;  %1249 = vmatpush.msra.mxu1 %v636_v62  ;;  %v252_v61 = vld [vmem:[%s5689_s1 + $0x6f0] sm:$0xff] }
  0x99   :  { %1269 = vmatpush.msra.mxu3 %v716_v63  ;;  %1288 = vmatpush.msrb.mxu2 %v801_v0  ;;  %v332_v62 = vld [vmem:[%s5689_s1 + $0x970] sm:$0xff]  ;;  %v82_v63 = vld [vmem:[%s5689_s1 + $0x1a0] sm:$0xff] }
  0x9a   :  { %1230 = vmatpush.msra.mxu0 %v551_v31  ;;  %1250 = vmatpush.msra.mxu1 %v631_v1  ;;  %v162_v0 = vld [vmem:[%s5689_s1 + $0x420] sm:$0xff]  ;;  %v247_v31 = vld [vmem:[%s5689_s1 + $0x6c8] sm:$0xff] }
  0x9b   :  { %1270 = vmatpush.msra.mxu3 %v711_v2  ;;  %1289 = vmatpush.msrb.mxu2 %v796_v3  ;;  %v327_v1 = vld [vmem:[%s5689_s1 + $0x948] sm:$0xff]  ;;  %v77_v2 = vld [vmem:[%s5689_s1 + $0x178] sm:$0xff] }
  0x9c   :  { %1231 = vmatpush.msra.mxu0 %v546_v4  ;;  %1251 = vmatpush.msra.mxu1 %v626_v5  ;;  %v157_v3 = vld [vmem:[%s5689_s1 + $0x3f8] sm:$0xff]  ;;  %v242_v4 = vld [vmem:[%s5689_s1 + $0x6a0] sm:$0xff] }
  0x9d   :  { %1271 = vmatpush.msra.mxu3 %v706_v6  ;;  %1290 = vmatpush.msrb.mxu2 %v791_v7  ;;  %v322_v5 = vld [vmem:[%s5689_s1 + $0x920] sm:$0xff]  ;;  %v72_v6 = vld [vmem:[%s5689_s1 + $0x150] sm:$0xff] }
  0x9e   :  { %1232 = vmatpush.msra.mxu0 %v541_v8  ;;  %1252 = vmatpush.msra.mxu1 %v621_v9  ;;  %v152_v7 = vld [vmem:[%s5689_s1 + $0x3d0] sm:$0xff]  ;;  %v317_v8 = vld [vmem:[%s5689_s1 + $0x8f8] sm:$0xff]  ;;  %v67_v9 = vld [vmem:[%s5689_s1 + $0x128] sm:$0xff] }
  0x9f   :  { %1272 = vmatpush.msra.mxu3 %v701_v10  ;;  %1291 = vmatpush.msrb.mxu2 %v786_v12  ;;  %v147_v10 = vld [vmem:[%s5689_s1 + $0x3a8] sm:$0xff]  ;;  %v232_v12 = vld [vmem:[%s5689_s1 + $0x650] sm:$0xff] }
  0xa0   :  { %1233 = vmatpush.msra.mxu0 %v536_v13  ;;  %1253 = vmatpush.msra.mxu1 %v616_v14  ;;  %v312_v13 = vld [vmem:[%s5689_s1 + $0x8d0] sm:$0xff]  ;;  %v62_v14 = vld [vmem:[%s5689_s1 + $0x100] sm:$0xff] }
  0xa1   :  { %1273 = vmatpush.msra.mxu3 %v696_v16  ;;  %1292 = vmatpush.msrb.mxu2 %v781_v18  ;;  %v142_v16 = vld [vmem:[%s5689_s1 + $0x380] sm:$0xff]  ;;  %v227_v18 = vld [vmem:[%s5689_s1 + $0x628] sm:$0xff] }
  0xa2   :  { %1234 = vmatpush.msra.mxu0 %v531_v19  ;;  %1254 = vmatpush.msra.mxu1 %v611_v20  ;;  %v307_v19 = vld [vmem:[%s5689_s1 + $0x8a8] sm:$0xff]  ;;  %v57_v20 = vld [vmem:[%s5689_s1 + $0xd8] sm:$0xff] }
  0xa3   :  { %1274 = vmatpush.msra.mxu3 %v691_v21  ;;  %1293 = vmatpush.msrb.mxu2 %v776_v23  ;;  %v137_v21 = vld [vmem:[%s5689_s1 + $0x358] sm:$0xff]  ;;  %v222_v23 = vld [vmem:[%s5689_s1 + $0x600] sm:$0xff] }
  0xa4   :  { %1235 = vmatpush.msra.mxu0 %v526_v25  ;;  %1255 = vmatpush.msra.mxu1 %v606_v27  ;;  %v302_v25 = vld [vmem:[%s5689_s1 + $0x880] sm:$0xff]  ;;  %v52_v27 = vld [vmem:[%s5689_s1 + $0xb0] sm:$0xff] }
  0xa5   :  { %1275 = vmatpush.msra.mxu3 %v686_v28  ;;  %1294 = vmatpush.msrb.mxu2 %v771_v29  ;;  %v132_v28 = vld [vmem:[%s5689_s1 + $0x330] sm:$0xff]  ;;  %v217_v29 = vld [vmem:[%s5689_s1 + $0x5d8] sm:$0xff] }
  0xa6   :  { %1236 = vmatpush.msra.mxu0 %v521_v30  ;;  %1256 = vmatpush.msra.mxu1 %v601_v32  ;;  %v297_v30 = vld [vmem:[%s5689_s1 + $0x858] sm:$0xff]  ;;  %v47_v32 = vld [vmem:[%s5689_s1 + $0x88] sm:$0xff] }
  0xa7   :  { %1276 = vmatpush.msra.mxu3 %v681_v33  ;;  %1295 = vmatpush.msrb.mxu2 %v766_v34  ;;  %v127_v33 = vld [vmem:[%s5689_s1 + $0x308] sm:$0xff]  ;;  %v212_v34 = vld [vmem:[%s5689_s1 + $0x5b0] sm:$0xff] }
  0xa8   :  { %1237 = vmatpush.msra.mxu0 %v516_v35  ;;  %1257 = vmatpush.msra.mxu1 %v596_v36  ;;  %v292_v35 = vld [vmem:[%s5689_s1 + $0x830] sm:$0xff]  ;;  %v42_v36 = vld [vmem:[%s5689_s1 + $0x60] sm:$0xff] }
  0xa9   :  { %1277 = vmatpush.msra.mxu3 %v676_v37  ;;  %1296 = vmatpush.msrb.mxu2 %v761_v42  ;;  %v122_v37 = vld [vmem:[%s5689_s1 + $0x2e0] sm:$0xff]  ;;  %v207_v42 = vld [vmem:[%s5689_s1 + $0x588] sm:$0xff] }
  0xaa   :  { %1238 = vmatpush.msra.mxu0 %v511_v43  ;;  %1258 = vmatpush.msra.mxu1 %v591_v44  ;;  %v287_v43 = vld [vmem:[%s5689_s1 + $0x808] sm:$0xff]  ;;  %v37_v44 = vld [vmem:[%s5689_s1 + $0x38] sm:$0xff] }
  0xab   :  { %1278 = vmatpush.msra.mxu3 %v671_v45  ;;  %1239 = vmatmul.f32.vlgmr.msra.gmra.mxu0 %v2961_v15  ;;  %v102_v15 = vld [vmem:[%s5689_s1 + $0x240] sm:$0xff]  ;;  %v117_v45 = vld [vmem:[%s5689_s1 + $0x2b8] sm:$0xff] }
  0xac   :  { %1279 = vmatmul.f32.vlgmr.msra.gmra.mxu3 %v3143_v17  ;;  %1297 = vmatpush.msrb.mxu2 %v756_v46  ;;  %v267_v17 = vld [vmem:[%s5689_s1 + $0x768] sm:$0xff]  ;;  %v202_v46 = vld [vmem:[%s5689_s1 + $0x560] sm:$0xff] }
  0xad   :  { %1317 = vmatpush.msrb.mxu0 %v836_v47  ;;  %1323 = vmatpush.msrb.mxu1 %v107_v48  ;;  %v282_v47 = vld [vmem:[%s5689_s1 + $0x7e0] sm:$0xff]  ;;  %v32_v48 = vld [vmem:[%s5689_s1 + $0x10] sm:$0xff] }
  0xae   :  { %1343 = vmatpush.msrb.mxu3 %v187_v49  ;;  %1259 = vmatmul.f32.vlgmr.msra.gmra.mxu1 %v2993_v26  ;;  %v177_v26 = vld [vmem:[%s5689_s1 + $0x498] sm:$0xff]  ;;  %v112_v49 = vld [vmem:[%s5689_s1 + $0x290] sm:$0xff] }
  0xaf   :  { %1298 = vmatpush.msrb.mxu2 %v751_v50  ;;  %1318 = vmatpush.msrb.mxu0 %v831_v51  ;;  %v197_v50 = vld [vmem:[%s5689_s1 + $0x538] sm:$0xff] }
  0xb0   :  { %1324 = vmatpush.msrb.mxu1 %v102_v15  ;;  %1344 = vmatpush.msrb.mxu3 %v182_v52  ;;  %v277_v51 = vld [vmem:[%s5689_s1 + $0x7b8] sm:$0xff]  ;;  %v427_v15 = vld [vmem:[%s5689_s1 + $0xc68] sm:$0xff] }
  0xb1   :  { %1299 = vmatmul.f32.vlgmr.msrb.gmra.mxu2 %v3160_v22  ;;  %1363 = vmatpush.msra.mxu0 %v267_v17  ;;  %v337_v22 = vld [vmem:[%s5689_s1 + $0x998] sm:$0xff]  ;;  %v507_v52 = vld [vmem:[%s5689_s1 + $0xee8] sm:$0xff]  ;;  %v192_v17 = vld [vmem:[%s5689_s1 + $0x510] sm:$0xff] }
  0xb2   :  { %1383 = vmatpush.msra.mxu2 %v347_v53  ;;  %1325 = vmatpush.msrb.mxu1 %v97_v54  ;;  %v272_v53 = vld [vmem:[%s5689_s1 + $0x790] sm:$0xff]  ;;  %v422_v54 = vld [vmem:[%s5689_s1 + $0xc40] sm:$0xff] }
  0xb3   :  { %1345 = vmatpush.msrb.mxu3 %v177_v26  ;;  %1364 = vmatpush.msra.mxu0 %v262_v55  ;;  %v502_v26 = vld [vmem:[%s5689_s1 + $0xec0] sm:$0xff]  ;;  %v587_v55 = vld [vmem:[%s5689_s1 + $0x1168] sm:$0xff] }
  0xb4   :  { %1384 = vmatpush.msra.mxu2 %v342_v56  ;;  %1326 = vmatpush.msrb.mxu1 %v92_v57  ;;  %v667_v56 = vld [vmem:[%s5689_s1 + $0x13e8] sm:$0xff]  ;;  %v417_v57 = vld [vmem:[%s5689_s1 + $0xc18] sm:$0xff] }
  0xb5   :  { %1346 = vmatpush.msrb.mxu3 %v172_v58  ;;  %1365 = vmatpush.msra.mxu0 %v257_v59  ;;  %v497_v58 = vld [vmem:[%s5689_s1 + $0xe98] sm:$0xff]  ;;  %v582_v59 = vld [vmem:[%s5689_s1 + $0x1140] sm:$0xff] }
  0xb6   :  { %1385 = vmatpush.msra.mxu2 %v337_v22  ;;  %1327 = vmatpush.msrb.mxu1 %v87_v60  ;;  %v662_v22 = vld [vmem:[%s5689_s1 + $0x13c0] sm:$0xff]  ;;  %v412_v60 = vld [vmem:[%s5689_s1 + $0xbf0] sm:$0xff] }
  0xb7   :  { %1347 = vmatpush.msrb.mxu3 %v167_v24  ;;  %1366 = vmatpush.msra.mxu0 %v252_v61  ;;  %v492_v24 = vld [vmem:[%s5689_s1 + $0xe70] sm:$0xff]  ;;  %v577_v61 = vld [vmem:[%s5689_s1 + $0x1118] sm:$0xff] }
  0xb8   :  { %1386 = vmatpush.msra.mxu2 %v332_v62  ;;  %1328 = vmatpush.msrb.mxu1 %v82_v63  ;;  %v657_v62 = vld [vmem:[%s5689_s1 + $0x1398] sm:$0xff]  ;;  %v407_v63 = vld [vmem:[%s5689_s1 + $0xbc8] sm:$0xff] }
  0xb9   :  { %1348 = vmatpush.msrb.mxu3 %v162_v0  ;;  %2442 = vmatmul.msk.f32.vlgmr.msrb.gmra.mxu0 %vm880_vm0, %v3129_v11  ;;  %v237_v11 = vld [vmem:[%s5689_s1 + $0x678] sm:$0xff]  ;;  %v487_v0 = vld [vmem:[%s5689_s1 + $0xe48] sm:$0xff] }
  0xba   :  { %1367 = vmatpush.msra.mxu0 %v247_v31  ;;  %1387 = vmatpush.msra.mxu2 %v327_v1  ;;  %v572_v31 = vld [vmem:[%s5689_s1 + $0x10f0] sm:$0xff] }
  0xbb   :  { %1329 = vmatpush.msrb.mxu1 %v77_v2  ;;  %1349 = vmatpush.msrb.mxu3 %v157_v3  ;;  %v652_v1 = vld [vmem:[%s5689_s1 + $0x1370] sm:$0xff]  ;;  %v402_v2 = vld [vmem:[%s5689_s1 + $0xba0] sm:$0xff] }
  0xbc   :  { %1368 = vmatpush.msra.mxu0 %v242_v4  ;;  %1388 = vmatpush.msra.mxu2 %v322_v5  ;;  %v482_v3 = vld [vmem:[%s5689_s1 + $0xe20] sm:$0xff]  ;;  %v567_v4 = vld [vmem:[%s5689_s1 + $0x10c8] sm:$0xff] }
  0xbd   :  { %1330 = vmatpush.msrb.mxu1 %v72_v6  ;;  %1350 = vmatpush.msrb.mxu3 %v152_v7  ;;  %v647_v5 = vld [vmem:[%s5689_s1 + $0x1348] sm:$0xff]  ;;  %v397_v6 = vld [vmem:[%s5689_s1 + $0xb78] sm:$0xff] }
  0xbe   :  { %1369 = vmatpush.msra.mxu0 %v237_v11  ;;  %1389 = vmatpush.msra.mxu2 %v317_v8  ;;  %v477_v7 = vld [vmem:[%s5689_s1 + $0xdf8] sm:$0xff]  ;;  %v562_v11 = vld [vmem:[%s5689_s1 + $0x10a0] sm:$0xff] }
  0xbf   :  { %1331 = vmatpush.msrb.mxu1 %v67_v9  ;;  %1351 = vmatpush.msrb.mxu3 %v147_v10  ;;  %v642_v8 = vld [vmem:[%s5689_s1 + $0x1320] sm:$0xff]  ;;  %v392_v9 = vld [vmem:[%s5689_s1 + $0xb50] sm:$0xff] }
  0xc0   :  { %1370 = vmatpush.msra.mxu0 %v232_v12  ;;  %1390 = vmatpush.msra.mxu2 %v312_v13  ;;  %v472_v10 = vld [vmem:[%s5689_s1 + $0xdd0] sm:$0xff]  ;;  %v557_v12 = vld [vmem:[%s5689_s1 + $0x1078] sm:$0xff] }
  0xc1   :  { %1332 = vmatpush.msrb.mxu1 %v62_v14  ;;  %1352 = vmatpush.msrb.mxu3 %v142_v16  ;;  %v637_v13 = vld [vmem:[%s5689_s1 + $0x12f8] sm:$0xff]  ;;  %v387_v14 = vld [vmem:[%s5689_s1 + $0xb28] sm:$0xff] }
  0xc2   :  { %1371 = vmatpush.msra.mxu0 %v227_v18  ;;  %1391 = vmatpush.msra.mxu2 %v307_v19  ;;  %v467_v16 = vld [vmem:[%s5689_s1 + $0xda8] sm:$0xff]  ;;  %v552_v18 = vld [vmem:[%s5689_s1 + $0x1050] sm:$0xff] }
  0xc3   :  { %1333 = vmatpush.msrb.mxu1 %v57_v20  ;;  %1353 = vmatpush.msrb.mxu3 %v137_v21  ;;  %v632_v19 = vld [vmem:[%s5689_s1 + $0x12d0] sm:$0xff]  ;;  %v382_v20 = vld [vmem:[%s5689_s1 + $0xb00] sm:$0xff] }
  0xc4   :  { %1372 = vmatpush.msra.mxu0 %v222_v23  ;;  %1392 = vmatpush.msra.mxu2 %v302_v25  ;;  %v462_v21 = vld [vmem:[%s5689_s1 + $0xd80] sm:$0xff]  ;;  %v547_v23 = vld [vmem:[%s5689_s1 + $0x1028] sm:$0xff] }
  0xc5   :  { %1334 = vmatpush.msrb.mxu1 %v52_v27  ;;  %1354 = vmatpush.msrb.mxu3 %v132_v28  ;;  %v627_v25 = vld [vmem:[%s5689_s1 + $0x12a8] sm:$0xff]  ;;  %v377_v27 = vld [vmem:[%s5689_s1 + $0xad8] sm:$0xff] }
  0xc6   :  { %1373 = vmatpush.msra.mxu0 %v217_v29  ;;  %1393 = vmatpush.msra.mxu2 %v297_v30  ;;  %v457_v28 = vld [vmem:[%s5689_s1 + $0xd58] sm:$0xff]  ;;  %v542_v29 = vld [vmem:[%s5689_s1 + $0x1000] sm:$0xff] }
  0xc7   :  { %1335 = vmatpush.msrb.mxu1 %v47_v32  ;;  %1355 = vmatpush.msrb.mxu3 %v127_v33  ;;  %v622_v30 = vld [vmem:[%s5689_s1 + $0x1280] sm:$0xff]  ;;  %v372_v32 = vld [vmem:[%s5689_s1 + $0xab0] sm:$0xff] }
  0xc8   :  { %1374 = vmatpush.msra.mxu0 %v212_v34  ;;  %1394 = vmatpush.msra.mxu2 %v292_v35  ;;  %v452_v33 = vld [vmem:[%s5689_s1 + $0xd30] sm:$0xff]  ;;  %v537_v34 = vld [vmem:[%s5689_s1 + $0xfd8] sm:$0xff] }
  0xc9   :  { %1336 = vmatpush.msrb.mxu1 %v42_v36  ;;  %1356 = vmatpush.msrb.mxu3 %v122_v37  ;;  %v617_v35 = vld [vmem:[%s5689_s1 + $0x1258] sm:$0xff]  ;;  %v367_v36 = vld [vmem:[%s5689_s1 + $0xa88] sm:$0xff] }
  0xca   :  { %1375 = vmatpush.msra.mxu0 %v207_v42  ;;  %1395 = vmatpush.msra.mxu2 %v287_v43  ;;  %v447_v37 = vld [vmem:[%s5689_s1 + $0xd08] sm:$0xff]  ;;  %v532_v42 = vld [vmem:[%s5689_s1 + $0xfb0] sm:$0xff] }
  0xcb   :  { %1337 = vmatpush.msrb.mxu1 %v37_v44  ;;  %1357 = vmatpush.msrb.mxu3 %v117_v45  ;;  %v612_v43 = vld [vmem:[%s5689_s1 + $0x1230] sm:$0xff]  ;;  %v362_v44 = vld [vmem:[%s5689_s1 + $0xa60] sm:$0xff] }
  0xcc   :  { %1376 = vmatpush.msra.mxu0 %v202_v46  ;;  %1396 = vmatpush.msra.mxu2 %v282_v47  ;;  %v442_v45 = vld [vmem:[%s5689_s1 + $0xce0] sm:$0xff]  ;;  %v527_v46 = vld [vmem:[%s5689_s1 + $0xf88] sm:$0xff] }
  0xcd   :  { %1338 = vmatpush.msrb.mxu1 %v32_v48  ;;  %1358 = vmatpush.msrb.mxu3 %v112_v49  ;;  %v607_v47 = vld [vmem:[%s5689_s1 + $0x1208] sm:$0xff]  ;;  %v357_v48 = vld [vmem:[%s5689_s1 + $0xa38] sm:$0xff] }
  0xce   :  { %1377 = vmatpush.msra.mxu0 %v197_v50  ;;  %1397 = vmatpush.msra.mxu2 %v277_v51  ;;  %v437_v49 = vld [vmem:[%s5689_s1 + $0xcb8] sm:$0xff]  ;;  %v602_v50 = vld [vmem:[%s5689_s1 + $0x11e0] sm:$0xff] }
  0xcf   :  { %1403 = vmatpush.msra.mxu1 %v427_v15  ;;  %1423 = vmatpush.msra.mxu3 %v507_v52  ;;  %v522_v51 = vld [vmem:[%s5689_s1 + $0xf60] sm:$0xff]  ;;  %v352_v15 = vld [vmem:[%s5689_s1 + $0xa10] sm:$0xff] }
  0xd0   :  { %1378 = vmatpush.msra.mxu0 %v192_v17  ;;  %1398 = vmatpush.msra.mxu2 %v272_v53  ;;  %v432_v52 = vld [vmem:[%s5689_s1 + $0xc90] sm:$0xff]  ;;  %v517_v17 = vld [vmem:[%s5689_s1 + $0xf38] sm:$0xff] }
  0xd1   :  { %1404 = vmatpush.msra.mxu1 %v422_v54  ;;  %1424 = vmatpush.msra.mxu3 %v502_v26  ;;  %v597_v53 = vld [vmem:[%s5689_s1 + $0x11b8] sm:$0xff]  ;;  %v747_v54 = vld [vmem:[%s5689_s1 + $0x1668] sm:$0xff] }
  0xd2   :  { %1443 = vmatpush.msrb.mxu0 %v587_v55  ;;  %1463 = vmatpush.msrb.mxu2 %v667_v56  ;;  %v827_v26 = vld [vmem:[%s5689_s1 + $0x18e8] sm:$0xff]  ;;  %v512_v55 = vld [vmem:[%s5689_s1 + $0xf10] sm:$0xff] }
  0xd3   :  { %1405 = vmatpush.msra.mxu1 %v417_v57  ;;  %1425 = vmatpush.msra.mxu3 %v497_v58  ;;  %v592_v56 = vld [vmem:[%s5689_s1 + $0x1190] sm:$0xff]  ;;  %v742_v57 = vld [vmem:[%s5689_s1 + $0x1640] sm:$0xff] }
  0xd4   :  { %1444 = vmatpush.msrb.mxu0 %v582_v59  ;;  %1464 = vmatpush.msrb.mxu2 %v662_v22  ;;  %v822_v58 = vld [vmem:[%s5689_s1 + $0x18c0] sm:$0xff]  ;;  %v837_v59 = vld [vmem:[%s5689_s1 + $0x1938] sm:$0xff]  ;;  %v108_v22 = vld [vmem:[%s5689_s1 + $0x270] sm:$0xff] }
  0xd5   :  { %1406 = vmatpush.msra.mxu1 %v412_v60  ;;  %1426 = vmatpush.msra.mxu3 %v492_v24  ;;  %v737_v60 = vld [vmem:[%s5689_s1 + $0x1618] sm:$0xff] }
  0xd6   :  { %1445 = vmatpush.msrb.mxu0 %v577_v61  ;;  %1465 = vmatpush.msrb.mxu2 %v657_v62  ;;  %v817_v24 = vld [vmem:[%s5689_s1 + $0x1898] sm:$0xff]  ;;  %v832_v61 = vld [vmem:[%s5689_s1 + $0x1910] sm:$0xff]  ;;  %v103_v62 = vld [vmem:[%s5689_s1 + $0x248] sm:$0xff] }
  0xd7   :  { %1407 = vmatpush.msra.mxu1 %v407_v63  ;;  %1427 = vmatpush.msra.mxu3 %v487_v0  ;;  %v732_v63 = vld [vmem:[%s5689_s1 + $0x15f0] sm:$0xff] }
  0xd8   :  { %1446 = vmatpush.msrb.mxu0 %v572_v31  ;;  %1466 = vmatpush.msrb.mxu2 %v652_v1  ;;  %v812_v0 = vld [vmem:[%s5689_s1 + $0x1870] sm:$0xff]  ;;  %v98_v1 = vld [vmem:[%s5689_s1 + $0x220] sm:$0xff] }
  0xd9   :  { %1408 = vmatpush.msra.mxu1 %v402_v2  ;;  %1428 = vmatpush.msra.mxu3 %v482_v3  ;;  %v188_v31 = vld [vmem:[%s5689_s1 + $0x4f0] sm:$0xff]  ;;  %v727_v3 = vld [vmem:[%s5689_s1 + $0x15c8] sm:$0xff] }
  0xda   :  { %1447 = vmatpush.msrb.mxu0 %v567_v4  ;;  %1467 = vmatpush.msrb.mxu2 %v647_v5  ;;  %v3989_v2 = vld.sshfl [vmem:[#allocation1 + $0x30] sm:$0xff pattern:$0x73625140]  ;;  %v807_v4 = vld [vmem:[%s5689_s1 + $0x1848] sm:$0xff] }
  0xdb   :  { %1409 = vmatpush.msra.mxu1 %v397_v6  ;;  %1429 = vmatpush.msra.mxu3 %v477_v7  ;;  %v183_v5 = vld [vmem:[%s5689_s1 + $0x4c8] sm:$0xff]  ;;  %v93_v6 = vld [vmem:[%s5689_s1 + $0x1f8] sm:$0xff] }
  0xdc   :  { %1448 = vmatpush.msrb.mxu0 %v562_v11  ;;  %1468 = vmatpush.msrb.mxu2 %v642_v8  ;;  %v4004_v7 = vld.sshfl [vmem:[#allocation1 + $0x28] sm:$0xff pattern:$0x73625140]  ;;  %v722_v11 = vld [vmem:[%s5689_s1 + $0x15a0] sm:$0xff] }
  0xdd   :  { %1410 = vmatpush.msra.mxu1 %v392_v9  ;;  %1430 = vmatpush.msra.mxu3 %v472_v10  ;;  %v802_v8 = vld [vmem:[%s5689_s1 + $0x1820] sm:$0xff]  ;;  %v88_v10 = vld [vmem:[%s5689_s1 + $0x1d0] sm:$0xff] }
  0xde   :  { %1449 = vmatpush.msrb.mxu0 %v557_v12  ;;  %1469 = vmatpush.msrb.mxu2 %v637_v13  ;;  %v178_v9 = vld [vmem:[%s5689_s1 + $0x4a0] sm:$0xff]  ;;  %v717_v12 = vld [vmem:[%s5689_s1 + $0x1578] sm:$0xff] }
  0xdf   :  { %1411 = vmatpush.msra.mxu1 %v387_v14  ;;  %1431 = vmatpush.msra.mxu3 %v467_v16  ;;  %v797_v13 = vld [vmem:[%s5689_s1 + $0x17f8] sm:$0xff]  ;;  %v83_v16 = vld [vmem:[%s5689_s1 + $0x1a8] sm:$0xff] }
  0xe0   :  { %1450 = vmatpush.msrb.mxu0 %v552_v18  ;;  %1470 = vmatpush.msrb.mxu2 %v632_v19  ;;  %v173_v14 = vld [vmem:[%s5689_s1 + $0x478] sm:$0xff]  ;;  %v4031_v18 = vld.sshfl [vmem:[#allocation1 + $0x20] sm:$0xff pattern:$0x73625140] }
  0xe1   :  { %1412 = vmatpush.msra.mxu1 %v382_v20  ;;  %1432 = vmatpush.msra.mxu3 %v462_v21  ;;  %v4034_v19 = vld.sshfl [vmem:[#allocation1 + $0x38] sm:$0xff pattern:$0x73625140]  ;;  %v712_v20 = vld [vmem:[%s5689_s1 + $0x1550] sm:$0xff] }
  0xe2   :  { %1451 = vmatpush.msrb.mxu0 %v547_v23  ;;  %1471 = vmatpush.msrb.mxu2 %v627_v25  ;;  %v792_v21 = vld [vmem:[%s5689_s1 + $0x17d0] sm:$0xff]  ;;  %v78_v25 = vld [vmem:[%s5689_s1 + $0x180] sm:$0xff] }
  0xe3   :  { %1413 = vmatpush.msra.mxu1 %v377_v27  ;;  %1433 = vmatpush.msra.mxu3 %v457_v28  ;;  %v168_v23 = vld [vmem:[%s5689_s1 + $0x450] sm:$0xff]  ;;  %v707_v27 = vld [vmem:[%s5689_s1 + $0x1528] sm:$0xff] }
  0xe4   :  { %1452 = vmatpush.msrb.mxu0 %v542_v29  ;;  %1472 = vmatpush.msrb.mxu2 %v622_v30  ;;  %v787_v28 = vld [vmem:[%s5689_s1 + $0x17a8] sm:$0xff]  ;;  %v73_v30 = vld [vmem:[%s5689_s1 + $0x158] sm:$0xff] }
  0xe5   :  { %1414 = vmatpush.msra.mxu1 %v372_v32  ;;  %1434 = vmatpush.msra.mxu3 %v452_v33  ;;  %v163_v29 = vld [vmem:[%s5689_s1 + $0x428] sm:$0xff]  ;;  %v702_v32 = vld [vmem:[%s5689_s1 + $0x1500] sm:$0xff] }
  0xe6   :  { %1453 = vmatpush.msrb.mxu0 %v537_v34  ;;  %1473 = vmatpush.msrb.mxu2 %v617_v35  ;;  %v782_v33 = vld [vmem:[%s5689_s1 + $0x1780] sm:$0xff]  ;;  %v68_v35 = vld [vmem:[%s5689_s1 + $0x130] sm:$0xff] }
  0xe7   :  { %1415 = vmatpush.msra.mxu1 %v367_v36  ;;  %1435 = vmatpush.msra.mxu3 %v447_v37  ;;  %v158_v34 = vld [vmem:[%s5689_s1 + $0x400] sm:$0xff]  ;;  %v697_v36 = vld [vmem:[%s5689_s1 + $0x14d8] sm:$0xff] }
  0xe8   :  { %1454 = vmatpush.msrb.mxu0 %v532_v42  ;;  %1474 = vmatpush.msrb.mxu2 %v612_v43  ;;  %v777_v37 = vld [vmem:[%s5689_s1 + $0x1758] sm:$0xff]  ;;  %v63_v43 = vld [vmem:[%s5689_s1 + $0x108] sm:$0xff] }
  0xe9   :  { %1416 = vmatpush.msra.mxu1 %v362_v44  ;;  %1436 = vmatpush.msra.mxu3 %v442_v45  ;;  %v153_v42 = vld [vmem:[%s5689_s1 + $0x3d8] sm:$0xff]  ;;  %v692_v44 = vld [vmem:[%s5689_s1 + $0x14b0] sm:$0xff] }
  0xea   :  { %1455 = vmatpush.msrb.mxu0 %v527_v46  ;;  %1475 = vmatpush.msrb.mxu2 %v607_v47  ;;  %v772_v45 = vld [vmem:[%s5689_s1 + $0x1730] sm:$0xff]  ;;  %v58_v47 = vld [vmem:[%s5689_s1 + $0xe0] sm:$0xff] }
  0xeb   :  { %1417 = vmatpush.msra.mxu1 %v357_v48  ;;  %1437 = vmatpush.msra.mxu3 %v437_v49  ;;  %v148_v46 = vld [vmem:[%s5689_s1 + $0x3b0] sm:$0xff]  ;;  %v687_v48 = vld [vmem:[%s5689_s1 + $0x1488] sm:$0xff] }
  0xec   :  { %1379 = vmatmul.f32.vlgmr.msra.gmra.mxu0 %v2838_v38  ;;  %1476 = vmatpush.msrb.mxu2 %v602_v50  ;;  %v767_v49 = vld [vmem:[%s5689_s1 + $0x1708] sm:$0xff] }
  0xed   :  { %1456 = vmatpush.msrb.mxu0 %v522_v51  ;;  %1418 = vmatpush.msra.mxu1 %v352_v15  ;;  %v143_v50 = vld [vmem:[%s5689_s1 + $0x388] sm:$0xff]  ;;  %v53_v51 = vld [vmem:[%s5689_s1 + $0xb8] sm:$0xff]  ;;  %v682_v15 = vld [vmem:[%s5689_s1 + $0x1460] sm:$0xff] }
  0xee   :  { %1438 = vmatpush.msra.mxu3 %v432_v52  ;;  %1339 = vmatmul.f32.vlgmr.msrb.gmra.mxu1 %v2840_v39  ;;  %v762_v52 = vld [vmem:[%s5689_s1 + $0x16e0] sm:$0xff] }
  0xef   :  { %1359 = vmatmul.f32.vlgmr.msrb.gmra.mxu3 %v2842_v40  ;;  %1457 = vmatpush.msrb.mxu0 %v517_v17  ;;  %v138_v17 = vld [vmem:[%s5689_s1 + $0x360] sm:$0xff] }
  0xf0   :  { %1477 = vmatpush.msrb.mxu2 %v597_v53  ;;  %1483 = vmatpush.msrb.mxu1 %v747_v54  ;;  %v48_v53 = vld [vmem:[%s5689_s1 + $0x90] sm:$0xff]  ;;  %v677_v54 = vld [vmem:[%s5689_s1 + $0x1438] sm:$0xff] }
  0xf1   :  { %1503 = vmatpush.msrb.mxu3 %v827_v26  ;;  %1458 = vmatpush.msrb.mxu0 %v512_v55  ;;  %v757_v26 = vld [vmem:[%s5689_s1 + $0x16b8] sm:$0xff] }
  0xf2   :  { %1478 = vmatpush.msrb.mxu2 %v592_v56  ;;  %1484 = vmatpush.msrb.mxu1 %v742_v57  ;;  %v133_v55 = vld [vmem:[%s5689_s1 + $0x338] sm:$0xff]  ;;  %v43_v56 = vld [vmem:[%s5689_s1 + $0x68] sm:$0xff]  ;;  %v672_v57 = vld [vmem:[%s5689_s1 + $0x1410] sm:$0xff] }
  0xf3   :  { %1504 = vmatpush.msrb.mxu3 %v822_v58  ;;  %1399 = vmatmul.f32.vlgmr.msra.gmra.mxu2 %v2844_v41  ;;  %v752_v58 = vld [vmem:[%s5689_s1 + $0x1690] sm:$0xff] }
  0xf4   :  { %1537 = vmatpush.msra.mxu0 %v837_v59  ;;  %1543 = vmatpush.msra.mxu2 %v108_v22  ;;  %v128_v59 = vld [vmem:[%s5689_s1 + $0x310] sm:$0xff]  ;;  %v38_v22 = vld [vmem:[%s5689_s1 + $0x40] sm:$0xff] }
  0xf5   :  { %1485 = vmatpush.msrb.mxu1 %v737_v60  ;;  %1505 = vmatpush.msrb.mxu3 %v817_v24  ;;  %v268_v60 = vld [vmem:[%s5689_s1 + $0x770] sm:$0xff] }
  0xf6   :  { %1538 = vmatpush.msra.mxu0 %v832_v61  ;;  %1544 = vmatpush.msra.mxu2 %v103_v62  ;;  %v348_v24 = vld [vmem:[%s5689_s1 + $0x9f0] sm:$0xff]  ;;  %v4151_v61 = vld.sshfl [vmem:[#allocation1] sm:$0xff pattern:$0x73625140]  ;;  %v123_v62 = vld [vmem:[%s5689_s1 + $0x2e8] sm:$0xff] }
  0xf7   :  { %1459 = vmatmul.f32.vlgmr.msrb.gmra.mxu0 %v3989_v2  ;;  %1486 = vmatpush.msrb.mxu1 %v732_v63  ;;  %v33_v63 = vld [vmem:[%s5689_s1 + $0x18] sm:$0xff] }
  0xf8   :  { %1506 = vmatpush.msrb.mxu3 %v812_v0  ;;  %1563 = vmatpush.msrb.mxu0 %v188_v31  ;;  %v4160_v0 = vld.sshfl [vmem:[#allocation1 + $0x8] sm:$0xff pattern:$0x73625140] }
  0xf9   :  { %1545 = vmatpush.msra.mxu2 %v98_v1  ;;  %1439 = vmatmul.f32.vlgmr.msra.gmra.mxu3 %v4004_v7  ;;  %v263_v31 = vld [vmem:[%s5689_s1 + $0x748] sm:$0xff] }
  0xfa   :  { %1487 = vmatpush.msrb.mxu1 %v727_v3  ;;  %1507 = vmatpush.msrb.mxu3 %v807_v4  ;;  %v343_v1 = vld [vmem:[%s5689_s1 + $0x9c8] sm:$0xff]  ;;  %v118_v3 = vld [vmem:[%s5689_s1 + $0x2c0] sm:$0xff]  ;;  %v428_v4 = vld [vmem:[%s5689_s1 + $0xc70] sm:$0xff] }
  0xfb   :  { %1564 = vmatpush.msrb.mxu0 %v183_v5  ;;  %1546 = vmatpush.msra.mxu2 %v93_v6  ;;  %v258_v5 = vld [vmem:[%s5689_s1 + $0x720] sm:$0xff] }
  0xfc   :  { %1488 = vmatpush.msrb.mxu1 %v722_v11  ;;  %1508 = vmatpush.msrb.mxu3 %v802_v8  ;;  %v338_v6 = vld [vmem:[%s5689_s1 + $0x9a0] sm:$0xff]  ;;  %v113_v11 = vld [vmem:[%s5689_s1 + $0x298] sm:$0xff]  ;;  %v423_v8 = vld [vmem:[%s5689_s1 + $0xc48] sm:$0xff] }
  0xfd   :  { %1565 = vmatpush.msrb.mxu0 %v178_v9  ;;  %1547 = vmatpush.msra.mxu2 %v88_v10  ;;  %v253_v9 = vld [vmem:[%s5689_s1 + $0x6f8] sm:$0xff] }
  0xfe   :  { %1419 = vmatmul.f32.vlgmr.msra.gmra.mxu1 %v4031_v18  ;;  %1479 = vmatmul.f32.vlgmr.msrb.gmra.mxu2 %v4034_v19  ;;  %v333_v10 = vld [vmem:[%s5689_s1 + $0x978] sm:$0xff] }
  0xff   :  { %1489 = vmatpush.msrb.mxu1 %v717_v12  ;;  %1509 = vmatpush.msrb.mxu3 %v797_v13  ;;  %v508_v12 = vld [vmem:[%s5689_s1 + $0xef0] sm:$0xff]  ;;  %v418_v13 = vld [vmem:[%s5689_s1 + $0xc20] sm:$0xff] }
 0x100   :  { %1566 = vmatpush.msrb.mxu0 %v173_v14  ;;  %1548 = vmatpush.msra.mxu2 %v83_v16  ;;  %v248_v14 = vld [vmem:[%s5689_s1 + $0x6d0] sm:$0xff] }
 0x101   :  { %1490 = vmatpush.msrb.mxu1 %v712_v20  ;;  %1510 = vmatpush.msrb.mxu3 %v792_v21  ;;  %v4202_v16 = vld.sshfl [vmem:[#allocation1 + $0x10] sm:$0xff pattern:$0x73625140]  ;;  %v503_v21 = vld [vmem:[%s5689_s1 + $0xec8] sm:$0xff] }
 0x102   :  { %1567 = vmatpush.msrb.mxu0 %v168_v23  ;;  %1549 = vmatpush.msra.mxu2 %v78_v25  ;;  %v328_v20 = vld [vmem:[%s5689_s1 + $0x950] sm:$0xff]  ;;  %v413_v23 = vld [vmem:[%s5689_s1 + $0xbf8] sm:$0xff]  ;;  %v243_v25 = vld [vmem:[%s5689_s1 + $0x6a8] sm:$0xff] }
 0x103   :  { %1491 = vmatpush.msrb.mxu1 %v707_v27  ;;  %1511 = vmatpush.msrb.mxu3 %v787_v28  ;;  %v323_v27 = vld [vmem:[%s5689_s1 + $0x928] sm:$0xff]  ;;  %v498_v28 = vld [vmem:[%s5689_s1 + $0xea0] sm:$0xff] }
 0x104   :  { %1568 = vmatpush.msrb.mxu0 %v163_v29  ;;  %1550 = vmatpush.msra.mxu2 %v73_v30  ;;  %v408_v29 = vld [vmem:[%s5689_s1 + $0xbd0] sm:$0xff]  ;;  %v238_v30 = vld [vmem:[%s5689_s1 + $0x680] sm:$0xff] }
 0x105   :  { %1492 = vmatpush.msrb.mxu1 %v702_v32  ;;  %1512 = vmatpush.msrb.mxu3 %v782_v33  ;;  %v318_v32 = vld [vmem:[%s5689_s1 + $0x900] sm:$0xff]  ;;  %v493_v33 = vld [vmem:[%s5689_s1 + $0xe78] sm:$0xff] }
 0x106   :  { %1569 = vmatpush.msrb.mxu0 %v158_v34  ;;  %1551 = vmatpush.msra.mxu2 %v68_v35  ;;  %v403_v34 = vld [vmem:[%s5689_s1 + $0xba8] sm:$0xff]  ;;  %v233_v35 = vld [vmem:[%s5689_s1 + $0x658] sm:$0xff] }
 0x107   :  { %1493 = vmatpush.msrb.mxu1 %v697_v36  ;;  %1513 = vmatpush.msrb.mxu3 %v777_v37  ;;  %v313_v36 = vld [vmem:[%s5689_s1 + $0x8d8] sm:$0xff]  ;;  %v488_v37 = vld [vmem:[%s5689_s1 + $0xe50] sm:$0xff] }
 0x108   :  { %1570 = vmatpush.msrb.mxu0 %v153_v42  ;;  %1552 = vmatpush.msra.mxu2 %v63_v43  ;;  %v398_v42 = vld [vmem:[%s5689_s1 + $0xb80] sm:$0xff]  ;;  %v228_v43 = vld [vmem:[%s5689_s1 + $0x630] sm:$0xff] }
 0x109   :  { %1494 = vmatpush.msrb.mxu1 %v692_v44  ;;  %1514 = vmatpush.msrb.mxu3 %v772_v45  ;;  %v308_v44 = vld [vmem:[%s5689_s1 + $0x8b0] sm:$0xff]  ;;  %v483_v45 = vld [vmem:[%s5689_s1 + $0xe28] sm:$0xff] }
 0x10a   :  { %1571 = vmatpush.msrb.mxu0 %v148_v46  ;;  %1553 = vmatpush.msra.mxu2 %v58_v47  ;;  %v393_v46 = vld [vmem:[%s5689_s1 + $0xb58] sm:$0xff]  ;;  %v223_v47 = vld [vmem:[%s5689_s1 + $0x608] sm:$0xff] }
 0x10b   :  { %1495 = vmatpush.msrb.mxu1 %v687_v48  ;;  %1515 = vmatpush.msrb.mxu3 %v767_v49  ;;  %v303_v48 = vld [vmem:[%s5689_s1 + $0x888] sm:$0xff]  ;;  %v478_v49 = vld [vmem:[%s5689_s1 + $0xe00] sm:$0xff] }
 0x10c   :  { %1572 = vmatpush.msrb.mxu0 %v143_v50  ;;  %1554 = vmatpush.msra.mxu2 %v53_v51  ;;  %v388_v50 = vld [vmem:[%s5689_s1 + $0xb30] sm:$0xff]  ;;  %v218_v51 = vld [vmem:[%s5689_s1 + $0x5e0] sm:$0xff] }
 0x10d   :  { %1496 = vmatpush.msrb.mxu1 %v682_v15  ;;  %1516 = vmatpush.msrb.mxu3 %v762_v52  ;;  %v298_v15 = vld [vmem:[%s5689_s1 + $0x860] sm:$0xff]  ;;  %v473_v52 = vld [vmem:[%s5689_s1 + $0xdd8] sm:$0xff] }
 0x10e   :  { %1573 = vmatpush.msrb.mxu0 %v138_v17  ;;  %1555 = vmatpush.msra.mxu2 %v48_v53  ;;  %v383_v17 = vld [vmem:[%s5689_s1 + $0xb08] sm:$0xff]  ;;  %v213_v53 = vld [vmem:[%s5689_s1 + $0x5b8] sm:$0xff] }
 0x10f   :  { %1497 = vmatpush.msrb.mxu1 %v677_v54  ;;  %1517 = vmatpush.msrb.mxu3 %v757_v26  ;;  %v293_v54 = vld [vmem:[%s5689_s1 + $0x838] sm:$0xff]  ;;  %v468_v26 = vld [vmem:[%s5689_s1 + $0xdb0] sm:$0xff] }
 0x110   :  { %1574 = vmatpush.msrb.mxu0 %v133_v55  ;;  %1556 = vmatpush.msra.mxu2 %v43_v56  ;;  %v378_v55 = vld [vmem:[%s5689_s1 + $0xae0] sm:$0xff]  ;;  %v208_v56 = vld [vmem:[%s5689_s1 + $0x590] sm:$0xff] }
 0x111   :  { %1498 = vmatpush.msrb.mxu1 %v672_v57  ;;  %1518 = vmatpush.msrb.mxu3 %v752_v58  ;;  %v288_v57 = vld [vmem:[%s5689_s1 + $0x810] sm:$0xff]  ;;  %v463_v58 = vld [vmem:[%s5689_s1 + $0xd88] sm:$0xff] }
 0x112   :  { %1575 = vmatpush.msrb.mxu0 %v128_v59  ;;  %1499 = vmatmul.f32.vlgmr.msrb.gmra.mxu1 %v4151_v61  ;;  %v373_v59 = vld [vmem:[%s5689_s1 + $0xab8] sm:$0xff] }
 0x113   :  { %1519 = vmatmul.f32.vlgmr.msrb.gmra.mxu3 %v4160_v0  ;;  %1557 = vmatpush.msra.mxu2 %v38_v22  ;;  %v203_v22 = vld [vmem:[%s5689_s1 + $0x568] sm:$0xff] }
 0x114   :  { %1583 = vmatpush.msra.mxu1 %v268_v60  ;;  %1603 = vmatpush.msra.mxu3 %v348_v24  ;;  %v283_v60 = vld [vmem:[%s5689_s1 + $0x7e8] sm:$0xff]  ;;  %v458_v24 = vld [vmem:[%s5689_s1 + $0xd60] sm:$0xff] }
 0x115   :  { %1576 = vmatpush.msrb.mxu0 %v123_v62  ;;  %1558 = vmatpush.msra.mxu2 %v33_v63  ;;  %v368_v62 = vld [vmem:[%s5689_s1 + $0xa90] sm:$0xff]  ;;  %v198_v63 = vld [vmem:[%s5689_s1 + $0x540] sm:$0xff] }
 0x116   :  { %1584 = vmatpush.msra.mxu1 %v263_v31  ;;  %1604 = vmatpush.msra.mxu3 %v343_v1  ;;  %v278_v31 = vld [vmem:[%s5689_s1 + $0x7c0] sm:$0xff]  ;;  %v453_v1 = vld [vmem:[%s5689_s1 + $0xd38] sm:$0xff] }
 0x117   :  { %1577 = vmatpush.msrb.mxu0 %v118_v3  ;;  %1623 = vmatpush.msrb.mxu2 %v428_v4  ;;  %v363_v3 = vld [vmem:[%s5689_s1 + $0xa68] sm:$0xff]  ;;  %v193_v4 = vld [vmem:[%s5689_s1 + $0x518] sm:$0xff] }
 0x118   :  { %1585 = vmatpush.msra.mxu1 %v258_v5  ;;  %1605 = vmatpush.msra.mxu3 %v338_v6  ;;  %v273_v5 = vld [vmem:[%s5689_s1 + $0x798] sm:$0xff]  ;;  %v448_v6 = vld [vmem:[%s5689_s1 + $0xd10] sm:$0xff] }
 0x119   :  { %1578 = vmatpush.msrb.mxu0 %v113_v11  ;;  %1624 = vmatpush.msrb.mxu2 %v423_v8  ;;  %v358_v11 = vld [vmem:[%s5689_s1 + $0xa40] sm:$0xff]  ;;  %v588_v8 = vld [vmem:[%s5689_s1 + $0x1170] sm:$0xff] }
 0x11a   :  { %2443 = vmatmul.msk.f32.vlgmr.msra.gmra.mxu0 %vm880_vm0, %v4202_v16  ;;  %1586 = vmatpush.msra.mxu1 %v253_v9  ;;  %v668_v9 = vld [vmem:[%s5689_s1 + $0x13f0] sm:$0xff] }
 0x11b   :  { %1606 = vmatpush.msra.mxu3 %v333_v10  ;;  %1643 = vmatpush.msra.mxu0 %v508_v12  ;;  %v443_v10 = vld [vmem:[%s5689_s1 + $0xce8] sm:$0xff]  ;;  %v353_v12 = vld [vmem:[%s5689_s1 + $0xa18] sm:$0xff] }
 0x11c   :  { %1625 = vmatpush.msrb.mxu2 %v418_v13  ;;  %1587 = vmatpush.msra.mxu1 %v248_v14  ;;  %v583_v13 = vld [vmem:[%s5689_s1 + $0x1148] sm:$0xff] }
 0x11d   :  { %1607 = vmatpush.msra.mxu3 %v328_v20  ;;  %1644 = vmatpush.msra.mxu0 %v503_v21  ;;  %v663_v14 = vld [vmem:[%s5689_s1 + $0x13c8] sm:$0xff]  ;;  %v438_v20 = vld [vmem:[%s5689_s1 + $0xcc0] sm:$0xff]  ;;  %v748_v21 = vld [vmem:[%s5689_s1 + $0x1670] sm:$0xff] }
 0x11e   :  { %1626 = vmatpush.msrb.mxu2 %v413_v23  ;;  %1588 = vmatpush.msra.mxu1 %v243_v25  ;;  %v578_v23 = vld [vmem:[%s5689_s1 + $0x1120] sm:$0xff] }
 0x11f   :  { %1608 = vmatpush.msra.mxu3 %v323_v27  ;;  %1645 = vmatpush.msra.mxu0 %v498_v28  ;;  %v658_v25 = vld [vmem:[%s5689_s1 + $0x13a0] sm:$0xff]  ;;  %v433_v27 = vld [vmem:[%s5689_s1 + $0xc98] sm:$0xff]  ;;  %v743_v28 = vld [vmem:[%s5689_s1 + $0x1648] sm:$0xff] }
 0x120   :  { %1627 = vmatpush.msrb.mxu2 %v408_v29  ;;  %1589 = vmatpush.msra.mxu1 %v238_v30  ;;  %v573_v29 = vld [vmem:[%s5689_s1 + $0x10f8] sm:$0xff] }
 0x121   :  { %1609 = vmatpush.msra.mxu3 %v318_v32  ;;  %1646 = vmatpush.msra.mxu0 %v493_v33  ;;  %v653_v30 = vld [vmem:[%s5689_s1 + $0x1378] sm:$0xff]  ;;  %v828_v32 = vld [vmem:[%s5689_s1 + $0x18f0] sm:$0xff]  ;;  %v738_v33 = vld [vmem:[%s5689_s1 + $0x1620] sm:$0xff] }
 0x122   :  { %1628 = vmatpush.msrb.mxu2 %v403_v34  ;;  %1590 = vmatpush.msra.mxu1 %v233_v35  ;;  %v568_v34 = vld [vmem:[%s5689_s1 + $0x10d0] sm:$0xff] }
 0x123   :  { %1610 = vmatpush.msra.mxu3 %v313_v36  ;;  %1647 = vmatpush.msra.mxu0 %v488_v37  ;;  %v648_v35 = vld [vmem:[%s5689_s1 + $0x1350] sm:$0xff]  ;;  %v823_v36 = vld [vmem:[%s5689_s1 + $0x18c8] sm:$0xff]  ;;  %v733_v37 = vld [vmem:[%s5689_s1 + $0x15f8] sm:$0xff] }
 0x124   :  { %1629 = vmatpush.msrb.mxu2 %v398_v42  ;;  %1591 = vmatpush.msra.mxu1 %v228_v43  ;;  %v563_v42 = vld [vmem:[%s5689_s1 + $0x10a8] sm:$0xff] }
 0x125   :  { %1611 = vmatpush.msra.mxu3 %v308_v44  ;;  %1648 = vmatpush.msra.mxu0 %v483_v45  ;;  %v643_v43 = vld [vmem:[%s5689_s1 + $0x1328] sm:$0xff]  ;;  %v818_v44 = vld [vmem:[%s5689_s1 + $0x18a0] sm:$0xff]  ;;  %v728_v45 = vld [vmem:[%s5689_s1 + $0x15d0] sm:$0xff] }
 0x126   :  { %1630 = vmatpush.msrb.mxu2 %v393_v46  ;;  %1592 = vmatpush.msra.mxu1 %v223_v47  ;;  %v558_v46 = vld [vmem:[%s5689_s1 + $0x1080] sm:$0xff] }
 0x127   :  { %1612 = vmatpush.msra.mxu3 %v303_v48  ;;  %1649 = vmatpush.msra.mxu0 %v478_v49  ;;  %v638_v47 = vld [vmem:[%s5689_s1 + $0x1300] sm:$0xff]  ;;  %v813_v48 = vld [vmem:[%s5689_s1 + $0x1878] sm:$0xff]  ;;  %v723_v49 = vld [vmem:[%s5689_s1 + $0x15a8] sm:$0xff] }
 0x128   :  { %1631 = vmatpush.msrb.mxu2 %v388_v50  ;;  %1593 = vmatpush.msra.mxu1 %v218_v51  ;;  %v553_v50 = vld [vmem:[%s5689_s1 + $0x1058] sm:$0xff] }
 0x129   :  { %1613 = vmatpush.msra.mxu3 %v298_v15  ;;  %1650 = vmatpush.msra.mxu0 %v473_v52  ;;  %v633_v51 = vld [vmem:[%s5689_s1 + $0x12d8] sm:$0xff]  ;;  %v808_v15 = vld [vmem:[%s5689_s1 + $0x1850] sm:$0xff]  ;;  %v718_v52 = vld [vmem:[%s5689_s1 + $0x1580] sm:$0xff] }
 0x12a   :  { %1632 = vmatpush.msrb.mxu2 %v383_v17  ;;  %1594 = vmatpush.msra.mxu1 %v213_v53  ;;  %v548_v17 = vld [vmem:[%s5689_s1 + $0x1030] sm:$0xff] }
 0x12b   :  { %1614 = vmatpush.msra.mxu3 %v293_v54  ;;  %1651 = vmatpush.msra.mxu0 %v468_v26  ;;  %v628_v53 = vld [vmem:[%s5689_s1 + $0x12b0] sm:$0xff]  ;;  %v803_v54 = vld [vmem:[%s5689_s1 + $0x1828] sm:$0xff]  ;;  %v713_v26 = vld [vmem:[%s5689_s1 + $0x1558] sm:$0xff] }
 0x12c   :  { %1633 = vmatpush.msrb.mxu2 %v378_v55  ;;  %1595 = vmatpush.msra.mxu1 %v208_v56  ;;  %v543_v55 = vld [vmem:[%s5689_s1 + $0x1008] sm:$0xff] }
 0x12d   :  { %1615 = vmatpush.msra.mxu3 %v288_v57  ;;  %1652 = vmatpush.msra.mxu0 %v463_v58  ;;  %v623_v56 = vld [vmem:[%s5689_s1 + $0x1288] sm:$0xff]  ;;  %v798_v57 = vld [vmem:[%s5689_s1 + $0x1800] sm:$0xff]  ;;  %v708_v58 = vld [vmem:[%s5689_s1 + $0x1530] sm:$0xff] }
 0x12e   :  { %1634 = vmatpush.msrb.mxu2 %v373_v59  ;;  %1596 = vmatpush.msra.mxu1 %v203_v22  ;;  %v538_v59 = vld [vmem:[%s5689_s1 + $0xfe0] sm:$0xff] }
 0x12f   :  { %1616 = vmatpush.msra.mxu3 %v283_v60  ;;  %1653 = vmatpush.msra.mxu0 %v458_v24  ;;  %v618_v22 = vld [vmem:[%s5689_s1 + $0x1260] sm:$0xff]  ;;  %v793_v60 = vld [vmem:[%s5689_s1 + $0x17d8] sm:$0xff]  ;;  %v703_v24 = vld [vmem:[%s5689_s1 + $0x1508] sm:$0xff] }
 0x130   :  { %1635 = vmatpush.msrb.mxu2 %v368_v62  ;;  %1597 = vmatpush.msra.mxu1 %v198_v63  ;;  %v533_v62 = vld [vmem:[%s5689_s1 + $0xfb8] sm:$0xff] }
 0x131   :  { %1617 = vmatpush.msra.mxu3 %v278_v31  ;;  %1654 = vmatpush.msra.mxu0 %v453_v1  ;;  %v613_v63 = vld [vmem:[%s5689_s1 + $0x1238] sm:$0xff]  ;;  %v788_v31 = vld [vmem:[%s5689_s1 + $0x17b0] sm:$0xff]  ;;  %v698_v1 = vld [vmem:[%s5689_s1 + $0x14e0] sm:$0xff] }
 0x132   :  { %1636 = vmatpush.msrb.mxu2 %v363_v3  ;;  %1598 = vmatpush.msra.mxu1 %v193_v4  ;;  %v528_v3 = vld [vmem:[%s5689_s1 + $0xf90] sm:$0xff] }
 0x133   :  { %1618 = vmatpush.msra.mxu3 %v273_v5  ;;  %1655 = vmatpush.msra.mxu0 %v448_v6  ;;  %v608_v4 = vld [vmem:[%s5689_s1 + $0x1210] sm:$0xff]  ;;  %v783_v5 = vld [vmem:[%s5689_s1 + $0x1788] sm:$0xff]  ;;  %v693_v6 = vld [vmem:[%s5689_s1 + $0x14b8] sm:$0xff] }
 0x134   :  { %1637 = vmatpush.msrb.mxu2 %v358_v11  ;;  %1663 = vmatpush.msrb.mxu1 %v588_v8  ;;  %v523_v11 = vld [vmem:[%s5689_s1 + $0xf68] sm:$0xff] }
 0x135   :  { %1683 = vmatpush.msrb.mxu3 %v668_v9  ;;  %1656 = vmatpush.msra.mxu0 %v443_v10  ;;  %v603_v8 = vld [vmem:[%s5689_s1 + $0x11e8] sm:$0xff]  ;;  %v778_v9 = vld [vmem:[%s5689_s1 + $0x1760] sm:$0xff]  ;;  %v688_v10 = vld [vmem:[%s5689_s1 + $0x1490] sm:$0xff] }
 0x136   :  { %1638 = vmatpush.msrb.mxu2 %v353_v12  ;;  %1664 = vmatpush.msrb.mxu1 %v583_v13  ;;  %v518_v12 = vld [vmem:[%s5689_s1 + $0xf40] sm:$0xff] }
 0x137   :  { %1684 = vmatpush.msrb.mxu3 %v663_v14  ;;  %1559 = vmatmul.f32.vlgmr.msra.gmra.mxu2 %v2840_v39  ;;  %v598_v13 = vld [vmem:[%s5689_s1 + $0x11c0] sm:$0xff]  ;;  %v773_v14 = vld [vmem:[%s5689_s1 + $0x1738] sm:$0xff] }
 0x138   :  { %1657 = vmatpush.msra.mxu0 %v438_v20  ;;  %1703 = vmatpush.msra.mxu2 %v748_v21  ;;  %v683_v20 = vld [vmem:[%s5689_s1 + $0x1468] sm:$0xff]  ;;  %v593_v21 = vld [vmem:[%s5689_s1 + $0x1198] sm:$0xff] }
 0x139   :  { %1665 = vmatpush.msrb.mxu1 %v578_v23  ;;  %1685 = vmatpush.msrb.mxu3 %v658_v25  ;;  %v768_v23 = vld [vmem:[%s5689_s1 + $0x1710] sm:$0xff]  ;;  %v678_v25 = vld [vmem:[%s5689_s1 + $0x1440] sm:$0xff] }
 0x13a   :  { %1658 = vmatpush.msra.mxu0 %v433_v27  ;;  %1704 = vmatpush.msra.mxu2 %v743_v28  ;;  %v838_v27 = vld [vmem:[%s5689_s1 + $0x1940] sm:$0xff]  ;;  %v109_v28 = vld [vmem:[%s5689_s1 + $0x278] sm:$0xff] }
 0x13b   :  { %1579 = vmatmul.f32.vlgmr.msrb.gmra.mxu0 %v2842_v40  ;;  %1666 = vmatpush.msrb.mxu1 %v573_v29  ;;  %v763_v29 = vld [vmem:[%s5689_s1 + $0x16e8] sm:$0xff] }
 0x13c   :  { %1686 = vmatpush.msrb.mxu3 %v653_v30  ;;  %1723 = vmatpush.msrb.mxu0 %v828_v32  ;;  %v673_v30 = vld [vmem:[%s5689_s1 + $0x1418] sm:$0xff] }
 0x13d   :  { %1705 = vmatpush.msra.mxu2 %v738_v33  ;;  %1667 = vmatpush.msrb.mxu1 %v568_v34  ;;  %v833_v32 = vld [vmem:[%s5689_s1 + $0x1918] sm:$0xff]  ;;  %v104_v33 = vld [vmem:[%s5689_s1 + $0x250] sm:$0xff]  ;;  %v758_v34 = vld [vmem:[%s5689_s1 + $0x16c0] sm:$0xff] }
 0x13e   :  { %1687 = vmatpush.msrb.mxu3 %v648_v35  ;;  %1724 = vmatpush.msrb.mxu0 %v823_v36  ;;  %v189_v35 = vld [vmem:[%s5689_s1 + $0x4f8] sm:$0xff] }
 0x13f   :  { %1706 = vmatpush.msra.mxu2 %v733_v37  ;;  %1668 = vmatpush.msrb.mxu1 %v563_v42  ;;  %v269_v36 = vld [vmem:[%s5689_s1 + $0x778] sm:$0xff]  ;;  %v264_v42 = vld [vmem:[%s5689_s1 + $0x750] sm:$0xff] }
 0x140   :  { %1688 = vmatpush.msrb.mxu3 %v643_v43  ;;  %1725 = vmatpush.msrb.mxu0 %v818_v44  ;;  %v753_v37 = vld [vmem:[%s5689_s1 + $0x1698] sm:$0xff]  ;;  %v179_v43 = vld [vmem:[%s5689_s1 + $0x4a8] sm:$0xff] }
 0x141   :  { %1707 = vmatpush.msra.mxu2 %v728_v45  ;;  %1669 = vmatpush.msrb.mxu1 %v558_v46  ;;  %v259_v44 = vld [vmem:[%s5689_s1 + $0x728] sm:$0xff]  ;;  %v89_v45 = vld [vmem:[%s5689_s1 + $0x1d8] sm:$0xff]  ;;  %v344_v46 = vld [vmem:[%s5689_s1 + $0x9d0] sm:$0xff] }
 0x142   :  { %1689 = vmatpush.msrb.mxu3 %v638_v47  ;;  %1726 = vmatpush.msrb.mxu0 %v813_v48  ;;  %v174_v47 = vld [vmem:[%s5689_s1 + $0x480] sm:$0xff] }
 0x143   :  { %1708 = vmatpush.msra.mxu2 %v723_v49  ;;  %1670 = vmatpush.msrb.mxu1 %v553_v50  ;;  %v254_v48 = vld [vmem:[%s5689_s1 + $0x700] sm:$0xff]  ;;  %v84_v49 = vld [vmem:[%s5689_s1 + $0x1b0] sm:$0xff]  ;;  %v339_v50 = vld [vmem:[%s5689_s1 + $0x9a8] sm:$0xff] }
 0x144   :  { %1690 = vmatpush.msrb.mxu3 %v633_v51  ;;  %1727 = vmatpush.msrb.mxu0 %v808_v15  ;;  %v169_v51 = vld [vmem:[%s5689_s1 + $0x458] sm:$0xff] }
 0x145   :  { %1709 = vmatpush.msra.mxu2 %v718_v52  ;;  %1671 = vmatpush.msrb.mxu1 %v548_v17  ;;  %v249_v15 = vld [vmem:[%s5689_s1 + $0x6d8] sm:$0xff]  ;;  %v79_v52 = vld [vmem:[%s5689_s1 + $0x188] sm:$0xff]  ;;  %v334_v17 = vld [vmem:[%s5689_s1 + $0x980] sm:$0xff] }
 0x146   :  { %1691 = vmatpush.msrb.mxu3 %v628_v53  ;;  %1728 = vmatpush.msrb.mxu0 %v803_v54  ;;  %v244_v53 = vld [vmem:[%s5689_s1 + $0x6b0] sm:$0xff] }
 0x147   :  { %1710 = vmatpush.msra.mxu2 %v713_v26  ;;  %1672 = vmatpush.msrb.mxu1 %v543_v55  ;;  %v164_v54 = vld [vmem:[%s5689_s1 + $0x430] sm:$0xff]  ;;  %v74_v26 = vld [vmem:[%s5689_s1 + $0x160] sm:$0xff]  ;;  %v329_v55 = vld [vmem:[%s5689_s1 + $0x958] sm:$0xff] }
 0x148   :  { %1692 = vmatpush.msrb.mxu3 %v623_v56  ;;  %1729 = vmatpush.msrb.mxu0 %v798_v57  ;;  %v239_v56 = vld [vmem:[%s5689_s1 + $0x688] sm:$0xff]  ;;  %v69_v57 = vld [vmem:[%s5689_s1 + $0x138] sm:$0xff] }
 0x149   :  { %1711 = vmatpush.msra.mxu2 %v708_v58  ;;  %1673 = vmatpush.msrb.mxu1 %v538_v59  ;;  %v324_v58 = vld [vmem:[%s5689_s1 + $0x930] sm:$0xff]  ;;  %v234_v59 = vld [vmem:[%s5689_s1 + $0x660] sm:$0xff] }
 0x14a   :  { %1693 = vmatpush.msrb.mxu3 %v618_v22  ;;  %1730 = vmatpush.msrb.mxu0 %v793_v60  ;;  %v64_v22 = vld [vmem:[%s5689_s1 + $0x110] sm:$0xff]  ;;  %v319_v60 = vld [vmem:[%s5689_s1 + $0x908] sm:$0xff] }
 0x14b   :  { %1712 = vmatpush.msra.mxu2 %v703_v24  ;;  %1674 = vmatpush.msrb.mxu1 %v533_v62  ;;  %v229_v24 = vld [vmem:[%s5689_s1 + $0x638] sm:$0xff] }
 0x14c   :  { %1694 = vmatpush.msrb.mxu3 %v613_v63  ;;  %1731 = vmatpush.msrb.mxu0 %v788_v31  ;;  %v149_v62 = vld [vmem:[%s5689_s1 + $0x3b8] sm:$0xff]  ;;  %v59_v63 = vld [vmem:[%s5689_s1 + $0xe8] sm:$0xff]  ;;  %v314_v31 = vld [vmem:[%s5689_s1 + $0x8e0] sm:$0xff] }
 0x14d   :  { %1713 = vmatpush.msra.mxu2 %v698_v1  ;;  %1619 = vmatmul.f32.vlgmr.msra.gmra.mxu3 %v2844_v41  ;;  %v224_v1 = vld [vmem:[%s5689_s1 + $0x610] sm:$0xff] }
 0x14e   :  { %1675 = vmatpush.msrb.mxu1 %v528_v3  ;;  %1695 = vmatpush.msrb.mxu3 %v608_v4  ;;  %v144_v3 = vld [vmem:[%s5689_s1 + $0x390] sm:$0xff]  ;;  %v54_v4 = vld [vmem:[%s5689_s1 + $0xc0] sm:$0xff] }
 0x14f   :  { %1732 = vmatpush.msrb.mxu0 %v783_v5  ;;  %1714 = vmatpush.msra.mxu2 %v693_v6  ;;  %v309_v5 = vld [vmem:[%s5689_s1 + $0x8b8] sm:$0xff]  ;;  %v219_v6 = vld [vmem:[%s5689_s1 + $0x5e8] sm:$0xff] }
 0x150   :  { %1599 = vmatmul.f32.vlgmr.msra.gmra.mxu1 %v2838_v38  ;;  %1639 = vmatmul.f32.vlgmr.msrb.gmra.mxu2 %v4031_v18  ;;  %v513_v18 = vld [vmem:[%s5689_s1 + $0xf18] sm:$0xff] }
 0x151   :  { %1676 = vmatpush.msrb.mxu1 %v523_v11  ;;  %1696 = vmatpush.msrb.mxu3 %v603_v8  ;;  %v139_v11 = vld [vmem:[%s5689_s1 + $0x368] sm:$0xff]  ;;  %v49_v8 = vld [vmem:[%s5689_s1 + $0x98] sm:$0xff] }
 0x152   :  { %1733 = vmatpush.msrb.mxu0 %v778_v9  ;;  %1715 = vmatpush.msra.mxu2 %v688_v10  ;;  %v304_v9 = vld [vmem:[%s5689_s1 + $0x890] sm:$0xff]  ;;  %v214_v10 = vld [vmem:[%s5689_s1 + $0x5c0] sm:$0xff] }
 0x153   :  { %1677 = vmatpush.msrb.mxu1 %v518_v12  ;;  %1697 = vmatpush.msrb.mxu3 %v598_v13  ;;  %v134_v12 = vld [vmem:[%s5689_s1 + $0x340] sm:$0xff]  ;;  %v44_v13 = vld [vmem:[%s5689_s1 + $0x70] sm:$0xff] }
 0x154   :  { %1734 = vmatpush.msrb.mxu0 %v773_v14  ;;  %1716 = vmatpush.msra.mxu2 %v683_v20  ;;  %v299_v14 = vld [vmem:[%s5689_s1 + $0x868] sm:$0xff]  ;;  %v209_v20 = vld [vmem:[%s5689_s1 + $0x598] sm:$0xff] }
 0x155   :  { %1678 = vmatpush.msrb.mxu1 %v513_v18  ;;  %1698 = vmatpush.msrb.mxu3 %v593_v21  ;;  %v129_v18 = vld [vmem:[%s5689_s1 + $0x318] sm:$0xff]  ;;  %v39_v21 = vld [vmem:[%s5689_s1 + $0x48] sm:$0xff] }
 0x156   :  { %1735 = vmatpush.msrb.mxu0 %v768_v23  ;;  %1717 = vmatpush.msra.mxu2 %v678_v25  ;;  %v294_v23 = vld [vmem:[%s5689_s1 + $0x840] sm:$0xff]  ;;  %v204_v25 = vld [vmem:[%s5689_s1 + $0x570] sm:$0xff] }
 0x157   :  { %1757 = vmatpush.msra.mxu1 %v838_v27  ;;  %1763 = vmatpush.msra.mxu3 %v109_v28  ;;  %v124_v27 = vld [vmem:[%s5689_s1 + $0x2f0] sm:$0xff]  ;;  %v34_v28 = vld [vmem:[%s5689_s1 + $0x20] sm:$0xff] }
 0x158   :  { %1699 = vmatmul.f32.vlgmr.msrb.gmra.mxu3 %v4034_v19  ;;  %1736 = vmatpush.msrb.mxu0 %v763_v29  ;;  %v99_v19 = vld [vmem:[%s5689_s1 + $0x228] sm:$0xff]  ;;  %v289_v29 = vld [vmem:[%s5689_s1 + $0x818] sm:$0xff] }
 0x159   :  { %1718 = vmatpush.msra.mxu2 %v673_v30  ;;  %1758 = vmatpush.msra.mxu1 %v833_v32  ;;  %v199_v30 = vld [vmem:[%s5689_s1 + $0x548] sm:$0xff] }
 0x15a   :  { %1764 = vmatpush.msra.mxu3 %v104_v33  ;;  %1659 = vmatmul.f32.vlgmr.msra.gmra.mxu0 %v4004_v7  ;;  %v184_v7 = vld [vmem:[%s5689_s1 + $0x4d0] sm:$0xff]  ;;  %v119_v32 = vld [vmem:[%s5689_s1 + $0x2c8] sm:$0xff]  ;;  %v429_v33 = vld [vmem:[%s5689_s1 + $0xc78] sm:$0xff] }
 0x15b   :  { %1679 = vmatmul.f32.vlgmr.msrb.gmra.mxu1 %v3989_v2  ;;  %1719 = vmatmul.f32.vlgmr.msra.gmra.mxu2 %v4151_v61  ;;  %v94_v2 = vld [vmem:[%s5689_s1 + $0x200] sm:$0xff]  ;;  %v349_v61 = vld [vmem:[%s5689_s1 + $0x9f8] sm:$0xff] }
 0x15c   :  { %1737 = vmatpush.msrb.mxu0 %v758_v34  ;;  %1783 = vmatpush.msrb.mxu1 %v189_v35  ;;  %v284_v34 = vld [vmem:[%s5689_s1 + $0x7f0] sm:$0xff]  ;;  %v194_v35 = vld [vmem:[%s5689_s1 + $0x520] sm:$0xff] }
 0x15d   :  { %1803 = vmatpush.msrb.mxu2 %v269_v36  ;;  %1765 = vmatpush.msra.mxu3 %v99_v19  ;;  %v114_v36 = vld [vmem:[%s5689_s1 + $0x2a0] sm:$0xff]  ;;  %v424_v19 = vld [vmem:[%s5689_s1 + $0xc50] sm:$0xff] }
 0x15e   :  { %1738 = vmatpush.msrb.mxu0 %v753_v37  ;;  %1784 = vmatpush.msrb.mxu1 %v184_v7  ;;  %v279_v37 = vld [vmem:[%s5689_s1 + $0x7c8] sm:$0xff]  ;;  %v509_v7 = vld [vmem:[%s5689_s1 + $0xef8] sm:$0xff] }
 0x15f   :  { %1804 = vmatpush.msrb.mxu2 %v264_v42  ;;  %1766 = vmatpush.msra.mxu3 %v94_v2  ;;  %v4767_v42 = vpop.f32.mrf.mxu0  ;;  %v589_v2 = vld [vmem:[%s5689_s1 + $0x1178] sm:$0xff] }
 0x160   :  { %1823 = vmatpush.msra.mxu0 %v349_v61  ;;  %1785 = vmatpush.msrb.mxu1 %v179_v43  ;;  %v419_v61 = vld [vmem:[%s5689_s1 + $0xc28] sm:$0xff]  ;;  %v274_v43 = vld [vmem:[%s5689_s1 + $0x7a0] sm:$0xff] }
 0x161   :  { %1805 = vmatpush.msrb.mxu2 %v259_v44  ;;  %1767 = vmatpush.msra.mxu3 %v89_v45  ;;  %v504_v44 = vld [vmem:[%s5689_s1 + $0xed0] sm:$0xff]  ;;  %v4781_v45 = vpop.f32.mrf.mxu2 }
 0x162   :  { %1824 = vmatpush.msra.mxu0 %v344_v46  ;;  %1786 = vmatpush.msrb.mxu1 %v174_v47  ;;  %v584_v46 = vld [vmem:[%s5689_s1 + $0x1150] sm:$0xff]  ;;  %v414_v47 = vld [vmem:[%s5689_s1 + $0xc00] sm:$0xff] }
 0x163   :  { %1806 = vmatpush.msrb.mxu2 %v254_v48  ;;  %1768 = vmatpush.msra.mxu3 %v84_v49  ;;  %v669_v48 = vld [vmem:[%s5689_s1 + $0x13f8] sm:$0xff]  ;;  %v499_v49 = vld [vmem:[%s5689_s1 + $0xea8] sm:$0xff] }
 0x164   :  { %1825 = vmatpush.msra.mxu0 %v339_v50  ;;  %1787 = vmatpush.msrb.mxu1 %v169_v51  ;;  %v579_v50 = vld [vmem:[%s5689_s1 + $0x1128] sm:$0xff]  ;;  %v409_v51 = vld [vmem:[%s5689_s1 + $0xbd8] sm:$0xff] }
 0x165   :  { %1739 = vmatmul.f32.vlgmr.msrb.gmra.mxu0 %v4160_v0  ;;  %1807 = vmatpush.msrb.mxu2 %v249_v15  ;;  %v159_v0 = vld [vmem:[%s5689_s1 + $0x408] sm:$0xff]  ;;  %v664_v15 = vld [vmem:[%s5689_s1 + $0x13d0] sm:$0xff] }
 0x166   :  { %1769 = vmatpush.msra.mxu3 %v79_v52  ;;  %1826 = vmatpush.msra.mxu0 %v334_v17  ;;  %v494_v52 = vld [vmem:[%s5689_s1 + $0xe80] sm:$0xff] }
 0x167   :  { %2444 = vmatmul.msk.f32.vlgmr.msra.gmra.mxu1 %vm880_vm0, %v4202_v16  ;;  %1808 = vmatpush.msrb.mxu2 %v244_v53  ;;  %v154_v16 = vld [vmem:[%s5689_s1 + $0x3e0] sm:$0xff]  ;;  %v404_v53 = vld [vmem:[%s5689_s1 + $0xbb0] sm:$0xff] }
 0x168   :  { %1788 = vmatpush.msrb.mxu1 %v164_v54  ;;  %1770 = vmatpush.msra.mxu3 %v74_v26  ;;  %v574_v17 = vld [vmem:[%s5689_s1 + $0x1100] sm:$0xff]  ;;  %v659_v54 = vld [vmem:[%s5689_s1 + $0x13a8] sm:$0xff]  ;;  %v489_v26 = vld [vmem:[%s5689_s1 + $0xe58] sm:$0xff] }
 0x169   :  { %1827 = vmatpush.msra.mxu0 %v329_v55  ;;  %1809 = vmatpush.msrb.mxu2 %v239_v56  ;;  %v569_v55 = vld [vmem:[%s5689_s1 + $0x10d8] sm:$0xff]  ;;  %v399_v56 = vld [vmem:[%s5689_s1 + $0xb88] sm:$0xff] }
 0x16a   :  { %1789 = vmatpush.msrb.mxu1 %v159_v0  ;;  %1771 = vmatpush.msra.mxu3 %v69_v57  ;;  %v654_v0 = vld [vmem:[%s5689_s1 + $0x1380] sm:$0xff]  ;;  %v484_v57 = vld [vmem:[%s5689_s1 + $0xe30] sm:$0xff] }
 0x16b   :  { %1828 = vmatpush.msra.mxu0 %v324_v58  ;;  %1810 = vmatpush.msrb.mxu2 %v234_v59  ;;  %v4831_v58 = vpop.f32.mrf.mxu0  ;;  %v564_v59 = vld [vmem:[%s5689_s1 + $0x10b0] sm:$0xff] }
 0x16c   :  { %1790 = vmatpush.msrb.mxu1 %v154_v16  ;;  %1772 = vmatpush.msra.mxu3 %v64_v22  ;;  %v394_v16 = vld [vmem:[%s5689_s1 + $0xb60] sm:$0xff]  ;;  %v649_v22 = vld [vmem:[%s5689_s1 + $0x1358] sm:$0xff] }
 0x16d   :  { %1829 = vmatpush.msra.mxu0 %v319_v60  ;;  %1811 = vmatpush.msrb.mxu2 %v229_v24  ;;  %v479_v60 = vld [vmem:[%s5689_s1 + $0xe08] sm:$0xff]  ;;  %v4845_v24 = vpop.f32.mrf.mxu3 }
 0x16e   :  { %1791 = vmatpush.msrb.mxu1 %v149_v62  ;;  %1773 = vmatpush.msra.mxu3 %v59_v63  ;;  %v4847_v62 = vpop.f32.mrf.mxu2  ;;  %v559_v63 = vld [vmem:[%s5689_s1 + $0x1088] sm:$0xff] }
 0x16f   :  { %1830 = vmatpush.msra.mxu0 %v314_v31  ;;  %1812 = vmatpush.msrb.mxu2 %v224_v1  ;;  %v389_v31 = vld [vmem:[%s5689_s1 + $0xb38] sm:$0xff]  ;;  %v4855_v1 = vpop.f32.mrf.mxu1 }
 0x170   :  { %1792 = vmatpush.msrb.mxu1 %v144_v3  ;;  %1774 = vmatpush.msra.mxu3 %v54_v4  ;;  %v644_v3 = vld [vmem:[%s5689_s1 + $0x1330] sm:$0xff]  ;;  %v474_v4 = vld [vmem:[%s5689_s1 + $0xde0] sm:$0xff] }
 0x171   :  { %1831 = vmatpush.msra.mxu0 %v309_v5  ;;  %1813 = vmatpush.msrb.mxu2 %v219_v6  ;;  %v554_v5 = vld [vmem:[%s5689_s1 + $0x1060] sm:$0xff]  ;;  %v384_v6 = vld [vmem:[%s5689_s1 + $0xb10] sm:$0xff] }
 0x172   :  { %1793 = vmatpush.msrb.mxu1 %v139_v11  ;;  %1775 = vmatpush.msra.mxu3 %v49_v8  ;;  %v639_v11 = vld [vmem:[%s5689_s1 + $0x1308] sm:$0xff]  ;;  %v469_v8 = vld [vmem:[%s5689_s1 + $0xdb8] sm:$0xff] }
 0x173   :  { %1832 = vmatpush.msra.mxu0 %v304_v9  ;;  %1814 = vmatpush.msrb.mxu2 %v214_v10  ;;  %v549_v9 = vld [vmem:[%s5689_s1 + $0x1038] sm:$0xff]  ;;  %v379_v10 = vld [vmem:[%s5689_s1 + $0xae8] sm:$0xff] }
 0x174   :  { %1794 = vmatpush.msrb.mxu1 %v134_v12  ;;  %1776 = vmatpush.msra.mxu3 %v44_v13  ;;  %v634_v12 = vld [vmem:[%s5689_s1 + $0x12e0] sm:$0xff]  ;;  %v464_v13 = vld [vmem:[%s5689_s1 + $0xd90] sm:$0xff] }
 0x175   :  { %1833 = vmatpush.msra.mxu0 %v299_v14  ;;  %1815 = vmatpush.msrb.mxu2 %v209_v20  ;;  %v4887_v14 = vpop.f32.mrf.mxu0  ;;  %v544_v20 = vld [vmem:[%s5689_s1 + $0x1010] sm:$0xff] }
 0x176   :  { %1795 = vmatpush.msrb.mxu1 %v129_v18  ;;  %1777 = vmatpush.msra.mxu3 %v39_v21  ;;  %v374_v18 = vld [vmem:[%s5689_s1 + $0xac0] sm:$0xff]  ;;  %v629_v21 = vld [vmem:[%s5689_s1 + $0x12b8] sm:$0xff] }
 0x177   :  { %1834 = vmatpush.msra.mxu0 %v294_v23  ;;  %1816 = vmatpush.msrb.mxu2 %v204_v25  ;;  %v459_v23 = vld [vmem:[%s5689_s1 + $0xd68] sm:$0xff]  ;;  %v4901_v25 = vpop.f32.mrf.mxu2 }
 0x178   :  { %1796 = vmatpush.msrb.mxu1 %v124_v27  ;;  %1778 = vmatpush.msra.mxu3 %v34_v28  ;;  %v539_v27 = vld [vmem:[%s5689_s1 + $0xfe8] sm:$0xff]  ;;  %v369_v28 = vld [vmem:[%s5689_s1 + $0xa98] sm:$0xff] }
 0x179   :  { %1835 = vmatpush.msra.mxu0 %v289_v29  ;;  %1817 = vmatpush.msrb.mxu2 %v199_v30  ;;  %v624_v29 = vld [vmem:[%s5689_s1 + $0x1290] sm:$0xff]  ;;  %v454_v30 = vld [vmem:[%s5689_s1 + $0xd40] sm:$0xff] }
 0x17a   :  { %1797 = vmatpush.msrb.mxu1 %v119_v32  ;;  %1843 = vmatpush.msrb.mxu3 %v429_v33  ;;  %v4915_v32 = vpop.f32.mrf.mxu3  ;;  %v534_v33 = vld [vmem:[%s5689_s1 + $0xfc0] sm:$0xff] }
 0x17b   :  { %1836 = vmatpush.msra.mxu0 %v284_v34  ;;  %1818 = vmatpush.msrb.mxu2 %v194_v35  ;;  %v364_v34 = vld [vmem:[%s5689_s1 + $0xa70] sm:$0xff]  ;;  %v4926_v35 = vld [vmem:[%s5690_s2] sm:$0x1f] }
 0x17c   :  { %1798 = vmatpush.msrb.mxu1 %v114_v36  ;;  %1844 = vmatpush.msrb.mxu3 %v424_v19  ;;  %v4928_v36 = vpop.f32.mrf.mxu1  ;;  %v619_v19 = vld [vmem:[%s5689_s1 + $0x1268] sm:$0xff] }
 0x17d   :  { %1837 = vmatpush.msra.mxu0 %v279_v37  ;;  %1883 = vmatpush.msra.mxu2 %v589_v2  ;;  %v449_v37 = vld [vmem:[%s5689_s1 + $0xd18] sm:$0xff]  ;;  %v359_v2 = vld [vmem:[%s5689_s1 + $0xa48] sm:$0xff] }
 0x17e   :  { %1863 = vmatpush.msra.mxu1 %v509_v7  ;;  %1845 = vmatpush.msrb.mxu3 %v419_v61  ;;  %v529_v7 = vld [vmem:[%s5689_s1 + $0xf98] sm:$0xff]  ;;  %v614_v61 = vld [vmem:[%s5689_s1 + $0x1240] sm:$0xff] }
 0x17f   :  { %1838 = vmatpush.msra.mxu0 %v274_v43  ;;  %1884 = vmatpush.msra.mxu2 %v584_v46  ;;  %v842_v43 = vperm.slane %v4926_v35, 0  ;;  %v444_v46 = vld [vmem:[%s5689_s1 + $0xcf0] sm:$0xff] }
 0x180   :  { %1864 = vmatpush.msra.mxu1 %v504_v44  ;;  %1846 = vmatpush.msrb.mxu3 %v414_v47  ;;  %v4946_v44 = vpop.f32.mrf.mxu0  ;;  %v524_v47 = vld [vmem:[%s5689_s1 + $0xf70] sm:$0xff] }
 0x181   :  { %1903 = vmatpush.msrb.mxu0 %v669_v48  ;;  %1885 = vmatpush.msra.mxu2 %v579_v50  ;;  %v354_v48 = vld [vmem:[%s5689_s1 + $0xa20] sm:$0xff]  ;;  %v1140_v50 = vpop.f32.mrf.mxu2 }
 0x182   :  { %1865 = vmatpush.msra.mxu1 %v499_v49  ;;  %1847 = vmatpush.msrb.mxu3 %v409_v51  ;;  %v609_v49 = vld [vmem:[%s5689_s1 + $0x1218] sm:$0xff]  ;;  %v439_v51 = vld [vmem:[%s5689_s1 + $0xcc8] sm:$0xff] }
 0x183   :  { %1904 = vmatpush.msrb.mxu0 %v664_v15  ;;  %1886 = vmatpush.msra.mxu2 %v574_v17  ;;  %v843_v15 = vperm.slane %v4926_v35, 1  ;;  %v749_v17 = vld [vmem:[%s5689_s1 + $0x1678] sm:$0xff] }
 0x184   :  { %1866 = vmatpush.msra.mxu1 %v494_v52  ;;  %1848 = vmatpush.msrb.mxu3 %v404_v53  ;;  %v519_v52 = vld [vmem:[%s5689_s1 + $0xf48] sm:$0xff]  ;;  %v901_v53 = vadd.f32 %v4767_v42, %v842_v43  ;;  %v514_v42 = vld [vmem:[%s5689_s1 + $0xf20] sm:$0xff] }
 0x185   :  { %1905 = vmatpush.msrb.mxu0 %v659_v54  ;;  %1887 = vmatpush.msra.mxu2 %v569_v55  ;;  %v1120_v54 = vpop.f32.mrf.mxu3  ;;  %v4978_v55 = vpop.f32.mrf.mxu1 }
 0x186   :  { %1867 = vmatpush.msra.mxu1 %v489_v26  ;;  %1849 = vmatpush.msrb.mxu3 %v399_v56  ;;  %v434_v26 = vld [vmem:[%s5689_s1 + $0xca0] sm:$0xff]  ;;  %v744_v56 = vld [vmem:[%s5689_s1 + $0x1650] sm:$0xff] }
 0x187   :  { %1906 = vmatpush.msrb.mxu0 %v654_v0  ;;  %1888 = vmatpush.msra.mxu2 %v564_v59  ;;  %v599_v0 = vld [vmem:[%s5689_s1 + $0x11c8] sm:$0xff] }
 0x188   :  { %1868 = vmatpush.msra.mxu1 %v484_v57  ;;  %1850 = vmatpush.msrb.mxu3 %v394_v16  ;;  %v1121_v57 = vadd.f32 %v1120_v54, %v843_v15  ;;  %v839_v59 = vld [vmem:[%s5689_s1 + $0x1948] sm:$0xff]  ;;  %v921_v16 = vadd.f32 %v4855_v1, %v901_v53  ;;  %v834_v1 = vld [vmem:[%s5689_s1 + $0x1920] sm:$0xff]  ;;  %v704_v53 = vld [vmem:[%s5689_s1 + $0x1510] sm:$0xff] }
 0x189   :  { %1907 = vmatpush.msrb.mxu0 %v649_v22  ;;  %1889 = vmatpush.msra.mxu2 %v559_v63  ;;  %v4997_v22 = vpop.f32.mrf.mxu0  ;;  %v594_v63 = vld [vmem:[%s5689_s1 + $0x11a0] sm:$0xff]  ;;  %v2006_v54 = vld [vmem:[%s5691_s3 + $0x90] sm:$0xff] }
 0x18a   :  { %1869 = vmatpush.msra.mxu1 %v479_v60  ;;  %1851 = vmatpush.msrb.mxu3 %v389_v31  ;;  %v739_v60 = vld [vmem:[%s5689_s1 + $0x1628] sm:$0xff]  ;;  %v824_v31 = vld [vmem:[%s5689_s1 + $0x18d0] sm:$0xff]  ;;  %v794_v15 = vld [vmem:[%s5689_s1 + $0x17e0] sm:$0xff] }
 0x18b   :  { %1908 = vmatpush.msrb.mxu0 %v644_v3  ;;  %1890 = vmatpush.msra.mxu2 %v554_v5  ;;  %v1141_v3 = vadd.f32 %v1140_v50, %v1121_v57  ;;  %v941_v5 = vadd.f32 %v4781_v45, %v921_v16  ;;  %v2016_v45 = vld [vmem:[%s5691_s3 + $0xe0] sm:$0xff]  ;;  %v844_v16 = vperm.slane %v4926_v35, 2 }
 0x18c   :  { %1870 = vmatpush.msra.mxu1 %v474_v4  ;;  %1852 = vmatpush.msrb.mxu3 %v384_v6  ;;  %v734_v4 = vld [vmem:[%s5689_s1 + $0x1600] sm:$0xff]  ;;  %v5019_v6 = vpop.f32.mrf.mxu2 }
 0x18d   :  { %1909 = vmatpush.msrb.mxu0 %v639_v11  ;;  %1891 = vmatpush.msra.mxu2 %v549_v9  ;;  %v2050_v11 = vld [vmem:[%s5691_s3 + $0x1f0] sm:$0xff]  ;;  %v1180_v9 = vpop.f32.mrf.mxu1  ;;  %v2004_v57 = vld [vmem:[%s5691_s3 + $0x80] sm:$0xff] }
 0x18e   :  { %1871 = vmatpush.msra.mxu1 %v469_v8  ;;  %1853 = vmatpush.msrb.mxu3 %v379_v10  ;;  %v819_v8 = vld [vmem:[%s5689_s1 + $0x18a8] sm:$0xff]  ;;  %v2458_v10 = vld.sshfl [vmem:[#allocation1 + $0x30] sm:$0xff pattern:$0x73625140] }
 0x18f   :  { %1910 = vmatpush.msrb.mxu0 %v634_v12  ;;  %1892 = vmatpush.msra.mxu2 %v544_v20  ;;  %v729_v12 = vld [vmem:[%s5689_s1 + $0x15d8] sm:$0xff]  ;;  %v1161_v20 = vadd.f32 %v4946_v44, %v1141_v3  ;;  %v714_v44 = vld [vmem:[%s5689_s1 + $0x1560] sm:$0xff] }
 0x190   :  { %1872 = vmatpush.msra.mxu1 %v464_v13  ;;  %1854 = vmatpush.msrb.mxu3 %v374_v18  ;;  %v2048_v13 = vld [vmem:[%s5691_s3 + $0x1e0] sm:$0xff]  ;;  %v2014_v18 = vld [vmem:[%s5691_s3 + $0xd0] sm:$0xff] }
 0x191   :  { %1911 = vmatpush.msrb.mxu0 %v629_v21  ;;  %1893 = vmatpush.msra.mxu2 %v539_v27  ;;  %v961_v21 = vadd.f32 %v4845_v24, %v941_v5  ;;  %v2459_v27 = vld.sshfl [vmem:[#allocation1 + $0x20] sm:$0xff pattern:$0x73625140]  ;;  %v809_v24 = vld [vmem:[%s5689_s1 + $0x1858] sm:$0xff]  ;;  %v779_v5 = vld [vmem:[%s5689_s1 + $0x1768] sm:$0xff] }
 0x192   :  { %1873 = vmatpush.msra.mxu1 %v459_v23  ;;  %1855 = vmatpush.msrb.mxu3 %v369_v28  ;;  %v5045_v23 = vpop.f32.mrf.mxu0  ;;  %v724_v28 = vld [vmem:[%s5689_s1 + $0x15b0] sm:$0xff] }
 0x193   :  { %1912 = vmatpush.msrb.mxu0 %v624_v29  ;;  %1894 = vmatpush.msra.mxu2 %v534_v33  ;;  %v2046_v29 = vld [vmem:[%s5691_s3 + $0x1d0] sm:$0xff]  ;;  %v2012_v33 = vld [vmem:[%s5691_s3 + $0xc0] sm:$0xff] }
 0x194   :  { %1874 = vmatpush.msra.mxu1 %v454_v30  ;;  %1856 = vmatpush.msrb.mxu3 %v364_v34  ;;  %v1200_v30 = vpop.f32.mrf.mxu3  ;;  %v719_v34 = vld [vmem:[%s5689_s1 + $0x1588] sm:$0xff]  ;;  %v5072_v43 = vpop.f32.mrf.mxu2 }
 0x195   :  { %1913 = vmatpush.msrb.mxu0 %v619_v19  ;;  %1895 = vmatpush.msra.mxu2 %v529_v7  ;;  %v2044_v19 = vld [vmem:[%s5691_s3 + $0x1c0] sm:$0xff]  ;;  %v804_v7 = vld [vmem:[%s5689_s1 + $0x1830] sm:$0xff] }
 0x196   :  { %1875 = vmatpush.msra.mxu1 %v449_v37  ;;  %1857 = vmatpush.msrb.mxu3 %v359_v2  ;;  %v1181_v37 = vadd.f32 %v1180_v9, %v1161_v20  ;;  %v2010_v2 = vld [vmem:[%s5691_s3 + $0xb0] sm:$0xff] }
 0x197   :  { %1914 = vmatpush.msrb.mxu0 %v614_v61  ;;  %1819 = vmatmul.f32.vlgmr.msrb.gmra.mxu2 %v2838_v38  ;;  %v604_v38 = vld [vmem:[%s5689_s1 + $0x11f0] sm:$0xff]  ;;  %v981_v61 = vadd.f32 %v4831_v58, %v961_v21  ;;  %v2008_v58 = vld [vmem:[%s5691_s3 + $0xa0] sm:$0xff]  ;;  %v769_v21 = vld [vmem:[%s5689_s1 + $0x1718] sm:$0xff] }
 0x198   :  { %1876 = vmatpush.msra.mxu1 %v444_v46  ;;  %1896 = vmatpush.msra.mxu2 %v524_v47  ;;  %v2042_v46 = vld [vmem:[%s5691_s3 + $0x1b0] sm:$0xff]  ;;  %v1260_v47 = vpop.f32.mrf.mxu1  ;;  %v1201_v50 = vadd.f32 %v1200_v30, %v1181_v37 }
 0x199   :  { %1858 = vmatpush.msrb.mxu3 %v354_v48  ;;  %1915 = vmatpush.msrb.mxu0 %v609_v49  ;;  %v799_v48 = vld [vmem:[%s5689_s1 + $0x1808] sm:$0xff]  ;;  %v709_v49 = vld [vmem:[%s5689_s1 + $0x1538] sm:$0xff]  ;;  %v1998_v20 = vld [vmem:[%s5691_s3 + $0x50] sm:$0xff] }
 0x19a   :  { %1779 = vmatmul.f32.vlgmr.msra.gmra.mxu3 %v2840_v39  ;;  %1877 = vmatpush.msra.mxu1 %v439_v51  ;;  %v829_v39 = vld [vmem:[%s5689_s1 + $0x18f8] sm:$0xff]  ;;  %v2040_v51 = vld [vmem:[%s5691_s3 + $0x1a0] sm:$0xff] }
 0x19b   :  { %1897 = vmatpush.msra.mxu2 %v519_v52  ;;  %1923 = vmatpush.msra.mxu3 %v749_v17  ;;  %v1001_v52 = vadd.f32 %v4928_v36, %v981_v61  ;;  %v5096_v17 = vpop.f32.mrf.mxu0  ;;  %v2038_v36 = vld [vmem:[%s5691_s3 + $0x190] sm:$0xff] }
 0x19c   :  { %1916 = vmatpush.msrb.mxu0 %v604_v38  ;;  %1878 = vmatpush.msra.mxu1 %v434_v26  ;;  %v1280_v38 = vpop.f32.mrf.mxu3  ;;  %v2460_v26 = vld.sshfl [vmem:[#allocation1 + $0x28] sm:$0xff pattern:$0x73625140]  ;;  %v2462_v61 = vld.sshfl [vmem:[#allocation1 + $0x10] sm:$0xff pattern:$0x73625140] }
 0x19d   :  { %1898 = vmatpush.msra.mxu2 %v514_v42  ;;  %1924 = vmatpush.msra.mxu3 %v744_v56  ;;  %v789_v42 = vld [vmem:[%s5689_s1 + $0x17b8] sm:$0xff]  ;;  %v699_v56 = vld [vmem:[%s5689_s1 + $0x14e8] sm:$0xff] }
 0x19e   :  { %1799 = vmatmul.f32.vlgmr.msrb.gmra.mxu1 %v2842_v40  ;;  %1917 = vmatpush.msrb.mxu0 %v599_v0  ;;  %v2018_v40 = vld [vmem:[%s5691_s3 + $0xf0] sm:$0xff]  ;;  %v1221_v0 = vadd.f32 %v5019_v6, %v1201_v50  ;;  %v2000_v6 = vld [vmem:[%s5691_s3 + $0x60] sm:$0xff] }
 0x19f   :  { %1943 = vmatpush.msrb.mxu1 %v829_v39  ;;  %1977 = vmatpush.msrb.mxu2 %v839_v59  ;;  %v2036_v39 = vld [vmem:[%s5691_s3 + $0x180] sm:$0xff]  ;;  %v1021_v59 = vadd.f32 %v4847_v62, %v1001_v52  ;;  %v2002_v62 = vld [vmem:[%s5691_s3 + $0x70] sm:$0xff] }
 0x1a0   :  { %1925 = vmatpush.msra.mxu3 %v739_v60  ;;  %1918 = vmatpush.msrb.mxu0 %v594_v63  ;;  %v5122_v60 = vpop.f32.mrf.mxu2  ;;  %v784_v63 = vld [vmem:[%s5689_s1 + $0x1790] sm:$0xff]  ;;  %v1340_v3 = vpop.f32.mrf.mxu1  ;;  %v2080_v50 = vld [vmem:[%s5691_s3 + $0x2e0] sm:$0xff] }
 0x1a1   :  { %1944 = vmatpush.msrb.mxu1 %v824_v31  ;;  %1978 = vmatpush.msrb.mxu2 %v834_v1  ;;  %v694_v31 = vld [vmem:[%s5689_s1 + $0x14c0] sm:$0xff]  ;;  %v1241_v1 = vadd.f32 %v4997_v22, %v1221_v0  ;;  %v689_v22 = vld [vmem:[%s5689_s1 + $0x1498] sm:$0xff]  ;;  %v1341_v9 = vadd.f32 %v1340_v3, %v844_v16  ;;  %v1990_v52 = vld [vmem:[%s5691_s3 + $0x10] sm:$0xff] }
 0x1a2   :  { %1839 = vmatmul.f32.vlgmr.msra.gmra.mxu0 %v2844_v41  ;;  %1899 = vmatmul.f32.vlgmr.msra.gmra.mxu2 %v2458_v10  ;;  %v814_v41 = vld [vmem:[%s5689_s1 + $0x1880] sm:$0xff]  ;;  %v2019_v16 = vld [vmem:[%s5691_s3 + $0xf8] sm:$0xff]  ;;  %v2017_v3 = vld [vmem:[%s5691_s3 + $0xe8] sm:$0xff] }
 0x1a3   :  { %1926 = vmatpush.msra.mxu3 %v734_v4  ;;  %2148 = vmatpush.msra.mxu0 %v2018_v40  ;;  %v2461_v4 = vld.sshfl [vmem:[#allocation1 + $0x38] sm:$0xff pattern:$0x73625140]  ;;  %v2034_v40 = vld [vmem:[%s5691_s3 + $0x170] sm:$0xff]  ;;  %v774_v10 = vld [vmem:[%s5689_s1 + $0x1740] sm:$0xff] }
 0x1a4   :  { %2168 = vmatpush.msra.mxu2 %v2050_v11  ;;  %1945 = vmatpush.msrb.mxu1 %v819_v8  ;;  %v2032_v11 = vld [vmem:[%s5691_s3 + $0x160] sm:$0xff]  ;;  %v1041_v8 = vadd.f32 %v4915_v32, %v1021_v59  ;;  %v2030_v32 = vld [vmem:[%s5691_s3 + $0x150] sm:$0xff] }
 0x1a5   :  { %1859 = vmatmul.f32.vlgmr.msrb.gmra.mxu3 %v2459_v27  ;;  %2149 = vmatpush.msra.mxu0 %v2016_v45  ;;  %v684_v45 = vld [vmem:[%s5689_s1 + $0x1470] sm:$0xff]  ;;  %v679_v27 = vld [vmem:[%s5689_s1 + $0x1448] sm:$0xff] }
 0x1a6   :  { %1927 = vmatpush.msra.mxu3 %v729_v12  ;;  %2169 = vmatpush.msra.mxu2 %v2048_v13  ;;  %v1261_v12 = vadd.f32 %v1260_v47, %v1241_v1  ;;  %v1360_v13 = vpop.f32.mrf.mxu3  ;;  %v2074_v1 = vld [vmem:[%s5691_s3 + $0x2b0] sm:$0xff] }
 0x1a7   :  { %1946 = vmatpush.msrb.mxu1 %v814_v41  ;;  %2150 = vmatpush.msra.mxu0 %v2014_v18  ;;  %v1061_v41 = vadd.f32 %v4887_v14, %v1041_v8  ;;  %v5163_v18 = vpop.f32.mrf.mxu0  ;;  %v2028_v14 = vld [vmem:[%s5691_s3 + $0x140] sm:$0xff]  ;;  %v1361_v30 = vadd.f32 %v1360_v13, %v1341_v9  ;;  %v2106_v8 = vld [vmem:[%s5691_s3 + $0x3b0] sm:$0xff] }
 0x1a8   :  { %1928 = vmatpush.msra.mxu3 %v724_v28  ;;  %2170 = vmatpush.msra.mxu2 %v2046_v29  ;;  %v1281_v28 = vadd.f32 %v1280_v38, %v1261_v12  ;;  %v1996_v29 = vld [vmem:[%s5691_s3 + $0x40] sm:$0xff]  ;;  %v5187_v37 = vpop.f32.mrf.mxu2  ;;  %v1420_v47 = vpop.f32.mrf.mxu1  ;;  %v2078_v38 = vld [vmem:[%s5691_s3 + $0x2d0] sm:$0xff] }
 0x1a9   :  { %1947 = vmatpush.msrb.mxu1 %v809_v24  ;;  %2151 = vmatpush.msra.mxu0 %v2012_v33  ;;  %v764_v24 = vld [vmem:[%s5689_s1 + $0x16f0] sm:$0xff]  ;;  %v674_v33 = vld [vmem:[%s5689_s1 + $0x1420] sm:$0xff] }
 0x1aa   :  { %1929 = vmatpush.msra.mxu3 %v719_v34  ;;  %2171 = vmatpush.msra.mxu2 %v2044_v19  ;;  %v1994_v34 = vld [vmem:[%s5691_s3 + $0x30] sm:$0xff]  ;;  %v1081_v19 = vadd.f32 %v4978_v55, %v1061_v41  ;;  %v2104_v12 = vld [vmem:[%s5691_s3 + $0x3a0] sm:$0xff] }
 0x1ab   :  { %1948 = vmatpush.msrb.mxu1 %v804_v7  ;;  %2152 = vmatpush.msra.mxu0 %v2010_v2  ;;  %v2026_v7 = vld [vmem:[%s5691_s3 + $0x130] sm:$0xff]  ;;  %v1301_v2 = vadd.f32 %v5072_v43, %v1281_v28  ;;  %v1992_v43 = vld [vmem:[%s5691_s3 + $0x20] sm:$0xff] }
 0x1ac   :  { %1930 = vmatpush.msra.mxu3 %v714_v44  ;;  %2172 = vmatpush.msra.mxu2 %v2042_v46  ;;  %v759_v44 = vld [vmem:[%s5689_s1 + $0x16c8] sm:$0xff]  ;;  %v2082_v55 = vld [vmem:[%s5691_s3 + $0x2f0] sm:$0xff]  ;;  %v1381_v46 = vadd.f32 %v5096_v17, %v1361_v30 }
 0x1ad   :  { %1949 = vmatpush.msrb.mxu1 %v799_v48  ;;  %2153 = vmatpush.msra.mxu0 %v2008_v58  ;;  %v2024_v48 = vld [vmem:[%s5691_s3 + $0x120] sm:$0xff]  ;;  %v2022_v17 = vld [vmem:[%s5691_s3 + $0x110] sm:$0xff] }
 0x1ae   :  { %1879 = vmatmul.f32.vlgmr.msra.gmra.mxu1 %v2460_v26  ;;  %1931 = vmatpush.msra.mxu3 %v709_v49  ;;  %v2463_v58 = vld.sshfl [vmem:[#allocation1] sm:$0xff pattern:$0x73625140]  ;;  %v1401_v26 = vadd.f32 %v5122_v60, %v1381_v46  ;;  %v2110_v60 = vld [vmem:[%s5691_s3 + $0x3d0] sm:$0xff] }
 0x1af   :  { %2173 = vmatpush.msra.mxu2 %v2040_v51  ;;  %1950 = vmatpush.msrb.mxu1 %v794_v15  ;;  %v754_v49 = vld [vmem:[%s5689_s1 + $0x16a0] sm:$0xff]  ;;  %v5214_v51 = vadd.f32 %v4901_v25, %v1081_v19  ;;  %v5216_v15 = vpop.f32.mrf.mxu0  ;;  %v2114_v25 = vld [vmem:[%s5691_s3 + $0x3f0] sm:$0xff]  ;;  %s2491_s1 = smov [#allocation2]  }
 0x1b0   :  { %1932 = vmatpush.msra.mxu3 %v704_v53  ;;  %2154 = vmatpush.msra.mxu0 %v2006_v54  ;;  %v5225_v53 = vadd.f32 %v5045_v23, %v1301_v2  ;;  %v1440_v54 = vpop.f32.mrf.mxu3  ;;  %v1988_v23 = vld [vmem:[%s5691_s3] sm:$0xff]  ;;  %v2102_v41 = vld [vmem:[%s5691_s3 + $0x390] sm:$0xff]  ;;  %s2430_s14 = sshll.u32 %s2491_s1, 4  ;;  %s2431_s14 = int_to_ptr.vmem [resolvable:$true] %s2430_s14 }
 0x1b1   :  { %2174 = vmatpush.msra.mxu2 %v2038_v36  ;;  %1951 = vmatpush.msrb.mxu1 %v789_v42  ;;  %v2020_v36 = vld [vmem:[%s5691_s3 + $0x100] sm:$0xff]  ;;  %v1983_v0 = vmax.f32 %v5214_v51, 0.0  ;;  %v2039_v51 = vld [vmem:[%s5691_s3 + $0x198] sm:$0xff] }
 0x1b2   :  { %1919 = vmatmul.f32.vlgmr.msrb.gmra.mxu0 %v2461_v4  ;;  %1933 = vmatpush.msra.mxu3 %v699_v56  ;;  %v2112_v42 = vld [vmem:[%s5691_s3 + $0x3e0] sm:$0xff]  ;;  %v845_v56 = vperm.slane %v4926_v35, 3  ;;  %v1984_v59 = vmax.f32 %v5225_v53, 0.0 }
 0x1b3   :  { %2155 = vmatpush.msra.mxu0 %v2004_v57  ;;  %2175 = vmatpush.msra.mxu2 %v2036_v39  ;;  %v2076_v57 = vld [vmem:[%s5691_s3 + $0x2c0] sm:$0xff] }
 0x1b4   :  { %1952 = vmatpush.msrb.mxu1 %v784_v63  ;;  %1934 = vmatpush.msra.mxu3 %v694_v31  ;;  %v1421_v63 = vadd.f32 %v1420_v47, %v1401_v26  ;;  %v1500_v31 = vpop.f32.mrf.mxu1  ;;  %v2108_v4 = vld [vmem:[%s5691_s3 + $0x3c0] sm:$0xff]  ;;  %v2003_v47 = vld [vmem:[%s5691_s3 + $0x78] sm:$0xff] }
 0x1b5   :  { %2156 = vmatpush.msra.mxu0 %v2002_v62  ;;  %2176 = vmatpush.msra.mxu2 %v2034_v40  ;;  %v2072_v40 = vld [vmem:[%s5691_s3 + $0x2a0] sm:$0xff] }
 0x1b6   :  { %1953 = vmatpush.msrb.mxu1 %v779_v5  ;;  %1935 = vmatpush.msra.mxu3 %v689_v22  ;;  %v1441_v9 = vadd.f32 %v1440_v54, %v1421_v63  ;;  %v2124_v53 = vld [vmem:[%s5691_s3 + $0x440] sm:$0xff] }
 0x1b7   :  { %2157 = vmatpush.msra.mxu0 %v2000_v6  ;;  %2177 = vmatpush.msra.mxu2 %v2032_v11  ;;  %v2464_v6 = vld.sshfl [vmem:[#allocation1 + $0x8] sm:$0xff pattern:$0x73625140]  ;;  %v2015_v11 = vld [vmem:[%s5691_s3 + $0xd8] sm:$0xff] }
 0x1b8   :  { %1954 = vmatpush.msrb.mxu1 %v774_v10  ;;  %1936 = vmatpush.msra.mxu3 %v684_v45  ;;  %v1580_v5 = vpop.f32.mrf.mxu0  ;;  %v1520_v22 = vpop.f32.mrf.mxu3  ;;  %v2070_v10 = vld [vmem:[%s5691_s3 + $0x290] sm:$0xff]  ;;  %v2013_v45 = vld [vmem:[%s5691_s3 + $0xc8] sm:$0xff] }
 0x1b9   :  { %2158 = vmatpush.msra.mxu0 %v1998_v20  ;;  %2178 = vmatpush.msra.mxu2 %v2030_v32  ;;  %v2068_v20 = vld [vmem:[%s5691_s3 + $0x280] sm:$0xff]  ;;  %v2011_v32 = vld [vmem:[%s5691_s3 + $0xb8] sm:$0xff] }
 0x1ba   :  { %1955 = vmatpush.msrb.mxu1 %v769_v21  ;;  %1937 = vmatpush.msra.mxu3 %v679_v27  ;;  %v1560_v39 = vpop.f32.mrf.mxu2  ;;  %v1461_v21 = vadd.f32 %v5163_v18, %v1441_v9  ;;  %v2066_v27 = vld [vmem:[%s5691_s3 + $0x270] sm:$0xff]  ;;  %v2064_v18 = vld [vmem:[%s5691_s3 + $0x260] sm:$0xff]  ;;  %v1989_v9 = vld [vmem:[%s5691_s3 + $0x8] sm:$0xff] }
 0x1bb   :  { %2159 = vmatpush.msra.mxu0 %v1996_v29  ;;  %2179 = vmatpush.msra.mxu2 %v2028_v14  ;;  %v1561_v62 = vadd.f32 %v1560_v39, %v845_v56  ;;  %v2009_v29 = vld [vmem:[%s5691_s3 + $0xa8] sm:$0xff]  ;;  %v2100_v14 = vld [vmem:[%s5691_s3 + $0x380] sm:$0xff] }
 0x1bc   :  { %1956 = vmatpush.msrb.mxu1 %v764_v24  ;;  %2445 = vmatmul.msk.f32.vlgmr.msrb.gmra.mxu2 %vm880_vm0, %v2462_v61  ;;  %v2007_v24 = vld [vmem:[%s5691_s3 + $0x98] sm:$0xff]  ;;  %v1481_v19 = vadd.f32 %v5187_v37, %v1461_v21  ;;  %v2005_v61 = vld [vmem:[%s5691_s3 + $0x88] sm:$0xff]  ;;  %v2060_v37 = vld [vmem:[%s5691_s3 + $0x240] sm:$0xff] }
 0x1bd   :  { %1938 = vmatpush.msra.mxu3 %v674_v33  ;;  %2160 = vmatpush.msra.mxu0 %v1994_v34  ;;  %v1581_v13 = vadd.f32 %v1580_v5, %v1561_v62  ;;  %v2098_v33 = vld [vmem:[%s5691_s3 + $0x370] sm:$0xff]  ;;  %v1997_v56 = vld [vmem:[%s5691_s3 + $0x48] sm:$0xff] }
 0x1be   :  { %2180 = vmatpush.msra.mxu2 %v2026_v7  ;;  %1939 = vmatmul.f32.vlgmr.msra.gmra.mxu3 %v2463_v58  ;;  %v2062_v7 = vld [vmem:[%s5691_s3 + $0x250] sm:$0xff]  ;;  %v2049_v5 = vld [vmem:[%s5691_s3 + $0x1e8] sm:$0xff] }
 0x1bf   :  { %1957 = vmatpush.msrb.mxu1 %v759_v44  ;;  %2188 = vmatpush.msrb.mxu3 %v2082_v55  ;;  %v2096_v44 = vld [vmem:[%s5691_s3 + $0x360] sm:$0xff]  ;;  %v1501_v55 = vadd.f32 %v1500_v31, %v1481_v19  ;;  %v2134_v21 = vld [vmem:[%s5691_s3 + $0x490] sm:$0xff]  ;;  %v2101_v19 = vld [vmem:[%s5691_s3 + $0x388] sm:$0xff] }
 0x1c0   :  { %2161 = vmatpush.msra.mxu0 %v1992_v43  ;;  %2181 = vmatpush.msra.mxu2 %v2024_v48  ;;  %v2094_v43 = vld [vmem:[%s5691_s3 + $0x350] sm:$0xff] }
 0x1c1   :  { %1958 = vmatpush.msrb.mxu1 %v754_v49  ;;  %2189 = vmatpush.msrb.mxu3 %v2080_v50  ;;  %v1521_v58 = vadd.f32 %v1520_v22, %v1501_v55  ;;  %v2058_v49 = vld [vmem:[%s5691_s3 + $0x230] sm:$0xff]  ;;  %v2001_v50 = vld [vmem:[%s5691_s3 + $0x68] sm:$0xff] }
 0x1c2   :  { %2162 = vmatpush.msra.mxu0 %v1990_v52  ;;  %2182 = vmatpush.msra.mxu2 %v2022_v17  ;;  %v2092_v52 = vld [vmem:[%s5691_s3 + $0x340] sm:$0xff]  ;;  %v2029_v55 = vld [vmem:[%s5691_s3 + $0x148] sm:$0xff] }
 0x1c3   :  { %2208 = vmatpush.msra.mxu1 %v2114_v25  ;;  %2190 = vmatpush.msrb.mxu3 %v2078_v38  ;;  %v2056_v17 = vld [vmem:[%s5691_s3 + $0x220] sm:$0xff]  ;;  %v1999_v25 = vld [vmem:[%s5691_s3 + $0x58] sm:$0xff]  ;;  %v2090_v38 = vld [vmem:[%s5691_s3 + $0x330] sm:$0xff] }
 0x1c4   :  { %2163 = vmatpush.msra.mxu0 %v1988_v23  ;;  %2183 = vmatpush.msra.mxu2 %v2020_v36  ;;  %v5352_v36 = vadd.f32 %v5216_v15, %v1521_v58  ;;  %v2052_v15 = vld [vmem:[%s5691_s3 + $0x200] sm:$0xff]  ;;  %v2023_v58 = vld [vmem:[%s5691_s3 + $0x118] sm:$0xff] }
 0x1c5   :  { %2209 = vmatpush.msra.mxu1 %v2112_v42  ;;  %2164 = vmatmul.f32.vlgmr.msra.gmra.mxu0 %v1983_v0  ;;  %v2054_v42 = vld [vmem:[%s5691_s3 + $0x210] sm:$0xff] }
 0x1c6   :  { %2184 = vmatmul.f32.vlgmr.msra.gmra.mxu2 %v1984_v59  ;;  %2191 = vmatpush.msrb.mxu3 %v2076_v57  ;;  %v2088_v57 = vld [vmem:[%s5691_s3 + $0x320] sm:$0xff]  ;;  %v1985_v31 = vmax.f32 %v5352_v36, 0.0  ;;  %v2361_v36 = vld [vmem:[%s5693_s5 + $0x58] sm:$0xff] }
 0x1c7   :  { %2248 = vmatpush.msrb.mxu2 %v2019_v16  ;;  %2210 = vmatpush.msra.mxu1 %v2110_v60  ;;  %v1995_v60 = vld [vmem:[%s5691_s3 + $0x38] sm:$0xff] }
 0x1c8   :  { %1959 = vmatmul.f32.vlgmr.msrb.gmra.mxu1 %v2464_v6  ;;  %2192 = vmatpush.msrb.mxu3 %v2074_v1  ;;  %v2086_v1 = vld [vmem:[%s5691_s3 + $0x310] sm:$0xff]  ;;  %v1991_v6 = vld [vmem:[%s5691_s3 + $0x18] sm:$0xff] }
 0x1c9   :  { %2249 = vmatpush.msrb.mxu2 %v2017_v3  ;;  %2211 = vmatpush.msra.mxu1 %v2108_v4  ;;  %v2051_v3 = vld [vmem:[%s5691_s3 + $0x1f8] sm:$0xff]  ;;  %v1993_v4 = vld [vmem:[%s5691_s3 + $0x28] sm:$0xff] }
 0x1ca   :  { %2193 = vmatpush.msrb.mxu3 %v2072_v40  ;;  %v2084_v40 = vld [vmem:[%s5691_s3 + $0x300] sm:$0xff] }
 0x1cb   :  { %2250 = vmatpush.msrb.mxu2 %v2015_v11  ;;  %2212 = vmatpush.msra.mxu1 %v2106_v8  ;;  %v2115_v11 = vld [vmem:[%s5691_s3 + $0x3f8] sm:$0xff] }
 0x1cc   :  { %2194 = vmatpush.msrb.mxu3 %v2070_v10  ;;  %v2047_v8 = vld [vmem:[%s5691_s3 + $0x1d8] sm:$0xff]  ;;  %v2113_v10 = vld [vmem:[%s5691_s3 + $0x3e8] sm:$0xff] }
 0x1cd   :  { %2251 = vmatpush.msrb.mxu2 %v2013_v45  ;;  %2213 = vmatpush.msra.mxu1 %v2104_v12  ;;  %v1600_v28 = vpop.f32.mrf.mxu1  ;;  %v2136_v12 = vld [vmem:[%s5691_s3 + $0x4a0] sm:$0xff] }
 0x1ce   :  { %2195 = vmatpush.msrb.mxu3 %v2068_v20  ;;  %v1601_v30 = vadd.f32 %v1600_v28, %v1581_v13  ;;  %v2045_v13 = vld [vmem:[%s5691_s3 + $0x1c8] sm:$0xff]  ;;  %2233 = vmatpush.msrb.mxu0 %v2136_v12  ;;  %v2067_v12 = vld [vmem:[%s5691_s3 + $0x278] sm:$0xff] }
 0x1cf   :  { %2252 = vmatpush.msrb.mxu2 %v2011_v32  ;;  %2214 = vmatpush.msra.mxu1 %v2102_v41  ;;  %v2111_v32 = vld [vmem:[%s5691_s3 + $0x3d8] sm:$0xff] }
 0x1d0   :  { %2196 = vmatpush.msrb.mxu3 %v2066_v27  ;;  %v1620_v34 = vpop.f32.mrf.mxu3  ;;  %v2043_v27 = vld [vmem:[%s5691_s3 + $0x1b8] sm:$0xff]  ;;  %2234 = vmatpush.msrb.mxu0 %v2134_v21 }
 0x1d1   :  { %2253 = vmatpush.msrb.mxu2 %v2009_v29  ;;  %2215 = vmatpush.msra.mxu1 %v2100_v14  ;;  %v1621_v2 = vadd.f32 %v1620_v34, %v1601_v30  ;;  %v2109_v29 = vld [vmem:[%s5691_s3 + $0x3c8] sm:$0xff]  ;;  %v2035_v34 = vld [vmem:[%s5691_s3 + $0x178] sm:$0xff] }
 0x1d2   :  { %2197 = vmatpush.msrb.mxu3 %v2064_v18  ;;  %v2041_v14 = vld [vmem:[%s5691_s3 + $0x1a8] sm:$0xff]  ;;  %v2107_v18 = vld [vmem:[%s5691_s3 + $0x3b8] sm:$0xff] }
 0x1d3   :  { %2254 = vmatpush.msrb.mxu2 %v2007_v24  ;;  %2216 = vmatpush.msra.mxu1 %v2098_v33  ;;  %v1640_v46 = vpop.f32.mrf.mxu2  ;;  %v2037_v24 = vld [vmem:[%s5691_s3 + $0x188] sm:$0xff]  ;;  %v2103_v33 = vld [vmem:[%s5691_s3 + $0x398] sm:$0xff] }
 0x1d4   :  { %2198 = vmatpush.msrb.mxu3 %v2062_v7  ;;  %v1641_v48 = vadd.f32 %v1640_v46, %v1621_v2  ;;  %v2033_v7 = vld [vmem:[%s5691_s3 + $0x168] sm:$0xff]  ;;  %v2099_v2 = vld [vmem:[%s5691_s3 + $0x378] sm:$0xff] }
 0x1d5   :  { %2255 = vmatpush.msrb.mxu2 %v2005_v61  ;;  %2217 = vmatpush.msra.mxu1 %v2096_v44  ;;  %v2031_v61 = vld [vmem:[%s5691_s3 + $0x158] sm:$0xff]  ;;  %v2097_v44 = vld [vmem:[%s5691_s3 + $0x368] sm:$0xff] }
 0x1d6   :  { %2199 = vmatpush.msrb.mxu3 %v2060_v37  ;;  %v2095_v37 = vld [vmem:[%s5691_s3 + $0x358] sm:$0xff] }
 0x1d7   :  { %2256 = vmatpush.msrb.mxu2 %v2003_v47  ;;  %2218 = vmatpush.msra.mxu1 %v2094_v43  ;;  %v1660_v54 = vpop.f32.mrf.mxu0  ;;  %v2027_v46 = vld [vmem:[%s5691_s3 + $0x138] sm:$0xff]  ;;  %v2093_v47 = vld [vmem:[%s5691_s3 + $0x348] sm:$0xff] }
 0x1d8   :  { %2200 = vmatpush.msrb.mxu3 %v2058_v49  ;;  %v1661_v26 = vadd.f32 %v1660_v54, %v1641_v48  ;;  %v1680_v23 = vpop.f32.mrf.mxu1  ;;  %v2025_v43 = vld [vmem:[%s5691_s3 + $0x128] sm:$0xff]  ;;  %v2091_v48 = vld [vmem:[%s5691_s3 + $0x338] sm:$0xff]  ;;  %v2132_v54 = vld [vmem:[%s5691_s3 + $0x480] sm:$0xff] }
 0x1d9   :  { %2257 = vmatpush.msrb.mxu2 %v2001_v50  ;;  %2219 = vmatpush.msra.mxu1 %v2092_v52  ;;  %v2089_v49 = vld [vmem:[%s5691_s3 + $0x328] sm:$0xff]  ;;  %v2087_v52 = vld [vmem:[%s5691_s3 + $0x318] sm:$0xff] }
 0x1da   :  { %2201 = vmatpush.msrb.mxu3 %v2056_v17  ;;  %v1681_v39 = vadd.f32 %v1680_v23, %v1661_v26  ;;  %v2021_v50 = vld [vmem:[%s5691_s3 + $0x108] sm:$0xff]  ;;  %2235 = vmatpush.msrb.mxu0 %v2132_v54  ;;  %v2126_v26 = vld [vmem:[%s5691_s3 + $0x450] sm:$0xff]  ;;  %v2120_v23 = vld [vmem:[%s5691_s3 + $0x420] sm:$0xff] }
 0x1db   :  { %2258 = vmatpush.msrb.mxu2 %v1999_v25  ;;  %2220 = vmatpush.msra.mxu1 %v2090_v38  ;;  %v1700_v16 = vpop.f32.mrf.mxu3  ;;  %v2085_v17 = vld [vmem:[%s5691_s3 + $0x308] sm:$0xff]  ;;  %v2130_v25 = vld [vmem:[%s5691_s3 + $0x470] sm:$0xff]  ;;  %v2128_v38 = vld [vmem:[%s5691_s3 + $0x460] sm:$0xff] }
 0x1dc   :  { %2202 = vmatpush.msrb.mxu3 %v2054_v42  ;;  %v1701_v63 = vadd.f32 %v1700_v16, %v1681_v39  ;;  %2236 = vmatpush.msrb.mxu0 %v2130_v25  ;;  %v2118_v42 = vld [vmem:[%s5691_s3 + $0x410] sm:$0xff]  ;;  %v2137_v39 = vld [vmem:[%s5691_s3 + $0x4a8] sm:$0xff]  ;;  %v2063_v21 = vld [vmem:[%s5691_s3 + $0x258] sm:$0xff] }
 0x1dd   :  { %2259 = vmatpush.msrb.mxu2 %v1997_v56  ;;  %2221 = vmatpush.msra.mxu1 %v2088_v57  ;;  %v2116_v56 = vld [vmem:[%s5691_s3 + $0x400] sm:$0xff]  ;;  %v2083_v57 = vld [vmem:[%s5691_s3 + $0x2f8] sm:$0xff]  ;;  %v2081_v16 = vld [vmem:[%s5691_s3 + $0x2e8] sm:$0xff] }
 0x1de   :  { %2203 = vmatpush.msrb.mxu3 %v2052_v15  ;;  %v1720_v62 = vpop.f32.mrf.mxu2  ;;  %2237 = vmatpush.msrb.mxu0 %v2128_v38  ;;  %v2135_v15 = vld [vmem:[%s5691_s3 + $0x498] sm:$0xff]  ;;  %v2363_v54 = vld [vmem:[%s5693_s5 + $0x68] sm:$0xff]  ;;  %v2362_v25 = vld [vmem:[%s5693_s5 + $0x60] sm:$0xff] }
 0x1df   :  { %2260 = vmatpush.msrb.mxu2 %v1995_v60  ;;  %2204 = vmatmul.f32.vlgmr.msrb.gmra.mxu3 %v1985_v31  ;;  %v1721_v22 = vadd.f32 %v1720_v62, %v1701_v63  ;;  %v2133_v60 = vld [vmem:[%s5691_s3 + $0x488] sm:$0xff]  ;;  %v2079_v63 = vld [vmem:[%s5691_s3 + $0x2d8] sm:$0xff] }
 0x1e0   :  { %2222 = vmatpush.msra.mxu1 %v2086_v1  ;;  %2268 = vmatpush.msra.mxu3 %v2051_v3  ;;  %v2131_v1 = vld [vmem:[%s5691_s3 + $0x478] sm:$0xff]  ;;  %v2077_v3 = vld [vmem:[%s5691_s3 + $0x2c8] sm:$0xff] }
 0x1e1   :  { %2261 = vmatpush.msrb.mxu2 %v1993_v4  ;;  %2238 = vmatpush.msrb.mxu0 %v2126_v26  ;;  %v2129_v4 = vld [vmem:[%s5691_s3 + $0x468] sm:$0xff]  ;;  %v2075_v62 = vld [vmem:[%s5691_s3 + $0x2b8] sm:$0xff]  ;;  %v2358_v26 = vld [vmem:[%s5693_s5 + $0x40] sm:$0xff] }
 0x1e2   :  { %2223 = vmatpush.msra.mxu1 %v2084_v40  ;;  %2269 = vmatpush.msra.mxu3 %v2049_v5  ;;  %v1740_v45 = vpop.f32.mrf.mxu0  ;;  %v2073_v40 = vld [vmem:[%s5691_s3 + $0x2a8] sm:$0xff]  ;;  %v2071_v5 = vld [vmem:[%s5691_s3 + $0x298] sm:$0xff] }
 0x1e3   :  { %2262 = vmatpush.msrb.mxu2 %v1991_v6  ;;  %v1741_v20 = vadd.f32 %v1740_v45, %v1721_v22  ;;  %2239 = vmatpush.msrb.mxu0 %v2124_v53  ;;  %v2127_v22 = vld [vmem:[%s5691_s3 + $0x458] sm:$0xff]  ;;  %v846_v6 = vperm.slane %v4926_v35, 4  ;;  %v2359_v38 = vld [vmem:[%s5693_s5 + $0x48] sm:$0xff] }
 0x1e4   :  { %2308 = vmatpush.msrb.mxu1 %v2115_v11  ;;  %2270 = vmatpush.msra.mxu3 %v2047_v8  ;;  %v1760_v41 = vpop.f32.mrf.mxu1  ;;  %v2069_v8 = vld [vmem:[%s5691_s3 + $0x288] sm:$0xff]  ;;  %v2123_v35 = vld [vmem:[%s5691_s3 + $0x438] sm:$0xff] }
 0x1e5   :  { %2263 = vmatpush.msrb.mxu2 %v1989_v9  ;;  %v1761_v28 = vadd.f32 %v1760_v41, %v1741_v20  ;;  %v2125_v9 = vld [vmem:[%s5691_s3 + $0x448] sm:$0xff]  ;;  %v2357_v53 = vld [vmem:[%s5693_s5 + $0x38] sm:$0xff] }
 0x1e6   :  { %2309 = vmatpush.msrb.mxu1 %v2113_v10  ;;  %2264 = vmatmul.f32.vlgmr.msrb.gmra.mxu2 %v1983_v0  ;;  %v2105_v0 = vld [vmem:[%s5691_s3 + $0x3a8] sm:$0xff] }
 0x1e7   :  { %2271 = vmatpush.msra.mxu3 %v2045_v13  ;;  %v1986_v30 = vmax.f32 %v1761_v28, 0.0  ;;  %2333 = vmatpush.msra.mxu2 %v2137_v39  ;;  %v2065_v13 = vld [vmem:[%s5691_s3 + $0x268] sm:$0xff]  ;;  %v2374_v39 = vld [vmem:[%s5693_s5 + $0xc0] sm:$0xff] }
 0x1e8   :  { %2310 = vmatpush.msrb.mxu1 %v2111_v32  ;;  %v2121_v20 = vld [vmem:[%s5691_s3 + $0x428] sm:$0xff] }
 0x1e9   :  { %2272 = vmatpush.msra.mxu3 %v2043_v27  ;;  %2224 = vmatmul.f32.vlgmr.msra.gmra.mxu1 %v1986_v30  ;;  %v2119_v27 = vld [vmem:[%s5691_s3 + $0x418] sm:$0xff]  ;;  %v2061_v28 = vld [vmem:[%s5691_s3 + $0x248] sm:$0xff] }
 0x1ea   :  { %2311 = vmatpush.msrb.mxu1 %v2109_v29  ;;  %2334 = vmatpush.msra.mxu2 %v2135_v15  ;;  %v2117_v29 = vld [vmem:[%s5691_s3 + $0x408] sm:$0xff] }
 0x1eb   :  { %2273 = vmatpush.msra.mxu3 %v2041_v14  ;;  %v2351_v15 = vld [vmem:[%s5693_s5 + $0x8] sm:$0xff] }
 0x1ec   :  { %2312 = vmatpush.msrb.mxu1 %v2107_v18  ;;  %2335 = vmatpush.msra.mxu2 %v2133_v60  ;;  %v2350_v60 = vld [vmem:[%s5693_s5] sm:$0xff] }
 0x1ed   :  { %2274 = vmatpush.msra.mxu3 %v2039_v51  ;;  %v2057_v51 = vld [vmem:[%s5691_s3 + $0x228] sm:$0xff] }
 0x1ee   :  { %2313 = vmatpush.msrb.mxu1 %v2105_v0  ;;  %2336 = vmatpush.msra.mxu2 %v2131_v1  ;;  %v2055_v0 = vld [vmem:[%s5691_s3 + $0x218] sm:$0xff]  ;;  %v2371_v1 = vld [vmem:[%s5693_s5 + $0xa8] sm:$0xff] }
 0x1ef   :  { %2275 = vmatpush.msra.mxu3 %v2037_v24 }
 0x1f0   :  { %2314 = vmatpush.msrb.mxu1 %v2103_v33  ;;  %2337 = vmatpush.msra.mxu2 %v2129_v4  ;;  %v2369_v4 = vld [vmem:[%s5693_s5 + $0x98] sm:$0xff] }
 0x1f1   :  { %2276 = vmatpush.msra.mxu3 %v2035_v34  ;;  %v2053_v34 = vld [vmem:[%s5691_s3 + $0x208] sm:$0xff] }
 0x1f2   :  { %2315 = vmatpush.msrb.mxu1 %v2101_v19  ;;  %2338 = vmatpush.msra.mxu2 %v2127_v22  ;;  %v2138_v22 = vld [vmem:[%s5692_s4] sm:$0x3] }
 0x1f3   :  { %2277 = vmatpush.msra.mxu3 %v2033_v7 }
 0x1f4   :  { %2316 = vmatpush.msrb.mxu1 %v2099_v2  ;;  %2339 = vmatpush.msra.mxu2 %v2125_v9 }
 0x1f5   :  { %2278 = vmatpush.msra.mxu3 %v2031_v61 }
 0x1f6   :  { %2317 = vmatpush.msrb.mxu1 %v2097_v44  ;;  %2340 = vmatpush.msra.mxu2 %v2123_v35 }
 0x1f7   :  { %2279 = vmatpush.msra.mxu3 %v2029_v55 }
 0x1f8   :  { %2318 = vmatpush.msrb.mxu1 %v2095_v37  ;;  %2341 = vmatpush.msra.mxu2 %v2121_v20 }
 0x1f9   :  { %2280 = vmatpush.msra.mxu3 %v2027_v46 }
 0x1fa   :  { %2319 = vmatpush.msrb.mxu1 %v2093_v47  ;;  %2342 = vmatpush.msra.mxu2 %v2119_v27 }
 0x1fb   :  { %2281 = vmatpush.msra.mxu3 %v2025_v43 }
 0x1fc   :  { %2320 = vmatpush.msrb.mxu1 %v2091_v48  ;;  %2343 = vmatpush.msra.mxu2 %v2117_v29 }
 0x1fd   :  { %2282 = vmatpush.msra.mxu3 %v2023_v58 }
 0x1fe   :  { %2321 = vmatpush.msrb.mxu1 %v2089_v49 }
 0x1ff   :  { %2283 = vmatpush.msra.mxu3 %v2021_v50 }
 0x200   :  { %2284 = vmatmul.f32.vlgmr.msra.gmra.mxu3 %v1984_v59  ;;  %2322 = vmatpush.msrb.mxu1 %v2087_v52  ;;  %v2122_v59 = vld [vmem:[%s5691_s3 + $0x430] sm:$0xff]  ;;  %v2365_v52 = vld [vmem:[%s5693_s5 + $0x78] sm:$0xff] }
 0x201   :  { %2240 = vmatpush.msrb.mxu0 %v2122_v59  ;;  %2383 = vmatpush.msrb.mxu3 %v2365_v52  ;;  %v2356_v59 = vld [vmem:[%s5693_s5 + $0x30] sm:$0xff] }
 0x202   :  { %2323 = vmatpush.msrb.mxu1 %v2085_v17  ;;  %v2364_v17 = vld [vmem:[%s5693_s5 + $0x70] sm:$0xff] }
 0x203   :  { %2324 = vmatmul.f32.vlgmr.msrb.gmra.mxu1 %v1986_v30  ;;  %2241 = vmatpush.msrb.mxu0 %v2120_v23  ;;  %v2059_v30 = vld [vmem:[%s5691_s3 + $0x238] sm:$0xff]  ;;  %v2355_v23 = vld [vmem:[%s5693_s5 + $0x28] sm:$0xff] }
 0x204   :  { %2384 = vmatpush.msrb.mxu3 %v2364_v17 }
 0x205   :  { %2242 = vmatpush.msrb.mxu0 %v2118_v42  ;;  %v2354_v42 = vld [vmem:[%s5693_s5 + $0x20] sm:$0xff] }
 0x206   :  { %2385 = vmatpush.msrb.mxu3 %v2363_v54 }
 0x207   :  { %2243 = vmatpush.msrb.mxu0 %v2116_v56  ;;  %v2353_v56 = vld [vmem:[%s5693_s5 + $0x18] sm:$0xff] }
 0x208   :  { %2386 = vmatpush.msrb.mxu3 %v2362_v25 }
 0x209   :  { %2288 = vmatpush.msra.mxu0 %v2083_v57  ;;  %v2352_v57 = vld [vmem:[%s5693_s5 + $0x10] sm:$0xff] }
 0x20a   :  { %2387 = vmatpush.msrb.mxu3 %v2361_v36 }
 0x20b   :  { %2289 = vmatpush.msra.mxu0 %v2081_v16  ;;  %v2373_v16 = vld [vmem:[%s5693_s5 + $0xb8] sm:$0xff] }
 0x20d   :  { %2290 = vmatpush.msra.mxu0 %v2079_v63  ;;  %v2372_v63 = vld [vmem:[%s5693_s5 + $0xb0] sm:$0xff] }
 0x20f   :  { %2291 = vmatpush.msra.mxu0 %v2077_v3  ;;  %v2370_v3 = vld [vmem:[%s5693_s5 + $0xa0] sm:$0xff] }
 0x211   :  { %2292 = vmatpush.msra.mxu0 %v2075_v62  ;;  %v2368_v62 = vld [vmem:[%s5693_s5 + $0x90] sm:$0xff] }
 0x213   :  { %2293 = vmatpush.msra.mxu0 %v2073_v40  ;;  %v2367_v40 = vld [vmem:[%s5693_s5 + $0x88] sm:$0xff] }
 0x215   :  { %2294 = vmatpush.msra.mxu0 %v2071_v5  ;;  %v2366_v5 = vld [vmem:[%s5693_s5 + $0x80] sm:$0xff] }
 0x217   :  { %2295 = vmatpush.msra.mxu0 %v2069_v8 }
 0x219   :  { %2296 = vmatpush.msra.mxu0 %v2067_v12 }
 0x21a   :  { %v1820_v41 = vpop.f32.mrf.mxu2 }
 0x21b   :  { %v1800_v45 = vpop.f32.mrf.mxu1  ;;  %2297 = vmatpush.msra.mxu0 %v2065_v13 }
 0x21d   :  { %v1780_v11 = vpop.f32.mrf.mxu3  ;;  %2298 = vmatpush.msra.mxu0 %v2063_v21 }
 0x21e   :  { %v1781_v10 = vadd.f32 %v1780_v11, %v846_v6  ;;  %v2140_v6 = vperm.slane %v2138_v22, 0 }
 0x21f   :  { %2299 = vmatpush.msra.mxu0 %v2061_v28  ;;  %v1840_v18 = vpop.f32.mrf.mxu0 }
 0x220   :  { %v1801_v32 = vadd.f32 %v1800_v45, %v1781_v10 }
 0x221   :  { %2300 = vmatpush.msra.mxu0 %v2059_v30 }
 0x222   :  { %v1821_v14 = vadd.f32 %v1820_v41, %v1801_v32  ;;  %v2141_v32 = vperm.slane %v2138_v22, 1 }
 0x223   :  { %2301 = vmatpush.msra.mxu0 %v2057_v51 }
 0x224   :  { %v1841_v24 = vadd.f32 %v1840_v18, %v1821_v14 }
 0x225   :  { %2302 = vmatpush.msra.mxu0 %v2055_v0  ;;  %v1900_v61 = vpop.f32.mrf.mxu2 }
 0x227   :  { %2303 = vmatpush.msra.mxu0 %v2053_v34 }
 0x228   :  { %v1860_v33 = vpop.f32.mrf.mxu3 }
 0x229   :  { %v1861_v19 = vadd.f32 %v1860_v33, %v1841_v24 }
 0x22b   :  { %v1880_v7 = vpop.f32.mrf.mxu1 }
 0x22c   :  { %v1881_v2 = vadd.f32 %v1880_v7, %v1861_v19  ;;  %v2450_v19 = vld [vmem:[%s5694_s6] ss:$0 sm:$0xff] }
 0x22e   :  { %v1901_v44 = vadd.f32 %v1900_v61, %v1881_v2 }
 0x22f   :  { %v1920_v55 = vpop.f32.mrf.mxu0 }
 0x230   :  { %v1921_v37 = vadd.f32 %v1920_v55, %v1901_v44 }
 0x23f   :  { %v1980_v58 = vpop.f32.mrf.mxu2 }
 0x241   :  { %v1940_v46 = vpop.f32.mrf.mxu3 }
 0x242   :  { %v1941_v47 = vadd.f32 %v1940_v46, %v1921_v37  ;;  %v2165_v11 = vpop.f32.mrf.mxu0 }
 0x243   :  { %v2166_v9 = vadd.f32 %v2165_v11, %v2140_v6 }
 0x245   :  { %v1960_v43 = vpop.f32.mrf.mxu1 }
 0x246   :  { %v1961_v48 = vadd.f32 %v1960_v43, %v1941_v47 }
 0x248   :  { %v1981_v49 = vadd.f32 %v1980_v58, %v1961_v48 }
 0x249   :  { %v2185_v8 = vpop.f32.mrf.mxu2 }
 0x24a   :  { %v1987_v50 = vmax.f32 %v1981_v49, 0.0  ;;  %v2186_v45 = vadd.f32 %v2185_v8, %v2166_v9 }
 0x24c   :  { %2446 = vmatmul.msk.f32.vlgmr.msrb.gmra.mxu0 %vm2144_vm1, %v1987_v50  ;;  %2447 = vmatmul.msk.f32.vlgmr.msra.gmra.mxu2 %vm2144_vm1, %v1987_v50 }
 0x24d   :  { %2410 = vmatpush.msrb.mxu0 %v2374_v39 }
 0x24f   :  { %2411 = vmatpush.msrb.mxu0 %v2373_v16 }
 0x251   :  { %2412 = vmatpush.msrb.mxu0 %v2372_v63 }
 0x253   :  { %2413 = vmatpush.msrb.mxu0 %v2371_v1 }
 0x254   :  { %2304 = vmatmul.f32.vlgmr.msra.gmra.mxu0 %v1985_v31  ;;  %v2360_v31 = vld [vmem:[%s5693_s5 + $0x50] sm:$0xff] }
 0x255   :  { %2388 = vmatpush.msrb.mxu3 %v2360_v31  ;;  %2414 = vmatpush.msrb.mxu0 %v2370_v3 }
 0x257   :  { %2389 = vmatpush.msrb.mxu3 %v2359_v38  ;;  %2415 = vmatpush.msrb.mxu0 %v2369_v4 }
 0x259   :  { %2390 = vmatpush.msrb.mxu3 %v2358_v26  ;;  %2416 = vmatpush.msrb.mxu0 %v2368_v62 }
 0x25b   :  { %2391 = vmatpush.msrb.mxu3 %v2357_v53  ;;  %2417 = vmatpush.msrb.mxu0 %v2367_v40 }
 0x25d   :  { %2392 = vmatpush.msrb.mxu3 %v2356_v59  ;;  %2418 = vmatpush.msrb.mxu0 %v2366_v5 }
 0x25f   :  { %2393 = vmatpush.msrb.mxu3 %v2355_v23 }
 0x261   :  { %2394 = vmatpush.msrb.mxu3 %v2354_v42 }
 0x262   :  { %v2205_v10 = vpop.f32.mrf.mxu3 }
 0x263   :  { %2395 = vmatpush.msrb.mxu3 %v2353_v56  ;;  %v2206_v35 = vadd.f32 %v2205_v10, %v2186_v45 }
 0x265   :  { %2396 = vmatpush.msrb.mxu3 %v2352_v57 }
 0x266   :  { %v2225_v12 = vpop.f32.mrf.mxu1 }
 0x267   :  { %2397 = vmatpush.msrb.mxu3 %v2351_v15  ;;  %v2226_v13 = vadd.f32 %v2225_v12, %v2206_v35 }
 0x269   :  { %2398 = vmatpush.msrb.mxu3 %v2350_v60  ;;  %v2265_v21 = vpop.f32.mrf.mxu2 }
 0x26a   :  { %v2266_v29 = vadd.f32 %v2265_v21, %v2141_v32 }
 0x280   :  { %v2325_v51 = vpop.f32.mrf.mxu1 }
 0x283   :  { %v2285_v28 = vpop.f32.mrf.mxu3 }
 0x284   :  { %v2286_v14 = vadd.f32 %v2285_v28, %v2266_v29 }
 0x2c9   :  { %v2245_v20 = vpop.f32.mrf.mxu0 }
 0x2ca   :  { %v2246_v41 = vadd.f32 %v2245_v20, %v2226_v13 }
 0x2cc   :  { %v2348_v27 = vmax.f32 %v2246_v41, 0.0 }
 0x2ce   :  { %2399 = vmatmul.f32.vlgmr.msrb.gmra.mxu3 %v2348_v27 }
 0x2cf   :  { %v2345_v24 = vpop.f32.mrf.mxu2 }
 0x2d1   :  { %v2305_v30 = vpop.f32.mrf.mxu0 }
 0x2d2   :  { %v2306_v18 = vadd.f32 %v2305_v30, %v2286_v14 }
 0x2d4   :  { %v2326_v0 = vadd.f32 %v2325_v51, %v2306_v18 }
 0x2d6   :  { %v2346_v33 = vadd.f32 %v2345_v24, %v2326_v0 }
 0x2d8   :  { %v2349_v34 = vmax.f32 %v2346_v33, 0.0 }
 0x2da   :  { %2448 = vmatmul.msk.f32.vlgmr.msrb.gmra.mxu0 %vm2379_vm2, %v2349_v34 }
 0x351   :  { %v2400_v7 = vpop.f32.mrf.mxu3 }
 0x352   :  { %v2401_v2 = vadd.f32 %v2450_v19, %v2400_v7 }
 0x357   :  { %v2420_v61 = vpop.f32.mrf.mxu0 }
 0x358   :  { %v2421_v44 = vadd.f32 %v2420_v61, %v2401_v2 }
 0x35a   :  { %2424 = vst.msk [vmem:[#allocation2] sm:$0x3] %vm2423_vm3, %v2421_v44 }
 0x35b   :  { %2435 = dma.vmem_to_hbm [thread:$0]  %s2431_s14, 32, %s2433_s16, [#allocation3]  }
 0x35c   :  { %2489 = dma.done.wait [#allocation3], 32  }
 0x35d   :  { %2490 = vsyncadd [#allocation3], 4294967264 }
 0x35e   :  { %2440 = vsyncpa [#allocation3], 1 }

</bundles_post_ra>
